<compile_context>
chip_gen: v6e
topology: v6e:2x2x1
jax: 0.10.0
libtpu: 0.0.40
codegen_flags: <defaults>
</compile_context>

<pallas_src>
import jax
import jax.numpy as jnp
from jax.experimental import pallas as pl
from jax.experimental.pallas import tpu as pltpu

VMEM = pltpu.MemorySpace.VMEM


# --------------------------- in-kernel building blocks ----------------------

def _log_softmax(z):
    z = z - jnp.max(z, axis=-1, keepdims=True)
    return z - jnp.log(jnp.sum(jnp.exp(z), axis=-1, keepdims=True))


def _attention_scores(att_in, w_row, b_11, mask_f):
    """SelfAttention / SelfAttention_metaphors score path.
    att_in: (N,S,A)  w_row: (1,A)  b_11: (1,1)  mask_f: (N,S) float.
    Returns masked + renormalized scores (N,S).  Softmax over all S then
    mask + renormalize, matching the PyTorch reference (denominator cancels)."""
    N, S, A = att_in.shape
    s = jnp.sum(att_in * w_row.reshape(1, 1, A), axis=-1)          # Linear(A,1)
    s = jnp.tanh(s + b_11)
    s = s - jnp.max(s, axis=-1, keepdims=True)
    e = jnp.exp(s)
    p = e / jnp.sum(e, axis=-1, keepdims=True)
    mp = p * mask_f
    denom = jnp.maximum(jnp.sum(mp, axis=-1, keepdims=True), 1e-20)  # 0-len guard
    return mp / denom


def _bilstm_layer(x, lengths, wih_ref, b_ref, whh_f_ref, whh_b_ref, gx_ref, y_ref):
    """Bidirectional LSTM layer with packed-sequence semantics.

    x:        (N,S,Ein) f32 value     lengths: (N,1) int32 value
    wih_ref:  (Ein,8H) bf16 ref = [W_ih_f | W_ih_b], gate order [i|f|o|g]
    b_ref:    (1,8H)  f32 ref  (bias_ih + bias_hh, both directions)
    whh_*_ref:(H,4H)  f32 refs, gate order [i|f|o|g]
    gx_ref:   (N,S,8H) f32 VMEM scratch (staged gate pre-activations)
    y_ref:    (N,S,2H) f32 VMEM scratch (layer output written here)
    """
    N, S, Ein = x.shape
    H8 = gx_ref.shape[-1]
    H4 = H8 // 2
    H = H4 // 4

    # Merged input projection for both directions: one bf16 MXU GEMM, f32 acc.
    gx = jnp.dot(x.reshape(N * S, Ein).astype(jnp.bfloat16), wih_ref[...],
                 preferred_element_type=jnp.float32) + b_ref[...]
    gx_ref[...] = gx.reshape(N, S, H8)

    whh_f = whh_f_ref[...]
    whh_b = whh_b_ref[...]

    def cell(g_pre, h_prev, c_prev, whh, live):
        gates = g_pre + jnp.dot(h_prev, whh, preferred_element_type=jnp.float32)
        sg = jax.nn.sigmoid(gates[:, :3 * H])        # fused [ i | f | o ]
        gg = jnp.tanh(gates[:, 3 * H:])              # g
        c_new = sg[:, H:2 * H] * c_prev + sg[:, :H] * gg
        h_new = sg[:, 2 * H:3 * H] * jnp.tanh(c_new)
        c_out = jnp.where(live, c_new, c_prev)       # freeze at t >= length
        h_out = jnp.where(live, h_new, h_prev)
        y_out = jnp.where(live, h_new, 0.0)          # pad_packed zeros
        return h_out, c_out, y_out

    h_f = jnp.zeros((N, H), jnp.float32)
    c_f = jnp.zeros((N, H), jnp.float32)
    h_b = jnp.zeros((N, H), jnp.float32)
    c_b = jnp.zeros((N, H), jnp.float32)

    for s in range(S):                               # static unroll (small S)
        tb = S - 1 - s
        h_f, c_f, y_f = cell(gx_ref[:, s, :H4], h_f, c_f, whh_f, lengths > s)
        h_b, c_b, y_b = cell(gx_ref[:, tb, H4:], h_b, c_b, whh_b, lengths > tb)
        y_ref[:, s, :H] = y_f                        # stream out as we go
        y_ref[:, tb, H:] = y_b


# --------------------------- stage 1: sentence kernel ------------------------

def _build_sentence_kernel(sb, T, H, n_enc, nc):
    H2 = 2 * H

    def kernel(*refs):
        it = iter(refs)
        x_ref, len_ref = next(it), next(it)
        enc_p = [(next(it), next(it), next(it), next(it)) for _ in range(n_enc)]
        mw_ref, mb_ref = next(it), next(it)
        amw_ref, amb_ref = next(it), next(it)
        asw_ref, asb_ref = next(it), next(it)
        meta_ref, avg_ref = next(it), next(it)
        gx_sc = next(it)
        y_sc = [next(it), next(it)]                  # ping-pong between layers

        lengths = len_ref[...].reshape(sb, 1)        # (sb,1) int32
        h = x_ref[...]                               # (sb,T,E)

        # 1) sentence BiLSTM encoder (input dropout = identity in eval)
        for li, (wih, b, whf, whb) in enumerate(enc_p):
            yref = y_sc[li % 2]
            _bilstm_layer(h, lengths, wih, b, whf, whb, gx_sc, yref)
            h = yref[...]
        out_embedding = h                            # (sb,T,2H), VMEM-resident

        # 2) MetaphorModel: Linear(2H,nc) + log_softmax (dropout = identity)
        meta = _log_softmax(
            jnp.dot(out_embedding.reshape(sb * T, H2), mw_ref[...],
                    preferred_element_type=jnp.float32) + mb_ref[...])
        meta3 = meta.reshape(sb, T, nc)
        meta_ref[...] = meta3

        # 3a) HyperModel sentence-level part (per-sentence, so it tiles over B)
        tmask = (jax.lax.broadcasted_iota(jnp.int32, (sb, T), 1)
                 < lengths).astype(jnp.float32)
        # new_embeds (SelfAttention_metaphors): scores from meta_pred applied
        # to out_embedding; only `weighted` is used downstream.
        s1 = _attention_scores(meta3, amw_ref[...], amb_ref[...], tmask)
        weighted1 = out_embedding * s1[:, :, None]
        # self_attention_sentence over the weighted tensor -> sentence rep.
        s2 = _attention_scores(weighted1, asw_ref[...], asb_ref[...], tmask)
        avg_ref[...] = jnp.sum(weighted1 * s2[:, :, None], axis=1, keepdims=True)

    return kernel


# --------------------------- stage 2: document kernel ------------------------

def _build_doc_kernel(H, n_doc, doc_lengths, nc):
    H2 = 2 * H
    D = len(doc_lengths)
    Td_pad = max(8, ((max(doc_lengths) + 7) // 8) * 8)   # sublane aligned, masked

    def kernel(*refs):
        it = iter(refs)
        avg_ref, dlen_ref = next(it), next(it)
        doc_p = [(next(it), next(it), next(it), next(it)) for _ in range(n_doc)]
        adw_ref, adb_ref = next(it), next(it)
        dcw_ref, dcb_ref = next(it), next(it)
        hyp_ref = next(it)
        gx_sc = next(it)
        y_sc = [next(it), next(it)]

        avg = avg_ref[...]                           # (B,2H)
        dlens = dlen_ref[...]                        # (D,1) int32

        # torch.split(averaged_docs, doc_lengths) + pad_sequence(batch_first):
        # doc lengths are compile-time constants -> pure static slicing.
        rows, off = [], 0
        for L in doc_lengths:
            seg = avg[off:off + L]
            if L < Td_pad:
                seg = jnp.concatenate(
                    [seg, jnp.zeros((Td_pad - L, H2), jnp.float32)], axis=0)
            rows.append(seg)
            off += L
        docs = jnp.stack(rows, axis=0)               # (D,Td_pad,2H)

        # doc-level BiLSTM encoder
        hd = docs
        for li, (wih, b, whf, whb) in enumerate(doc_p):
            yref = y_sc[li % 2]
            _bilstm_layer(hd, dlens, wih, b, whf, whb, gx_sc, yref)
            hd = yref[...]

        # doc-level self attention -> doc representation
        dmask = (jax.lax.broadcasted_iota(jnp.int32, (D, Td_pad), 1)
                 < dlens).astype(jnp.float32)
        s3 = _attention_scores(hd, adw_ref[...], adb_ref[...], dmask)
        prediction = jnp.sum(hd * s3[:, :, None], axis=1)        # (D,2H)

        # doc_classifier: Linear(2H,nc) + log_softmax
        hyp_ref[...] = _log_softmax(
            jnp.dot(prediction, dcw_ref[...],
                    preferred_element_type=jnp.float32) + dcb_ref[...])

    return kernel, Td_pad


# ------------------------------- host wrapper --------------------------------

def _reorder_gates(w):
    """PyTorch LSTM gate order [i|f|g|o] -> kernel order [i|f|o|g] (last dim)."""
    H = w.shape[-1] // 4
    return jnp.concatenate([w[..., :2 * H], w[..., 3 * H:], w[..., 2 * H:3 * H]],
                           axis=-1)


def _pack_lstm_layer(p):
    """Pack one BiLSTM layer:
       wih:   (Ein,8H) bf16 = [W_ih_f | W_ih_b]    (gate order [i|f|o|g])
       b:     (1,8H)   f32  = bias_ih + bias_hh per direction
       whh_f, whh_b: (H,4H) f32
    (Weights here are already (in,4H); real torch weight_ih/hh are (4H,in) and
     would need a transpose before packing.)"""
    wih = jnp.concatenate([_reorder_gates(p['wih_f']),
                           _reorder_gates(p['wih_b'])], axis=1).astype(jnp.bfloat16)
    b = jnp.concatenate([_reorder_gates(p['bih_f'] + p['bhh_f']),
                         _reorder_gates(p['bih_b'] + p['bhh_b'])]
                        ).reshape(1, -1).astype(jnp.float32)
    whh_f = _reorder_gates(p['whh_f']).astype(jnp.float32)
    whh_b = _reorder_gates(p['whh_b']).astype(jnp.float32)
    return [wih, b, whh_f, whh_b]


def _full_spec(a):
    nd = a.ndim
    return pl.BlockSpec(a.shape, lambda i, _nd=nd: (0,) * _nd, memory_space=VMEM)


def _vmem_limit(arrays, extra_bytes):
    est = sum(int(a.size) * a.dtype.itemsize for a in arrays) * 2 + extra_bytes
    est += 4 << 20
    return int(min(max(est, 32 << 20), 64 << 20))


def multitask_forward(params, input_data, length_data, doc_lengths_static,
                      is_doc=True, sentence_block=None):
    B, T, E = input_data.shape
    H = params['encoder'][0]['whh_f'].shape[0]
    H2, H8 = 2 * H, 8 * H
    nc = params['meta_cls_w'].shape[1]
    n_enc = len(params['encoder'])
    n_doc = len(params['doc_lstm'])
    D = len(doc_lengths_static)

    sb = sentence_block if (sentence_block and B % sentence_block == 0) else B
    nb = B // sb

    x = input_data.astype(jnp.float32)
    lens3 = length_data.reshape(B, 1, 1).astype(jnp.int32)

    enc_w = []
    for p in params['encoder']:
        enc_w += _pack_lstm_layer(p)

    # ---------------- stage 1: sentence encoder + metaphor head + sent attn
    s1_inputs = [x, lens3] + enc_w + [
        params['meta_cls_w'].astype(jnp.float32),
        params['meta_cls_b'].reshape(1, nc).astype(jnp.float32),
        params['att_meta_w'].astype(jnp.float32),
        params['att_meta_b'].reshape(1, 1).astype(jnp.float32),
        params['att_sent_w'].astype(jnp.float32),
        params['att_sent_b'].reshape(1, 1).astype(jnp.float32),
    ]
    s1_in_specs = [
        pl.BlockSpec((sb, T, E), lambda i: (i, 0, 0), memory_space=VMEM),
        pl.BlockSpec((sb, 1, 1), lambda i: (i, 0, 0), memory_space=VMEM),
    ] + [_full_spec(a) for a in s1_inputs[2:]]
    s1_out_shape = (jax.ShapeDtypeStruct((B, T, nc), jnp.float32),
                    jax.ShapeDtypeStruct((B, 1, H2), jnp.float32))
    s1_out_specs = (pl.BlockSpec((sb, T, nc), lambda i: (i, 0, 0), memory_space=VMEM),
                    pl.BlockSpec((sb, 1, H2), lambda i: (i, 0, 0), memory_space=VMEM))
    s1_scratch = [pltpu.VMEM((sb, T, H8), jnp.float32),
                  pltpu.VMEM((sb, T, H2), jnp.float32),
                  pltpu.VMEM((sb, T, H2), jnp.float32)]
    s1_extra = 4 * (B * T * nc + B * H2 + sb * T * (H8 + 2 * H2))

    meta3, avg3 = pl.pallas_call(
        _build_sentence_kernel(sb, T, H, n_enc, nc),
        grid=(nb,),
        in_specs=s1_in_specs,
        out_specs=s1_out_specs,
        out_shape=s1_out_shape,
        scratch_shapes=s1_scratch,
        compiler_params=pltpu.CompilerParams(
            dimension_semantics=("parallel",),
            vmem_limit_bytes=_vmem_limit(s1_inputs, s1_extra)),
    )(*s1_inputs)

    if not is_doc:
        return meta3, None

    # ---------------- stage 2: doc split/pad + doc BiLSTM + doc classifier
    doc_kernel, Td_pad = _build_doc_kernel(H, n_doc, tuple(doc_lengths_static), nc)
    avg2d = avg3.reshape(B, H2)
    dlens = jnp.array(doc_lengths_static, jnp.int32).reshape(D, 1)

    doc_w = []
    for p in params['doc_lstm']:
        doc_w += _pack_lstm_layer(p)
    s2_inputs = [avg2d, dlens] + doc_w + [
        params['att_doc_w'].astype(jnp.float32),
        params['att_doc_b'].reshape(1, 1).astype(jnp.float32),
        params['doc_cls_w'].astype(jnp.float32),
        params['doc_cls_b'].reshape(1, nc).astype(jnp.float32),
    ]
    s2_scratch = [pltpu.VMEM((D, Td_pad, H8), jnp.float32),
                  pltpu.VMEM((D, Td_pad, H2), jnp.float32),
                  pltpu.VMEM((D, Td_pad, H2), jnp.float32)]
    s2_extra = 4 * (D * nc + D * Td_pad * (H8 + 2 * H2))

    hyp = pl.pallas_call(
        doc_kernel,
        out_shape=jax.ShapeDtypeStruct((D, nc), jnp.float32),
        in_specs=[pl.BlockSpec(memory_space=VMEM)] * len(s2_inputs),
        out_specs=pl.BlockSpec(memory_space=VMEM),
        scratch_shapes=s2_scratch,
        compiler_params=pltpu.CompilerParams(
            vmem_limit_bytes=_vmem_limit(s2_inputs, s2_extra)),
    )(*s2_inputs)

    return meta3, hyp


def init_params(key, embed_dim, hidden_dim, enc_layers, hyper_layers, num_classes=2):
    def uni(k, shape, scale=0.08):
        return jax.random.uniform(k, shape, jnp.float32, -scale, scale)

    keys = iter(jax.random.split(key, 128))
    H = hidden_dim

    def lstm_layer(in_dim):
        return {
            'wih_f': uni(next(keys), (in_dim, 4 * H)),
            'whh_f': uni(next(keys), (H, 4 * H)),
            'bih_f': uni(next(keys), (4 * H,)),
            'bhh_f': uni(next(keys), (4 * H,)),
            'wih_b': uni(next(keys), (in_dim, 4 * H)),
            'whh_b': uni(next(keys), (H, 4 * H)),
            'bih_b': uni(next(keys), (4 * H,)),
            'bhh_b': uni(next(keys), (4 * H,)),
        }

    return {
        'encoder':    [lstm_layer(embed_dim if l == 0 else 2 * H)
                       for l in range(enc_layers)],
        'meta_cls_w': uni(next(keys), (2 * H, num_classes)),
        'meta_cls_b': uni(next(keys), (num_classes,)),
        # HyperModel parameters
        'att_meta_w': uni(next(keys), (1, 2)),        # SelfAttention_metaphors(2)
        'att_meta_b': uni(next(keys), (1,)),
        'att_sent_w': uni(next(keys), (1, 2 * H)),    # self_attention_sentence
        'att_sent_b': uni(next(keys), (1,)),
        'doc_lstm':   [lstm_layer(2 * H) for _ in range(hyper_layers)],
        'att_doc_w':  uni(next(keys), (1, 2 * H)),    # doc-level self attention
        'att_doc_b':  uni(next(keys), (1,)),
        'doc_cls_w':  uni(next(keys), (2 * H, num_classes)),
        'doc_cls_b':  uni(next(keys), (num_classes,)),
    }


# --------------------------------- main ---------------------------------------

if __name__ == "__main__":
    # B=6 sentences, T=8 max tokens, embed=32, hidden=32 (2H=64),
    # 2 documents with lengths [4, 2] (sum == B).  max(length_data) == T so the
    # pad_packed_sequence output width matches T exactly.
    B, T, E, H = 6, 8, 32, 32
    key = jax.random.PRNGKey(0)
    k_in, k_par = jax.random.split(key)

    input_data = jax.random.normal(k_in, (B, T, E), jnp.float32)
    length_data = jnp.array([8, 6, 8, 5, 7, 3], jnp.int32)
    doc_lengths = [4, 2]
    assert sum(doc_lengths) == B

    params = init_params(k_par, embed_dim=E, hidden_dim=H,
                         enc_layers=1, hyper_layers=1, num_classes=2)

    fwd = jax.jit(lambda p, x, lens: multitask_forward(
        p, x, lens, doc_lengths, is_doc=True, sentence_block=3))
    meta_pred, hyp_pred = fwd(params, input_data, length_data)
    (meta_pred, hyp_pred) = jax.block_until_ready((meta_pred, hyp_pred))

    assert meta_pred.shape == (B, T, 2)
    assert hyp_pred.shape == (len(doc_lengths), 2)
    assert bool(jnp.all(jnp.isfinite(meta_pred))) and bool(jnp.all(jnp.isfinite(hyp_pred)))
    # log_softmax rows should exp-sum to 1
    assert bool(jnp.allclose(jnp.sum(jnp.exp(meta_pred), axis=-1), 1.0, atol=1e-3))
    assert bool(jnp.allclose(jnp.sum(jnp.exp(hyp_pred), axis=-1), 1.0, atol=1e-3))

    # TODO(synk): dropout layers are identity (eval mode); training-time dropout not modeled.
    print("KERNEL_OK")
</pallas_src>

<mosaic_0001>
module attributes {stable_mosaic.version = 11 : i64} {
  func.func @kernel(%arg0: i32, %arg1: memref<3x8x32xf32, #tpu.memory_space<vmem>>, %arg2: memref<3x1x1xi32, #tpu.memory_space<vmem>>, %arg3: memref<32x256xbf16, #tpu.memory_space<vmem>>, %arg4: memref<1x256xf32, #tpu.memory_space<vmem>>, %arg5: memref<32x128xf32, #tpu.memory_space<vmem>>, %arg6: memref<32x128xf32, #tpu.memory_space<vmem>>, %arg7: memref<64x2xf32, #tpu.memory_space<vmem>>, %arg8: memref<1x2xf32, #tpu.memory_space<vmem>>, %arg9: memref<1x2xf32, #tpu.memory_space<vmem>>, %arg10: memref<1x1xf32, #tpu.memory_space<vmem>>, %arg11: memref<1x64xf32, #tpu.memory_space<vmem>>, %arg12: memref<1x1xf32, #tpu.memory_space<vmem>>, %arg13: memref<3x8x2xf32, #tpu.memory_space<vmem>>, %arg14: memref<3x1x64xf32, #tpu.memory_space<vmem>>, %arg15: memref<3x8x256xf32, #tpu.memory_space<vmem>>, %arg16: memref<3x8x64xf32, #tpu.memory_space<vmem>>, %arg17: memref<3x8x64xf32, #tpu.memory_space<vmem>>) attributes {dimension_semantics = [#tpu.dimension_semantics<parallel>], iteration_bounds = array<i64: 2>, scalar_prefetch = 0 : i64, scratch_operands = 3 : i64, tpu.core_type = #tpu.core_type<tc>, window_params = [{transform_indices = @transform_0, window_bounds = array<i64: 3, 8, 32>}, {transform_indices = @transform_1, window_bounds = array<i64: 3, 1, 1>}, {pipeline_mode = #tpu.pipeline_mode<synchronous>, transform_indices = @transform_2, window_bounds = array<i64: 32, 256>}, {pipeline_mode = #tpu.pipeline_mode<synchronous>, transform_indices = @transform_3, window_bounds = array<i64: 1, 256>}, {pipeline_mode = #tpu.pipeline_mode<synchronous>, transform_indices = @transform_4, window_bounds = array<i64: 32, 128>}, {pipeline_mode = #tpu.pipeline_mode<synchronous>, transform_indices = @transform_5, window_bounds = array<i64: 32, 128>}, {pipeline_mode = #tpu.pipeline_mode<synchronous>, transform_indices = @transform_6, window_bounds = array<i64: 64, 2>}, {pipeline_mode = #tpu.pipeline_mode<synchronous>, transform_indices = @transform_7, window_bounds = array<i64: 1, 2>}, {pipeline_mode = #tpu.pipeline_mode<synchronous>, transform_indices = @transform_8, window_bounds = array<i64: 1, 2>}, {pipeline_mode = #tpu.pipeline_mode<synchronous>, transform_indices = @transform_9, window_bounds = array<i64: 1, 1>}, {pipeline_mode = #tpu.pipeline_mode<synchronous>, transform_indices = @transform_10, window_bounds = array<i64: 1, 64>}, {pipeline_mode = #tpu.pipeline_mode<synchronous>, transform_indices = @transform_11, window_bounds = array<i64: 1, 1>}, {transform_indices = @transform_12, window_bounds = array<i64: 3, 8, 2>}, {transform_indices = @transform_13, window_bounds = array<i64: 3, 1, 64>}]} {
    %c0 = arith.constant 0 : index
    %c0_0 = arith.constant 0 : index
    %c0_1 = arith.constant 0 : index
    %0 = vector.load %arg2[%c0, %c0_0, %c0_1] : memref<3x1x1xi32, #tpu.memory_space<vmem>>, vector<3x1x1xi32>
    %1 = vector.shape_cast %0 : vector<3x1x1xi32> to vector<3x1xi32>
    %c0_2 = arith.constant 0 : index
    %c0_3 = arith.constant 0 : index
    %c0_4 = arith.constant 0 : index
    %2 = vector.load %arg1[%c0_2, %c0_3, %c0_4] : memref<3x8x32xf32, #tpu.memory_space<vmem>>, vector<3x8x32xf32>
    %3 = vector.shape_cast %2 : vector<3x8x32xf32> to vector<24x32xf32>
    %4 = arith.truncf %3 : vector<24x32xf32> to vector<24x32xbf16>
    %c0_5 = arith.constant 0 : index
    %c0_6 = arith.constant 0 : index
    %5 = vector.load %arg3[%c0_5, %c0_6] : memref<32x256xbf16, #tpu.memory_space<vmem>>, vector<32x256xbf16>
    %cst = arith.constant dense<0.000000e+00> : vector<24x256xf32>
    %6 = tpu.matmul %4, %5, %cst {dimension_numbers = #tpu.dot_dimension_numbers<[1], [0], [0], [1], [0, 0, 1, 1], [], []>} : vector<24x32xbf16>, vector<32x256xbf16>, vector<24x256xf32> -> vector<24x256xf32>
    %c0_7 = arith.constant 0 : index
    %c0_8 = arith.constant 0 : index
    %7 = vector.load %arg4[%c0_7, %c0_8] : memref<1x256xf32, #tpu.memory_space<vmem>>, vector<1x256xf32>
    %8 = vector.broadcast %7 : vector<1x256xf32> to vector<24x256xf32>
    %9 = arith.addf %6, %8 : vector<24x256xf32>
    %10 = vector.shape_cast %9 : vector<24x256xf32> to vector<3x8x256xf32>
    %c0_9 = arith.constant 0 : index
    %c0_10 = arith.constant 0 : index
    %c0_11 = arith.constant 0 : index
    %11 = vector.load %arg15[%c0_9, %c0_10, %c0_11] : memref<3x8x256xf32, #tpu.memory_space<vmem>>, vector<3x8x256xf32>
    tpu.vector_store %arg15[%c0_9, %c0_10, %c0_11], %10 {strides = array<i32>} : memref<3x8x256xf32, #tpu.memory_space<vmem>>, vector<3x8x256xf32>,
    %c0_12 = arith.constant 0 : index
    %c0_13 = arith.constant 0 : index
    %12 = vector.load %arg5[%c0_12, %c0_13] : memref<32x128xf32, #tpu.memory_space<vmem>>, vector<32x128xf32>
    %c0_14 = arith.constant 0 : index
    %c0_15 = arith.constant 0 : index
    %13 = vector.load %arg6[%c0_14, %c0_15] : memref<32x128xf32, #tpu.memory_space<vmem>>, vector<32x128xf32>
    %cst_16 = arith.constant 0.000000e+00 : f32
    %14 = vector.broadcast %cst_16 : f32 to vector<3x32xf32>
    %cst_17 = arith.constant 0.000000e+00 : f32
    %15 = vector.broadcast %cst_17 : f32 to vector<3x32xf32>
    %cst_18 = arith.constant 0.000000e+00 : f32
    %16 = vector.broadcast %cst_18 : f32 to vector<3x32xf32>
    %cst_19 = arith.constant 0.000000e+00 : f32
    %17 = vector.broadcast %cst_19 : f32 to vector<3x32xf32>
    %c0_20 = arith.constant 0 : index
    %c0_21 = arith.constant 0 : index
    %c0_22 = arith.constant 0 : index
    %18 = vector.load %arg15[%c0_20, %c0_21, %c0_22] : memref<3x8x256xf32, #tpu.memory_space<vmem>>, vector<3x1x128xf32>
    %19 = vector.shape_cast %18 : vector<3x1x128xf32> to vector<3x128xf32>
    %c0_i32 = arith.constant 0 : i32
    %20 = vector.broadcast %c0_i32 : i32 to vector<3x1xi32>
    %21 = arith.cmpi sgt, %1, %20 : vector<3x1xi32>
    %cst_23 = arith.constant dense<0.000000e+00> : vector<3x128xf32>
    %22 = tpu.matmul %14, %12, %cst_23 {dimension_numbers = #tpu.dot_dimension_numbers<[1], [0], [0], [1], [0, 0, 1, 1], [], []>} : vector<3x32xf32>, vector<32x128xf32>, vector<3x128xf32> -> vector<3x128xf32>
    %23 = arith.addf %19, %22 : vector<3x128xf32>
    %24 = vector.extract_strided_slice %23 {offsets = [0, 0], sizes = [3, 96], strides = [1, 1]} : vector<3x128xf32> to vector<3x96xf32>
    %25 = arith.negf %24 : vector<3x96xf32>
    %26 = math.exp %25 : vector<3x96xf32>
    %cst_24 = arith.constant 1.000000e+00 : f32
    %27 = vector.broadcast %cst_24 : f32 to vector<3x96xf32>
    %28 = arith.addf %27, %26 : vector<3x96xf32>
    %29 = arith.divf %27, %28 : vector<3x96xf32>
    %30 = vector.extract_strided_slice %23 {offsets = [0, 96], sizes = [3, 32], strides = [1, 1]} : vector<3x128xf32> to vector<3x32xf32>
    %31 = math.tanh %30 : vector<3x32xf32>
    %32 = vector.extract_strided_slice %29 {offsets = [0, 32], sizes = [3, 32], strides = [1, 1]} : vector<3x96xf32> to vector<3x32xf32>
    %33 = arith.mulf %32, %15 : vector<3x32xf32>
    %34 = vector.extract_strided_slice %29 {offsets = [0, 0], sizes = [3, 32], strides = [1, 1]} : vector<3x96xf32> to vector<3x32xf32>
    %35 = arith.mulf %34, %31 : vector<3x32xf32>
    %36 = arith.addf %33, %35 : vector<3x32xf32>
    %37 = vector.extract_strided_slice %29 {offsets = [0, 64], sizes = [3, 32], strides = [1, 1]} : vector<3x96xf32> to vector<3x32xf32>
    %38 = math.tanh %36 : vector<3x32xf32>
    %39 = arith.mulf %37, %38 : vector<3x32xf32>
    %40 = vector.shape_cast %21 : vector<3x1xi1> to vector<3x1xi1>
    %41 = vector.broadcast %40 : vector<3x1xi1> to vector<3x32xi1>
    %42 = arith.select %41, %36, %15 : vector<3x32xi1>, vector<3x32xf32>
    %43 = vector.shape_cast %21 : vector<3x1xi1> to vector<3x1xi1>
    %44 = vector.broadcast %43 : vector<3x1xi1> to vector<3x32xi1>
    %45 = arith.select %44, %39, %14 : vector<3x32xi1>, vector<3x32xf32>
    %cst_25 = arith.constant 0.000000e+00 : f32
    %46 = vector.shape_cast %21 : vector<3x1xi1> to vector<3x1xi1>
    %47 = vector.broadcast %46 : vector<3x1xi1> to vector<3x32xi1>
    %48 = vector.broadcast %cst_25 : f32 to vector<3x32xf32>
    %49 = arith.select %47, %39, %48 : vector<3x32xi1>, vector<3x32xf32>
    %c0_26 = arith.constant 0 : index
    %c7 = arith.constant 7 : index
    %c128 = arith.constant 128 : index
    %50 = vector.load %arg15[%c0_26, %c7, %c128] : memref<3x8x256xf32, #tpu.memory_space<vmem>>, vector<3x1x128xf32>
    %51 = vector.shape_cast %50 : vector<3x1x128xf32> to vector<3x128xf32>
    %c7_i32 = arith.constant 7 : i32
    %52 = vector.broadcast %c7_i32 : i32 to vector<3x1xi32>
    %53 = arith.cmpi sgt, %1, %52 : vector<3x1xi32>
    %cst_27 = arith.constant dense<0.000000e+00> : vector<3x128xf32>
    %54 = tpu.matmul %16, %13, %cst_27 {dimension_numbers = #tpu.dot_dimension_numbers<[1], [0], [0], [1], [0, 0, 1, 1], [], []>} : vector<3x32xf32>, vector<32x128xf32>, vector<3x128xf32> -> vector<3x128xf32>
    %55 = arith.addf %51, %54 : vector<3x128xf32>
    %56 = vector.extract_strided_slice %55 {offsets = [0, 0], sizes = [3, 96], strides = [1, 1]} : vector<3x128xf32> to vector<3x96xf32>
    %57 = arith.negf %56 : vector<3x96xf32>
    %58 = math.exp %57 : vector<3x96xf32>
    %cst_28 = arith.constant 1.000000e+00 : f32
    %59 = vector.broadcast %cst_28 : f32 to vector<3x96xf32>
    %60 = arith.addf %59, %58 : vector<3x96xf32>
    %61 = arith.divf %59, %60 : vector<3x96xf32>
    %62 = vector.extract_strided_slice %55 {offsets = [0, 96], sizes = [3, 32], strides = [1, 1]} : vector<3x128xf32> to vector<3x32xf32>
    %63 = math.tanh %62 : vector<3x32xf32>
    %64 = vector.extract_strided_slice %61 {offsets = [0, 32], sizes = [3, 32], strides = [1, 1]} : vector<3x96xf32> to vector<3x32xf32>
    %65 = arith.mulf %64, %17 : vector<3x32xf32>
    %66 = vector.extract_strided_slice %61 {offsets = [0, 0], sizes = [3, 32], strides = [1, 1]} : vector<3x96xf32> to vector<3x32xf32>
    %67 = arith.mulf %66, %63 : vector<3x32xf32>
    %68 = arith.addf %65, %67 : vector<3x32xf32>
    %69 = vector.extract_strided_slice %61 {offsets = [0, 64], sizes = [3, 32], strides = [1, 1]} : vector<3x96xf32> to vector<3x32xf32>
    %70 = math.tanh %68 : vector<3x32xf32>
    %71 = arith.mulf %69, %70 : vector<3x32xf32>
    %72 = vector.shape_cast %53 : vector<3x1xi1> to vector<3x1xi1>
    %73 = vector.broadcast %72 : vector<3x1xi1> to vector<3x32xi1>
    %74 = arith.select %73, %68, %17 : vector<3x32xi1>, vector<3x32xf32>
    %75 = vector.shape_cast %53 : vector<3x1xi1> to vector<3x1xi1>
    %76 = vector.broadcast %75 : vector<3x1xi1> to vector<3x32xi1>
    %77 = arith.select %76, %71, %16 : vector<3x32xi1>, vector<3x32xf32>
    %cst_29 = arith.constant 0.000000e+00 : f32
    %78 = vector.shape_cast %53 : vector<3x1xi1> to vector<3x1xi1>
    %79 = vector.broadcast %78 : vector<3x1xi1> to vector<3x32xi1>
    %80 = vector.broadcast %cst_29 : f32 to vector<3x32xf32>
    %81 = arith.select %79, %71, %80 : vector<3x32xi1>, vector<3x32xf32>
    %c0_30 = arith.constant 0 : index
    %c0_31 = arith.constant 0 : index
    %c0_32 = arith.constant 0 : index
    %82 = vector.load %arg16[%c0_30, %c0_31, %c0_32] : memref<3x8x64xf32, #tpu.memory_space<vmem>>, vector<3x1x32xf32>
    %83 = vector.shape_cast %82 : vector<3x1x32xf32> to vector<3x32xf32>
    %84 = vector.shape_cast %49 : vector<3x32xf32> to vector<3x1x32xf32>
    tpu.vector_store %arg16[%c0_30, %c0_31, %c0_32], %84 {strides = array<i32>} : memref<3x8x64xf32, #tpu.memory_space<vmem>>, vector<3x1x32xf32>,
    %c0_33 = arith.constant 0 : index
    %c7_34 = arith.constant 7 : index
    %c32 = arith.constant 32 : index
    %85 = vector.load %arg16[%c0_33, %c7_34, %c32] : memref<3x8x64xf32, #tpu.memory_space<vmem>>, vector<3x1x32xf32>
    %86 = vector.shape_cast %85 : vector<3x1x32xf32> to vector<3x32xf32>
    %87 = vector.shape_cast %81 : vector<3x32xf32> to vector<3x1x32xf32>
    tpu.vector_store %arg16[%c0_33, %c7_34, %c32], %87 {strides = array<i32>} : memref<3x8x64xf32, #tpu.memory_space<vmem>>, vector<3x1x32xf32>,
    %c0_35 = arith.constant 0 : index
    %c1 = arith.constant 1 : index
    %c0_36 = arith.constant 0 : index
    %88 = vector.load %arg15[%c0_35, %c1, %c0_36] : memref<3x8x256xf32, #tpu.memory_space<vmem>>, vector<3x1x128xf32>
    %89 = vector.shape_cast %88 : vector<3x1x128xf32> to vector<3x128xf32>
    %c1_i32 = arith.constant 1 : i32
    %90 = vector.broadcast %c1_i32 : i32 to vector<3x1xi32>
    %91 = arith.cmpi sgt, %1, %90 : vector<3x1xi32>
    %cst_37 = arith.constant dense<0.000000e+00> : vector<3x128xf32>
    %92 = tpu.matmul %45, %12, %cst_37 {dimension_numbers = #tpu.dot_dimension_numbers<[1], [0], [0], [1], [0, 0, 1, 1], [], []>} : vector<3x32xf32>, vector<32x128xf32>, vector<3x128xf32> -> vector<3x128xf32>
    %93 = arith.addf %89, %92 : vector<3x128xf32>
    %94 = vector.extract_strided_slice %93 {offsets = [0, 0], sizes = [3, 96], strides = [1, 1]} : vector<3x128xf32> to vector<3x96xf32>
    %95 = arith.negf %94 : vector<3x96xf32>
    %96 = math.exp %95 : vector<3x96xf32>
    %cst_38 = arith.constant 1.000000e+00 : f32
    %97 = vector.broadcast %cst_38 : f32 to vector<3x96xf32>
    %98 = arith.addf %97, %96 : vector<3x96xf32>
    %99 = arith.divf %97, %98 : vector<3x96xf32>
    %100 = vector.extract_strided_slice %93 {offsets = [0, 96], sizes = [3, 32], strides = [1, 1]} : vector<3x128xf32> to vector<3x32xf32>
    %101 = math.tanh %100 : vector<3x32xf32>
    %102 = vector.extract_strided_slice %99 {offsets = [0, 32], sizes = [3, 32], strides = [1, 1]} : vector<3x96xf32> to vector<3x32xf32>
    %103 = arith.mulf %102, %42 : vector<3x32xf32>
    %104 = vector.extract_strided_slice %99 {offsets = [0, 0], sizes = [3, 32], strides = [1, 1]} : vector<3x96xf32> to vector<3x32xf32>
    %105 = arith.mulf %104, %101 : vector<3x32xf32>
    %106 = arith.addf %103, %105 : vector<3x32xf32>
    %107 = vector.extract_strided_slice %99 {offsets = [0, 64], sizes = [3, 32], strides = [1, 1]} : vector<3x96xf32> to vector<3x32xf32>
    %108 = math.tanh %106 : vector<3x32xf32>
    %109 = arith.mulf %107, %108 : vector<3x32xf32>
    %110 = vector.shape_cast %91 : vector<3x1xi1> to vector<3x1xi1>
    %111 = vector.broadcast %110 : vector<3x1xi1> to vector<3x32xi1>
    %112 = arith.select %111, %106, %42 : vector<3x32xi1>, vector<3x32xf32>
    %113 = vector.shape_cast %91 : vector<3x1xi1> to vector<3x1xi1>
    %114 = vector.broadcast %113 : vector<3x1xi1> to vector<3x32xi1>
    %115 = arith.select %114, %109, %45 : vector<3x32xi1>, vector<3x32xf32>
    %cst_39 = arith.constant 0.000000e+00 : f32
    %116 = vector.shape_cast %91 : vector<3x1xi1> to vector<3x1xi1>
    %117 = vector.broadcast %116 : vector<3x1xi1> to vector<3x32xi1>
    %118 = vector.broadcast %cst_39 : f32 to vector<3x32xf32>
    %119 = arith.select %117, %109, %118 : vector<3x32xi1>, vector<3x32xf32>
    %c0_40 = arith.constant 0 : index
    %c6 = arith.constant 6 : index
    %c128_41 = arith.constant 128 : index
    %120 = vector.load %arg15[%c0_40, %c6, %c128_41] : memref<3x8x256xf32, #tpu.memory_space<vmem>>, vector<3x1x128xf32>
    %121 = vector.shape_cast %120 : vector<3x1x128xf32> to vector<3x128xf32>
    %c6_i32 = arith.constant 6 : i32
    %122 = vector.broadcast %c6_i32 : i32 to vector<3x1xi32>
    %123 = arith.cmpi sgt, %1, %122 : vector<3x1xi32>
    %cst_42 = arith.constant dense<0.000000e+00> : vector<3x128xf32>
    %124 = tpu.matmul %77, %13, %cst_42 {dimension_numbers = #tpu.dot_dimension_numbers<[1], [0], [0], [1], [0, 0, 1, 1], [], []>} : vector<3x32xf32>, vector<32x128xf32>, vector<3x128xf32> -> vector<3x128xf32>
    %125 = arith.addf %121, %124 : vector<3x128xf32>
    %126 = vector.extract_strided_slice %125 {offsets = [0, 0], sizes = [3, 96], strides = [1, 1]} : vector<3x128xf32> to vector<3x96xf32>
    %127 = arith.negf %126 : vector<3x96xf32>
    %128 = math.exp %127 : vector<3x96xf32>
    %cst_43 = arith.constant 1.000000e+00 : f32
    %129 = vector.broadcast %cst_43 : f32 to vector<3x96xf32>
    %130 = arith.addf %129, %128 : vector<3x96xf32>
    %131 = arith.divf %129, %130 : vector<3x96xf32>
    %132 = vector.extract_strided_slice %125 {offsets = [0, 96], sizes = [3, 32], strides = [1, 1]} : vector<3x128xf32> to vector<3x32xf32>
    %133 = math.tanh %132 : vector<3x32xf32>
    %134 = vector.extract_strided_slice %131 {offsets = [0, 32], sizes = [3, 32], strides = [1, 1]} : vector<3x96xf32> to vector<3x32xf32>
    %135 = arith.mulf %134, %74 : vector<3x32xf32>
    %136 = vector.extract_strided_slice %131 {offsets = [0, 0], sizes = [3, 32], strides = [1, 1]} : vector<3x96xf32> to vector<3x32xf32>
    %137 = arith.mulf %136, %133 : vector<3x32xf32>
    %138 = arith.addf %135, %137 : vector<3x32xf32>
    %139 = vector.extract_strided_slice %131 {offsets = [0, 64], sizes = [3, 32], strides = [1, 1]} : vector<3x96xf32> to vector<3x32xf32>
    %140 = math.tanh %138 : vector<3x32xf32>
    %141 = arith.mulf %139, %140 : vector<3x32xf32>
    %142 = vector.shape_cast %123 : vector<3x1xi1> to vector<3x1xi1>
    %143 = vector.broadcast %142 : vector<3x1xi1> to vector<3x32xi1>
    %144 = arith.select %143, %138, %74 : vector<3x32xi1>, vector<3x32xf32>
    %145 = vector.shape_cast %123 : vector<3x1xi1> to vector<3x1xi1>
    %146 = vector.broadcast %145 : vector<3x1xi1> to vector<3x32xi1>
    %147 = arith.select %146, %141, %77 : vector<3x32xi1>, vector<3x32xf32>
    %cst_44 = arith.constant 0.000000e+00 : f32
    %148 = vector.shape_cast %123 : vector<3x1xi1> to vector<3x1xi1>
    %149 = vector.broadcast %148 : vector<3x1xi1> to vector<3x32xi1>
    %150 = vector.broadcast %cst_44 : f32 to vector<3x32xf32>
    %151 = arith.select %149, %141, %150 : vector<3x32xi1>, vector<3x32xf32>
    %c0_45 = arith.constant 0 : index
    %c1_46 = arith.constant 1 : index
    %c0_47 = arith.constant 0 : index
    %152 = vector.load %arg16[%c0_45, %c1_46, %c0_47] : memref<3x8x64xf32, #tpu.memory_space<vmem>>, vector<3x1x32xf32>
    %153 = vector.shape_cast %152 : vector<3x1x32xf32> to vector<3x32xf32>
    %154 = vector.shape_cast %119 : vector<3x32xf32> to vector<3x1x32xf32>
    tpu.vector_store %arg16[%c0_45, %c1_46, %c0_47], %154 {strides = array<i32>} : memref<3x8x64xf32, #tpu.memory_space<vmem>>, vector<3x1x32xf32>,
    %c0_48 = arith.constant 0 : index
    %c6_49 = arith.constant 6 : index
    %c32_50 = arith.constant 32 : index
    %155 = vector.load %arg16[%c0_48, %c6_49, %c32_50] : memref<3x8x64xf32, #tpu.memory_space<vmem>>, vector<3x1x32xf32>
    %156 = vector.shape_cast %155 : vector<3x1x32xf32> to vector<3x32xf32>
    %157 = vector.shape_cast %151 : vector<3x32xf32> to vector<3x1x32xf32>
    tpu.vector_store %arg16[%c0_48, %c6_49, %c32_50], %157 {strides = array<i32>} : memref<3x8x64xf32, #tpu.memory_space<vmem>>, vector<3x1x32xf32>,
    %c0_51 = arith.constant 0 : index
    %c2 = arith.constant 2 : index
    %c0_52 = arith.constant 0 : index
    %158 = vector.load %arg15[%c0_51, %c2, %c0_52] : memref<3x8x256xf32, #tpu.memory_space<vmem>>, vector<3x1x128xf32>
    %159 = vector.shape_cast %158 : vector<3x1x128xf32> to vector<3x128xf32>
    %c2_i32 = arith.constant 2 : i32
    %160 = vector.broadcast %c2_i32 : i32 to vector<3x1xi32>
    %161 = arith.cmpi sgt, %1, %160 : vector<3x1xi32>
    %cst_53 = arith.constant dense<0.000000e+00> : vector<3x128xf32>
    %162 = tpu.matmul %115, %12, %cst_53 {dimension_numbers = #tpu.dot_dimension_numbers<[1], [0], [0], [1], [0, 0, 1, 1], [], []>} : vector<3x32xf32>, vector<32x128xf32>, vector<3x128xf32> -> vector<3x128xf32>
    %163 = arith.addf %159, %162 : vector<3x128xf32>
    %164 = vector.extract_strided_slice %163 {offsets = [0, 0], sizes = [3, 96], strides = [1, 1]} : vector<3x128xf32> to vector<3x96xf32>
    %165 = arith.negf %164 : vector<3x96xf32>
    %166 = math.exp %165 : vector<3x96xf32>
    %cst_54 = arith.constant 1.000000e+00 : f32
    %167 = vector.broadcast %cst_54 : f32 to vector<3x96xf32>
    %168 = arith.addf %167, %166 : vector<3x96xf32>
    %169 = arith.divf %167, %168 : vector<3x96xf32>
    %170 = vector.extract_strided_slice %163 {offsets = [0, 96], sizes = [3, 32], strides = [1, 1]} : vector<3x128xf32> to vector<3x32xf32>
    %171 = math.tanh %170 : vector<3x32xf32>
    %172 = vector.extract_strided_slice %169 {offsets = [0, 32], sizes = [3, 32], strides = [1, 1]} : vector<3x96xf32> to vector<3x32xf32>
    %173 = arith.mulf %172, %112 : vector<3x32xf32>
    %174 = vector.extract_strided_slice %169 {offsets = [0, 0], sizes = [3, 32], strides = [1, 1]} : vector<3x96xf32> to vector<3x32xf32>
    %175 = arith.mulf %174, %171 : vector<3x32xf32>
    %176 = arith.addf %173, %175 : vector<3x32xf32>
    %177 = vector.extract_strided_slice %169 {offsets = [0, 64], sizes = [3, 32], strides = [1, 1]} : vector<3x96xf32> to vector<3x32xf32>
    %178 = math.tanh %176 : vector<3x32xf32>
    %179 = arith.mulf %177, %178 : vector<3x32xf32>
    %180 = vector.shape_cast %161 : vector<3x1xi1> to vector<3x1xi1>
    %181 = vector.broadcast %180 : vector<3x1xi1> to vector<3x32xi1>
    %182 = arith.select %181, %176, %112 : vector<3x32xi1>, vector<3x32xf32>
    %183 = vector.shape_cast %161 : vector<3x1xi1> to vector<3x1xi1>
    %184 = vector.broadcast %183 : vector<3x1xi1> to vector<3x32xi1>
    %185 = arith.select %184, %179, %115 : vector<3x32xi1>, vector<3x32xf32>
    %cst_55 = arith.constant 0.000000e+00 : f32
    %186 = vector.shape_cast %161 : vector<3x1xi1> to vector<3x1xi1>
    %187 = vector.broadcast %186 : vector<3x1xi1> to vector<3x32xi1>
    %188 = vector.broadcast %cst_55 : f32 to vector<3x32xf32>
    %189 = arith.select %187, %179, %188 : vector<3x32xi1>, vector<3x32xf32>
    %c0_56 = arith.constant 0 : index
    %c5 = arith.constant 5 : index
    %c128_57 = arith.constant 128 : index
    %190 = vector.load %arg15[%c0_56, %c5, %c128_57] : memref<3x8x256xf32, #tpu.memory_space<vmem>>, vector<3x1x128xf32>
    %191 = vector.shape_cast %190 : vector<3x1x128xf32> to vector<3x128xf32>
    %c5_i32 = arith.constant 5 : i32
    %192 = vector.broadcast %c5_i32 : i32 to vector<3x1xi32>
    %193 = arith.cmpi sgt, %1, %192 : vector<3x1xi32>
    %cst_58 = arith.constant dense<0.000000e+00> : vector<3x128xf32>
    %194 = tpu.matmul %147, %13, %cst_58 {dimension_numbers = #tpu.dot_dimension_numbers<[1], [0], [0], [1], [0, 0, 1, 1], [], []>} : vector<3x32xf32>, vector<32x128xf32>, vector<3x128xf32> -> vector<3x128xf32>
    %195 = arith.addf %191, %194 : vector<3x128xf32>
    %196 = vector.extract_strided_slice %195 {offsets = [0, 0], sizes = [3, 96], strides = [1, 1]} : vector<3x128xf32> to vector<3x96xf32>
    %197 = arith.negf %196 : vector<3x96xf32>
    %198 = math.exp %197 : vector<3x96xf32>
    %cst_59 = arith.constant 1.000000e+00 : f32
    %199 = vector.broadcast %cst_59 : f32 to vector<3x96xf32>
    %200 = arith.addf %199, %198 : vector<3x96xf32>
    %201 = arith.divf %199, %200 : vector<3x96xf32>
    %202 = vector.extract_strided_slice %195 {offsets = [0, 96], sizes = [3, 32], strides = [1, 1]} : vector<3x128xf32> to vector<3x32xf32>
    %203 = math.tanh %202 : vector<3x32xf32>
    %204 = vector.extract_strided_slice %201 {offsets = [0, 32], sizes = [3, 32], strides = [1, 1]} : vector<3x96xf32> to vector<3x32xf32>
    %205 = arith.mulf %204, %144 : vector<3x32xf32>
    %206 = vector.extract_strided_slice %201 {offsets = [0, 0], sizes = [3, 32], strides = [1, 1]} : vector<3x96xf32> to vector<3x32xf32>
    %207 = arith.mulf %206, %203 : vector<3x32xf32>
    %208 = arith.addf %205, %207 : vector<3x32xf32>
    %209 = vector.extract_strided_slice %201 {offsets = [0, 64], sizes = [3, 32], strides = [1, 1]} : vector<3x96xf32> to vector<3x32xf32>
    %210 = math.tanh %208 : vector<3x32xf32>
    %211 = arith.mulf %209, %210 : vector<3x32xf32>
    %212 = vector.shape_cast %193 : vector<3x1xi1> to vector<3x1xi1>
    %213 = vector.broadcast %212 : vector<3x1xi1> to vector<3x32xi1>
    %214 = arith.select %213, %208, %144 : vector<3x32xi1>, vector<3x32xf32>
    %215 = vector.shape_cast %193 : vector<3x1xi1> to vector<3x1xi1>
    %216 = vector.broadcast %215 : vector<3x1xi1> to vector<3x32xi1>
    %217 = arith.select %216, %211, %147 : vector<3x32xi1>, vector<3x32xf32>
    %cst_60 = arith.constant 0.000000e+00 : f32
    %218 = vector.shape_cast %193 : vector<3x1xi1> to vector<3x1xi1>
    %219 = vector.broadcast %218 : vector<3x1xi1> to vector<3x32xi1>
    %220 = vector.broadcast %cst_60 : f32 to vector<3x32xf32>
    %221 = arith.select %219, %211, %220 : vector<3x32xi1>, vector<3x32xf32>
    %c0_61 = arith.constant 0 : index
    %c2_62 = arith.constant 2 : index
    %c0_63 = arith.constant 0 : index
    %222 = vector.load %arg16[%c0_61, %c2_62, %c0_63] : memref<3x8x64xf32, #tpu.memory_space<vmem>>, vector<3x1x32xf32>
    %223 = vector.shape_cast %222 : vector<3x1x32xf32> to vector<3x32xf32>
    %224 = vector.shape_cast %189 : vector<3x32xf32> to vector<3x1x32xf32>
    tpu.vector_store %arg16[%c0_61, %c2_62, %c0_63], %224 {strides = array<i32>} : memref<3x8x64xf32, #tpu.memory_space<vmem>>, vector<3x1x32xf32>,
    %c0_64 = arith.constant 0 : index
    %c5_65 = arith.constant 5 : index
    %c32_66 = arith.constant 32 : index
    %225 = vector.load %arg16[%c0_64, %c5_65, %c32_66] : memref<3x8x64xf32, #tpu.memory_space<vmem>>, vector<3x1x32xf32>
    %226 = vector.shape_cast %225 : vector<3x1x32xf32> to vector<3x32xf32>
    %227 = vector.shape_cast %221 : vector<3x32xf32> to vector<3x1x32xf32>
    tpu.vector_store %arg16[%c0_64, %c5_65, %c32_66], %227 {strides = array<i32>} : memref<3x8x64xf32, #tpu.memory_space<vmem>>, vector<3x1x32xf32>,
    %c0_67 = arith.constant 0 : index
    %c3 = arith.constant 3 : index
    %c0_68 = arith.constant 0 : index
    %228 = vector.load %arg15[%c0_67, %c3, %c0_68] : memref<3x8x256xf32, #tpu.memory_space<vmem>>, vector<3x1x128xf32>
    %229 = vector.shape_cast %228 : vector<3x1x128xf32> to vector<3x128xf32>
    %c3_i32 = arith.constant 3 : i32
    %230 = vector.broadcast %c3_i32 : i32 to vector<3x1xi32>
    %231 = arith.cmpi sgt, %1, %230 : vector<3x1xi32>
    %cst_69 = arith.constant dense<0.000000e+00> : vector<3x128xf32>
    %232 = tpu.matmul %185, %12, %cst_69 {dimension_numbers = #tpu.dot_dimension_numbers<[1], [0], [0], [1], [0, 0, 1, 1], [], []>} : vector<3x32xf32>, vector<32x128xf32>, vector<3x128xf32> -> vector<3x128xf32>
    %233 = arith.addf %229, %232 : vector<3x128xf32>
    %234 = vector.extract_strided_slice %233 {offsets = [0, 0], sizes = [3, 96], strides = [1, 1]} : vector<3x128xf32> to vector<3x96xf32>
    %235 = arith.negf %234 : vector<3x96xf32>
    %236 = math.exp %235 : vector<3x96xf32>
    %cst_70 = arith.constant 1.000000e+00 : f32
    %237 = vector.broadcast %cst_70 : f32 to vector<3x96xf32>
    %238 = arith.addf %237, %236 : vector<3x96xf32>
    %239 = arith.divf %237, %238 : vector<3x96xf32>
    %240 = vector.extract_strided_slice %233 {offsets = [0, 96], sizes = [3, 32], strides = [1, 1]} : vector<3x128xf32> to vector<3x32xf32>
    %241 = math.tanh %240 : vector<3x32xf32>
    %242 = vector.extract_strided_slice %239 {offsets = [0, 32], sizes = [3, 32], strides = [1, 1]} : vector<3x96xf32> to vector<3x32xf32>
    %243 = arith.mulf %242, %182 : vector<3x32xf32>
    %244 = vector.extract_strided_slice %239 {offsets = [0, 0], sizes = [3, 32], strides = [1, 1]} : vector<3x96xf32> to vector<3x32xf32>
    %245 = arith.mulf %244, %241 : vector<3x32xf32>
    %246 = arith.addf %243, %245 : vector<3x32xf32>
    %247 = vector.extract_strided_slice %239 {offsets = [0, 64], sizes = [3, 32], strides = [1, 1]} : vector<3x96xf32> to vector<3x32xf32>
    %248 = math.tanh %246 : vector<3x32xf32>
    %249 = arith.mulf %247, %248 : vector<3x32xf32>
    %250 = vector.shape_cast %231 : vector<3x1xi1> to vector<3x1xi1>
    %251 = vector.broadcast %250 : vector<3x1xi1> to vector<3x32xi1>
    %252 = arith.select %251, %246, %182 : vector<3x32xi1>, vector<3x32xf32>
    %253 = vector.shape_cast %231 : vector<3x1xi1> to vector<3x1xi1>
    %254 = vector.broadcast %253 : vector<3x1xi1> to vector<3x32xi1>
    %255 = arith.select %254, %249, %185 : vector<3x32xi1>, vector<3x32xf32>
    %cst_71 = arith.constant 0.000000e+00 : f32
    %256 = vector.shape_cast %231 : vector<3x1xi1> to vector<3x1xi1>
    %257 = vector.broadcast %256 : vector<3x1xi1> to vector<3x32xi1>
    %258 = vector.broadcast %cst_71 : f32 to vector<3x32xf32>
    %259 = arith.select %257, %249, %258 : vector<3x32xi1>, vector<3x32xf32>
    %c0_72 = arith.constant 0 : index
    %c4 = arith.constant 4 : index
    %c128_73 = arith.constant 128 : index
    %260 = vector.load %arg15[%c0_72, %c4, %c128_73] : memref<3x8x256xf32, #tpu.memory_space<vmem>>, vector<3x1x128xf32>
    %261 = vector.shape_cast %260 : vector<3x1x128xf32> to vector<3x128xf32>
    %c4_i32 = arith.constant 4 : i32
    %262 = vector.broadcast %c4_i32 : i32 to vector<3x1xi32>
    %263 = arith.cmpi sgt, %1, %262 : vector<3x1xi32>
    %cst_74 = arith.constant dense<0.000000e+00> : vector<3x128xf32>
    %264 = tpu.matmul %217, %13, %cst_74 {dimension_numbers = #tpu.dot_dimension_numbers<[1], [0], [0], [1], [0, 0, 1, 1], [], []>} : vector<3x32xf32>, vector<32x128xf32>, vector<3x128xf32> -> vector<3x128xf32>
    %265 = arith.addf %261, %264 : vector<3x128xf32>
    %266 = vector.extract_strided_slice %265 {offsets = [0, 0], sizes = [3, 96], strides = [1, 1]} : vector<3x128xf32> to vector<3x96xf32>
    %267 = arith.negf %266 : vector<3x96xf32>
    %268 = math.exp %267 : vector<3x96xf32>
    %cst_75 = arith.constant 1.000000e+00 : f32
    %269 = vector.broadcast %cst_75 : f32 to vector<3x96xf32>
    %270 = arith.addf %269, %268 : vector<3x96xf32>
    %271 = arith.divf %269, %270 : vector<3x96xf32>
    %272 = vector.extract_strided_slice %265 {offsets = [0, 96], sizes = [3, 32], strides = [1, 1]} : vector<3x128xf32> to vector<3x32xf32>
    %273 = math.tanh %272 : vector<3x32xf32>
    %274 = vector.extract_strided_slice %271 {offsets = [0, 32], sizes = [3, 32], strides = [1, 1]} : vector<3x96xf32> to vector<3x32xf32>
    %275 = arith.mulf %274, %214 : vector<3x32xf32>
    %276 = vector.extract_strided_slice %271 {offsets = [0, 0], sizes = [3, 32], strides = [1, 1]} : vector<3x96xf32> to vector<3x32xf32>
    %277 = arith.mulf %276, %273 : vector<3x32xf32>
    %278 = arith.addf %275, %277 : vector<3x32xf32>
    %279 = vector.extract_strided_slice %271 {offsets = [0, 64], sizes = [3, 32], strides = [1, 1]} : vector<3x96xf32> to vector<3x32xf32>
    %280 = math.tanh %278 : vector<3x32xf32>
    %281 = arith.mulf %279, %280 : vector<3x32xf32>
    %282 = vector.shape_cast %263 : vector<3x1xi1> to vector<3x1xi1>
    %283 = vector.broadcast %282 : vector<3x1xi1> to vector<3x32xi1>
    %284 = arith.select %283, %278, %214 : vector<3x32xi1>, vector<3x32xf32>
    %285 = vector.shape_cast %263 : vector<3x1xi1> to vector<3x1xi1>
    %286 = vector.broadcast %285 : vector<3x1xi1> to vector<3x32xi1>
    %287 = arith.select %286, %281, %217 : vector<3x32xi1>, vector<3x32xf32>
    %cst_76 = arith.constant 0.000000e+00 : f32
    %288 = vector.shape_cast %263 : vector<3x1xi1> to vector<3x1xi1>
    %289 = vector.broadcast %288 : vector<3x1xi1> to vector<3x32xi1>
    %290 = vector.broadcast %cst_76 : f32 to vector<3x32xf32>
    %291 = arith.select %289, %281, %290 : vector<3x32xi1>, vector<3x32xf32>
    %c0_77 = arith.constant 0 : index
    %c3_78 = arith.constant 3 : index
    %c0_79 = arith.constant 0 : index
    %292 = vector.load %arg16[%c0_77, %c3_78, %c0_79] : memref<3x8x64xf32, #tpu.memory_space<vmem>>, vector<3x1x32xf32>
    %293 = vector.shape_cast %292 : vector<3x1x32xf32> to vector<3x32xf32>
    %294 = vector.shape_cast %259 : vector<3x32xf32> to vector<3x1x32xf32>
    tpu.vector_store %arg16[%c0_77, %c3_78, %c0_79], %294 {strides = array<i32>} : memref<3x8x64xf32, #tpu.memory_space<vmem>>, vector<3x1x32xf32>,
    %c0_80 = arith.constant 0 : index
    %c4_81 = arith.constant 4 : index
    %c32_82 = arith.constant 32 : index
    %295 = vector.load %arg16[%c0_80, %c4_81, %c32_82] : memref<3x8x64xf32, #tpu.memory_space<vmem>>, vector<3x1x32xf32>
    %296 = vector.shape_cast %295 : vector<3x1x32xf32> to vector<3x32xf32>
    %297 = vector.shape_cast %291 : vector<3x32xf32> to vector<3x1x32xf32>
    tpu.vector_store %arg16[%c0_80, %c4_81, %c32_82], %297 {strides = array<i32>} : memref<3x8x64xf32, #tpu.memory_space<vmem>>, vector<3x1x32xf32>,
    %c0_83 = arith.constant 0 : index
    %c4_84 = arith.constant 4 : index
    %c0_85 = arith.constant 0 : index
    %298 = vector.load %arg15[%c0_83, %c4_84, %c0_85] : memref<3x8x256xf32, #tpu.memory_space<vmem>>, vector<3x1x128xf32>
    %299 = vector.shape_cast %298 : vector<3x1x128xf32> to vector<3x128xf32>
    %c4_i32_86 = arith.constant 4 : i32
    %300 = vector.broadcast %c4_i32_86 : i32 to vector<3x1xi32>
    %301 = arith.cmpi sgt, %1, %300 : vector<3x1xi32>
    %cst_87 = arith.constant dense<0.000000e+00> : vector<3x128xf32>
    %302 = tpu.matmul %255, %12, %cst_87 {dimension_numbers = #tpu.dot_dimension_numbers<[1], [0], [0], [1], [0, 0, 1, 1], [], []>} : vector<3x32xf32>, vector<32x128xf32>, vector<3x128xf32> -> vector<3x128xf32>
    %303 = arith.addf %299, %302 : vector<3x128xf32>
    %304 = vector.extract_strided_slice %303 {offsets = [0, 0], sizes = [3, 96], strides = [1, 1]} : vector<3x128xf32> to vector<3x96xf32>
    %305 = arith.negf %304 : vector<3x96xf32>
    %306 = math.exp %305 : vector<3x96xf32>
    %cst_88 = arith.constant 1.000000e+00 : f32
    %307 = vector.broadcast %cst_88 : f32 to vector<3x96xf32>
    %308 = arith.addf %307, %306 : vector<3x96xf32>
    %309 = arith.divf %307, %308 : vector<3x96xf32>
    %310 = vector.extract_strided_slice %303 {offsets = [0, 96], sizes = [3, 32], strides = [1, 1]} : vector<3x128xf32> to vector<3x32xf32>
    %311 = math.tanh %310 : vector<3x32xf32>
    %312 = vector.extract_strided_slice %309 {offsets = [0, 32], sizes = [3, 32], strides = [1, 1]} : vector<3x96xf32> to vector<3x32xf32>
    %313 = arith.mulf %312, %252 : vector<3x32xf32>
    %314 = vector.extract_strided_slice %309 {offsets = [0, 0], sizes = [3, 32], strides = [1, 1]} : vector<3x96xf32> to vector<3x32xf32>
    %315 = arith.mulf %314, %311 : vector<3x32xf32>
    %316 = arith.addf %313, %315 : vector<3x32xf32>
    %317 = vector.extract_strided_slice %309 {offsets = [0, 64], sizes = [3, 32], strides = [1, 1]} : vector<3x96xf32> to vector<3x32xf32>
    %318 = math.tanh %316 : vector<3x32xf32>
    %319 = arith.mulf %317, %318 : vector<3x32xf32>
    %320 = vector.shape_cast %301 : vector<3x1xi1> to vector<3x1xi1>
    %321 = vector.broadcast %320 : vector<3x1xi1> to vector<3x32xi1>
    %322 = arith.select %321, %316, %252 : vector<3x32xi1>, vector<3x32xf32>
    %323 = vector.shape_cast %301 : vector<3x1xi1> to vector<3x1xi1>
    %324 = vector.broadcast %323 : vector<3x1xi1> to vector<3x32xi1>
    %325 = arith.select %324, %319, %255 : vector<3x32xi1>, vector<3x32xf32>
    %cst_89 = arith.constant 0.000000e+00 : f32
    %326 = vector.shape_cast %301 : vector<3x1xi1> to vector<3x1xi1>
    %327 = vector.broadcast %326 : vector<3x1xi1> to vector<3x32xi1>
    %328 = vector.broadcast %cst_89 : f32 to vector<3x32xf32>
    %329 = arith.select %327, %319, %328 : vector<3x32xi1>, vector<3x32xf32>
    %c0_90 = arith.constant 0 : index
    %c3_91 = arith.constant 3 : index
    %c128_92 = arith.constant 128 : index
    %330 = vector.load %arg15[%c0_90, %c3_91, %c128_92] : memref<3x8x256xf32, #tpu.memory_space<vmem>>, vector<3x1x128xf32>
    %331 = vector.shape_cast %330 : vector<3x1x128xf32> to vector<3x128xf32>
    %c3_i32_93 = arith.constant 3 : i32
    %332 = vector.broadcast %c3_i32_93 : i32 to vector<3x1xi32>
    %333 = arith.cmpi sgt, %1, %332 : vector<3x1xi32>
    %cst_94 = arith.constant dense<0.000000e+00> : vector<3x128xf32>
    %334 = tpu.matmul %287, %13, %cst_94 {dimension_numbers = #tpu.dot_dimension_numbers<[1], [0], [0], [1], [0, 0, 1, 1], [], []>} : vector<3x32xf32>, vector<32x128xf32>, vector<3x128xf32> -> vector<3x128xf32>
    %335 = arith.addf %331, %334 : vector<3x128xf32>
    %336 = vector.extract_strided_slice %335 {offsets = [0, 0], sizes = [3, 96], strides = [1, 1]} : vector<3x128xf32> to vector<3x96xf32>
    %337 = arith.negf %336 : vector<3x96xf32>
    %338 = math.exp %337 : vector<3x96xf32>
    %cst_95 = arith.constant 1.000000e+00 : f32
    %339 = vector.broadcast %cst_95 : f32 to vector<3x96xf32>
    %340 = arith.addf %339, %338 : vector<3x96xf32>
    %341 = arith.divf %339, %340 : vector<3x96xf32>
    %342 = vector.extract_strided_slice %335 {offsets = [0, 96], sizes = [3, 32], strides = [1, 1]} : vector<3x128xf32> to vector<3x32xf32>
    %343 = math.tanh %342 : vector<3x32xf32>
    %344 = vector.extract_strided_slice %341 {offsets = [0, 32], sizes = [3, 32], strides = [1, 1]} : vector<3x96xf32> to vector<3x32xf32>
    %345 = arith.mulf %344, %284 : vector<3x32xf32>
    %346 = vector.extract_strided_slice %341 {offsets = [0, 0], sizes = [3, 32], strides = [1, 1]} : vector<3x96xf32> to vector<3x32xf32>
    %347 = arith.mulf %346, %343 : vector<3x32xf32>
    %348 = arith.addf %345, %347 : vector<3x32xf32>
    %349 = vector.extract_strided_slice %341 {offsets = [0, 64], sizes = [3, 32], strides = [1, 1]} : vector<3x96xf32> to vector<3x32xf32>
    %350 = math.tanh %348 : vector<3x32xf32>
    %351 = arith.mulf %349, %350 : vector<3x32xf32>
    %352 = vector.shape_cast %333 : vector<3x1xi1> to vector<3x1xi1>
    %353 = vector.broadcast %352 : vector<3x1xi1> to vector<3x32xi1>
    %354 = arith.select %353, %348, %284 : vector<3x32xi1>, vector<3x32xf32>
    %355 = vector.shape_cast %333 : vector<3x1xi1> to vector<3x1xi1>
    %356 = vector.broadcast %355 : vector<3x1xi1> to vector<3x32xi1>
    %357 = arith.select %356, %351, %287 : vector<3x32xi1>, vector<3x32xf32>
    %cst_96 = arith.constant 0.000000e+00 : f32
    %358 = vector.shape_cast %333 : vector<3x1xi1> to vector<3x1xi1>
    %359 = vector.broadcast %358 : vector<3x1xi1> to vector<3x32xi1>
    %360 = vector.broadcast %cst_96 : f32 to vector<3x32xf32>
    %361 = arith.select %359, %351, %360 : vector<3x32xi1>, vector<3x32xf32>
    %c0_97 = arith.constant 0 : index
    %c4_98 = arith.constant 4 : index
    %c0_99 = arith.constant 0 : index
    %362 = vector.load %arg16[%c0_97, %c4_98, %c0_99] : memref<3x8x64xf32, #tpu.memory_space<vmem>>, vector<3x1x32xf32>
    %363 = vector.shape_cast %362 : vector<3x1x32xf32> to vector<3x32xf32>
    %364 = vector.shape_cast %329 : vector<3x32xf32> to vector<3x1x32xf32>
    tpu.vector_store %arg16[%c0_97, %c4_98, %c0_99], %364 {strides = array<i32>} : memref<3x8x64xf32, #tpu.memory_space<vmem>>, vector<3x1x32xf32>,
    %c0_100 = arith.constant 0 : index
    %c3_101 = arith.constant 3 : index
    %c32_102 = arith.constant 32 : index
    %365 = vector.load %arg16[%c0_100, %c3_101, %c32_102] : memref<3x8x64xf32, #tpu.memory_space<vmem>>, vector<3x1x32xf32>
    %366 = vector.shape_cast %365 : vector<3x1x32xf32> to vector<3x32xf32>
    %367 = vector.shape_cast %361 : vector<3x32xf32> to vector<3x1x32xf32>
    tpu.vector_store %arg16[%c0_100, %c3_101, %c32_102], %367 {strides = array<i32>} : memref<3x8x64xf32, #tpu.memory_space<vmem>>, vector<3x1x32xf32>,
    %c0_103 = arith.constant 0 : index
    %c5_104 = arith.constant 5 : index
    %c0_105 = arith.constant 0 : index
    %368 = vector.load %arg15[%c0_103, %c5_104, %c0_105] : memref<3x8x256xf32, #tpu.memory_space<vmem>>, vector<3x1x128xf32>
    %369 = vector.shape_cast %368 : vector<3x1x128xf32> to vector<3x128xf32>
    %c5_i32_106 = arith.constant 5 : i32
    %370 = vector.broadcast %c5_i32_106 : i32 to vector<3x1xi32>
    %371 = arith.cmpi sgt, %1, %370 : vector<3x1xi32>
    %cst_107 = arith.constant dense<0.000000e+00> : vector<3x128xf32>
    %372 = tpu.matmul %325, %12, %cst_107 {dimension_numbers = #tpu.dot_dimension_numbers<[1], [0], [0], [1], [0, 0, 1, 1], [], []>} : vector<3x32xf32>, vector<32x128xf32>, vector<3x128xf32> -> vector<3x128xf32>
    %373 = arith.addf %369, %372 : vector<3x128xf32>
    %374 = vector.extract_strided_slice %373 {offsets = [0, 0], sizes = [3, 96], strides = [1, 1]} : vector<3x128xf32> to vector<3x96xf32>
    %375 = arith.negf %374 : vector<3x96xf32>
    %376 = math.exp %375 : vector<3x96xf32>
    %cst_108 = arith.constant 1.000000e+00 : f32
    %377 = vector.broadcast %cst_108 : f32 to vector<3x96xf32>
    %378 = arith.addf %377, %376 : vector<3x96xf32>
    %379 = arith.divf %377, %378 : vector<3x96xf32>
    %380 = vector.extract_strided_slice %373 {offsets = [0, 96], sizes = [3, 32], strides = [1, 1]} : vector<3x128xf32> to vector<3x32xf32>
    %381 = math.tanh %380 : vector<3x32xf32>
    %382 = vector.extract_strided_slice %379 {offsets = [0, 32], sizes = [3, 32], strides = [1, 1]} : vector<3x96xf32> to vector<3x32xf32>
    %383 = arith.mulf %382, %322 : vector<3x32xf32>
    %384 = vector.extract_strided_slice %379 {offsets = [0, 0], sizes = [3, 32], strides = [1, 1]} : vector<3x96xf32> to vector<3x32xf32>
    %385 = arith.mulf %384, %381 : vector<3x32xf32>
    %386 = arith.addf %383, %385 : vector<3x32xf32>
    %387 = vector.extract_strided_slice %379 {offsets = [0, 64], sizes = [3, 32], strides = [1, 1]} : vector<3x96xf32> to vector<3x32xf32>
    %388 = math.tanh %386 : vector<3x32xf32>
    %389 = arith.mulf %387, %388 : vector<3x32xf32>
    %390 = vector.shape_cast %371 : vector<3x1xi1> to vector<3x1xi1>
    %391 = vector.broadcast %390 : vector<3x1xi1> to vector<3x32xi1>
    %392 = arith.select %391, %386, %322 : vector<3x32xi1>, vector<3x32xf32>
    %393 = vector.shape_cast %371 : vector<3x1xi1> to vector<3x1xi1>
    %394 = vector.broadcast %393 : vector<3x1xi1> to vector<3x32xi1>
    %395 = arith.select %394, %389, %325 : vector<3x32xi1>, vector<3x32xf32>
    %cst_109 = arith.constant 0.000000e+00 : f32
    %396 = vector.shape_cast %371 : vector<3x1xi1> to vector<3x1xi1>
    %397 = vector.broadcast %396 : vector<3x1xi1> to vector<3x32xi1>
    %398 = vector.broadcast %cst_109 : f32 to vector<3x32xf32>
    %399 = arith.select %397, %389, %398 : vector<3x32xi1>, vector<3x32xf32>
    %c0_110 = arith.constant 0 : index
    %c2_111 = arith.constant 2 : index
    %c128_112 = arith.constant 128 : index
    %400 = vector.load %arg15[%c0_110, %c2_111, %c128_112] : memref<3x8x256xf32, #tpu.memory_space<vmem>>, vector<3x1x128xf32>
    %401 = vector.shape_cast %400 : vector<3x1x128xf32> to vector<3x128xf32>
    %c2_i32_113 = arith.constant 2 : i32
    %402 = vector.broadcast %c2_i32_113 : i32 to vector<3x1xi32>
    %403 = arith.cmpi sgt, %1, %402 : vector<3x1xi32>
    %cst_114 = arith.constant dense<0.000000e+00> : vector<3x128xf32>
    %404 = tpu.matmul %357, %13, %cst_114 {dimension_numbers = #tpu.dot_dimension_numbers<[1], [0], [0], [1], [0, 0, 1, 1], [], []>} : vector<3x32xf32>, vector<32x128xf32>, vector<3x128xf32> -> vector<3x128xf32>
    %405 = arith.addf %401, %404 : vector<3x128xf32>
    %406 = vector.extract_strided_slice %405 {offsets = [0, 0], sizes = [3, 96], strides = [1, 1]} : vector<3x128xf32> to vector<3x96xf32>
    %407 = arith.negf %406 : vector<3x96xf32>
    %408 = math.exp %407 : vector<3x96xf32>
    %cst_115 = arith.constant 1.000000e+00 : f32
    %409 = vector.broadcast %cst_115 : f32 to vector<3x96xf32>
    %410 = arith.addf %409, %408 : vector<3x96xf32>
    %411 = arith.divf %409, %410 : vector<3x96xf32>
    %412 = vector.extract_strided_slice %405 {offsets = [0, 96], sizes = [3, 32], strides = [1, 1]} : vector<3x128xf32> to vector<3x32xf32>
    %413 = math.tanh %412 : vector<3x32xf32>
    %414 = vector.extract_strided_slice %411 {offsets = [0, 32], sizes = [3, 32], strides = [1, 1]} : vector<3x96xf32> to vector<3x32xf32>
    %415 = arith.mulf %414, %354 : vector<3x32xf32>
    %416 = vector.extract_strided_slice %411 {offsets = [0, 0], sizes = [3, 32], strides = [1, 1]} : vector<3x96xf32> to vector<3x32xf32>
    %417 = arith.mulf %416, %413 : vector<3x32xf32>
    %418 = arith.addf %415, %417 : vector<3x32xf32>
    %419 = vector.extract_strided_slice %411 {offsets = [0, 64], sizes = [3, 32], strides = [1, 1]} : vector<3x96xf32> to vector<3x32xf32>
    %420 = math.tanh %418 : vector<3x32xf32>
    %421 = arith.mulf %419, %420 : vector<3x32xf32>
    %422 = vector.shape_cast %403 : vector<3x1xi1> to vector<3x1xi1>
    %423 = vector.broadcast %422 : vector<3x1xi1> to vector<3x32xi1>
    %424 = arith.select %423, %418, %354 : vector<3x32xi1>, vector<3x32xf32>
    %425 = vector.shape_cast %403 : vector<3x1xi1> to vector<3x1xi1>
    %426 = vector.broadcast %425 : vector<3x1xi1> to vector<3x32xi1>
    %427 = arith.select %426, %421, %357 : vector<3x32xi1>, vector<3x32xf32>
    %cst_116 = arith.constant 0.000000e+00 : f32
    %428 = vector.shape_cast %403 : vector<3x1xi1> to vector<3x1xi1>
    %429 = vector.broadcast %428 : vector<3x1xi1> to vector<3x32xi1>
    %430 = vector.broadcast %cst_116 : f32 to vector<3x32xf32>
    %431 = arith.select %429, %421, %430 : vector<3x32xi1>, vector<3x32xf32>
    %c0_117 = arith.constant 0 : index
    %c5_118 = arith.constant 5 : index
    %c0_119 = arith.constant 0 : index
    %432 = vector.load %arg16[%c0_117, %c5_118, %c0_119] : memref<3x8x64xf32, #tpu.memory_space<vmem>>, vector<3x1x32xf32>
    %433 = vector.shape_cast %432 : vector<3x1x32xf32> to vector<3x32xf32>
    %434 = vector.shape_cast %399 : vector<3x32xf32> to vector<3x1x32xf32>
    tpu.vector_store %arg16[%c0_117, %c5_118, %c0_119], %434 {strides = array<i32>} : memref<3x8x64xf32, #tpu.memory_space<vmem>>, vector<3x1x32xf32>,
    %c0_120 = arith.constant 0 : index
    %c2_121 = arith.constant 2 : index
    %c32_122 = arith.constant 32 : index
    %435 = vector.load %arg16[%c0_120, %c2_121, %c32_122] : memref<3x8x64xf32, #tpu.memory_space<vmem>>, vector<3x1x32xf32>
    %436 = vector.shape_cast %435 : vector<3x1x32xf32> to vector<3x32xf32>
    %437 = vector.shape_cast %431 : vector<3x32xf32> to vector<3x1x32xf32>
    tpu.vector_store %arg16[%c0_120, %c2_121, %c32_122], %437 {strides = array<i32>} : memref<3x8x64xf32, #tpu.memory_space<vmem>>, vector<3x1x32xf32>,
    %c0_123 = arith.constant 0 : index
    %c6_124 = arith.constant 6 : index
    %c0_125 = arith.constant 0 : index
    %438 = vector.load %arg15[%c0_123, %c6_124, %c0_125] : memref<3x8x256xf32, #tpu.memory_space<vmem>>, vector<3x1x128xf32>
    %439 = vector.shape_cast %438 : vector<3x1x128xf32> to vector<3x128xf32>
    %c6_i32_126 = arith.constant 6 : i32
    %440 = vector.broadcast %c6_i32_126 : i32 to vector<3x1xi32>
    %441 = arith.cmpi sgt, %1, %440 : vector<3x1xi32>
    %cst_127 = arith.constant dense<0.000000e+00> : vector<3x128xf32>
    %442 = tpu.matmul %395, %12, %cst_127 {dimension_numbers = #tpu.dot_dimension_numbers<[1], [0], [0], [1], [0, 0, 1, 1], [], []>} : vector<3x32xf32>, vector<32x128xf32>, vector<3x128xf32> -> vector<3x128xf32>
    %443 = arith.addf %439, %442 : vector<3x128xf32>
    %444 = vector.extract_strided_slice %443 {offsets = [0, 0], sizes = [3, 96], strides = [1, 1]} : vector<3x128xf32> to vector<3x96xf32>
    %445 = arith.negf %444 : vector<3x96xf32>
    %446 = math.exp %445 : vector<3x96xf32>
    %cst_128 = arith.constant 1.000000e+00 : f32
    %447 = vector.broadcast %cst_128 : f32 to vector<3x96xf32>
    %448 = arith.addf %447, %446 : vector<3x96xf32>
    %449 = arith.divf %447, %448 : vector<3x96xf32>
    %450 = vector.extract_strided_slice %443 {offsets = [0, 96], sizes = [3, 32], strides = [1, 1]} : vector<3x128xf32> to vector<3x32xf32>
    %451 = math.tanh %450 : vector<3x32xf32>
    %452 = vector.extract_strided_slice %449 {offsets = [0, 32], sizes = [3, 32], strides = [1, 1]} : vector<3x96xf32> to vector<3x32xf32>
    %453 = arith.mulf %452, %392 : vector<3x32xf32>
    %454 = vector.extract_strided_slice %449 {offsets = [0, 0], sizes = [3, 32], strides = [1, 1]} : vector<3x96xf32> to vector<3x32xf32>
    %455 = arith.mulf %454, %451 : vector<3x32xf32>
    %456 = arith.addf %453, %455 : vector<3x32xf32>
    %457 = vector.extract_strided_slice %449 {offsets = [0, 64], sizes = [3, 32], strides = [1, 1]} : vector<3x96xf32> to vector<3x32xf32>
    %458 = math.tanh %456 : vector<3x32xf32>
    %459 = arith.mulf %457, %458 : vector<3x32xf32>
    %460 = vector.shape_cast %441 : vector<3x1xi1> to vector<3x1xi1>
    %461 = vector.broadcast %460 : vector<3x1xi1> to vector<3x32xi1>
    %462 = arith.select %461, %456, %392 : vector<3x32xi1>, vector<3x32xf32>
    %463 = vector.shape_cast %441 : vector<3x1xi1> to vector<3x1xi1>
    %464 = vector.broadcast %463 : vector<3x1xi1> to vector<3x32xi1>
    %465 = arith.select %464, %459, %395 : vector<3x32xi1>, vector<3x32xf32>
    %cst_129 = arith.constant 0.000000e+00 : f32
    %466 = vector.shape_cast %441 : vector<3x1xi1> to vector<3x1xi1>
    %467 = vector.broadcast %466 : vector<3x1xi1> to vector<3x32xi1>
    %468 = vector.broadcast %cst_129 : f32 to vector<3x32xf32>
    %469 = arith.select %467, %459, %468 : vector<3x32xi1>, vector<3x32xf32>
    %c0_130 = arith.constant 0 : index
    %c1_131 = arith.constant 1 : index
    %c128_132 = arith.constant 128 : index
    %470 = vector.load %arg15[%c0_130, %c1_131, %c128_132] : memref<3x8x256xf32, #tpu.memory_space<vmem>>, vector<3x1x128xf32>
    %471 = vector.shape_cast %470 : vector<3x1x128xf32> to vector<3x128xf32>
    %c1_i32_133 = arith.constant 1 : i32
    %472 = vector.broadcast %c1_i32_133 : i32 to vector<3x1xi32>
    %473 = arith.cmpi sgt, %1, %472 : vector<3x1xi32>
    %cst_134 = arith.constant dense<0.000000e+00> : vector<3x128xf32>
    %474 = tpu.matmul %427, %13, %cst_134 {dimension_numbers = #tpu.dot_dimension_numbers<[1], [0], [0], [1], [0, 0, 1, 1], [], []>} : vector<3x32xf32>, vector<32x128xf32>, vector<3x128xf32> -> vector<3x128xf32>
    %475 = arith.addf %471, %474 : vector<3x128xf32>
    %476 = vector.extract_strided_slice %475 {offsets = [0, 0], sizes = [3, 96], strides = [1, 1]} : vector<3x128xf32> to vector<3x96xf32>
    %477 = arith.negf %476 : vector<3x96xf32>
    %478 = math.exp %477 : vector<3x96xf32>
    %cst_135 = arith.constant 1.000000e+00 : f32
    %479 = vector.broadcast %cst_135 : f32 to vector<3x96xf32>
    %480 = arith.addf %479, %478 : vector<3x96xf32>
    %481 = arith.divf %479, %480 : vector<3x96xf32>
    %482 = vector.extract_strided_slice %475 {offsets = [0, 96], sizes = [3, 32], strides = [1, 1]} : vector<3x128xf32> to vector<3x32xf32>
    %483 = math.tanh %482 : vector<3x32xf32>
    %484 = vector.extract_strided_slice %481 {offsets = [0, 32], sizes = [3, 32], strides = [1, 1]} : vector<3x96xf32> to vector<3x32xf32>
    %485 = arith.mulf %484, %424 : vector<3x32xf32>
    %486 = vector.extract_strided_slice %481 {offsets = [0, 0], sizes = [3, 32], strides = [1, 1]} : vector<3x96xf32> to vector<3x32xf32>
    %487 = arith.mulf %486, %483 : vector<3x32xf32>
    %488 = arith.addf %485, %487 : vector<3x32xf32>
    %489 = vector.extract_strided_slice %481 {offsets = [0, 64], sizes = [3, 32], strides = [1, 1]} : vector<3x96xf32> to vector<3x32xf32>
    %490 = math.tanh %488 : vector<3x32xf32>
    %491 = arith.mulf %489, %490 : vector<3x32xf32>
    %492 = vector.shape_cast %473 : vector<3x1xi1> to vector<3x1xi1>
    %493 = vector.broadcast %492 : vector<3x1xi1> to vector<3x32xi1>
    %494 = arith.select %493, %488, %424 : vector<3x32xi1>, vector<3x32xf32>
    %495 = vector.shape_cast %473 : vector<3x1xi1> to vector<3x1xi1>
    %496 = vector.broadcast %495 : vector<3x1xi1> to vector<3x32xi1>
    %497 = arith.select %496, %491, %427 : vector<3x32xi1>, vector<3x32xf32>
    %cst_136 = arith.constant 0.000000e+00 : f32
    %498 = vector.shape_cast %473 : vector<3x1xi1> to vector<3x1xi1>
    %499 = vector.broadcast %498 : vector<3x1xi1> to vector<3x32xi1>
    %500 = vector.broadcast %cst_136 : f32 to vector<3x32xf32>
    %501 = arith.select %499, %491, %500 : vector<3x32xi1>, vector<3x32xf32>
    %c0_137 = arith.constant 0 : index
    %c6_138 = arith.constant 6 : index
    %c0_139 = arith.constant 0 : index
    %502 = vector.load %arg16[%c0_137, %c6_138, %c0_139] : memref<3x8x64xf32, #tpu.memory_space<vmem>>, vector<3x1x32xf32>
    %503 = vector.shape_cast %502 : vector<3x1x32xf32> to vector<3x32xf32>
    %504 = vector.shape_cast %469 : vector<3x32xf32> to vector<3x1x32xf32>
    tpu.vector_store %arg16[%c0_137, %c6_138, %c0_139], %504 {strides = array<i32>} : memref<3x8x64xf32, #tpu.memory_space<vmem>>, vector<3x1x32xf32>,
    %c0_140 = arith.constant 0 : index
    %c1_141 = arith.constant 1 : index
    %c32_142 = arith.constant 32 : index
    %505 = vector.load %arg16[%c0_140, %c1_141, %c32_142] : memref<3x8x64xf32, #tpu.memory_space<vmem>>, vector<3x1x32xf32>
    %506 = vector.shape_cast %505 : vector<3x1x32xf32> to vector<3x32xf32>
    %507 = vector.shape_cast %501 : vector<3x32xf32> to vector<3x1x32xf32>
    tpu.vector_store %arg16[%c0_140, %c1_141, %c32_142], %507 {strides = array<i32>} : memref<3x8x64xf32, #tpu.memory_space<vmem>>, vector<3x1x32xf32>,
    %c0_143 = arith.constant 0 : index
    %c7_144 = arith.constant 7 : index
    %c0_145 = arith.constant 0 : index
    %508 = vector.load %arg15[%c0_143, %c7_144, %c0_145] : memref<3x8x256xf32, #tpu.memory_space<vmem>>, vector<3x1x128xf32>
    %509 = vector.shape_cast %508 : vector<3x1x128xf32> to vector<3x128xf32>
    %c7_i32_146 = arith.constant 7 : i32
    %510 = vector.broadcast %c7_i32_146 : i32 to vector<3x1xi32>
    %511 = arith.cmpi sgt, %1, %510 : vector<3x1xi32>
    %cst_147 = arith.constant dense<0.000000e+00> : vector<3x128xf32>
    %512 = tpu.matmul %465, %12, %cst_147 {dimension_numbers = #tpu.dot_dimension_numbers<[1], [0], [0], [1], [0, 0, 1, 1], [], []>} : vector<3x32xf32>, vector<32x128xf32>, vector<3x128xf32> -> vector<3x128xf32>
    %513 = arith.addf %509, %512 : vector<3x128xf32>
    %514 = vector.extract_strided_slice %513 {offsets = [0, 0], sizes = [3, 96], strides = [1, 1]} : vector<3x128xf32> to vector<3x96xf32>
    %515 = arith.negf %514 : vector<3x96xf32>
    %516 = math.exp %515 : vector<3x96xf32>
    %cst_148 = arith.constant 1.000000e+00 : f32
    %517 = vector.broadcast %cst_148 : f32 to vector<3x96xf32>
    %518 = arith.addf %517, %516 : vector<3x96xf32>
    %519 = arith.divf %517, %518 : vector<3x96xf32>
    %520 = vector.extract_strided_slice %513 {offsets = [0, 96], sizes = [3, 32], strides = [1, 1]} : vector<3x128xf32> to vector<3x32xf32>
    %521 = math.tanh %520 : vector<3x32xf32>
    %522 = vector.extract_strided_slice %519 {offsets = [0, 32], sizes = [3, 32], strides = [1, 1]} : vector<3x96xf32> to vector<3x32xf32>
    %523 = arith.mulf %522, %462 : vector<3x32xf32>
    %524 = vector.extract_strided_slice %519 {offsets = [0, 0], sizes = [3, 32], strides = [1, 1]} : vector<3x96xf32> to vector<3x32xf32>
    %525 = arith.mulf %524, %521 : vector<3x32xf32>
    %526 = arith.addf %523, %525 : vector<3x32xf32>
    %527 = vector.extract_strided_slice %519 {offsets = [0, 64], sizes = [3, 32], strides = [1, 1]} : vector<3x96xf32> to vector<3x32xf32>
    %528 = math.tanh %526 : vector<3x32xf32>
    %529 = arith.mulf %527, %528 : vector<3x32xf32>
    %cst_149 = arith.constant 0.000000e+00 : f32
    %530 = vector.shape_cast %511 : vector<3x1xi1> to vector<3x1xi1>
    %531 = vector.broadcast %530 : vector<3x1xi1> to vector<3x32xi1>
    %532 = vector.broadcast %cst_149 : f32 to vector<3x32xf32>
    %533 = arith.select %531, %529, %532 : vector<3x32xi1>, vector<3x32xf32>
    %c0_150 = arith.constant 0 : index
    %c0_151 = arith.constant 0 : index
    %c128_152 = arith.constant 128 : index
    %534 = vector.load %arg15[%c0_150, %c0_151, %c128_152] : memref<3x8x256xf32, #tpu.memory_space<vmem>>, vector<3x1x128xf32>
    %535 = vector.shape_cast %534 : vector<3x1x128xf32> to vector<3x128xf32>
    %c0_i32_153 = arith.constant 0 : i32
    %536 = vector.broadcast %c0_i32_153 : i32 to vector<3x1xi32>
    %537 = arith.cmpi sgt, %1, %536 : vector<3x1xi32>
    %cst_154 = arith.constant dense<0.000000e+00> : vector<3x128xf32>
    %538 = tpu.matmul %497, %13, %cst_154 {dimension_numbers = #tpu.dot_dimension_numbers<[1], [0], [0], [1], [0, 0, 1, 1], [], []>} : vector<3x32xf32>, vector<32x128xf32>, vector<3x128xf32> -> vector<3x128xf32>
    %539 = arith.addf %535, %538 : vector<3x128xf32>
    %540 = vector.extract_strided_slice %539 {offsets = [0, 0], sizes = [3, 96], strides = [1, 1]} : vector<3x128xf32> to vector<3x96xf32>
    %541 = arith.negf %540 : vector<3x96xf32>
    %542 = math.exp %541 : vector<3x96xf32>
    %cst_155 = arith.constant 1.000000e+00 : f32
    %543 = vector.broadcast %cst_155 : f32 to vector<3x96xf32>
    %544 = arith.addf %543, %542 : vector<3x96xf32>
    %545 = arith.divf %543, %544 : vector<3x96xf32>
    %546 = vector.extract_strided_slice %539 {offsets = [0, 96], sizes = [3, 32], strides = [1, 1]} : vector<3x128xf32> to vector<3x32xf32>
    %547 = math.tanh %546 : vector<3x32xf32>
    %548 = vector.extract_strided_slice %545 {offsets = [0, 32], sizes = [3, 32], strides = [1, 1]} : vector<3x96xf32> to vector<3x32xf32>
    %549 = arith.mulf %548, %494 : vector<3x32xf32>
    %550 = vector.extract_strided_slice %545 {offsets = [0, 0], sizes = [3, 32], strides = [1, 1]} : vector<3x96xf32> to vector<3x32xf32>
    %551 = arith.mulf %550, %547 : vector<3x32xf32>
    %552 = arith.addf %549, %551 : vector<3x32xf32>
    %553 = vector.extract_strided_slice %545 {offsets = [0, 64], sizes = [3, 32], strides = [1, 1]} : vector<3x96xf32> to vector<3x32xf32>
    %554 = math.tanh %552 : vector<3x32xf32>
    %555 = arith.mulf %553, %554 : vector<3x32xf32>
    %cst_156 = arith.constant 0.000000e+00 : f32
    %556 = vector.shape_cast %537 : vector<3x1xi1> to vector<3x1xi1>
    %557 = vector.broadcast %556 : vector<3x1xi1> to vector<3x32xi1>
    %558 = vector.broadcast %cst_156 : f32 to vector<3x32xf32>
    %559 = arith.select %557, %555, %558 : vector<3x32xi1>, vector<3x32xf32>
    %c0_157 = arith.constant 0 : index
    %c7_158 = arith.constant 7 : index
    %c0_159 = arith.constant 0 : index
    %560 = vector.load %arg16[%c0_157, %c7_158, %c0_159] : memref<3x8x64xf32, #tpu.memory_space<vmem>>, vector<3x1x32xf32>
    %561 = vector.shape_cast %560 : vector<3x1x32xf32> to vector<3x32xf32>
    %562 = vector.shape_cast %533 : vector<3x32xf32> to vector<3x1x32xf32>
    tpu.vector_store %arg16[%c0_157, %c7_158, %c0_159], %562 {strides = array<i32>} : memref<3x8x64xf32, #tpu.memory_space<vmem>>, vector<3x1x32xf32>,
    %c0_160 = arith.constant 0 : index
    %c0_161 = arith.constant 0 : index
    %c32_162 = arith.constant 32 : index
    %563 = vector.load %arg16[%c0_160, %c0_161, %c32_162] : memref<3x8x64xf32, #tpu.memory_space<vmem>>, vector<3x1x32xf32>
    %564 = vector.shape_cast %563 : vector<3x1x32xf32> to vector<3x32xf32>
    %565 = vector.shape_cast %559 : vector<3x32xf32> to vector<3x1x32xf32>
    tpu.vector_store %arg16[%c0_160, %c0_161, %c32_162], %565 {strides = array<i32>} : memref<3x8x64xf32, #tpu.memory_space<vmem>>, vector<3x1x32xf32>,
    %c0_163 = arith.constant 0 : index
    %c0_164 = arith.constant 0 : index
    %c0_165 = arith.constant 0 : index
    %566 = vector.load %arg16[%c0_163, %c0_164, %c0_165] : memref<3x8x64xf32, #tpu.memory_space<vmem>>, vector<3x8x64xf32>
    %567 = vector.shape_cast %566 : vector<3x8x64xf32> to vector<24x64xf32>
    %c0_166 = arith.constant 0 : index
    %c0_167 = arith.constant 0 : index
    %568 = vector.load %arg7[%c0_166, %c0_167] : memref<64x2xf32, #tpu.memory_space<vmem>>, vector<64x2xf32>
    %cst_168 = arith.constant dense<0.000000e+00> : vector<24x2xf32>
    %569 = tpu.matmul %567, %568, %cst_168 {dimension_numbers = #tpu.dot_dimension_numbers<[1], [0], [0], [1], [0, 0, 1, 1], [], []>} : vector<24x64xf32>, vector<64x2xf32>, vector<24x2xf32> -> vector<24x2xf32>
    %c0_169 = arith.constant 0 : index
    %c0_170 = arith.constant 0 : index
    %570 = vector.load %arg8[%c0_169, %c0_170] : memref<1x2xf32, #tpu.memory_space<vmem>>, vector<1x2xf32>
    %571 = vector.broadcast %570 : vector<1x2xf32> to vector<24x2xf32>
    %572 = arith.addf %569, %571 : vector<24x2xf32>
    %cst_171 = arith.constant dense<0xFF800000> : vector<24xf32>
    %573 = vector.multi_reduction <maximumf>, %572, %cst_171 [1] : vector<24x2xf32> to vector<24xf32>
    %574 = vector.shape_cast %573 : vector<24xf32> to vector<24x1xf32>
    %575 = vector.broadcast %574 : vector<24x1xf32> to vector<24x2xf32>
    %576 = arith.subf %572, %575 : vector<24x2xf32>
    %577 = math.exp %576 : vector<24x2xf32>
    %cst_172 = arith.constant dense<0.000000e+00> : vector<24xf32>
    %578 = vector.multi_reduction <add>, %577, %cst_172 [1] : vector<24x2xf32> to vector<24xf32>
    %579 = vector.shape_cast %578 : vector<24xf32> to vector<24x1xf32>
    %580 = math.log %579 : vector<24x1xf32>
    %581 = vector.broadcast %580 : vector<24x1xf32> to vector<24x2xf32>
    %582 = arith.subf %576, %581 : vector<24x2xf32>
    %583 = vector.shape_cast %582 : vector<24x2xf32> to vector<3x8x2xf32>
    %c0_173 = arith.constant 0 : index
    %c0_174 = arith.constant 0 : index
    %c0_175 = arith.constant 0 : index
    %584 = vector.load %arg13[%c0_173, %c0_174, %c0_175] : memref<3x8x2xf32, #tpu.memory_space<vmem>>, vector<3x8x2xf32>
    tpu.vector_store %arg13[%c0_173, %c0_174, %c0_175], %583 {strides = array<i32>} : memref<3x8x2xf32, #tpu.memory_space<vmem>>, vector<3x8x2xf32>,
    %585 = tpu.iota {dimensions = array<i32: 1>} : vector<3x8xi32>
    %586 = vector.broadcast %1 : vector<3x1xi32> to vector<3x8xi32>
    %587 = arith.cmpi slt, %585, %586 : vector<3x8xi32>
    %588 = arith.extui %587 : vector<3x8xi1> to vector<3x8xi32>
    %589 = arith.sitofp %588 : vector<3x8xi32> to vector<3x8xf32>
    %c0_176 = arith.constant 0 : index
    %c0_177 = arith.constant 0 : index
    %590 = vector.load %arg9[%c0_176, %c0_177] : memref<1x2xf32, #tpu.memory_space<vmem>>, vector<1x2xf32>
    %c0_178 = arith.constant 0 : index
    %c0_179 = arith.constant 0 : index
    %591 = vector.load %arg10[%c0_178, %c0_179] : memref<1x1xf32, #tpu.memory_space<vmem>>, vector<1x1xf32>
    %592 = vector.shape_cast %590 : vector<1x2xf32> to vector<1x1x2xf32>
    %593 = vector.broadcast %592 : vector<1x1x2xf32> to vector<3x8x2xf32>
    %594 = arith.mulf %583, %593 : vector<3x8x2xf32>
    %cst_180 = arith.constant dense<0.000000e+00> : vector<3x8xf32>
    %595 = vector.multi_reduction <add>, %594, %cst_180 [2] : vector<3x8x2xf32> to vector<3x8xf32>
    %596 = vector.broadcast %591 : vector<1x1xf32> to vector<3x8xf32>
    %597 = arith.addf %595, %596 : vector<3x8xf32>
    %598 = math.tanh %597 : vector<3x8xf32>
    %cst_181 = arith.constant dense<0xFF800000> : vector<3xf32>
    %599 = vector.multi_reduction <maximumf>, %598, %cst_181 [1] : vector<3x8xf32> to vector<3xf32>
    %600 = vector.shape_cast %599 : vector<3xf32> to vector<3x1xf32>
    %601 = vector.broadcast %600 : vector<3x1xf32> to vector<3x8xf32>
    %602 = arith.subf %598, %601 : vector<3x8xf32>
    %603 = math.exp %602 : vector<3x8xf32>
    %cst_182 = arith.constant dense<0.000000e+00> : vector<3xf32>
    %604 = vector.multi_reduction <add>, %603, %cst_182 [1] : vector<3x8xf32> to vector<3xf32>
    %605 = vector.shape_cast %604 : vector<3xf32> to vector<3x1xf32>
    %606 = vector.broadcast %605 : vector<3x1xf32> to vector<3x8xf32>
    %607 = arith.divf %603, %606 : vector<3x8xf32>
    %608 = arith.mulf %607, %589 : vector<3x8xf32>
    %cst_183 = arith.constant dense<0.000000e+00> : vector<3xf32>
    %609 = vector.multi_reduction <add>, %608, %cst_183 [1] : vector<3x8xf32> to vector<3xf32>
    %610 = vector.shape_cast %609 : vector<3xf32> to vector<3x1xf32>
    %cst_184 = arith.constant 9.99999968E-21 : f32
    %611 = vector.broadcast %cst_184 : f32 to vector<3x1xf32>
    %612 = arith.maximumf %610, %611 : vector<3x1xf32>
    %613 = vector.broadcast %612 : vector<3x1xf32> to vector<3x8xf32>
    %614 = arith.divf %608, %613 : vector<3x8xf32>
    %615 = vector.shape_cast %614 : vector<3x8xf32> to vector<3x8x1xf32>
    %616 = vector.broadcast %615 : vector<3x8x1xf32> to vector<3x8x64xf32>
    %617 = arith.mulf %566, %616 : vector<3x8x64xf32>
    %c0_185 = arith.constant 0 : index
    %c0_186 = arith.constant 0 : index
    %618 = vector.load %arg11[%c0_185, %c0_186] : memref<1x64xf32, #tpu.memory_space<vmem>>, vector<1x64xf32>
    %c0_187 = arith.constant 0 : index
    %c0_188 = arith.constant 0 : index
    %619 = vector.load %arg12[%c0_187, %c0_188] : memref<1x1xf32, #tpu.memory_space<vmem>>, vector<1x1xf32>
    %620 = vector.shape_cast %618 : vector<1x64xf32> to vector<1x1x64xf32>
    %621 = vector.broadcast %620 : vector<1x1x64xf32> to vector<3x8x64xf32>
    %622 = arith.mulf %617, %621 : vector<3x8x64xf32>
    %cst_189 = arith.constant dense<0.000000e+00> : vector<3x8xf32>
    %623 = vector.multi_reduction <add>, %622, %cst_189 [2] : vector<3x8x64xf32> to vector<3x8xf32>
    %624 = vector.broadcast %619 : vector<1x1xf32> to vector<3x8xf32>
    %625 = arith.addf %623, %624 : vector<3x8xf32>
    %626 = math.tanh %625 : vector<3x8xf32>
    %cst_190 = arith.constant dense<0xFF800000> : vector<3xf32>
    %627 = vector.multi_reduction <maximumf>, %626, %cst_190 [1] : vector<3x8xf32> to vector<3xf32>
    %628 = vector.shape_cast %627 : vector<3xf32> to vector<3x1xf32>
    %629 = vector.broadcast %628 : vector<3x1xf32> to vector<3x8xf32>
    %630 = arith.subf %626, %629 : vector<3x8xf32>
    %631 = math.exp %630 : vector<3x8xf32>
    %cst_191 = arith.constant dense<0.000000e+00> : vector<3xf32>
    %632 = vector.multi_reduction <add>, %631, %cst_191 [1] : vector<3x8xf32> to vector<3xf32>
    %633 = vector.shape_cast %632 : vector<3xf32> to vector<3x1xf32>
    %634 = vector.broadcast %633 : vector<3x1xf32> to vector<3x8xf32>
    %635 = arith.divf %631, %634 : vector<3x8xf32>
    %636 = arith.mulf %635, %589 : vector<3x8xf32>
    %cst_192 = arith.constant dense<0.000000e+00> : vector<3xf32>
    %637 = vector.multi_reduction <add>, %636, %cst_192 [1] : vector<3x8xf32> to vector<3xf32>
    %638 = vector.shape_cast %637 : vector<3xf32> to vector<3x1xf32>
    %cst_193 = arith.constant 9.99999968E-21 : f32
    %639 = vector.broadcast %cst_193 : f32 to vector<3x1xf32>
    %640 = arith.maximumf %638, %639 : vector<3x1xf32>
    %641 = vector.broadcast %640 : vector<3x1xf32> to vector<3x8xf32>
    %642 = arith.divf %636, %641 : vector<3x8xf32>
    %643 = vector.shape_cast %642 : vector<3x8xf32> to vector<3x8x1xf32>
    %644 = vector.broadcast %643 : vector<3x8x1xf32> to vector<3x8x64xf32>
    %645 = arith.mulf %617, %644 : vector<3x8x64xf32>
    %cst_194 = arith.constant dense<0.000000e+00> : vector<3x64xf32>
    %646 = vector.multi_reduction <add>, %645, %cst_194 [1] : vector<3x8x64xf32> to vector<3x64xf32>
    %647 = vector.shape_cast %646 : vector<3x64xf32> to vector<3x1x64xf32>
    %c0_195 = arith.constant 0 : index
    %c0_196 = arith.constant 0 : index
    %c0_197 = arith.constant 0 : index
    %648 = vector.load %arg14[%c0_195, %c0_196, %c0_197] : memref<3x1x64xf32, #tpu.memory_space<vmem>>, vector<3x1x64xf32>
    tpu.vector_store %arg14[%c0_195, %c0_196, %c0_197], %647 {strides = array<i32>} : memref<3x1x64xf32, #tpu.memory_space<vmem>>, vector<3x1x64xf32>,
    return
  }
  func.func @transform_0(%arg0: i32) -> (i32, i32, i32) {
    %c0_i32 = arith.constant 0 : i32
    %c0_i32_0 = arith.constant 0 : i32
    %c0_i32_1 = arith.constant 0 : i32
    return %arg0, %c0_i32, %c0_i32_0 : i32, i32, i32
  }
  func.func @transform_1(%arg0: i32) -> (i32, i32, i32) {
    %c0_i32 = arith.constant 0 : i32
    %c0_i32_0 = arith.constant 0 : i32
    %c0_i32_1 = arith.constant 0 : i32
    return %arg0, %c0_i32, %c0_i32_0 : i32, i32, i32
  }
  func.func @transform_2(%arg0: i32) -> (i32, i32) {
    %c0_i32 = arith.constant 0 : i32
    %c0_i32_0 = arith.constant 0 : i32
    %c0_i32_1 = arith.constant 0 : i32
    return %c0_i32, %c0_i32_0 : i32, i32
  }
  func.func @transform_3(%arg0: i32) -> (i32, i32) {
    %c0_i32 = arith.constant 0 : i32
    %c0_i32_0 = arith.constant 0 : i32
    %c0_i32_1 = arith.constant 0 : i32
    return %c0_i32, %c0_i32_0 : i32, i32
  }
  func.func @transform_4(%arg0: i32) -> (i32, i32) {
    %c0_i32 = arith.constant 0 : i32
    %c0_i32_0 = arith.constant 0 : i32
    %c0_i32_1 = arith.constant 0 : i32
    return %c0_i32, %c0_i32_0 : i32, i32
  }
  func.func @transform_5(%arg0: i32) -> (i32, i32) {
    %c0_i32 = arith.constant 0 : i32
    %c0_i32_0 = arith.constant 0 : i32
    %c0_i32_1 = arith.constant 0 : i32
    return %c0_i32, %c0_i32_0 : i32, i32
  }
  func.func @transform_6(%arg0: i32) -> (i32, i32) {
    %c0_i32 = arith.constant 0 : i32
    %c0_i32_0 = arith.constant 0 : i32
    %c0_i32_1 = arith.constant 0 : i32
    return %c0_i32, %c0_i32_0 : i32, i32
  }
  func.func @transform_7(%arg0: i32) -> (i32, i32) {
    %c0_i32 = arith.constant 0 : i32
    %c0_i32_0 = arith.constant 0 : i32
    %c0_i32_1 = arith.constant 0 : i32
    return %c0_i32, %c0_i32_0 : i32, i32
  }
  func.func @transform_8(%arg0: i32) -> (i32, i32) {
    %c0_i32 = arith.constant 0 : i32
    %c0_i32_0 = arith.constant 0 : i32
    %c0_i32_1 = arith.constant 0 : i32
    return %c0_i32, %c0_i32_0 : i32, i32
  }
  func.func @transform_9(%arg0: i32) -> (i32, i32) {
    %c0_i32 = arith.constant 0 : i32
    %c0_i32_0 = arith.constant 0 : i32
    %c0_i32_1 = arith.constant 0 : i32
    return %c0_i32, %c0_i32_0 : i32, i32
  }
  func.func @transform_10(%arg0: i32) -> (i32, i32) {
    %c0_i32 = arith.constant 0 : i32
    %c0_i32_0 = arith.constant 0 : i32
    %c0_i32_1 = arith.constant 0 : i32
    return %c0_i32, %c0_i32_0 : i32, i32
  }
  func.func @transform_11(%arg0: i32) -> (i32, i32) {
    %c0_i32 = arith.constant 0 : i32
    %c0_i32_0 = arith.constant 0 : i32
    %c0_i32_1 = arith.constant 0 : i32
    return %c0_i32, %c0_i32_0 : i32, i32
  }
  func.func @transform_12(%arg0: i32) -> (i32, i32, i32) {
    %c0_i32 = arith.constant 0 : i32
    %c0_i32_0 = arith.constant 0 : i32
    %c0_i32_1 = arith.constant 0 : i32
    return %arg0, %c0_i32, %c0_i32_0 : i32, i32, i32
  }
  func.func @transform_13(%arg0: i32) -> (i32, i32, i32) {
    %c0_i32 = arith.constant 0 : i32
    %c0_i32_0 = arith.constant 0 : i32
    %c0_i32_1 = arith.constant 0 : i32
    return %arg0, %c0_i32, %c0_i32_0 : i32, i32, i32
  }
}

module attributes {stable_mosaic.version = 11 : i64} {
  func.func @kernel(%arg0: memref<6x64xf32, #tpu.memory_space<vmem>>, %arg1: memref<2x1xi32, #tpu.memory_space<vmem>>, %arg2: memref<64x256xbf16, #tpu.memory_space<vmem>>, %arg3: memref<1x256xf32, #tpu.memory_space<vmem>>, %arg4: memref<32x128xf32, #tpu.memory_space<vmem>>, %arg5: memref<32x128xf32, #tpu.memory_space<vmem>>, %arg6: memref<1x64xf32, #tpu.memory_space<vmem>>, %arg7: memref<1x1xf32, #tpu.memory_space<vmem>>, %arg8: memref<64x2xf32, #tpu.memory_space<vmem>>, %arg9: memref<1x2xf32, #tpu.memory_space<vmem>>, %arg10: memref<2x2xf32, #tpu.memory_space<vmem>>, %arg11: memref<2x8x256xf32, #tpu.memory_space<vmem>>, %arg12: memref<2x8x64xf32, #tpu.memory_space<vmem>>, %arg13: memref<2x8x64xf32, #tpu.memory_space<vmem>>) attributes {dimension_semantics = [], scalar_prefetch = 0 : i64, scratch_operands = 3 : i64, tpu.core_type = #tpu.core_type<tc>} {
    %c0 = arith.constant 0 : index
    %c0_0 = arith.constant 0 : index
    %0 = vector.load %arg0[%c0, %c0_0] : memref<6x64xf32, #tpu.memory_space<vmem>>, vector<6x64xf32>
    %c0_1 = arith.constant 0 : index
    %c0_2 = arith.constant 0 : index
    %1 = vector.load %arg1[%c0_1, %c0_2] : memref<2x1xi32, #tpu.memory_space<vmem>>, vector<2x1xi32>
    %2 = vector.extract_strided_slice %0 {offsets = [0, 0], sizes = [4, 64], strides = [1, 1]} : vector<6x64xf32> to vector<4x64xf32>
    %cst = arith.constant 0.000000e+00 : f32
    %3 = vector.broadcast %cst : f32 to vector<4x64xf32>
    %4 = tpu.concatenate %2, %3 in 0 : vector<4x64xf32>, vector<4x64xf32> -> vector<8x64xf32>
    %5 = vector.extract_strided_slice %0 {offsets = [4, 0], sizes = [2, 64], strides = [1, 1]} : vector<6x64xf32> to vector<2x64xf32>
    %cst_3 = arith.constant 0.000000e+00 : f32
    %6 = vector.broadcast %cst_3 : f32 to vector<6x64xf32>
    %7 = tpu.concatenate %5, %6 in 0 : vector<2x64xf32>, vector<6x64xf32> -> vector<8x64xf32>
    %8 = vector.shape_cast %4 : vector<8x64xf32> to vector<1x8x64xf32>
    %9 = vector.shape_cast %7 : vector<8x64xf32> to vector<1x8x64xf32>
    %10 = tpu.concatenate %8, %9 in 0 : vector<1x8x64xf32>, vector<1x8x64xf32> -> vector<2x8x64xf32>
    %11 = vector.shape_cast %10 : vector<2x8x64xf32> to vector<16x64xf32>
    %12 = arith.truncf %11 : vector<16x64xf32> to vector<16x64xbf16>
    %c0_4 = arith.constant 0 : index
    %c0_5 = arith.constant 0 : index
    %13 = vector.load %arg2[%c0_4, %c0_5] : memref<64x256xbf16, #tpu.memory_space<vmem>>, vector<64x256xbf16>
    %cst_6 = arith.constant dense<0.000000e+00> : vector<16x256xf32>
    %14 = tpu.matmul %12, %13, %cst_6 {dimension_numbers = #tpu.dot_dimension_numbers<[1], [0], [0], [1], [0, 0, 1, 1], [], []>} : vector<16x64xbf16>, vector<64x256xbf16>, vector<16x256xf32> -> vector<16x256xf32>
    %c0_7 = arith.constant 0 : index
    %c0_8 = arith.constant 0 : index
    %15 = vector.load %arg3[%c0_7, %c0_8] : memref<1x256xf32, #tpu.memory_space<vmem>>, vector<1x256xf32>
    %16 = vector.broadcast %15 : vector<1x256xf32> to vector<16x256xf32>
    %17 = arith.addf %14, %16 : vector<16x256xf32>
    %18 = vector.shape_cast %17 : vector<16x256xf32> to vector<2x8x256xf32>
    %c0_9 = arith.constant 0 : index
    %c0_10 = arith.constant 0 : index
    %c0_11 = arith.constant 0 : index
    %19 = vector.load %arg11[%c0_9, %c0_10, %c0_11] : memref<2x8x256xf32, #tpu.memory_space<vmem>>, vector<2x8x256xf32>
    tpu.vector_store %arg11[%c0_9, %c0_10, %c0_11], %18 {strides = array<i32>} : memref<2x8x256xf32, #tpu.memory_space<vmem>>, vector<2x8x256xf32>,
    %c0_12 = arith.constant 0 : index
    %c0_13 = arith.constant 0 : index
    %20 = vector.load %arg4[%c0_12, %c0_13] : memref<32x128xf32, #tpu.memory_space<vmem>>, vector<32x128xf32>
    %c0_14 = arith.constant 0 : index
    %c0_15 = arith.constant 0 : index
    %21 = vector.load %arg5[%c0_14, %c0_15] : memref<32x128xf32, #tpu.memory_space<vmem>>, vector<32x128xf32>
    %cst_16 = arith.constant 0.000000e+00 : f32
    %22 = vector.broadcast %cst_16 : f32 to vector<2x32xf32>
    %cst_17 = arith.constant 0.000000e+00 : f32
    %23 = vector.broadcast %cst_17 : f32 to vector<2x32xf32>
    %cst_18 = arith.constant 0.000000e+00 : f32
    %24 = vector.broadcast %cst_18 : f32 to vector<2x32xf32>
    %cst_19 = arith.constant 0.000000e+00 : f32
    %25 = vector.broadcast %cst_19 : f32 to vector<2x32xf32>
    %c0_20 = arith.constant 0 : index
    %c0_21 = arith.constant 0 : index
    %c0_22 = arith.constant 0 : index
    %26 = vector.load %arg11[%c0_20, %c0_21, %c0_22] : memref<2x8x256xf32, #tpu.memory_space<vmem>>, vector<2x1x128xf32>
    %27 = vector.shape_cast %26 : vector<2x1x128xf32> to vector<2x128xf32>
    %c0_i32 = arith.constant 0 : i32
    %28 = vector.broadcast %c0_i32 : i32 to vector<2x1xi32>
    %29 = arith.cmpi sgt, %1, %28 : vector<2x1xi32>
    %cst_23 = arith.constant dense<0.000000e+00> : vector<2x128xf32>
    %30 = tpu.matmul %22, %20, %cst_23 {dimension_numbers = #tpu.dot_dimension_numbers<[1], [0], [0], [1], [0, 0, 1, 1], [], []>} : vector<2x32xf32>, vector<32x128xf32>, vector<2x128xf32> -> vector<2x128xf32>
    %31 = arith.addf %27, %30 : vector<2x128xf32>
    %32 = vector.extract_strided_slice %31 {offsets = [0, 0], sizes = [2, 96], strides = [1, 1]} : vector<2x128xf32> to vector<2x96xf32>
    %33 = arith.negf %32 : vector<2x96xf32>
    %34 = math.exp %33 : vector<2x96xf32>
    %cst_24 = arith.constant 1.000000e+00 : f32
    %35 = vector.broadcast %cst_24 : f32 to vector<2x96xf32>
    %36 = arith.addf %35, %34 : vector<2x96xf32>
    %37 = arith.divf %35, %36 : vector<2x96xf32>
    %38 = vector.extract_strided_slice %31 {offsets = [0, 96], sizes = [2, 32], strides = [1, 1]} : vector<2x128xf32> to vector<2x32xf32>
    %39 = math.tanh %38 : vector<2x32xf32>
    %40 = vector.extract_strided_slice %37 {offsets = [0, 32], sizes = [2, 32], strides = [1, 1]} : vector<2x96xf32> to vector<2x32xf32>
    %41 = arith.mulf %40, %23 : vector<2x32xf32>
    %42 = vector.extract_strided_slice %37 {offsets = [0, 0], sizes = [2, 32], strides = [1, 1]} : vector<2x96xf32> to vector<2x32xf32>
    %43 = arith.mulf %42, %39 : vector<2x32xf32>
    %44 = arith.addf %41, %43 : vector<2x32xf32>
    %45 = vector.extract_strided_slice %37 {offsets = [0, 64], sizes = [2, 32], strides = [1, 1]} : vector<2x96xf32> to vector<2x32xf32>
    %46 = math.tanh %44 : vector<2x32xf32>
    %47 = arith.mulf %45, %46 : vector<2x32xf32>
    %48 = vector.shape_cast %29 : vector<2x1xi1> to vector<2x1xi1>
    %49 = vector.broadcast %48 : vector<2x1xi1> to vector<2x32xi1>
    %50 = arith.select %49, %44, %23 : vector<2x32xi1>, vector<2x32xf32>
    %51 = vector.shape_cast %29 : vector<2x1xi1> to vector<2x1xi1>
    %52 = vector.broadcast %51 : vector<2x1xi1> to vector<2x32xi1>
    %53 = arith.select %52, %47, %22 : vector<2x32xi1>, vector<2x32xf32>
    %cst_25 = arith.constant 0.000000e+00 : f32
    %54 = vector.shape_cast %29 : vector<2x1xi1> to vector<2x1xi1>
    %55 = vector.broadcast %54 : vector<2x1xi1> to vector<2x32xi1>
    %56 = vector.broadcast %cst_25 : f32 to vector<2x32xf32>
    %57 = arith.select %55, %47, %56 : vector<2x32xi1>, vector<2x32xf32>
    %c0_26 = arith.constant 0 : index
    %c7 = arith.constant 7 : index
    %c128 = arith.constant 128 : index
    %58 = vector.load %arg11[%c0_26, %c7, %c128] : memref<2x8x256xf32, #tpu.memory_space<vmem>>, vector<2x1x128xf32>
    %59 = vector.shape_cast %58 : vector<2x1x128xf32> to vector<2x128xf32>
    %c7_i32 = arith.constant 7 : i32
    %60 = vector.broadcast %c7_i32 : i32 to vector<2x1xi32>
    %61 = arith.cmpi sgt, %1, %60 : vector<2x1xi32>
    %cst_27 = arith.constant dense<0.000000e+00> : vector<2x128xf32>
    %62 = tpu.matmul %24, %21, %cst_27 {dimension_numbers = #tpu.dot_dimension_numbers<[1], [0], [0], [1], [0, 0, 1, 1], [], []>} : vector<2x32xf32>, vector<32x128xf32>, vector<2x128xf32> -> vector<2x128xf32>
    %63 = arith.addf %59, %62 : vector<2x128xf32>
    %64 = vector.extract_strided_slice %63 {offsets = [0, 0], sizes = [2, 96], strides = [1, 1]} : vector<2x128xf32> to vector<2x96xf32>
    %65 = arith.negf %64 : vector<2x96xf32>
    %66 = math.exp %65 : vector<2x96xf32>
    %cst_28 = arith.constant 1.000000e+00 : f32
    %67 = vector.broadcast %cst_28 : f32 to vector<2x96xf32>
    %68 = arith.addf %67, %66 : vector<2x96xf32>
    %69 = arith.divf %67, %68 : vector<2x96xf32>
    %70 = vector.extract_strided_slice %63 {offsets = [0, 96], sizes = [2, 32], strides = [1, 1]} : vector<2x128xf32> to vector<2x32xf32>
    %71 = math.tanh %70 : vector<2x32xf32>
    %72 = vector.extract_strided_slice %69 {offsets = [0, 32], sizes = [2, 32], strides = [1, 1]} : vector<2x96xf32> to vector<2x32xf32>
    %73 = arith.mulf %72, %25 : vector<2x32xf32>
    %74 = vector.extract_strided_slice %69 {offsets = [0, 0], sizes = [2, 32], strides = [1, 1]} : vector<2x96xf32> to vector<2x32xf32>
    %75 = arith.mulf %74, %71 : vector<2x32xf32>
    %76 = arith.addf %73, %75 : vector<2x32xf32>
    %77 = vector.extract_strided_slice %69 {offsets = [0, 64], sizes = [2, 32], strides = [1, 1]} : vector<2x96xf32> to vector<2x32xf32>
    %78 = math.tanh %76 : vector<2x32xf32>
    %79 = arith.mulf %77, %78 : vector<2x32xf32>
    %80 = vector.shape_cast %61 : vector<2x1xi1> to vector<2x1xi1>
    %81 = vector.broadcast %80 : vector<2x1xi1> to vector<2x32xi1>
    %82 = arith.select %81, %76, %25 : vector<2x32xi1>, vector<2x32xf32>
    %83 = vector.shape_cast %61 : vector<2x1xi1> to vector<2x1xi1>
    %84 = vector.broadcast %83 : vector<2x1xi1> to vector<2x32xi1>
    %85 = arith.select %84, %79, %24 : vector<2x32xi1>, vector<2x32xf32>
    %cst_29 = arith.constant 0.000000e+00 : f32
    %86 = vector.shape_cast %61 : vector<2x1xi1> to vector<2x1xi1>
    %87 = vector.broadcast %86 : vector<2x1xi1> to vector<2x32xi1>
    %88 = vector.broadcast %cst_29 : f32 to vector<2x32xf32>
    %89 = arith.select %87, %79, %88 : vector<2x32xi1>, vector<2x32xf32>
    %c0_30 = arith.constant 0 : index
    %c0_31 = arith.constant 0 : index
    %c0_32 = arith.constant 0 : index
    %90 = vector.load %arg12[%c0_30, %c0_31, %c0_32] : memref<2x8x64xf32, #tpu.memory_space<vmem>>, vector<2x1x32xf32>
    %91 = vector.shape_cast %90 : vector<2x1x32xf32> to vector<2x32xf32>
    %92 = vector.shape_cast %57 : vector<2x32xf32> to vector<2x1x32xf32>
    tpu.vector_store %arg12[%c0_30, %c0_31, %c0_32], %92 {strides = array<i32>} : memref<2x8x64xf32, #tpu.memory_space<vmem>>, vector<2x1x32xf32>,
    %c0_33 = arith.constant 0 : index
    %c7_34 = arith.constant 7 : index
    %c32 = arith.constant 32 : index
    %93 = vector.load %arg12[%c0_33, %c7_34, %c32] : memref<2x8x64xf32, #tpu.memory_space<vmem>>, vector<2x1x32xf32>
    %94 = vector.shape_cast %93 : vector<2x1x32xf32> to vector<2x32xf32>
    %95 = vector.shape_cast %89 : vector<2x32xf32> to vector<2x1x32xf32>
    tpu.vector_store %arg12[%c0_33, %c7_34, %c32], %95 {strides = array<i32>} : memref<2x8x64xf32, #tpu.memory_space<vmem>>, vector<2x1x32xf32>,
    %c0_35 = arith.constant 0 : index
    %c1 = arith.constant 1 : index
    %c0_36 = arith.constant 0 : index
    %96 = vector.load %arg11[%c0_35, %c1, %c0_36] : memref<2x8x256xf32, #tpu.memory_space<vmem>>, vector<2x1x128xf32>
    %97 = vector.shape_cast %96 : vector<2x1x128xf32> to vector<2x128xf32>
    %c1_i32 = arith.constant 1 : i32
    %98 = vector.broadcast %c1_i32 : i32 to vector<2x1xi32>
    %99 = arith.cmpi sgt, %1, %98 : vector<2x1xi32>
    %cst_37 = arith.constant dense<0.000000e+00> : vector<2x128xf32>
    %100 = tpu.matmul %53, %20, %cst_37 {dimension_numbers = #tpu.dot_dimension_numbers<[1], [0], [0], [1], [0, 0, 1, 1], [], []>} : vector<2x32xf32>, vector<32x128xf32>, vector<2x128xf32> -> vector<2x128xf32>
    %101 = arith.addf %97, %100 : vector<2x128xf32>
    %102 = vector.extract_strided_slice %101 {offsets = [0, 0], sizes = [2, 96], strides = [1, 1]} : vector<2x128xf32> to vector<2x96xf32>
    %103 = arith.negf %102 : vector<2x96xf32>
    %104 = math.exp %103 : vector<2x96xf32>
    %cst_38 = arith.constant 1.000000e+00 : f32
    %105 = vector.broadcast %cst_38 : f32 to vector<2x96xf32>
    %106 = arith.addf %105, %104 : vector<2x96xf32>
    %107 = arith.divf %105, %106 : vector<2x96xf32>
    %108 = vector.extract_strided_slice %101 {offsets = [0, 96], sizes = [2, 32], strides = [1, 1]} : vector<2x128xf32> to vector<2x32xf32>
    %109 = math.tanh %108 : vector<2x32xf32>
    %110 = vector.extract_strided_slice %107 {offsets = [0, 32], sizes = [2, 32], strides = [1, 1]} : vector<2x96xf32> to vector<2x32xf32>
    %111 = arith.mulf %110, %50 : vector<2x32xf32>
    %112 = vector.extract_strided_slice %107 {offsets = [0, 0], sizes = [2, 32], strides = [1, 1]} : vector<2x96xf32> to vector<2x32xf32>
    %113 = arith.mulf %112, %109 : vector<2x32xf32>
    %114 = arith.addf %111, %113 : vector<2x32xf32>
    %115 = vector.extract_strided_slice %107 {offsets = [0, 64], sizes = [2, 32], strides = [1, 1]} : vector<2x96xf32> to vector<2x32xf32>
    %116 = math.tanh %114 : vector<2x32xf32>
    %117 = arith.mulf %115, %116 : vector<2x32xf32>
    %118 = vector.shape_cast %99 : vector<2x1xi1> to vector<2x1xi1>
    %119 = vector.broadcast %118 : vector<2x1xi1> to vector<2x32xi1>
    %120 = arith.select %119, %114, %50 : vector<2x32xi1>, vector<2x32xf32>
    %121 = vector.shape_cast %99 : vector<2x1xi1> to vector<2x1xi1>
    %122 = vector.broadcast %121 : vector<2x1xi1> to vector<2x32xi1>
    %123 = arith.select %122, %117, %53 : vector<2x32xi1>, vector<2x32xf32>
    %cst_39 = arith.constant 0.000000e+00 : f32
    %124 = vector.shape_cast %99 : vector<2x1xi1> to vector<2x1xi1>
    %125 = vector.broadcast %124 : vector<2x1xi1> to vector<2x32xi1>
    %126 = vector.broadcast %cst_39 : f32 to vector<2x32xf32>
    %127 = arith.select %125, %117, %126 : vector<2x32xi1>, vector<2x32xf32>
    %c0_40 = arith.constant 0 : index
    %c6 = arith.constant 6 : index
    %c128_41 = arith.constant 128 : index
    %128 = vector.load %arg11[%c0_40, %c6, %c128_41] : memref<2x8x256xf32, #tpu.memory_space<vmem>>, vector<2x1x128xf32>
    %129 = vector.shape_cast %128 : vector<2x1x128xf32> to vector<2x128xf32>
    %c6_i32 = arith.constant 6 : i32
    %130 = vector.broadcast %c6_i32 : i32 to vector<2x1xi32>
    %131 = arith.cmpi sgt, %1, %130 : vector<2x1xi32>
    %cst_42 = arith.constant dense<0.000000e+00> : vector<2x128xf32>
    %132 = tpu.matmul %85, %21, %cst_42 {dimension_numbers = #tpu.dot_dimension_numbers<[1], [0], [0], [1], [0, 0, 1, 1], [], []>} : vector<2x32xf32>, vector<32x128xf32>, vector<2x128xf32> -> vector<2x128xf32>
    %133 = arith.addf %129, %132 : vector<2x128xf32>
    %134 = vector.extract_strided_slice %133 {offsets = [0, 0], sizes = [2, 96], strides = [1, 1]} : vector<2x128xf32> to vector<2x96xf32>
    %135 = arith.negf %134 : vector<2x96xf32>
    %136 = math.exp %135 : vector<2x96xf32>
    %cst_43 = arith.constant 1.000000e+00 : f32
    %137 = vector.broadcast %cst_43 : f32 to vector<2x96xf32>
    %138 = arith.addf %137, %136 : vector<2x96xf32>
    %139 = arith.divf %137, %138 : vector<2x96xf32>
    %140 = vector.extract_strided_slice %133 {offsets = [0, 96], sizes = [2, 32], strides = [1, 1]} : vector<2x128xf32> to vector<2x32xf32>
    %141 = math.tanh %140 : vector<2x32xf32>
    %142 = vector.extract_strided_slice %139 {offsets = [0, 32], sizes = [2, 32], strides = [1, 1]} : vector<2x96xf32> to vector<2x32xf32>
    %143 = arith.mulf %142, %82 : vector<2x32xf32>
    %144 = vector.extract_strided_slice %139 {offsets = [0, 0], sizes = [2, 32], strides = [1, 1]} : vector<2x96xf32> to vector<2x32xf32>
    %145 = arith.mulf %144, %141 : vector<2x32xf32>
    %146 = arith.addf %143, %145 : vector<2x32xf32>
    %147 = vector.extract_strided_slice %139 {offsets = [0, 64], sizes = [2, 32], strides = [1, 1]} : vector<2x96xf32> to vector<2x32xf32>
    %148 = math.tanh %146 : vector<2x32xf32>
    %149 = arith.mulf %147, %148 : vector<2x32xf32>
    %150 = vector.shape_cast %131 : vector<2x1xi1> to vector<2x1xi1>
    %151 = vector.broadcast %150 : vector<2x1xi1> to vector<2x32xi1>
    %152 = arith.select %151, %146, %82 : vector<2x32xi1>, vector<2x32xf32>
    %153 = vector.shape_cast %131 : vector<2x1xi1> to vector<2x1xi1>
    %154 = vector.broadcast %153 : vector<2x1xi1> to vector<2x32xi1>
    %155 = arith.select %154, %149, %85 : vector<2x32xi1>, vector<2x32xf32>
    %cst_44 = arith.constant 0.000000e+00 : f32
    %156 = vector.shape_cast %131 : vector<2x1xi1> to vector<2x1xi1>
    %157 = vector.broadcast %156 : vector<2x1xi1> to vector<2x32xi1>
    %158 = vector.broadcast %cst_44 : f32 to vector<2x32xf32>
    %159 = arith.select %157, %149, %158 : vector<2x32xi1>, vector<2x32xf32>
    %c0_45 = arith.constant 0 : index
    %c1_46 = arith.constant 1 : index
    %c0_47 = arith.constant 0 : index
    %160 = vector.load %arg12[%c0_45, %c1_46, %c0_47] : memref<2x8x64xf32, #tpu.memory_space<vmem>>, vector<2x1x32xf32>
    %161 = vector.shape_cast %160 : vector<2x1x32xf32> to vector<2x32xf32>
    %162 = vector.shape_cast %127 : vector<2x32xf32> to vector<2x1x32xf32>
    tpu.vector_store %arg12[%c0_45, %c1_46, %c0_47], %162 {strides = array<i32>} : memref<2x8x64xf32, #tpu.memory_space<vmem>>, vector<2x1x32xf32>,
    %c0_48 = arith.constant 0 : index
    %c6_49 = arith.constant 6 : index
    %c32_50 = arith.constant 32 : index
    %163 = vector.load %arg12[%c0_48, %c6_49, %c32_50] : memref<2x8x64xf32, #tpu.memory_space<vmem>>, vector<2x1x32xf32>
    %164 = vector.shape_cast %163 : vector<2x1x32xf32> to vector<2x32xf32>
    %165 = vector.shape_cast %159 : vector<2x32xf32> to vector<2x1x32xf32>
    tpu.vector_store %arg12[%c0_48, %c6_49, %c32_50], %165 {strides = array<i32>} : memref<2x8x64xf32, #tpu.memory_space<vmem>>, vector<2x1x32xf32>,
    %c0_51 = arith.constant 0 : index
    %c2 = arith.constant 2 : index
    %c0_52 = arith.constant 0 : index
    %166 = vector.load %arg11[%c0_51, %c2, %c0_52] : memref<2x8x256xf32, #tpu.memory_space<vmem>>, vector<2x1x128xf32>
    %167 = vector.shape_cast %166 : vector<2x1x128xf32> to vector<2x128xf32>
    %c2_i32 = arith.constant 2 : i32
    %168 = vector.broadcast %c2_i32 : i32 to vector<2x1xi32>
    %169 = arith.cmpi sgt, %1, %168 : vector<2x1xi32>
    %cst_53 = arith.constant dense<0.000000e+00> : vector<2x128xf32>
    %170 = tpu.matmul %123, %20, %cst_53 {dimension_numbers = #tpu.dot_dimension_numbers<[1], [0], [0], [1], [0, 0, 1, 1], [], []>} : vector<2x32xf32>, vector<32x128xf32>, vector<2x128xf32> -> vector<2x128xf32>
    %171 = arith.addf %167, %170 : vector<2x128xf32>
    %172 = vector.extract_strided_slice %171 {offsets = [0, 0], sizes = [2, 96], strides = [1, 1]} : vector<2x128xf32> to vector<2x96xf32>
    %173 = arith.negf %172 : vector<2x96xf32>
    %174 = math.exp %173 : vector<2x96xf32>
    %cst_54 = arith.constant 1.000000e+00 : f32
    %175 = vector.broadcast %cst_54 : f32 to vector<2x96xf32>
    %176 = arith.addf %175, %174 : vector<2x96xf32>
    %177 = arith.divf %175, %176 : vector<2x96xf32>
    %178 = vector.extract_strided_slice %171 {offsets = [0, 96], sizes = [2, 32], strides = [1, 1]} : vector<2x128xf32> to vector<2x32xf32>
    %179 = math.tanh %178 : vector<2x32xf32>
    %180 = vector.extract_strided_slice %177 {offsets = [0, 32], sizes = [2, 32], strides = [1, 1]} : vector<2x96xf32> to vector<2x32xf32>
    %181 = arith.mulf %180, %120 : vector<2x32xf32>
    %182 = vector.extract_strided_slice %177 {offsets = [0, 0], sizes = [2, 32], strides = [1, 1]} : vector<2x96xf32> to vector<2x32xf32>
    %183 = arith.mulf %182, %179 : vector<2x32xf32>
    %184 = arith.addf %181, %183 : vector<2x32xf32>
    %185 = vector.extract_strided_slice %177 {offsets = [0, 64], sizes = [2, 32], strides = [1, 1]} : vector<2x96xf32> to vector<2x32xf32>
    %186 = math.tanh %184 : vector<2x32xf32>
    %187 = arith.mulf %185, %186 : vector<2x32xf32>
    %188 = vector.shape_cast %169 : vector<2x1xi1> to vector<2x1xi1>
    %189 = vector.broadcast %188 : vector<2x1xi1> to vector<2x32xi1>
    %190 = arith.select %189, %184, %120 : vector<2x32xi1>, vector<2x32xf32>
    %191 = vector.shape_cast %169 : vector<2x1xi1> to vector<2x1xi1>
    %192 = vector.broadcast %191 : vector<2x1xi1> to vector<2x32xi1>
    %193 = arith.select %192, %187, %123 : vector<2x32xi1>, vector<2x32xf32>
    %cst_55 = arith.constant 0.000000e+00 : f32
    %194 = vector.shape_cast %169 : vector<2x1xi1> to vector<2x1xi1>
    %195 = vector.broadcast %194 : vector<2x1xi1> to vector<2x32xi1>
    %196 = vector.broadcast %cst_55 : f32 to vector<2x32xf32>
    %197 = arith.select %195, %187, %196 : vector<2x32xi1>, vector<2x32xf32>
    %c0_56 = arith.constant 0 : index
    %c5 = arith.constant 5 : index
    %c128_57 = arith.constant 128 : index
    %198 = vector.load %arg11[%c0_56, %c5, %c128_57] : memref<2x8x256xf32, #tpu.memory_space<vmem>>, vector<2x1x128xf32>
    %199 = vector.shape_cast %198 : vector<2x1x128xf32> to vector<2x128xf32>
    %c5_i32 = arith.constant 5 : i32
    %200 = vector.broadcast %c5_i32 : i32 to vector<2x1xi32>
    %201 = arith.cmpi sgt, %1, %200 : vector<2x1xi32>
    %cst_58 = arith.constant dense<0.000000e+00> : vector<2x128xf32>
    %202 = tpu.matmul %155, %21, %cst_58 {dimension_numbers = #tpu.dot_dimension_numbers<[1], [0], [0], [1], [0, 0, 1, 1], [], []>} : vector<2x32xf32>, vector<32x128xf32>, vector<2x128xf32> -> vector<2x128xf32>
    %203 = arith.addf %199, %202 : vector<2x128xf32>
    %204 = vector.extract_strided_slice %203 {offsets = [0, 0], sizes = [2, 96], strides = [1, 1]} : vector<2x128xf32> to vector<2x96xf32>
    %205 = arith.negf %204 : vector<2x96xf32>
    %206 = math.exp %205 : vector<2x96xf32>
    %cst_59 = arith.constant 1.000000e+00 : f32
    %207 = vector.broadcast %cst_59 : f32 to vector<2x96xf32>
    %208 = arith.addf %207, %206 : vector<2x96xf32>
    %209 = arith.divf %207, %208 : vector<2x96xf32>
    %210 = vector.extract_strided_slice %203 {offsets = [0, 96], sizes = [2, 32], strides = [1, 1]} : vector<2x128xf32> to vector<2x32xf32>
    %211 = math.tanh %210 : vector<2x32xf32>
    %212 = vector.extract_strided_slice %209 {offsets = [0, 32], sizes = [2, 32], strides = [1, 1]} : vector<2x96xf32> to vector<2x32xf32>
    %213 = arith.mulf %212, %152 : vector<2x32xf32>
    %214 = vector.extract_strided_slice %209 {offsets = [0, 0], sizes = [2, 32], strides = [1, 1]} : vector<2x96xf32> to vector<2x32xf32>
    %215 = arith.mulf %214, %211 : vector<2x32xf32>
    %216 = arith.addf %213, %215 : vector<2x32xf32>
    %217 = vector.extract_strided_slice %209 {offsets = [0, 64], sizes = [2, 32], strides = [1, 1]} : vector<2x96xf32> to vector<2x32xf32>
    %218 = math.tanh %216 : vector<2x32xf32>
    %219 = arith.mulf %217, %218 : vector<2x32xf32>
    %220 = vector.shape_cast %201 : vector<2x1xi1> to vector<2x1xi1>
    %221 = vector.broadcast %220 : vector<2x1xi1> to vector<2x32xi1>
    %222 = arith.select %221, %216, %152 : vector<2x32xi1>, vector<2x32xf32>
    %223 = vector.shape_cast %201 : vector<2x1xi1> to vector<2x1xi1>
    %224 = vector.broadcast %223 : vector<2x1xi1> to vector<2x32xi1>
    %225 = arith.select %224, %219, %155 : vector<2x32xi1>, vector<2x32xf32>
    %cst_60 = arith.constant 0.000000e+00 : f32
    %226 = vector.shape_cast %201 : vector<2x1xi1> to vector<2x1xi1>
    %227 = vector.broadcast %226 : vector<2x1xi1> to vector<2x32xi1>
    %228 = vector.broadcast %cst_60 : f32 to vector<2x32xf32>
    %229 = arith.select %227, %219, %228 : vector<2x32xi1>, vector<2x32xf32>
    %c0_61 = arith.constant 0 : index
    %c2_62 = arith.constant 2 : index
    %c0_63 = arith.constant 0 : index
    %230 = vector.load %arg12[%c0_61, %c2_62, %c0_63] : memref<2x8x64xf32, #tpu.memory_space<vmem>>, vector<2x1x32xf32>
    %231 = vector.shape_cast %230 : vector<2x1x32xf32> to vector<2x32xf32>
    %232 = vector.shape_cast %197 : vector<2x32xf32> to vector<2x1x32xf32>
    tpu.vector_store %arg12[%c0_61, %c2_62, %c0_63], %232 {strides = array<i32>} : memref<2x8x64xf32, #tpu.memory_space<vmem>>, vector<2x1x32xf32>,
    %c0_64 = arith.constant 0 : index
    %c5_65 = arith.constant 5 : index
    %c32_66 = arith.constant 32 : index
    %233 = vector.load %arg12[%c0_64, %c5_65, %c32_66] : memref<2x8x64xf32, #tpu.memory_space<vmem>>, vector<2x1x32xf32>
    %234 = vector.shape_cast %233 : vector<2x1x32xf32> to vector<2x32xf32>
    %235 = vector.shape_cast %229 : vector<2x32xf32> to vector<2x1x32xf32>
    tpu.vector_store %arg12[%c0_64, %c5_65, %c32_66], %235 {strides = array<i32>} : memref<2x8x64xf32, #tpu.memory_space<vmem>>, vector<2x1x32xf32>,
    %c0_67 = arith.constant 0 : index
    %c3 = arith.constant 3 : index
    %c0_68 = arith.constant 0 : index
    %236 = vector.load %arg11[%c0_67, %c3, %c0_68] : memref<2x8x256xf32, #tpu.memory_space<vmem>>, vector<2x1x128xf32>
    %237 = vector.shape_cast %236 : vector<2x1x128xf32> to vector<2x128xf32>
    %c3_i32 = arith.constant 3 : i32
    %238 = vector.broadcast %c3_i32 : i32 to vector<2x1xi32>
    %239 = arith.cmpi sgt, %1, %238 : vector<2x1xi32>
    %cst_69 = arith.constant dense<0.000000e+00> : vector<2x128xf32>
    %240 = tpu.matmul %193, %20, %cst_69 {dimension_numbers = #tpu.dot_dimension_numbers<[1], [0], [0], [1], [0, 0, 1, 1], [], []>} : vector<2x32xf32>, vector<32x128xf32>, vector<2x128xf32> -> vector<2x128xf32>
    %241 = arith.addf %237, %240 : vector<2x128xf32>
    %242 = vector.extract_strided_slice %241 {offsets = [0, 0], sizes = [2, 96], strides = [1, 1]} : vector<2x128xf32> to vector<2x96xf32>
    %243 = arith.negf %242 : vector<2x96xf32>
    %244 = math.exp %243 : vector<2x96xf32>
    %cst_70 = arith.constant 1.000000e+00 : f32
    %245 = vector.broadcast %cst_70 : f32 to vector<2x96xf32>
    %246 = arith.addf %245, %244 : vector<2x96xf32>
    %247 = arith.divf %245, %246 : vector<2x96xf32>
    %248 = vector.extract_strided_slice %241 {offsets = [0, 96], sizes = [2, 32], strides = [1, 1]} : vector<2x128xf32> to vector<2x32xf32>
    %249 = math.tanh %248 : vector<2x32xf32>
    %250 = vector.extract_strided_slice %247 {offsets = [0, 32], sizes = [2, 32], strides = [1, 1]} : vector<2x96xf32> to vector<2x32xf32>
    %251 = arith.mulf %250, %190 : vector<2x32xf32>
    %252 = vector.extract_strided_slice %247 {offsets = [0, 0], sizes = [2, 32], strides = [1, 1]} : vector<2x96xf32> to vector<2x32xf32>
    %253 = arith.mulf %252, %249 : vector<2x32xf32>
    %254 = arith.addf %251, %253 : vector<2x32xf32>
    %255 = vector.extract_strided_slice %247 {offsets = [0, 64], sizes = [2, 32], strides = [1, 1]} : vector<2x96xf32> to vector<2x32xf32>
    %256 = math.tanh %254 : vector<2x32xf32>
    %257 = arith.mulf %255, %256 : vector<2x32xf32>
    %258 = vector.shape_cast %239 : vector<2x1xi1> to vector<2x1xi1>
    %259 = vector.broadcast %258 : vector<2x1xi1> to vector<2x32xi1>
    %260 = arith.select %259, %254, %190 : vector<2x32xi1>, vector<2x32xf32>
    %261 = vector.shape_cast %239 : vector<2x1xi1> to vector<2x1xi1>
    %262 = vector.broadcast %261 : vector<2x1xi1> to vector<2x32xi1>
    %263 = arith.select %262, %257, %193 : vector<2x32xi1>, vector<2x32xf32>
    %cst_71 = arith.constant 0.000000e+00 : f32
    %264 = vector.shape_cast %239 : vector<2x1xi1> to vector<2x1xi1>
    %265 = vector.broadcast %264 : vector<2x1xi1> to vector<2x32xi1>
    %266 = vector.broadcast %cst_71 : f32 to vector<2x32xf32>
    %267 = arith.select %265, %257, %266 : vector<2x32xi1>, vector<2x32xf32>
    %c0_72 = arith.constant 0 : index
    %c4 = arith.constant 4 : index
    %c128_73 = arith.constant 128 : index
    %268 = vector.load %arg11[%c0_72, %c4, %c128_73] : memref<2x8x256xf32, #tpu.memory_space<vmem>>, vector<2x1x128xf32>
    %269 = vector.shape_cast %268 : vector<2x1x128xf32> to vector<2x128xf32>
    %c4_i32 = arith.constant 4 : i32
    %270 = vector.broadcast %c4_i32 : i32 to vector<2x1xi32>
    %271 = arith.cmpi sgt, %1, %270 : vector<2x1xi32>
    %cst_74 = arith.constant dense<0.000000e+00> : vector<2x128xf32>
    %272 = tpu.matmul %225, %21, %cst_74 {dimension_numbers = #tpu.dot_dimension_numbers<[1], [0], [0], [1], [0, 0, 1, 1], [], []>} : vector<2x32xf32>, vector<32x128xf32>, vector<2x128xf32> -> vector<2x128xf32>
    %273 = arith.addf %269, %272 : vector<2x128xf32>
    %274 = vector.extract_strided_slice %273 {offsets = [0, 0], sizes = [2, 96], strides = [1, 1]} : vector<2x128xf32> to vector<2x96xf32>
    %275 = arith.negf %274 : vector<2x96xf32>
    %276 = math.exp %275 : vector<2x96xf32>
    %cst_75 = arith.constant 1.000000e+00 : f32
    %277 = vector.broadcast %cst_75 : f32 to vector<2x96xf32>
    %278 = arith.addf %277, %276 : vector<2x96xf32>
    %279 = arith.divf %277, %278 : vector<2x96xf32>
    %280 = vector.extract_strided_slice %273 {offsets = [0, 96], sizes = [2, 32], strides = [1, 1]} : vector<2x128xf32> to vector<2x32xf32>
    %281 = math.tanh %280 : vector<2x32xf32>
    %282 = vector.extract_strided_slice %279 {offsets = [0, 32], sizes = [2, 32], strides = [1, 1]} : vector<2x96xf32> to vector<2x32xf32>
    %283 = arith.mulf %282, %222 : vector<2x32xf32>
    %284 = vector.extract_strided_slice %279 {offsets = [0, 0], sizes = [2, 32], strides = [1, 1]} : vector<2x96xf32> to vector<2x32xf32>
    %285 = arith.mulf %284, %281 : vector<2x32xf32>
    %286 = arith.addf %283, %285 : vector<2x32xf32>
    %287 = vector.extract_strided_slice %279 {offsets = [0, 64], sizes = [2, 32], strides = [1, 1]} : vector<2x96xf32> to vector<2x32xf32>
    %288 = math.tanh %286 : vector<2x32xf32>
    %289 = arith.mulf %287, %288 : vector<2x32xf32>
    %290 = vector.shape_cast %271 : vector<2x1xi1> to vector<2x1xi1>
    %291 = vector.broadcast %290 : vector<2x1xi1> to vector<2x32xi1>
    %292 = arith.select %291, %286, %222 : vector<2x32xi1>, vector<2x32xf32>
    %293 = vector.shape_cast %271 : vector<2x1xi1> to vector<2x1xi1>
    %294 = vector.broadcast %293 : vector<2x1xi1> to vector<2x32xi1>
    %295 = arith.select %294, %289, %225 : vector<2x32xi1>, vector<2x32xf32>
    %cst_76 = arith.constant 0.000000e+00 : f32
    %296 = vector.shape_cast %271 : vector<2x1xi1> to vector<2x1xi1>
    %297 = vector.broadcast %296 : vector<2x1xi1> to vector<2x32xi1>
    %298 = vector.broadcast %cst_76 : f32 to vector<2x32xf32>
    %299 = arith.select %297, %289, %298 : vector<2x32xi1>, vector<2x32xf32>
    %c0_77 = arith.constant 0 : index
    %c3_78 = arith.constant 3 : index
    %c0_79 = arith.constant 0 : index
    %300 = vector.load %arg12[%c0_77, %c3_78, %c0_79] : memref<2x8x64xf32, #tpu.memory_space<vmem>>, vector<2x1x32xf32>
    %301 = vector.shape_cast %300 : vector<2x1x32xf32> to vector<2x32xf32>
    %302 = vector.shape_cast %267 : vector<2x32xf32> to vector<2x1x32xf32>
    tpu.vector_store %arg12[%c0_77, %c3_78, %c0_79], %302 {strides = array<i32>} : memref<2x8x64xf32, #tpu.memory_space<vmem>>, vector<2x1x32xf32>,
    %c0_80 = arith.constant 0 : index
    %c4_81 = arith.constant 4 : index
    %c32_82 = arith.constant 32 : index
    %303 = vector.load %arg12[%c0_80, %c4_81, %c32_82] : memref<2x8x64xf32, #tpu.memory_space<vmem>>, vector<2x1x32xf32>
    %304 = vector.shape_cast %303 : vector<2x1x32xf32> to vector<2x32xf32>
    %305 = vector.shape_cast %299 : vector<2x32xf32> to vector<2x1x32xf32>
    tpu.vector_store %arg12[%c0_80, %c4_81, %c32_82], %305 {strides = array<i32>} : memref<2x8x64xf32, #tpu.memory_space<vmem>>, vector<2x1x32xf32>,
    %c0_83 = arith.constant 0 : index
    %c4_84 = arith.constant 4 : index
    %c0_85 = arith.constant 0 : index
    %306 = vector.load %arg11[%c0_83, %c4_84, %c0_85] : memref<2x8x256xf32, #tpu.memory_space<vmem>>, vector<2x1x128xf32>
    %307 = vector.shape_cast %306 : vector<2x1x128xf32> to vector<2x128xf32>
    %c4_i32_86 = arith.constant 4 : i32
    %308 = vector.broadcast %c4_i32_86 : i32 to vector<2x1xi32>
    %309 = arith.cmpi sgt, %1, %308 : vector<2x1xi32>
    %cst_87 = arith.constant dense<0.000000e+00> : vector<2x128xf32>
    %310 = tpu.matmul %263, %20, %cst_87 {dimension_numbers = #tpu.dot_dimension_numbers<[1], [0], [0], [1], [0, 0, 1, 1], [], []>} : vector<2x32xf32>, vector<32x128xf32>, vector<2x128xf32> -> vector<2x128xf32>
    %311 = arith.addf %307, %310 : vector<2x128xf32>
    %312 = vector.extract_strided_slice %311 {offsets = [0, 0], sizes = [2, 96], strides = [1, 1]} : vector<2x128xf32> to vector<2x96xf32>
    %313 = arith.negf %312 : vector<2x96xf32>
    %314 = math.exp %313 : vector<2x96xf32>
    %cst_88 = arith.constant 1.000000e+00 : f32
    %315 = vector.broadcast %cst_88 : f32 to vector<2x96xf32>
    %316 = arith.addf %315, %314 : vector<2x96xf32>
    %317 = arith.divf %315, %316 : vector<2x96xf32>
    %318 = vector.extract_strided_slice %311 {offsets = [0, 96], sizes = [2, 32], strides = [1, 1]} : vector<2x128xf32> to vector<2x32xf32>
    %319 = math.tanh %318 : vector<2x32xf32>
    %320 = vector.extract_strided_slice %317 {offsets = [0, 32], sizes = [2, 32], strides = [1, 1]} : vector<2x96xf32> to vector<2x32xf32>
    %321 = arith.mulf %320, %260 : vector<2x32xf32>
    %322 = vector.extract_strided_slice %317 {offsets = [0, 0], sizes = [2, 32], strides = [1, 1]} : vector<2x96xf32> to vector<2x32xf32>
    %323 = arith.mulf %322, %319 : vector<2x32xf32>
    %324 = arith.addf %321, %323 : vector<2x32xf32>
    %325 = vector.extract_strided_slice %317 {offsets = [0, 64], sizes = [2, 32], strides = [1, 1]} : vector<2x96xf32> to vector<2x32xf32>
    %326 = math.tanh %324 : vector<2x32xf32>
    %327 = arith.mulf %325, %326 : vector<2x32xf32>
    %328 = vector.shape_cast %309 : vector<2x1xi1> to vector<2x1xi1>
    %329 = vector.broadcast %328 : vector<2x1xi1> to vector<2x32xi1>
    %330 = arith.select %329, %324, %260 : vector<2x32xi1>, vector<2x32xf32>
    %331 = vector.shape_cast %309 : vector<2x1xi1> to vector<2x1xi1>
    %332 = vector.broadcast %331 : vector<2x1xi1> to vector<2x32xi1>
    %333 = arith.select %332, %327, %263 : vector<2x32xi1>, vector<2x32xf32>
    %cst_89 = arith.constant 0.000000e+00 : f32
    %334 = vector.shape_cast %309 : vector<2x1xi1> to vector<2x1xi1>
    %335 = vector.broadcast %334 : vector<2x1xi1> to vector<2x32xi1>
    %336 = vector.broadcast %cst_89 : f32 to vector<2x32xf32>
    %337 = arith.select %335, %327, %336 : vector<2x32xi1>, vector<2x32xf32>
    %c0_90 = arith.constant 0 : index
    %c3_91 = arith.constant 3 : index
    %c128_92 = arith.constant 128 : index
    %338 = vector.load %arg11[%c0_90, %c3_91, %c128_92] : memref<2x8x256xf32, #tpu.memory_space<vmem>>, vector<2x1x128xf32>
    %339 = vector.shape_cast %338 : vector<2x1x128xf32> to vector<2x128xf32>
    %c3_i32_93 = arith.constant 3 : i32
    %340 = vector.broadcast %c3_i32_93 : i32 to vector<2x1xi32>
    %341 = arith.cmpi sgt, %1, %340 : vector<2x1xi32>
    %cst_94 = arith.constant dense<0.000000e+00> : vector<2x128xf32>
    %342 = tpu.matmul %295, %21, %cst_94 {dimension_numbers = #tpu.dot_dimension_numbers<[1], [0], [0], [1], [0, 0, 1, 1], [], []>} : vector<2x32xf32>, vector<32x128xf32>, vector<2x128xf32> -> vector<2x128xf32>
    %343 = arith.addf %339, %342 : vector<2x128xf32>
    %344 = vector.extract_strided_slice %343 {offsets = [0, 0], sizes = [2, 96], strides = [1, 1]} : vector<2x128xf32> to vector<2x96xf32>
    %345 = arith.negf %344 : vector<2x96xf32>
    %346 = math.exp %345 : vector<2x96xf32>
    %cst_95 = arith.constant 1.000000e+00 : f32
    %347 = vector.broadcast %cst_95 : f32 to vector<2x96xf32>
    %348 = arith.addf %347, %346 : vector<2x96xf32>
    %349 = arith.divf %347, %348 : vector<2x96xf32>
    %350 = vector.extract_strided_slice %343 {offsets = [0, 96], sizes = [2, 32], strides = [1, 1]} : vector<2x128xf32> to vector<2x32xf32>
    %351 = math.tanh %350 : vector<2x32xf32>
    %352 = vector.extract_strided_slice %349 {offsets = [0, 32], sizes = [2, 32], strides = [1, 1]} : vector<2x96xf32> to vector<2x32xf32>
    %353 = arith.mulf %352, %292 : vector<2x32xf32>
    %354 = vector.extract_strided_slice %349 {offsets = [0, 0], sizes = [2, 32], strides = [1, 1]} : vector<2x96xf32> to vector<2x32xf32>
    %355 = arith.mulf %354, %351 : vector<2x32xf32>
    %356 = arith.addf %353, %355 : vector<2x32xf32>
    %357 = vector.extract_strided_slice %349 {offsets = [0, 64], sizes = [2, 32], strides = [1, 1]} : vector<2x96xf32> to vector<2x32xf32>
    %358 = math.tanh %356 : vector<2x32xf32>
    %359 = arith.mulf %357, %358 : vector<2x32xf32>
    %360 = vector.shape_cast %341 : vector<2x1xi1> to vector<2x1xi1>
    %361 = vector.broadcast %360 : vector<2x1xi1> to vector<2x32xi1>
    %362 = arith.select %361, %356, %292 : vector<2x32xi1>, vector<2x32xf32>
    %363 = vector.shape_cast %341 : vector<2x1xi1> to vector<2x1xi1>
    %364 = vector.broadcast %363 : vector<2x1xi1> to vector<2x32xi1>
    %365 = arith.select %364, %359, %295 : vector<2x32xi1>, vector<2x32xf32>
    %cst_96 = arith.constant 0.000000e+00 : f32
    %366 = vector.shape_cast %341 : vector<2x1xi1> to vector<2x1xi1>
    %367 = vector.broadcast %366 : vector<2x1xi1> to vector<2x32xi1>
    %368 = vector.broadcast %cst_96 : f32 to vector<2x32xf32>
    %369 = arith.select %367, %359, %368 : vector<2x32xi1>, vector<2x32xf32>
    %c0_97 = arith.constant 0 : index
    %c4_98 = arith.constant 4 : index
    %c0_99 = arith.constant 0 : index
    %370 = vector.load %arg12[%c0_97, %c4_98, %c0_99] : memref<2x8x64xf32, #tpu.memory_space<vmem>>, vector<2x1x32xf32>
    %371 = vector.shape_cast %370 : vector<2x1x32xf32> to vector<2x32xf32>
    %372 = vector.shape_cast %337 : vector<2x32xf32> to vector<2x1x32xf32>
    tpu.vector_store %arg12[%c0_97, %c4_98, %c0_99], %372 {strides = array<i32>} : memref<2x8x64xf32, #tpu.memory_space<vmem>>, vector<2x1x32xf32>,
    %c0_100 = arith.constant 0 : index
    %c3_101 = arith.constant 3 : index
    %c32_102 = arith.constant 32 : index
    %373 = vector.load %arg12[%c0_100, %c3_101, %c32_102] : memref<2x8x64xf32, #tpu.memory_space<vmem>>, vector<2x1x32xf32>
    %374 = vector.shape_cast %373 : vector<2x1x32xf32> to vector<2x32xf32>
    %375 = vector.shape_cast %369 : vector<2x32xf32> to vector<2x1x32xf32>
    tpu.vector_store %arg12[%c0_100, %c3_101, %c32_102], %375 {strides = array<i32>} : memref<2x8x64xf32, #tpu.memory_space<vmem>>, vector<2x1x32xf32>,
    %c0_103 = arith.constant 0 : index
    %c5_104 = arith.constant 5 : index
    %c0_105 = arith.constant 0 : index
    %376 = vector.load %arg11[%c0_103, %c5_104, %c0_105] : memref<2x8x256xf32, #tpu.memory_space<vmem>>, vector<2x1x128xf32>
    %377 = vector.shape_cast %376 : vector<2x1x128xf32> to vector<2x128xf32>
    %c5_i32_106 = arith.constant 5 : i32
    %378 = vector.broadcast %c5_i32_106 : i32 to vector<2x1xi32>
    %379 = arith.cmpi sgt, %1, %378 : vector<2x1xi32>
    %cst_107 = arith.constant dense<0.000000e+00> : vector<2x128xf32>
    %380 = tpu.matmul %333, %20, %cst_107 {dimension_numbers = #tpu.dot_dimension_numbers<[1], [0], [0], [1], [0, 0, 1, 1], [], []>} : vector<2x32xf32>, vector<32x128xf32>, vector<2x128xf32> -> vector<2x128xf32>
    %381 = arith.addf %377, %380 : vector<2x128xf32>
    %382 = vector.extract_strided_slice %381 {offsets = [0, 0], sizes = [2, 96], strides = [1, 1]} : vector<2x128xf32> to vector<2x96xf32>
    %383 = arith.negf %382 : vector<2x96xf32>
    %384 = math.exp %383 : vector<2x96xf32>
    %cst_108 = arith.constant 1.000000e+00 : f32
    %385 = vector.broadcast %cst_108 : f32 to vector<2x96xf32>
    %386 = arith.addf %385, %384 : vector<2x96xf32>
    %387 = arith.divf %385, %386 : vector<2x96xf32>
    %388 = vector.extract_strided_slice %381 {offsets = [0, 96], sizes = [2, 32], strides = [1, 1]} : vector<2x128xf32> to vector<2x32xf32>
    %389 = math.tanh %388 : vector<2x32xf32>
    %390 = vector.extract_strided_slice %387 {offsets = [0, 32], sizes = [2, 32], strides = [1, 1]} : vector<2x96xf32> to vector<2x32xf32>
    %391 = arith.mulf %390, %330 : vector<2x32xf32>
    %392 = vector.extract_strided_slice %387 {offsets = [0, 0], sizes = [2, 32], strides = [1, 1]} : vector<2x96xf32> to vector<2x32xf32>
    %393 = arith.mulf %392, %389 : vector<2x32xf32>
    %394 = arith.addf %391, %393 : vector<2x32xf32>
    %395 = vector.extract_strided_slice %387 {offsets = [0, 64], sizes = [2, 32], strides = [1, 1]} : vector<2x96xf32> to vector<2x32xf32>
    %396 = math.tanh %394 : vector<2x32xf32>
    %397 = arith.mulf %395, %396 : vector<2x32xf32>
    %398 = vector.shape_cast %379 : vector<2x1xi1> to vector<2x1xi1>
    %399 = vector.broadcast %398 : vector<2x1xi1> to vector<2x32xi1>
    %400 = arith.select %399, %394, %330 : vector<2x32xi1>, vector<2x32xf32>
    %401 = vector.shape_cast %379 : vector<2x1xi1> to vector<2x1xi1>
    %402 = vector.broadcast %401 : vector<2x1xi1> to vector<2x32xi1>
    %403 = arith.select %402, %397, %333 : vector<2x32xi1>, vector<2x32xf32>
    %cst_109 = arith.constant 0.000000e+00 : f32
    %404 = vector.shape_cast %379 : vector<2x1xi1> to vector<2x1xi1>
    %405 = vector.broadcast %404 : vector<2x1xi1> to vector<2x32xi1>
    %406 = vector.broadcast %cst_109 : f32 to vector<2x32xf32>
    %407 = arith.select %405, %397, %406 : vector<2x32xi1>, vector<2x32xf32>
    %c0_110 = arith.constant 0 : index
    %c2_111 = arith.constant 2 : index
    %c128_112 = arith.constant 128 : index
    %408 = vector.load %arg11[%c0_110, %c2_111, %c128_112] : memref<2x8x256xf32, #tpu.memory_space<vmem>>, vector<2x1x128xf32>
    %409 = vector.shape_cast %408 : vector<2x1x128xf32> to vector<2x128xf32>
    %c2_i32_113 = arith.constant 2 : i32
    %410 = vector.broadcast %c2_i32_113 : i32 to vector<2x1xi32>
    %411 = arith.cmpi sgt, %1, %410 : vector<2x1xi32>
    %cst_114 = arith.constant dense<0.000000e+00> : vector<2x128xf32>
    %412 = tpu.matmul %365, %21, %cst_114 {dimension_numbers = #tpu.dot_dimension_numbers<[1], [0], [0], [1], [0, 0, 1, 1], [], []>} : vector<2x32xf32>, vector<32x128xf32>, vector<2x128xf32> -> vector<2x128xf32>
    %413 = arith.addf %409, %412 : vector<2x128xf32>
    %414 = vector.extract_strided_slice %413 {offsets = [0, 0], sizes = [2, 96], strides = [1, 1]} : vector<2x128xf32> to vector<2x96xf32>
    %415 = arith.negf %414 : vector<2x96xf32>
    %416 = math.exp %415 : vector<2x96xf32>
    %cst_115 = arith.constant 1.000000e+00 : f32
    %417 = vector.broadcast %cst_115 : f32 to vector<2x96xf32>
    %418 = arith.addf %417, %416 : vector<2x96xf32>
    %419 = arith.divf %417, %418 : vector<2x96xf32>
    %420 = vector.extract_strided_slice %413 {offsets = [0, 96], sizes = [2, 32], strides = [1, 1]} : vector<2x128xf32> to vector<2x32xf32>
    %421 = math.tanh %420 : vector<2x32xf32>
    %422 = vector.extract_strided_slice %419 {offsets = [0, 32], sizes = [2, 32], strides = [1, 1]} : vector<2x96xf32> to vector<2x32xf32>
    %423 = arith.mulf %422, %362 : vector<2x32xf32>
    %424 = vector.extract_strided_slice %419 {offsets = [0, 0], sizes = [2, 32], strides = [1, 1]} : vector<2x96xf32> to vector<2x32xf32>
    %425 = arith.mulf %424, %421 : vector<2x32xf32>
    %426 = arith.addf %423, %425 : vector<2x32xf32>
    %427 = vector.extract_strided_slice %419 {offsets = [0, 64], sizes = [2, 32], strides = [1, 1]} : vector<2x96xf32> to vector<2x32xf32>
    %428 = math.tanh %426 : vector<2x32xf32>
    %429 = arith.mulf %427, %428 : vector<2x32xf32>
    %430 = vector.shape_cast %411 : vector<2x1xi1> to vector<2x1xi1>
    %431 = vector.broadcast %430 : vector<2x1xi1> to vector<2x32xi1>
    %432 = arith.select %431, %426, %362 : vector<2x32xi1>, vector<2x32xf32>
    %433 = vector.shape_cast %411 : vector<2x1xi1> to vector<2x1xi1>
    %434 = vector.broadcast %433 : vector<2x1xi1> to vector<2x32xi1>
    %435 = arith.select %434, %429, %365 : vector<2x32xi1>, vector<2x32xf32>
    %cst_116 = arith.constant 0.000000e+00 : f32
    %436 = vector.shape_cast %411 : vector<2x1xi1> to vector<2x1xi1>
    %437 = vector.broadcast %436 : vector<2x1xi1> to vector<2x32xi1>
    %438 = vector.broadcast %cst_116 : f32 to vector<2x32xf32>
    %439 = arith.select %437, %429, %438 : vector<2x32xi1>, vector<2x32xf32>
    %c0_117 = arith.constant 0 : index
    %c5_118 = arith.constant 5 : index
    %c0_119 = arith.constant 0 : index
    %440 = vector.load %arg12[%c0_117, %c5_118, %c0_119] : memref<2x8x64xf32, #tpu.memory_space<vmem>>, vector<2x1x32xf32>
    %441 = vector.shape_cast %440 : vector<2x1x32xf32> to vector<2x32xf32>
    %442 = vector.shape_cast %407 : vector<2x32xf32> to vector<2x1x32xf32>
    tpu.vector_store %arg12[%c0_117, %c5_118, %c0_119], %442 {strides = array<i32>} : memref<2x8x64xf32, #tpu.memory_space<vmem>>, vector<2x1x32xf32>,
    %c0_120 = arith.constant 0 : index
    %c2_121 = arith.constant 2 : index
    %c32_122 = arith.constant 32 : index
    %443 = vector.load %arg12[%c0_120, %c2_121, %c32_122] : memref<2x8x64xf32, #tpu.memory_space<vmem>>, vector<2x1x32xf32>
    %444 = vector.shape_cast %443 : vector<2x1x32xf32> to vector<2x32xf32>
    %445 = vector.shape_cast %439 : vector<2x32xf32> to vector<2x1x32xf32>
    tpu.vector_store %arg12[%c0_120, %c2_121, %c32_122], %445 {strides = array<i32>} : memref<2x8x64xf32, #tpu.memory_space<vmem>>, vector<2x1x32xf32>,
    %c0_123 = arith.constant 0 : index
    %c6_124 = arith.constant 6 : index
    %c0_125 = arith.constant 0 : index
    %446 = vector.load %arg11[%c0_123, %c6_124, %c0_125] : memref<2x8x256xf32, #tpu.memory_space<vmem>>, vector<2x1x128xf32>
    %447 = vector.shape_cast %446 : vector<2x1x128xf32> to vector<2x128xf32>
    %c6_i32_126 = arith.constant 6 : i32
    %448 = vector.broadcast %c6_i32_126 : i32 to vector<2x1xi32>
    %449 = arith.cmpi sgt, %1, %448 : vector<2x1xi32>
    %cst_127 = arith.constant dense<0.000000e+00> : vector<2x128xf32>
    %450 = tpu.matmul %403, %20, %cst_127 {dimension_numbers = #tpu.dot_dimension_numbers<[1], [0], [0], [1], [0, 0, 1, 1], [], []>} : vector<2x32xf32>, vector<32x128xf32>, vector<2x128xf32> -> vector<2x128xf32>
    %451 = arith.addf %447, %450 : vector<2x128xf32>
    %452 = vector.extract_strided_slice %451 {offsets = [0, 0], sizes = [2, 96], strides = [1, 1]} : vector<2x128xf32> to vector<2x96xf32>
    %453 = arith.negf %452 : vector<2x96xf32>
    %454 = math.exp %453 : vector<2x96xf32>
    %cst_128 = arith.constant 1.000000e+00 : f32
    %455 = vector.broadcast %cst_128 : f32 to vector<2x96xf32>
    %456 = arith.addf %455, %454 : vector<2x96xf32>
    %457 = arith.divf %455, %456 : vector<2x96xf32>
    %458 = vector.extract_strided_slice %451 {offsets = [0, 96], sizes = [2, 32], strides = [1, 1]} : vector<2x128xf32> to vector<2x32xf32>
    %459 = math.tanh %458 : vector<2x32xf32>
    %460 = vector.extract_strided_slice %457 {offsets = [0, 32], sizes = [2, 32], strides = [1, 1]} : vector<2x96xf32> to vector<2x32xf32>
    %461 = arith.mulf %460, %400 : vector<2x32xf32>
    %462 = vector.extract_strided_slice %457 {offsets = [0, 0], sizes = [2, 32], strides = [1, 1]} : vector<2x96xf32> to vector<2x32xf32>
    %463 = arith.mulf %462, %459 : vector<2x32xf32>
    %464 = arith.addf %461, %463 : vector<2x32xf32>
    %465 = vector.extract_strided_slice %457 {offsets = [0, 64], sizes = [2, 32], strides = [1, 1]} : vector<2x96xf32> to vector<2x32xf32>
    %466 = math.tanh %464 : vector<2x32xf32>
    %467 = arith.mulf %465, %466 : vector<2x32xf32>
    %468 = vector.shape_cast %449 : vector<2x1xi1> to vector<2x1xi1>
    %469 = vector.broadcast %468 : vector<2x1xi1> to vector<2x32xi1>
    %470 = arith.select %469, %464, %400 : vector<2x32xi1>, vector<2x32xf32>
    %471 = vector.shape_cast %449 : vector<2x1xi1> to vector<2x1xi1>
    %472 = vector.broadcast %471 : vector<2x1xi1> to vector<2x32xi1>
    %473 = arith.select %472, %467, %403 : vector<2x32xi1>, vector<2x32xf32>
    %cst_129 = arith.constant 0.000000e+00 : f32
    %474 = vector.shape_cast %449 : vector<2x1xi1> to vector<2x1xi1>
    %475 = vector.broadcast %474 : vector<2x1xi1> to vector<2x32xi1>
    %476 = vector.broadcast %cst_129 : f32 to vector<2x32xf32>
    %477 = arith.select %475, %467, %476 : vector<2x32xi1>, vector<2x32xf32>
    %c0_130 = arith.constant 0 : index
    %c1_131 = arith.constant 1 : index
    %c128_132 = arith.constant 128 : index
    %478 = vector.load %arg11[%c0_130, %c1_131, %c128_132] : memref<2x8x256xf32, #tpu.memory_space<vmem>>, vector<2x1x128xf32>
    %479 = vector.shape_cast %478 : vector<2x1x128xf32> to vector<2x128xf32>
    %c1_i32_133 = arith.constant 1 : i32
    %480 = vector.broadcast %c1_i32_133 : i32 to vector<2x1xi32>
    %481 = arith.cmpi sgt, %1, %480 : vector<2x1xi32>
    %cst_134 = arith.constant dense<0.000000e+00> : vector<2x128xf32>
    %482 = tpu.matmul %435, %21, %cst_134 {dimension_numbers = #tpu.dot_dimension_numbers<[1], [0], [0], [1], [0, 0, 1, 1], [], []>} : vector<2x32xf32>, vector<32x128xf32>, vector<2x128xf32> -> vector<2x128xf32>
    %483 = arith.addf %479, %482 : vector<2x128xf32>
    %484 = vector.extract_strided_slice %483 {offsets = [0, 0], sizes = [2, 96], strides = [1, 1]} : vector<2x128xf32> to vector<2x96xf32>
    %485 = arith.negf %484 : vector<2x96xf32>
    %486 = math.exp %485 : vector<2x96xf32>
    %cst_135 = arith.constant 1.000000e+00 : f32
    %487 = vector.broadcast %cst_135 : f32 to vector<2x96xf32>
    %488 = arith.addf %487, %486 : vector<2x96xf32>
    %489 = arith.divf %487, %488 : vector<2x96xf32>
    %490 = vector.extract_strided_slice %483 {offsets = [0, 96], sizes = [2, 32], strides = [1, 1]} : vector<2x128xf32> to vector<2x32xf32>
    %491 = math.tanh %490 : vector<2x32xf32>
    %492 = vector.extract_strided_slice %489 {offsets = [0, 32], sizes = [2, 32], strides = [1, 1]} : vector<2x96xf32> to vector<2x32xf32>
    %493 = arith.mulf %492, %432 : vector<2x32xf32>
    %494 = vector.extract_strided_slice %489 {offsets = [0, 0], sizes = [2, 32], strides = [1, 1]} : vector<2x96xf32> to vector<2x32xf32>
    %495 = arith.mulf %494, %491 : vector<2x32xf32>
    %496 = arith.addf %493, %495 : vector<2x32xf32>
    %497 = vector.extract_strided_slice %489 {offsets = [0, 64], sizes = [2, 32], strides = [1, 1]} : vector<2x96xf32> to vector<2x32xf32>
    %498 = math.tanh %496 : vector<2x32xf32>
    %499 = arith.mulf %497, %498 : vector<2x32xf32>
    %500 = vector.shape_cast %481 : vector<2x1xi1> to vector<2x1xi1>
    %501 = vector.broadcast %500 : vector<2x1xi1> to vector<2x32xi1>
    %502 = arith.select %501, %496, %432 : vector<2x32xi1>, vector<2x32xf32>
    %503 = vector.shape_cast %481 : vector<2x1xi1> to vector<2x1xi1>
    %504 = vector.broadcast %503 : vector<2x1xi1> to vector<2x32xi1>
    %505 = arith.select %504, %499, %435 : vector<2x32xi1>, vector<2x32xf32>
    %cst_136 = arith.constant 0.000000e+00 : f32
    %506 = vector.shape_cast %481 : vector<2x1xi1> to vector<2x1xi1>
    %507 = vector.broadcast %506 : vector<2x1xi1> to vector<2x32xi1>
    %508 = vector.broadcast %cst_136 : f32 to vector<2x32xf32>
    %509 = arith.select %507, %499, %508 : vector<2x32xi1>, vector<2x32xf32>
    %c0_137 = arith.constant 0 : index
    %c6_138 = arith.constant 6 : index
    %c0_139 = arith.constant 0 : index
    %510 = vector.load %arg12[%c0_137, %c6_138, %c0_139] : memref<2x8x64xf32, #tpu.memory_space<vmem>>, vector<2x1x32xf32>
    %511 = vector.shape_cast %510 : vector<2x1x32xf32> to vector<2x32xf32>
    %512 = vector.shape_cast %477 : vector<2x32xf32> to vector<2x1x32xf32>
    tpu.vector_store %arg12[%c0_137, %c6_138, %c0_139], %512 {strides = array<i32>} : memref<2x8x64xf32, #tpu.memory_space<vmem>>, vector<2x1x32xf32>,
    %c0_140 = arith.constant 0 : index
    %c1_141 = arith.constant 1 : index
    %c32_142 = arith.constant 32 : index
    %513 = vector.load %arg12[%c0_140, %c1_141, %c32_142] : memref<2x8x64xf32, #tpu.memory_space<vmem>>, vector<2x1x32xf32>
    %514 = vector.shape_cast %513 : vector<2x1x32xf32> to vector<2x32xf32>
    %515 = vector.shape_cast %509 : vector<2x32xf32> to vector<2x1x32xf32>
    tpu.vector_store %arg12[%c0_140, %c1_141, %c32_142], %515 {strides = array<i32>} : memref<2x8x64xf32, #tpu.memory_space<vmem>>, vector<2x1x32xf32>,
    %c0_143 = arith.constant 0 : index
    %c7_144 = arith.constant 7 : index
    %c0_145 = arith.constant 0 : index
    %516 = vector.load %arg11[%c0_143, %c7_144, %c0_145] : memref<2x8x256xf32, #tpu.memory_space<vmem>>, vector<2x1x128xf32>
    %517 = vector.shape_cast %516 : vector<2x1x128xf32> to vector<2x128xf32>
    %c7_i32_146 = arith.constant 7 : i32
    %518 = vector.broadcast %c7_i32_146 : i32 to vector<2x1xi32>
    %519 = arith.cmpi sgt, %1, %518 : vector<2x1xi32>
    %cst_147 = arith.constant dense<0.000000e+00> : vector<2x128xf32>
    %520 = tpu.matmul %473, %20, %cst_147 {dimension_numbers = #tpu.dot_dimension_numbers<[1], [0], [0], [1], [0, 0, 1, 1], [], []>} : vector<2x32xf32>, vector<32x128xf32>, vector<2x128xf32> -> vector<2x128xf32>
    %521 = arith.addf %517, %520 : vector<2x128xf32>
    %522 = vector.extract_strided_slice %521 {offsets = [0, 0], sizes = [2, 96], strides = [1, 1]} : vector<2x128xf32> to vector<2x96xf32>
    %523 = arith.negf %522 : vector<2x96xf32>
    %524 = math.exp %523 : vector<2x96xf32>
    %cst_148 = arith.constant 1.000000e+00 : f32
    %525 = vector.broadcast %cst_148 : f32 to vector<2x96xf32>
    %526 = arith.addf %525, %524 : vector<2x96xf32>
    %527 = arith.divf %525, %526 : vector<2x96xf32>
    %528 = vector.extract_strided_slice %521 {offsets = [0, 96], sizes = [2, 32], strides = [1, 1]} : vector<2x128xf32> to vector<2x32xf32>
    %529 = math.tanh %528 : vector<2x32xf32>
    %530 = vector.extract_strided_slice %527 {offsets = [0, 32], sizes = [2, 32], strides = [1, 1]} : vector<2x96xf32> to vector<2x32xf32>
    %531 = arith.mulf %530, %470 : vector<2x32xf32>
    %532 = vector.extract_strided_slice %527 {offsets = [0, 0], sizes = [2, 32], strides = [1, 1]} : vector<2x96xf32> to vector<2x32xf32>
    %533 = arith.mulf %532, %529 : vector<2x32xf32>
    %534 = arith.addf %531, %533 : vector<2x32xf32>
    %535 = vector.extract_strided_slice %527 {offsets = [0, 64], sizes = [2, 32], strides = [1, 1]} : vector<2x96xf32> to vector<2x32xf32>
    %536 = math.tanh %534 : vector<2x32xf32>
    %537 = arith.mulf %535, %536 : vector<2x32xf32>
    %cst_149 = arith.constant 0.000000e+00 : f32
    %538 = vector.shape_cast %519 : vector<2x1xi1> to vector<2x1xi1>
    %539 = vector.broadcast %538 : vector<2x1xi1> to vector<2x32xi1>
    %540 = vector.broadcast %cst_149 : f32 to vector<2x32xf32>
    %541 = arith.select %539, %537, %540 : vector<2x32xi1>, vector<2x32xf32>
    %c0_150 = arith.constant 0 : index
    %c0_151 = arith.constant 0 : index
    %c128_152 = arith.constant 128 : index
    %542 = vector.load %arg11[%c0_150, %c0_151, %c128_152] : memref<2x8x256xf32, #tpu.memory_space<vmem>>, vector<2x1x128xf32>
    %543 = vector.shape_cast %542 : vector<2x1x128xf32> to vector<2x128xf32>
    %c0_i32_153 = arith.constant 0 : i32
    %544 = vector.broadcast %c0_i32_153 : i32 to vector<2x1xi32>
    %545 = arith.cmpi sgt, %1, %544 : vector<2x1xi32>
    %cst_154 = arith.constant dense<0.000000e+00> : vector<2x128xf32>
    %546 = tpu.matmul %505, %21, %cst_154 {dimension_numbers = #tpu.dot_dimension_numbers<[1], [0], [0], [1], [0, 0, 1, 1], [], []>} : vector<2x32xf32>, vector<32x128xf32>, vector<2x128xf32> -> vector<2x128xf32>
    %547 = arith.addf %543, %546 : vector<2x128xf32>
    %548 = vector.extract_strided_slice %547 {offsets = [0, 0], sizes = [2, 96], strides = [1, 1]} : vector<2x128xf32> to vector<2x96xf32>
    %549 = arith.negf %548 : vector<2x96xf32>
    %550 = math.exp %549 : vector<2x96xf32>
    %cst_155 = arith.constant 1.000000e+00 : f32
    %551 = vector.broadcast %cst_155 : f32 to vector<2x96xf32>
    %552 = arith.addf %551, %550 : vector<2x96xf32>
    %553 = arith.divf %551, %552 : vector<2x96xf32>
    %554 = vector.extract_strided_slice %547 {offsets = [0, 96], sizes = [2, 32], strides = [1, 1]} : vector<2x128xf32> to vector<2x32xf32>
    %555 = math.tanh %554 : vector<2x32xf32>
    %556 = vector.extract_strided_slice %553 {offsets = [0, 32], sizes = [2, 32], strides = [1, 1]} : vector<2x96xf32> to vector<2x32xf32>
    %557 = arith.mulf %556, %502 : vector<2x32xf32>
    %558 = vector.extract_strided_slice %553 {offsets = [0, 0], sizes = [2, 32], strides = [1, 1]} : vector<2x96xf32> to vector<2x32xf32>
    %559 = arith.mulf %558, %555 : vector<2x32xf32>
    %560 = arith.addf %557, %559 : vector<2x32xf32>
    %561 = vector.extract_strided_slice %553 {offsets = [0, 64], sizes = [2, 32], strides = [1, 1]} : vector<2x96xf32> to vector<2x32xf32>
    %562 = math.tanh %560 : vector<2x32xf32>
    %563 = arith.mulf %561, %562 : vector<2x32xf32>
    %cst_156 = arith.constant 0.000000e+00 : f32
    %564 = vector.shape_cast %545 : vector<2x1xi1> to vector<2x1xi1>
    %565 = vector.broadcast %564 : vector<2x1xi1> to vector<2x32xi1>
    %566 = vector.broadcast %cst_156 : f32 to vector<2x32xf32>
    %567 = arith.select %565, %563, %566 : vector<2x32xi1>, vector<2x32xf32>
    %c0_157 = arith.constant 0 : index
    %c7_158 = arith.constant 7 : index
    %c0_159 = arith.constant 0 : index
    %568 = vector.load %arg12[%c0_157, %c7_158, %c0_159] : memref<2x8x64xf32, #tpu.memory_space<vmem>>, vector<2x1x32xf32>
    %569 = vector.shape_cast %568 : vector<2x1x32xf32> to vector<2x32xf32>
    %570 = vector.shape_cast %541 : vector<2x32xf32> to vector<2x1x32xf32>
    tpu.vector_store %arg12[%c0_157, %c7_158, %c0_159], %570 {strides = array<i32>} : memref<2x8x64xf32, #tpu.memory_space<vmem>>, vector<2x1x32xf32>,
    %c0_160 = arith.constant 0 : index
    %c0_161 = arith.constant 0 : index
    %c32_162 = arith.constant 32 : index
    %571 = vector.load %arg12[%c0_160, %c0_161, %c32_162] : memref<2x8x64xf32, #tpu.memory_space<vmem>>, vector<2x1x32xf32>
    %572 = vector.shape_cast %571 : vector<2x1x32xf32> to vector<2x32xf32>
    %573 = vector.shape_cast %567 : vector<2x32xf32> to vector<2x1x32xf32>
    tpu.vector_store %arg12[%c0_160, %c0_161, %c32_162], %573 {strides = array<i32>} : memref<2x8x64xf32, #tpu.memory_space<vmem>>, vector<2x1x32xf32>,
    %c0_163 = arith.constant 0 : index
    %c0_164 = arith.constant 0 : index
    %c0_165 = arith.constant 0 : index
    %574 = vector.load %arg12[%c0_163, %c0_164, %c0_165] : memref<2x8x64xf32, #tpu.memory_space<vmem>>, vector<2x8x64xf32>
    %575 = tpu.iota {dimensions = array<i32: 1>} : vector<2x8xi32>
    %576 = vector.broadcast %1 : vector<2x1xi32> to vector<2x8xi32>
    %577 = arith.cmpi slt, %575, %576 : vector<2x8xi32>
    %578 = arith.extui %577 : vector<2x8xi1> to vector<2x8xi32>
    %579 = arith.sitofp %578 : vector<2x8xi32> to vector<2x8xf32>
    %c0_166 = arith.constant 0 : index
    %c0_167 = arith.constant 0 : index
    %580 = vector.load %arg6[%c0_166, %c0_167] : memref<1x64xf32, #tpu.memory_space<vmem>>, vector<1x64xf32>
    %c0_168 = arith.constant 0 : index
    %c0_169 = arith.constant 0 : index
    %581 = vector.load %arg7[%c0_168, %c0_169] : memref<1x1xf32, #tpu.memory_space<vmem>>, vector<1x1xf32>
    %582 = vector.shape_cast %580 : vector<1x64xf32> to vector<1x1x64xf32>
    %583 = vector.broadcast %582 : vector<1x1x64xf32> to vector<2x8x64xf32>
    %584 = arith.mulf %574, %583 : vector<2x8x64xf32>
    %cst_170 = arith.constant dense<0.000000e+00> : vector<2x8xf32>
    %585 = vector.multi_reduction <add>, %584, %cst_170 [2] : vector<2x8x64xf32> to vector<2x8xf32>
    %586 = vector.broadcast %581 : vector<1x1xf32> to vector<2x8xf32>
    %587 = arith.addf %585, %586 : vector<2x8xf32>
    %588 = math.tanh %587 : vector<2x8xf32>
    %cst_171 = arith.constant dense<0xFF800000> : vector<2xf32>
    %589 = vector.multi_reduction <maximumf>, %588, %cst_171 [1] : vector<2x8xf32> to vector<2xf32>
    %590 = vector.shape_cast %589 : vector<2xf32> to vector<2x1xf32>
    %591 = vector.broadcast %590 : vector<2x1xf32> to vector<2x8xf32>
    %592 = arith.subf %588, %591 : vector<2x8xf32>
    %593 = math.exp %592 : vector<2x8xf32>
    %cst_172 = arith.constant dense<0.000000e+00> : vector<2xf32>
    %594 = vector.multi_reduction <add>, %593, %cst_172 [1] : vector<2x8xf32> to vector<2xf32>
    %595 = vector.shape_cast %594 : vector<2xf32> to vector<2x1xf32>
    %596 = vector.broadcast %595 : vector<2x1xf32> to vector<2x8xf32>
    %597 = arith.divf %593, %596 : vector<2x8xf32>
    %598 = arith.mulf %597, %579 : vector<2x8xf32>
    %cst_173 = arith.constant dense<0.000000e+00> : vector<2xf32>
    %599 = vector.multi_reduction <add>, %598, %cst_173 [1] : vector<2x8xf32> to vector<2xf32>
    %600 = vector.shape_cast %599 : vector<2xf32> to vector<2x1xf32>
    %cst_174 = arith.constant 9.99999968E-21 : f32
    %601 = vector.broadcast %cst_174 : f32 to vector<2x1xf32>
    %602 = arith.maximumf %600, %601 : vector<2x1xf32>
    %603 = vector.broadcast %602 : vector<2x1xf32> to vector<2x8xf32>
    %604 = arith.divf %598, %603 : vector<2x8xf32>
    %605 = vector.shape_cast %604 : vector<2x8xf32> to vector<2x8x1xf32>
    %606 = vector.broadcast %605 : vector<2x8x1xf32> to vector<2x8x64xf32>
    %607 = arith.mulf %574, %606 : vector<2x8x64xf32>
    %cst_175 = arith.constant dense<0.000000e+00> : vector<2x64xf32>
    %608 = vector.multi_reduction <add>, %607, %cst_175 [1] : vector<2x8x64xf32> to vector<2x64xf32>
    %c0_176 = arith.constant 0 : index
    %c0_177 = arith.constant 0 : index
    %609 = vector.load %arg8[%c0_176, %c0_177] : memref<64x2xf32, #tpu.memory_space<vmem>>, vector<64x2xf32>
    %cst_178 = arith.constant dense<0.000000e+00> : vector<2x2xf32>
    %610 = tpu.matmul %608, %609, %cst_178 {dimension_numbers = #tpu.dot_dimension_numbers<[1], [0], [0], [1], [0, 0, 1, 1], [], []>} : vector<2x64xf32>, vector<64x2xf32>, vector<2x2xf32> -> vector<2x2xf32>
    %c0_179 = arith.constant 0 : index
    %c0_180 = arith.constant 0 : index
    %611 = vector.load %arg9[%c0_179, %c0_180] : memref<1x2xf32, #tpu.memory_space<vmem>>, vector<1x2xf32>
    %612 = vector.broadcast %611 : vector<1x2xf32> to vector<2x2xf32>
    %613 = arith.addf %610, %612 : vector<2x2xf32>
    %cst_181 = arith.constant dense<0xFF800000> : vector<2xf32>
    %614 = vector.multi_reduction <maximumf>, %613, %cst_181 [1] : vector<2x2xf32> to vector<2xf32>
    %615 = vector.shape_cast %614 : vector<2xf32> to vector<2x1xf32>
    %616 = vector.broadcast %615 : vector<2x1xf32> to vector<2x2xf32>
    %617 = arith.subf %613, %616 : vector<2x2xf32>
    %618 = math.exp %617 : vector<2x2xf32>
    %cst_182 = arith.constant dense<0.000000e+00> : vector<2xf32>
    %619 = vector.multi_reduction <add>, %618, %cst_182 [1] : vector<2x2xf32> to vector<2xf32>
    %620 = vector.shape_cast %619 : vector<2xf32> to vector<2x1xf32>
    %621 = math.log %620 : vector<2x1xf32>
    %622 = vector.broadcast %621 : vector<2x1xf32> to vector<2x2xf32>
    %623 = arith.subf %617, %622 : vector<2x2xf32>
    %c0_183 = arith.constant 0 : index
    %c0_184 = arith.constant 0 : index
    %624 = vector.load %arg10[%c0_183, %c0_184] : memref<2x2xf32, #tpu.memory_space<vmem>>, vector<2x2xf32>
    tpu.vector_store %arg10[%c0_183, %c0_184], %623 {strides = array<i32>} : memref<2x2xf32, #tpu.memory_space<vmem>>, vector<2x2xf32>,
    return
  }
}

</mosaic_0001>

<bundles_post_ra>
// kernel: _lambda_.3
= control target key start
LH: loop header
LB: loop body
LE: loop exit
PB: predicated region body
PF: predicated region fallthrough
CT: control target
= control target key end

     0   :  { %s5191_s0 = inlined_call_operand.vmem [shape: f32[6,64], index: 0, kind: input, shape index: {}]   ;;  %s5192_s1 = inlined_call_operand.vmem [shape: s32[2,1], index: 1, kind: input, shape index: {}]   ;;  %s5193_s2 = inlined_call_operand.vmem [shape: bf16[64,256], index: 2, kind: input, shape index: {}]   ;;  %s5194_s3 = inlined_call_operand.vmem [shape: f32[1,256], index: 3, kind: input, shape index: {}]   ;;  %s5195_s4 = inlined_call_operand.vmem [shape: f32[32,128], index: 4, kind: input, shape index: {}]   ;;  %s5196_s5 = inlined_call_operand.vmem [shape: f32[32,128], index: 5, kind: input, shape index: {}]   ;;  %s5197_s6 = inlined_call_operand.vmem [shape: f32[1,64], index: 6, kind: input, shape index: {}]   ;;  %s5198_s7 = inlined_call_operand.<no memory space> [shape: f32[1,1], index: 7, kind: input, shape index: {}]   ;;  %s5199_s8 = inlined_call_operand.vmem [shape: f32[64,2], index: 8, kind: input, shape index: {}]   ;;  %s5200_s9 = inlined_call_operand.vmem [shape: f32[1,2], index: 9, kind: input, shape index: {}]   ;;  %s5201_s10 = inlined_call_operand.hbm [shape: f32[2,2], index: 10, kind: output, shape index: {}]  }
   0x1   :  { %v15_v0 = vstv %s5198_s7 }
   0x2   :  { %16 = vst [vmem:[#allocation5] sm:$0x1] %v15_v0 }
   0x3   :  { %v3833_v1 = vld [vmem:[%s5193_s2 + $0x34] ss:$8 sps:$4 sm:$0xff]   ;;  %v3835_v2 = vld [vmem:[%s5193_s2 + $0x30] ss:$8 sps:$4 sm:$0xff]   ;;  %v4152_v3 = vmov 0.0   ;;  %v4153_v4 = vmov 0  }
   0x4   :  { %3628 = vmatprep.subr.mxu1 %v4152_v3  ;;  %145 = vmatprep.mubr.bf16.mxu0 %v4153_v4  ;;  %v3836_v5 = vld [vmem:[%s5193_s2 + $0x24] ss:$8 sps:$4 sm:$0xff]   ;;  %v3838_v6 = vld [vmem:[%s5193_s2 + $0x20] ss:$8 sps:$4 sm:$0xff]   ;;  %v3839_v7 = vld [vmem:[%s5193_s2 + $0x14] ss:$8 sps:$4 sm:$0xff]  }
   0x5   :  { %121 = vmatprep.subr.bf16.mxu0 %v3833_v1  ;;  %3831 = vset.pattern.permute.xlu0 %v4153_v4  ;;  %vm4154_vm0 = vmmov 0   ;;  %v4242_v8 = vld [vmem:[%s5195_s4 + $0x18] sm:$0xff]  ;;  %v4247_v9 = vld [vmem:[%s5195_s4 + $0x10] sm:$0xff]  ;;  %v39_v10 = vld [vmem:[%s5191_s0] sm:$0x3f]  ;;  %vm41_vm1 = vcmask 1043456  }
   0x6   :  { %122 = vmatpush1.bf16.msra.mxu0 %v3835_v2  ;;  %3832 = vset.pattern.permute.xlu1 %v4153_v4  ;;  %v3841_v11 = vld [vmem:[%s5193_s2 + $0x10] ss:$8 sps:$4 sm:$0xff]   ;;  %v44_v12 = vrot.slane %v39_v10, 4  ;;  %v4260_v13 = vld [vmem:[%s5195_s4 + $0x8] sm:$0xff]  ;;  %vm46_vm2 = vcmask 1041408  }
   0x7   :  { %123 = vmatprep.subr.bf16.mxu0 %v3836_v5  ;;  %3636 = vmatprep.mubr.msk.f32.mxu1 %vm4154_vm0, %v4152_v3  ;;  %v3842_v14 = vld [vmem:[%s5193_s2 + $0x4] ss:$8 sps:$4 sm:$0xff]  }
   0x8   :  { %3629 = vmatpush3.msra.mxu1 %v4242_v8 }
   0x9   :  { %3630 = vmatprep.subr.mxu1 %v4152_v3 }
   0xa   :  { %124 = vmatpush1.bf16.msra.mxu0 %v3838_v6  ;;  %3631 = vmatpush3.msra.mxu1 %v4247_v9 }
   0xb   :  { %125 = vmatprep.subr.bf16.mxu0 %v3839_v7 }
   0xc   :  { %17 = vsyncpa [#allocation7], 0  ;;  %3632 = vmatprep.subr.mxu1 %v4152_v3  ;;  %v4270_v15 = vld [vmem:[%s5195_s4] sm:$0xff]  ;;  %v42_v17 = vsel %vm41_vm1, %v39_v10, 0.0  ;;  %v47_v18 = vsel %vm46_vm2, %v44_v12, 0.0  ;;  %v4280_v19 = vld [vmem:[%s5196_s5 + $0x18] sm:$0xff]  ;;  %v59_v24 = vlaneseq }
   0xd   :  { %3633 = vmatpush3.msra.mxu1 %v4260_v13  ;;  %v3844_v16 = vld [vmem:[%s5193_s2] ss:$8 sps:$4 sm:$0xff]   ;;  %v4288_v20 = vld [vmem:[%s5196_s5 + $0x10] sm:$0xff]  ;;  %v48_v21 = vpack.c.bf16 %v47_v18, %v42_v17  ;;  %vm109_vm3 = vcmask 523264   ;;  %vm307_vm4 = vcmask 1041409   ;;  %s4156_s29 = smov 64  }
   0xe   :  { %126 = vmatpush1.bf16.msra.mxu0 %v3841_v11  ;;  %3634 = vmatprep.subr.mxu1 %v4152_v3  ;;  %v4297_v22 = vld [vmem:[%s5196_s5 + $0x8] sm:$0xff]  ;;  %v4305_v23 = vld [vmem:[%s5196_s5] sm:$0xff]  ;;  %v4334_v25 = vshrl.u32 %v59_v24, 7  ;;  %s4157_s30 = smov 96   ;;  %vm171_vm8 = vcmask 261120   ;;  %vm494_vm9 = vcmask 253952  }
   0xf   :  { %127 = vmatprep.subr.bf16.mxu0 %v3842_v14  ;;  %3635 = vmatpush3.msra.mxu1 %v4270_v15  ;;  %v57_v27 = vld [vmem:[%s5194_s3] sm:$0x3]  ;;  %s4155_s3 = smov 32   ;;  %s4159_s18 = smov [#allocation6]  }
  0x10   :  { %3639 = vmatprep.subr.mxu1 %v4152_v3  ;;  %3637 = vmatmul.mubr.f32.vlgmr.msra.gmra.mxu1 %v4152_v3  ;;  %v4337_v26 = vsub.s32 0, %v4334_v25  ;;  %v4343_v28 = vsub.s32 1, %v4334_v25 }
  0x11   :  { %3640 = vmatpush3.msra.mxu1 %v4280_v19  ;;  %3647 = vmatprep.mubr.msk.f32.mxu1 %vm4154_vm0, %v4152_v3 }
  0x12   :  { %128 = vmatpush1.bf16.msra.mxu0 %v3844_v16  ;;  %3641 = vmatprep.subr.mxu1 %v4152_v3  ;;  %v62_v30 = vrot.slane %v57_v27, %v4337_v26  ;;  %v66_v32 = vrot.slane %v57_v27, %v4343_v28 }
  0x13   :  { %3642 = vmatpush3.msra.mxu1 %v4288_v20  ;;  %3672 = vmatprep.subr.mxu0 %v4152_v3 }
  0x14   :  { %3643 = vmatprep.subr.mxu1 %v4152_v3 }
  0x15   :  { %3487 = vmatmul.mubr.msk.bf16.vlgmr.msra.gmra.mxu0 %vm109_vm3, %v48_v21  ;;  %3644 = vmatpush3.msra.mxu1 %v4297_v22 }
  0x16   :  { %3645 = vmatprep.subr.mxu1 %v4152_v3  ;;  %3673 = vmatpush3.msra.mxu0 %v4242_v8 }
  0x17   :  { %3646 = vmatpush3.msra.mxu1 %v4305_v23  ;;  %3674 = vmatprep.subr.mxu0 %v4152_v3 }
  0x18   :  { %3648 = vmatmul.mubr.f32.vlgmr.msra.gmra.mxu1 %v4152_v3  ;;  %3650 = vmatprep.subr.mxu1 %v4152_v3 }
  0x19   :  { %3651 = vmatpush3.msra.mxu1 %v4242_v8  ;;  %3658 = vmatprep.mubr.msk.f32.mxu1 %vm4154_vm0, %v4152_v3 }
  0x1a   :  { %3652 = vmatprep.subr.mxu1 %v4152_v3  ;;  %3675 = vmatpush3.msra.mxu0 %v4247_v9 }
  0x1b   :  { %3653 = vmatpush3.msra.mxu1 %v4247_v9  ;;  %3676 = vmatprep.subr.mxu0 %v4152_v3 }
  0x1c   :  { %3654 = vmatprep.subr.mxu1 %v4152_v3  ;;  %3677 = vmatpush3.msra.mxu0 %v4260_v13 }
  0x1d   :  { %3655 = vmatpush3.msra.mxu1 %v4260_v13  ;;  %3678 = vmatprep.subr.mxu0 %v4152_v3 }
  0x1e   :  { %3656 = vmatprep.subr.mxu1 %v4152_v3  ;;  %3679 = vmatpush3.msra.mxu0 %v4270_v15 }
  0x1f   :  { %3657 = vmatpush3.msra.mxu1 %v4270_v15  ;;  %3680 = vmatprep.mubr.msk.f32.mxu0 %vm4154_vm0, %v4152_v3 }
  0x20   :  { %3661 = vmatprep.subr.mxu1 %v4152_v3  ;;  %3694 = vmatprep.subr.mxu0 %v4152_v3 }
  0xd0   :  { %v241_v29 = vpop.f32.mrf.mxu1 }
  0xd1   :  { %v246_v43 = vrot.slane %v241_v29, 1 }
  0xd2   :  { %v3638_v31 = vpop.f32.mrf.mxu1 }
  0xd5   :  { %v147_v33 = vpop.f32.mrf.mxu0 }
  0xd6   :  { %v148_v34 = vadd.f32 %v147_v33, %v62_v30 }
  0xd7   :  { %v149_v35 = vpop.f32.mrf.mxu0 }
  0xd8   :  { %156 = vst [vmem:[#allocation2] sm:$0xff] %v148_v34  ;;  %v150_v36 = vadd.f32 %v149_v35, %v66_v32  ;;  %v390_v37 = vpop.f32.mrf.mxu1 }
  0xd9   :  { %v151_v38 = vpop.f32.mrf.mxu0  ;;  %v395_v44 = vrot.slane %v390_v37, 1 }
  0xda   :  { %157 = vst [vmem:[#allocation2 + $0x8] sm:$0xff] %v150_v36  ;;  %v152_v39 = vadd.f32 %v151_v38, %v62_v30  ;;  %v3649_v40 = vpop.f32.mrf.mxu1 }
  0xdb   :  { %v153_v41 = vpop.f32.mrf.mxu0 }
  0xdc   :  { %158 = vst [vmem:[#allocation2 + $0x10] sm:$0xff] %v152_v39  ;;  %v154_v42 = vadd.f32 %v153_v41, %v66_v32 }
  0xde   :  { %159 = vst [vmem:[#allocation2 + $0x18] sm:$0xff] %v154_v42 }
  0xdf   :  { %v168_v45 = vld [vmem:[#allocation2] ss:$0 sm:$0xff] }
  0xe0   :  { %v249_v49 = vadd.f32 %v241_v29, %v168_v45 }
  0xe1   :  { %v321_v50 = vld [vmem:[#allocation2 + $0xf] ss:$0 sm:$0xff] }
  0xe2   :  { %v398_v52 = vadd.f32 %v390_v37, %v321_v50  ;;  %v3488_v58 = vmul.f32 -1.442695, %v249_v49 }
  0xe3   :  { %v169_v46 = vld [vmem:[#allocation2 + $0x10] ss:$0 sm:$0xff] }
  0xe4   :  { %v250_v47 = vadd.f32 %v246_v43, %v169_v46  ;;  %v3490_v60 = vmul.f32 -1.442695, %v398_v52 }
  0xe5   :  { %v322_v48 = vld [vmem:[#allocation2 + $0x1f] ss:$0 sm:$0xff] }
  0xe6   :  { %3845 = vtanh.f32 %v250_v47  ;;  %v399_v51 = vadd.f32 %v395_v44, %v322_v48  ;;  %v3489_v57 = vmul.f32 -1.442695, %v250_v47  ;;  %v4362_v48 = vld [vmem:[%s5192_s1] sm:$0x3] }
  0xe7   :  { %vm170_vm5 = vcmp.gt.s32.totalorder %v4362_v48, 0  ;;  %vm323_vm6 = vcmp.gt.s32.totalorder %v4362_v48, 7  ;;  %vm698_vm11 = vcmp.gt.s32.totalorder %v4362_v48, 6  ;;  %vm539_vm12 = vcmp.gt.s32.totalorder %v4362_v48, 1 }
  0xe8   :  { %3847 = vtanh.f32 %v399_v51  ;;  %v3491_v59 = vmul.f32 -1.442695, %v399_v51  ;;  %v299_v51 = vsel %vm170_vm5, 1, %v4153_v4  ;;  %vm1083_vm15 = vcmp.gt.s32.totalorder %v4362_v48, 5 }
  0xe9   :  { %3849 = vtanh.f32 %v249_v49  ;;  %vm923_vm1 = vcmp.gt.s32.totalorder %v4362_v48, 2 }
  0xea   :  { %3851 = vtanh.f32 %v398_v52 }
  0xeb   :  { %3853 = vpow2.f32 %v3489_v57 }
  0xec   :  { %3855 = vpow2.f32 %v3488_v58 }
  0xed   :  { %3857 = vpow2.f32 %v3491_v59 }
  0xee   :  { %3859 = vpow2.f32 %v3490_v60 }
  0xf3   :  { %v3846_v53 = vpop.eup %3845 }
  0xf4   :  { %271 = vrot.lane.b32.xlu0 %v3846_v53, %s4155_s3 }
  0xf5   :  { %v3848_v54 = vpop.eup %3847 }
  0xf6   :  { %v3850_v55 = vpop.eup %3849  ;;  %420 = vrot.lane.b32.xlu1 %v3848_v54, %s4155_s3 }
  0xf7   :  { %v3852_v56 = vpop.eup %3851 }
  0xf8   :  { %269 = vrot.lane.b32.xlu0 %v3850_v55, %s4155_s3  ;;  %v3854_v61 = vpop.eup %3853 }
  0xf9   :  { %v3856_v62 = vpop.eup %3855  ;;  %v258_v63 = vadd.f32 1.0, %v3854_v61 }
  0xfa   :  { %418 = vrot.lane.b32.xlu1 %v3852_v56, %s4155_s3  ;;  %v3858_v0 = vpop.eup %3857  ;;  %v257_v1 = vadd.f32 1.0, %v3856_v62 }
  0xfb   :  { %3861 = vrcp.f32 %v258_v63  ;;  %v407_v2 = vadd.f32 1.0, %v3858_v0  ;;  %v3860_v5 = vpop.eup %3859  ;;  %v448_v0 = vsel %vm323_vm6, 1, %v4153_v4  ;;  %vm1469_vm6 = vcmp.gt.s32.totalorder %v4362_v48, 4 }
  0xfc   :  { %3863 = vrcp.f32 %v257_v1  ;;  %v406_v6 = vadd.f32 1.0, %v3860_v5 }
  0xfd   :  { %3865 = vrcp.f32 %v407_v2  ;;  %v4158_v2 = vmov 1966171168  }
  0xfe   :  { %3867 = vrcp.f32 %v406_v6  ;;  %v471_v5 = vunpack.c.l.s4 %v4158_v2 }
 0x100   :  { %v472_v6 = vunpack.c.0.s8 %v471_v5 }
 0x108   :  { %v3862_v7 = vpop.eup %3861 }
 0x109   :  { %v3864_v12 = vpop.eup %3863  ;;  %v266_v31 = vmul.f32 0.0, %v3862_v7 }
 0x10a   :  { %v3866_v16 = vpop.eup %3865  ;;  %v265_v35 = vmul.f32 0.0, %v3864_v12 }
 0x10b   :  { %v3868_v29 = vpop.eup %3867  ;;  %v415_v34 = vmul.f32 0.0, %v3866_v16 }
 0x10c   :  { %v414_v41 = vmul.f32 0.0, %v3868_v29 }
 0x166   :  { %v272_v10 = vpop.permute.xlu0 %271 }
 0x167   :  { %v276_v11 = vmul.f32 %v3862_v7, %v272_v10  ;;  %v4380_v10 = vsub.s32 %v472_v6, %v4334_v25 }
 0x168   :  { %v421_v14 = vpop.permute.xlu1 %420 }
 0x169   :  { %281 = vrot.lane.b32.xlu0 %v276_v11, %s4155_s3  ;;  %v425_v18 = vmul.f32 %v3866_v16, %v421_v14 }
 0x16a   :  { %v270_v17 = vpop.permute.xlu0 %269 }
 0x16b   :  { %v275_v21 = vmul.f32 %v3864_v12, %v270_v17 }
 0x16c   :  { %v419_v27 = vpop.permute.xlu1 %418 }
 0x16d   :  { %430 = vrot.lane.b32.xlu0 %v425_v18, %s4155_s3  ;;  %279 = vrot.lane.b32.xlu1 %v275_v21, %s4155_s3  ;;  %v424_v30 = vmul.f32 %v3868_v29, %v419_v27 }
 0x171   :  { %428 = vrot.lane.b32.xlu1 %v424_v30, %s4155_s3 }
 0x1db   :  { %v282_v32 = vpop.permute.xlu0 %281 }
 0x1dc   :  { %v286_v33 = vadd.f32 %v282_v32, %v266_v31  ;;  %v696_v32 = vld [vmem:[#allocation2 + $0xe] ss:$0 sm:$0xff] }
 0x1de   :  { %3869 = vtanh.f32 %v286_v33  ;;  %v306_v38 = vrot.slane %v286_v33, 7 }
 0x1df   :  { %v431_v36 = vpop.permute.xlu0 %430  ;;  %v280_v37 = vpop.permute.xlu1 %279 }
 0x1e0   :  { %v435_v39 = vadd.f32 %v431_v36, %v415_v34  ;;  %v285_v40 = vadd.f32 %v280_v37, %v265_v35  ;;  %v697_v36 = vld [vmem:[#allocation2 + $0x1e] ss:$0 sm:$0xff] }
 0x1e2   :  { %3871 = vtanh.f32 %v435_v39  ;;  %v4356_v42 = vsel %vm307_vm4, %v306_v38, %v285_v40  ;;  %v455_v44 = vrot.slane %v435_v39, 7 }
 0x1e3   :  { %3873 = vtanh.f32 %v285_v40  ;;  %v429_v43 = vpop.permute.xlu1 %428  ;;  %v538_v40 = vld [vmem:[#allocation2 + $0x11] ss:$0 sm:$0xff] }
 0x1e4   :  { %v434_v45 = vadd.f32 %v429_v43, %v414_v41  ;;  %v537_v41 = vld [vmem:[#allocation2 + $0x1] ss:$0 sm:$0xff] }
 0x1e6   :  { %3875 = vtanh.f32 %v434_v45  ;;  %v456_v46 = vsel %vm307_vm4, %v455_v44, %v434_v45 }
 0x1eb   :  { %v3870_v47 = vpop.eup %3869 }
 0x1ec   :  { %293 = vrot.lane.b32.xlu0 %v3870_v47, %s4155_s3 }
 0x1ef   :  { %v3872_v49 = vpop.eup %3871 }
 0x1f0   :  { %v3874_v50 = vpop.eup %3873  ;;  %442 = vrot.lane.b32.xlu0 %v3872_v49, %s4155_s3 }
 0x1f1   :  { %291 = vrot.lane.b32.xlu1 %v3874_v50, %s4155_s3 }
 0x1f3   :  { %v3876_v52 = vpop.eup %3875 }
 0x1f4   :  { %301 = vperm.xlu0 %3831, %v299_v51  }
 0x1f5   :  { %440 = vrot.lane.b32.xlu1 %v3876_v52, %s4155_s3 }
 0x25e   :  { %v294_v53 = vpop.permute.xlu0 %293 }
 0x25f   :  { %v298_v54 = vmul.f32 %v3862_v7, %v294_v53 }
 0x261   :  { %v315_v57 = vrot.slane %v298_v54, 7 }
 0x262   :  { %v443_v55 = vpop.permute.xlu0 %442 }
 0x263   :  { %v292_v56 = vpop.permute.xlu1 %291  ;;  %v447_v58 = vmul.f32 %v3866_v16, %v443_v55 }
 0x264   :  { %v297_v59 = vmul.f32 %v3864_v12, %v292_v56 }
 0x265   :  { %v463_v62 = vrot.slane %v447_v58, 7 }
 0x266   :  { %v316_v60 = vsel %vm307_vm4, %v315_v57, %v297_v59 }
 0x267   :  { %317 = vrot.lane.b32.xlu1 %v316_v60, %s4156_s29  ;;  %v441_v61 = vpop.permute.xlu1 %440 }
 0x268   :  { %v446_v63 = vmul.f32 %v3868_v29, %v441_v61 }
 0x26a   :  { %v464_v1 = vsel %vm307_vm4, %v463_v62, %v446_v63 }
 0x26b   :  { %450 = vperm.xlu1 %3832, %v448_v0   ;;  %465 = vrot.lane.b32.xlu0 %v464_v1, %s4156_s29 }
 0x26f   :  { %457 = vrot.lane.b32.xlu1 %v456_v46, %s4157_s30  ;;  %v4377_v7 = vpop.permute.xlu0 %301 }
 0x270   :  { %vm303_vm7 = vcmp.eq.s32.totalorder %v4377_v7, 1 }
 0x2d9   :  { %v318_v11 = vpop.permute.xlu1 %317 }
 0x2da   :  { %v4385_v12 = vsel %vm303_vm7, %v318_v11, 0.0 }
 0x2db   :  { %v476_v14 = vrot.slane %v4385_v12, %v4380_v10  ;;  %3659 = vmatmul.mubr.msk.f32.vlgmr.msra.gmra.mxu1 %vm171_vm8, %v4385_v12 }
 0x2dc   :  { %3662 = vmatpush3.msra.mxu1 %v4280_v19  ;;  %3669 = vmatprep.mubr.msk.f32.mxu1 %vm4154_vm0, %v4152_v3 }
 0x2dd   :  { %v477_v16 = vcombine.high %v476_v14, %v476_v14  ;;  %3663 = vmatprep.subr.mxu1 %v4152_v3  ;;  %v484_v17 = vrot.slane %v476_v14, %v4380_v10  ;;  %v466_v27 = vpop.permute.xlu0 %465 }
 0x2de   :  { %3664 = vmatpush3.msra.mxu1 %v4288_v20 }
 0x2df   :  { %3665 = vmatprep.subr.mxu1 %v4152_v3  ;;  %495 = vst.msk [vmem:[#allocation3] sm:$0x1] %vm494_vm9, %v484_v17  ;;  %v491_v18 = vrot.slane %v477_v16, %v4380_v10 }
 0x2e0   :  { %3666 = vmatpush3.msra.mxu1 %v4297_v22 }
 0x2e1   :  { %3667 = vmatprep.subr.mxu1 %v4152_v3  ;;  %496 = vst.msk [vmem:[#allocation3 + $0x8] sm:$0x1] %vm494_vm9, %v491_v18 }
 0x2e2   :  { %3668 = vmatpush3.msra.mxu1 %v4305_v23 }
 0x2e3   :  { %3683 = vmatprep.subr.mxu1 %v4152_v3 }
 0x2e6   :  { %v4405_v21 = vpop.permute.xlu1 %450 }
 0x2e7   :  { %vm452_vm10 = vcmp.eq.s32.totalorder %v4405_v21, 1 }
 0x2e8   :  { %v4410_v29 = vsel %vm452_vm10, %v466_v27, 0.0 }
 0x2e9   :  { %3670 = vmatmul.mubr.msk.f32.vlgmr.msra.gmra.mxu1 %vm171_vm8, %v4410_v29 }
 0x2ea   :  { %3684 = vmatpush3.msra.mxu1 %v4280_v19  ;;  %3691 = vmatprep.mubr.msk.f32.mxu1 %vm4154_vm0, %v4152_v3  ;;  %v458_v45 = vpop.permute.xlu1 %457 }
 0x2eb   :  { %3685 = vmatprep.subr.mxu1 %v4152_v3  ;;  %v4426_v47 = vsel %vm452_vm10, %v458_v45, 0.0 }
 0x2ec   :  { %3686 = vmatpush3.msra.mxu1 %v4288_v20  ;;  %v792_v50 = vrot.slane %v4426_v47, 1 }
 0x2ed   :  { %3687 = vmatprep.subr.mxu1 %v4152_v3 }
 0x2ee   :  { %3688 = vmatpush3.msra.mxu1 %v4297_v22 }
 0x2ef   :  { %3689 = vmatprep.subr.mxu1 %v4152_v3 }
 0x2f0   :  { %3690 = vmatpush3.msra.mxu1 %v4305_v23 }
 0x2f1   :  { %3705 = vmatprep.subr.mxu1 %v4152_v3 }
 0x39b   :  { %v608_v30 = vpop.f32.mrf.mxu1 }
 0x39c   :  { %v613_v39 = vrot.slane %v608_v30, 1  ;;  %v616_v44 = vadd.f32 %v608_v30, %v537_v41 }
 0x39d   :  { %v3660_v31 = vpop.f32.mrf.mxu1 }
 0x39e   :  { %v617_v43 = vadd.f32 %v613_v39, %v538_v40  ;;  %v3493_v56 = vmul.f32 -1.442695, %v616_v44 }
 0x3a0   :  { %v3494_v55 = vmul.f32 -1.442695, %v617_v43 }
 0x3a9   :  { %v767_v33 = vpop.f32.mrf.mxu1 }
 0x3aa   :  { %v772_v34 = vrot.slane %v767_v33, 1  ;;  %v775_v35 = vadd.f32 %v767_v33, %v696_v32 }
 0x3ab   :  { %v3671_v37 = vpop.f32.mrf.mxu1 }
 0x3ac   :  { %v776_v38 = vadd.f32 %v772_v34, %v697_v36  ;;  %3877 = vtanh.f32 %v775_v35  ;;  %v3496_v54 = vmul.f32 -1.442695, %v775_v35 }
 0x3ae   :  { %3879 = vtanh.f32 %v776_v38  ;;  %v3497_v53 = vmul.f32 -1.442695, %v776_v38 }
 0x3af   :  { %3881 = vtanh.f32 %v617_v43 }
 0x3b0   :  { %3883 = vtanh.f32 %v616_v44 }
 0x3b1   :  { %3885 = vpow2.f32 %v3497_v53 }
 0x3b2   :  { %3887 = vpow2.f32 %v3496_v54 }
 0x3b3   :  { %3889 = vpow2.f32 %v3494_v55 }
 0x3b4   :  { %3891 = vpow2.f32 %v3493_v56  ;;  %v833_v56 = vsel %vm698_vm11, 1, %v4153_v4  ;;  %vm1309_vm11 = vcmp.gt.s32.totalorder %v4362_v48, 3 }
 0x3b9   :  { %v3878_v46 = vpop.eup %3877 }
 0x3ba   :  { %803 = vrot.lane.b32.xlu1 %v3878_v46, %s4155_s3 }
 0x3bb   :  { %v3880_v49 = vpop.eup %3879 }
 0x3bc   :  { %805 = vrot.lane.b32.xlu0 %v3880_v49, %s4155_s3  ;;  %v3882_v51 = vpop.eup %3881 }
 0x3bd   :  { %v3884_v52 = vpop.eup %3883 }
 0x3be   :  { %795 = vrot.lane.b32.xlu1 %v792_v50, %s4155_s3  ;;  %v3886_v57 = vpop.eup %3885 }
 0x3bf   :  { %v784_v58 = vadd.f32 1.0, %v3886_v57 }
 0x3c0   :  { %309 = vrot.lane.b32.xlu0 %v4356_v42, %s4157_s30  ;;  %v3888_v42 = vpop.eup %3887 }
 0x3c1   :  { %v783_v59 = vadd.f32 1.0, %v3888_v42  ;;  %3893 = vrcp.f32 %v784_v58  ;;  %v3890_v60 = vpop.eup %3889 }
 0x3c2   :  { %793 = vrot.lane.b32.xlu1 %v4426_v47, %s4155_s3  ;;  %v625_v61 = vadd.f32 1.0, %v3890_v60  ;;  %v3892_v62 = vpop.eup %3891 }
 0x3c3   :  { %3895 = vrcp.f32 %v783_v59  ;;  %v624_v63 = vadd.f32 1.0, %v3892_v62  ;;  %v674_v59 = vsel %vm539_vm12, 1, %v4153_v4 }
 0x3c4   :  { %646 = vrot.lane.b32.xlu0 %v3882_v51, %s4155_s3  ;;  %3897 = vrcp.f32 %v625_v61 }
 0x3c5   :  { %3899 = vrcp.f32 %v624_v63 }
 0x3c6   :  { %644 = vrot.lane.b32.xlu1 %v3884_v52, %s4155_s3 }
 0x3ce   :  { %v3894_v1 = vpop.eup %3893 }
 0x3d0   :  { %v3896_v11 = vpop.eup %3895 }
 0x3d1   :  { %v3898_v30 = vpop.eup %3897 }
 0x3d2   :  { %v3900_v34 = vpop.eup %3899 }
 0x42c   :  { %v804_v0 = vpop.permute.xlu1 %803 }
 0x42d   :  { %v809_v16 = vmul.f32 %v3896_v11, %v804_v0 }
 0x42e   :  { %v806_v2 = vpop.permute.xlu0 %805 }
 0x42f   :  { %v810_v5 = vmul.f32 %v3894_v1, %v806_v2 }
 0x430   :  { %v796_v6 = vpop.permute.xlu1 %795 }
 0x431   :  { %815 = vrot.lane.b32.xlu0 %v810_v5, %s4155_s3  ;;  %v800_v36 = vmul.f32 %v3894_v1, %v796_v6 }
 0x432   :  { %v310_v14 = vpop.permute.xlu0 %309 }
 0x433   :  { %v4441_v17 = vsel %vm303_vm7, %v310_v14, 0.0 }
 0x434   :  { %v794_v18 = vpop.permute.xlu1 %793  ;;  %v633_v27 = vrot.slane %v4441_v17, 1 }
 0x435   :  { %813 = vrot.lane.b32.xlu0 %v809_v16, %s4155_s3  ;;  %v799_v39 = vmul.f32 %v3896_v11, %v794_v18 }
 0x436   :  { %v647_v31 = vpop.permute.xlu0 %646  ;;  %636 = vrot.lane.b32.xlu1 %v633_v27, %s4155_s3 }
 0x437   :  { %v651_v32 = vmul.f32 %v3898_v30, %v647_v31 }
 0x438   :  { %v645_v33 = vpop.permute.xlu1 %644 }
 0x439   :  { %634 = vrot.lane.b32.xlu0 %v4441_v17, %s4155_s3  ;;  %v650_v35 = vmul.f32 %v3900_v34, %v645_v33 }
 0x43a   :  { %656 = vrot.lane.b32.xlu1 %v651_v32, %s4155_s3 }
 0x43d   :  { %654 = vrot.lane.b32.xlu0 %v650_v35, %s4155_s3 }
 0x4a3   :  { %v816_v37 = vpop.permute.xlu0 %815 }
 0x4a4   :  { %v820_v38 = vadd.f32 %v816_v37, %v800_v36 }
 0x4a6   :  { %3901 = vtanh.f32 %v820_v38  ;;  %v840_v60 = vrot.slane %v820_v38, 7 }
 0x4a7   :  { %v814_v40 = vpop.permute.xlu0 %813 }
 0x4a8   :  { %v819_v41 = vadd.f32 %v814_v40, %v799_v39  ;;  %v637_v43 = vpop.permute.xlu1 %636 }
 0x4a9   :  { %v641_v44 = vmul.f32 %v3898_v30, %v637_v43  ;;  %v1082_v43 = vld [vmem:[#allocation2 + $0x1d] ss:$0 sm:$0xff] }
 0x4aa   :  { %3903 = vtanh.f32 %v819_v41  ;;  %v841_v61 = vsel %vm307_vm4, %v840_v60, %v819_v41 }
 0x4ab   :  { %v635_v45 = vpop.permute.xlu0 %634 }
 0x4ac   :  { %v657_v46 = vpop.permute.xlu1 %656  ;;  %v640_v50 = vmul.f32 %v3900_v34, %v635_v45 }
 0x4ad   :  { %v661_v49 = vadd.f32 %v657_v46, %v641_v44 }
 0x4af   :  { %3905 = vtanh.f32 %v661_v49  ;;  %v681_v51 = vrot.slane %v661_v49, 7  ;;  %v655_v52 = vpop.permute.xlu0 %654  ;;  %v921_v49 = vld [vmem:[#allocation2 + $0x2] ss:$0 sm:$0xff] }
 0x4b0   :  { %v660_v53 = vadd.f32 %v655_v52, %v640_v50  ;;  %v922_v52 = vld [vmem:[#allocation2 + $0x12] ss:$0 sm:$0xff] }
 0x4b2   :  { %3907 = vtanh.f32 %v660_v53  ;;  %v4452_v54 = vsel %vm307_vm4, %v681_v51, %v660_v53 }
 0x4b3   :  { %v3902_v55 = vpop.eup %3901 }
 0x4b4   :  { %827 = vrot.lane.b32.xlu1 %v3902_v55, %s4155_s3 }
 0x4b7   :  { %v3904_v57 = vpop.eup %3903 }
 0x4b8   :  { %835 = vperm.xlu1 %3832, %v833_v56   ;;  %825 = vrot.lane.b32.xlu0 %v3904_v57, %s4155_s3 }
 0x4bc   :  { %v3906_v58 = vpop.eup %3905 }
 0x4bd   :  { %668 = vrot.lane.b32.xlu0 %v3906_v58, %s4155_s3 }
 0x4bf   :  { %v3908_v42 = vpop.eup %3907 }
 0x4c0   :  { %666 = vrot.lane.b32.xlu1 %v3908_v42, %s4155_s3 }
 0x4c4   :  { %676 = vperm.xlu1 %3832, %v674_v59  }
 0x4c8   :  { %842 = vrot.lane.b32.xlu1 %v841_v61, %s4157_s30 }
 0x526   :  { %v828_v62 = vpop.permute.xlu1 %827 }
 0x527   :  { %v832_v63 = vmul.f32 %v3894_v1, %v828_v62 }
 0x529   :  { %v848_v2 = vrot.slane %v832_v63, 7 }
 0x52a   :  { %v826_v0 = vpop.permute.xlu0 %825 }
 0x52b   :  { %v831_v5 = vmul.f32 %v3896_v11, %v826_v0 }
 0x52d   :  { %v849_v6 = vsel %vm307_vm4, %v848_v2, %v831_v5 }
 0x52e   :  { %850 = vrot.lane.b32.xlu0 %v849_v6, %s4156_s29 }
 0x52f   :  { %v669_v14 = vpop.permute.xlu0 %668 }
 0x530   :  { %v673_v18 = vmul.f32 %v3898_v30, %v669_v14 }
 0x532   :  { %v689_v31 = vrot.slane %v673_v18, 7 }
 0x533   :  { %v4465_v16 = vpop.permute.xlu1 %835 }
 0x534   :  { %vm837_vm13 = vcmp.eq.s32.totalorder %v4465_v16, 1 }
 0x537   :  { %v667_v27 = vpop.permute.xlu1 %666 }
 0x538   :  { %v672_v32 = vmul.f32 %v3900_v34, %v667_v27 }
 0x53a   :  { %v690_v33 = vsel %vm307_vm4, %v689_v31, %v672_v32 }
 0x53b   :  { %691 = vrot.lane.b32.xlu0 %v690_v33, %s4156_s29 }
 0x53f   :  { %v4489_v30 = vpop.permute.xlu1 %676 }
 0x540   :  { %vm678_vm14 = vcmp.eq.s32.totalorder %v4489_v30, 1 }
 0x543   :  { %v843_v46 = vpop.permute.xlu1 %842 }
 0x5a0   :  { %v4470_v1 = vpop.permute.xlu0 %850 }
 0x5a1   :  { %v4476_v11 = vsel %vm837_vm13, %v4470_v1, %v4410_v29 }
 0x5a2   :  { %3692 = vmatmul.mubr.msk.f32.vlgmr.msra.gmra.mxu1 %vm171_vm8, %v4476_v11 }
 0x5a3   :  { %3706 = vmatpush3.msra.mxu1 %v4280_v19  ;;  %3713 = vmatprep.mubr.msk.f32.mxu1 %vm4154_vm0, %v4152_v3 }
 0x5a4   :  { %3707 = vmatprep.subr.mxu1 %v4152_v3 }
 0x5a5   :  { %3708 = vmatpush3.msra.mxu1 %v4288_v20 }
 0x5a6   :  { %3709 = vmatprep.subr.mxu1 %v4152_v3 }
 0x5a7   :  { %3710 = vmatpush3.msra.mxu1 %v4297_v22 }
 0x5a8   :  { %3711 = vmatprep.subr.mxu1 %v4152_v3 }
 0x5a9   :  { %3712 = vmatpush3.msra.mxu1 %v4305_v23 }
 0x5aa   :  { %3727 = vmatprep.subr.mxu1 %v4152_v3 }
 0x5ad   :  { %v692_v34 = vpop.permute.xlu0 %691 }
 0x5ae   :  { %v4496_v35 = vsel %vm678_vm14, %v692_v34, %v4385_v12  ;;  %v695_v36 = vsel %vm678_vm14, %v692_v34, 0.0 }
 0x5af   :  { %v862_v37 = vrot.slane %v695_v36, %v4380_v10  ;;  %3681 = vmatmul.mubr.msk.f32.vlgmr.msra.gmra.mxu0 %vm171_vm8, %v4496_v35 }
 0x5b0   :  { %3695 = vmatpush3.msra.mxu0 %v4242_v8  ;;  %3702 = vmatprep.mubr.msk.f32.mxu0 %vm4154_vm0, %v4152_v3  ;;  %v1081_v8 = vld [vmem:[#allocation2 + $0xd] ss:$0 sm:$0xff] }
 0x5b1   :  { %v863_v38 = vcombine.high %v862_v37, %v862_v37  ;;  %3696 = vmatprep.subr.mxu0 %v4152_v3  ;;  %v870_v39 = vrot.slane %v862_v37, %v4380_v10 }
 0x5b2   :  { %3697 = vmatpush3.msra.mxu0 %v4247_v9 }
 0x5b3   :  { %3698 = vmatprep.subr.mxu0 %v4152_v3  ;;  %880 = vst.msk [vmem:[#allocation3 + $0x1] sm:$0x1] %vm494_vm9, %v870_v39  ;;  %v877_v12 = vrot.slane %v863_v38, %v4380_v10 }
 0x5b4   :  { %3699 = vmatpush3.msra.mxu0 %v4260_v13 }
 0x5b5   :  { %3700 = vmatprep.subr.mxu0 %v4152_v3  ;;  %881 = vst.msk [vmem:[#allocation3 + $0x9] sm:$0x1] %vm494_vm9, %v877_v12 }
 0x5b6   :  { %3701 = vmatpush3.msra.mxu0 %v4270_v15  ;;  %v4520_v15 = vsel %vm837_vm13, %v843_v46, %v4426_v47 }
 0x5b7   :  { %3716 = vmatprep.subr.mxu0 %v4152_v3  ;;  %v1178_v58 = vrot.slane %v4520_v15, 1 }
 0x662   :  { %v1153_v40 = vpop.f32.mrf.mxu1 }
 0x663   :  { %v1158_v41 = vrot.slane %v1153_v40, 1  ;;  %v1161_v9 = vadd.f32 %v1153_v40, %v1081_v8 }
 0x664   :  { %v3693_v44 = vpop.f32.mrf.mxu1 }
 0x665   :  { %v1162_v45 = vadd.f32 %v1158_v41, %v1082_v43  ;;  %3909 = vtanh.f32 %v1161_v9  ;;  %v3502_v60 = vmul.f32 -1.442695, %v1161_v9 }
 0x667   :  { %3911 = vtanh.f32 %v1162_v45  ;;  %v3503_v59 = vmul.f32 -1.442695, %v1162_v45 }
 0x66f   :  { %v993_v13 = vpop.f32.mrf.mxu0 }
 0x670   :  { %v998_v50 = vrot.slane %v993_v13, 1  ;;  %v1001_v51 = vadd.f32 %v993_v13, %v921_v49 }
 0x671   :  { %v3682_v53 = vpop.f32.mrf.mxu0 }
 0x672   :  { %v3910_v55 = vpop.eup %3909  ;;  %v1002_v56 = vadd.f32 %v998_v50, %v922_v52  ;;  %3913 = vtanh.f32 %v1001_v51  ;;  %v3499_v61 = vmul.f32 -1.442695, %v1001_v51 }
 0x673   :  { %1189 = vrot.lane.b32.xlu1 %v3910_v55, %s4155_s3 }
 0x674   :  { %v3912_v57 = vpop.eup %3911  ;;  %3915 = vtanh.f32 %v1002_v56  ;;  %v3500_v62 = vmul.f32 -1.442695, %v1002_v56 }
 0x675   :  { %1191 = vrot.lane.b32.xlu0 %v3912_v57, %s4155_s3  ;;  %3917 = vpow2.f32 %v3503_v59 }
 0x676   :  { %3919 = vpow2.f32 %v3502_v60 }
 0x677   :  { %1181 = vrot.lane.b32.xlu1 %v1178_v58, %s4155_s3  ;;  %3921 = vpow2.f32 %v3499_v61  ;;  %v1219_v61 = vsel %vm1083_vm15, 1, %v4153_v4 }
 0x678   :  { %3923 = vpow2.f32 %v3500_v62 }
 0x679   :  { %683 = vrot.lane.b32.xlu0 %v4452_v54, %s4157_s30 }
 0x67b   :  { %1179 = vrot.lane.b32.xlu1 %v4520_v15, %s4155_s3 }
 0x67f   :  { %v3914_v47 = vpop.eup %3913 }
 0x680   :  { %1029 = vrot.lane.b32.xlu1 %v3914_v47, %s4155_s3 }
 0x681   :  { %v3916_v42 = vpop.eup %3915 }
 0x682   :  { %1031 = vrot.lane.b32.xlu0 %v3916_v42, %s4155_s3  ;;  %v3918_v63 = vpop.eup %3917 }
 0x683   :  { %v1170_v0 = vadd.f32 1.0, %v3918_v63  ;;  %v3920_v54 = vpop.eup %3919 }
 0x684   :  { %v1169_v2 = vadd.f32 1.0, %v3920_v54  ;;  %v3922_v5 = vpop.eup %3921 }
 0x685   :  { %3925 = vrcp.f32 %v1170_v0  ;;  %v3924_v6 = vpop.eup %3923  ;;  %v1009_v14 = vadd.f32 1.0, %v3922_v5 }
 0x686   :  { %3927 = vrcp.f32 %v1169_v2  ;;  %v1010_v18 = vadd.f32 1.0, %v3924_v6  ;;  %v1059_v2 = vsel %vm923_vm1, 1, %v4153_v4 }
 0x687   :  { %3929 = vrcp.f32 %v1009_v14 }
 0x688   :  { %3931 = vrcp.f32 %v1010_v18 }
 0x692   :  { %v3926_v31 = vpop.eup %3925 }
 0x693   :  { %v3928_v36 = vpop.eup %3927 }
 0x694   :  { %v3930_v40 = vpop.eup %3929 }
 0x695   :  { %v3932_v43 = vpop.eup %3931 }
 0x6e5   :  { %v1190_v27 = vpop.permute.xlu1 %1189 }
 0x6e6   :  { %v1195_v38 = vmul.f32 %v3928_v36, %v1190_v27 }
 0x6e7   :  { %v1192_v32 = vpop.permute.xlu0 %1191 }
 0x6e8   :  { %v1196_v33 = vmul.f32 %v3926_v31, %v1192_v32 }
 0x6e9   :  { %v1182_v34 = vpop.permute.xlu1 %1181 }
 0x6ea   :  { %1201 = vrot.lane.b32.xlu0 %v1196_v33, %s4155_s3 }
 0x6eb   :  { %v684_v37 = vpop.permute.xlu0 %683 }
 0x6ec   :  { %v4536_v39 = vsel %vm678_vm14, %v684_v37, %v4441_v17  ;;  %v1186_v17 = vmul.f32 %v3926_v31, %v1182_v34 }
 0x6ed   :  { %v1180_v12 = vpop.permute.xlu1 %1179  ;;  %v1018_v8 = vrot.slane %v4536_v39, 1 }
 0x6ee   :  { %1199 = vrot.lane.b32.xlu0 %v1195_v38, %s4155_s3  ;;  %v1185_v13 = vmul.f32 %v3928_v36, %v1180_v12 }
 0x6ef   :  { %1021 = vrot.lane.b32.xlu1 %v1018_v8, %s4155_s3 }
 0x6f2   :  { %v1030_v41 = vpop.permute.xlu1 %1029  ;;  %1019 = vrot.lane.b32.xlu0 %v4536_v39, %s4155_s3 }
 0x6f3   :  { %v1035_v9 = vmul.f32 %v3930_v40, %v1030_v41 }
 0x6f4   :  { %v1032_v44 = vpop.permute.xlu0 %1031 }
 0x6f5   :  { %v1036_v45 = vmul.f32 %v3932_v43, %v1032_v44 }
 0x6f6   :  { %1039 = vrot.lane.b32.xlu0 %v1035_v9, %s4155_s3 }
 0x6f7   :  { %1041 = vrot.lane.b32.xlu1 %v1036_v45, %s4155_s3  ;;  %v4611_v45 = vld [vmem:[%s5195_s4 + $0x10] sm:$0xff] }
 0x75c   :  { %v1202_v46 = vpop.permute.xlu0 %1201 }
 0x75d   :  { %v1206_v49 = vadd.f32 %v1202_v46, %v1186_v17  ;;  %v4620_v46 = vld [vmem:[%s5195_s4 + $0x8] sm:$0xff] }
 0x75f   :  { %3933 = vtanh.f32 %v1206_v49  ;;  %v1226_v5 = vrot.slane %v1206_v49, 7  ;;  %v4628_v49 = vld [vmem:[%s5195_s4] sm:$0xff] }
 0x760   :  { %v1200_v50 = vpop.permute.xlu0 %1199 }
 0x761   :  { %v1205_v51 = vadd.f32 %v1200_v50, %v1185_v13  ;;  %v1022_v53 = vpop.permute.xlu1 %1021  ;;  %v1467_v13 = vld [vmem:[#allocation2 + $0xc] ss:$0 sm:$0xff] }
 0x762   :  { %v1026_v56 = vmul.f32 %v3932_v43, %v1022_v53  ;;  %v1468_v53 = vld [vmem:[#allocation2 + $0x1c] ss:$0 sm:$0xff] }
 0x763   :  { %3935 = vtanh.f32 %v1205_v51  ;;  %v1227_v6 = vsel %vm307_vm4, %v1226_v5, %v1205_v51 }
 0x764   :  { %v1020_v52 = vpop.permute.xlu0 %1019 }
 0x765   :  { %v1025_v55 = vmul.f32 %v3930_v40, %v1020_v52 }
 0x768   :  { %v1040_v57 = vpop.permute.xlu0 %1039 }
 0x769   :  { %v1045_v58 = vadd.f32 %v1040_v57, %v1025_v55  ;;  %v1042_v47 = vpop.permute.xlu1 %1041 }
 0x76a   :  { %v1046_v42 = vadd.f32 %v1042_v47, %v1026_v56 }
 0x76b   :  { %3937 = vtanh.f32 %v1045_v58 }
 0x76c   :  { %v3934_v59 = vpop.eup %3933  ;;  %3939 = vtanh.f32 %v1046_v42  ;;  %v1066_v60 = vrot.slane %v1046_v42, 7 }
 0x76d   :  { %1213 = vrot.lane.b32.xlu1 %v3934_v59, %s4155_s3 }
 0x76e   :  { %v4549_v62 = vsel %vm307_vm4, %v1066_v60, %v1045_v58  ;;  %v1307_v58 = vld [vmem:[#allocation2 + $0x3] ss:$0 sm:$0xff]  ;;  %v1308_v60 = vld [vmem:[#allocation2 + $0x13] ss:$0 sm:$0xff] }
 0x770   :  { %v3936_v63 = vpop.eup %3935 }
 0x771   :  { %1221 = vperm.xlu1 %3832, %v1219_v61   ;;  %1211 = vrot.lane.b32.xlu0 %v3936_v63, %s4155_s3 }
 0x778   :  { %v3938_v0 = vpop.eup %3937 }
 0x779   :  { %v3940_v54 = vpop.eup %3939  ;;  %1051 = vrot.lane.b32.xlu1 %v3938_v0, %s4155_s3 }
 0x77a   :  { %1053 = vrot.lane.b32.xlu0 %v3940_v54, %s4155_s3 }
 0x77d   :  { %1061 = vperm.xlu1 %3832, %v1059_v2  }
 0x781   :  { %1228 = vrot.lane.b32.xlu1 %v1227_v6, %s4157_s30 }
 0x7df   :  { %v1214_v14 = vpop.permute.xlu1 %1213 }
 0x7e0   :  { %v1218_v18 = vmul.f32 %v3926_v31, %v1214_v14 }
 0x7e2   :  { %v1234_v32 = vrot.slane %v1218_v18, 7 }
 0x7e3   :  { %v1212_v27 = vpop.permute.xlu0 %1211 }
 0x7e4   :  { %v1217_v33 = vmul.f32 %v3928_v36, %v1212_v27 }
 0x7e6   :  { %v1235_v34 = vsel %vm307_vm4, %v1234_v32, %v1217_v33 }
 0x7e7   :  { %1236 = vrot.lane.b32.xlu0 %v1235_v34, %s4156_s29 }
 0x7ec   :  { %v1054_v37 = vpop.permute.xlu0 %1053  ;;  %v4560_v38 = vpop.permute.xlu1 %1221 }
 0x7ed   :  { %v1058_v12 = vmul.f32 %v3932_v43, %v1054_v37  ;;  %vm1223_vm2 = vcmp.eq.s32.totalorder %v4560_v38, 1 }
 0x7ef   :  { %v1074_v41 = vrot.slane %v1058_v12, 7 }
 0x7f0   :  { %v1052_v8 = vpop.permute.xlu1 %1051 }
 0x7f1   :  { %v1057_v9 = vmul.f32 %v3930_v40, %v1052_v8 }
 0x7f3   :  { %v1075_v44 = vsel %vm307_vm4, %v1074_v41, %v1057_v9 }
 0x7f4   :  { %1076 = vrot.lane.b32.xlu0 %v1075_v44, %s4156_s29 }
 0x859   :  { %v4565_v31 = vpop.permute.xlu0 %1236 }
 0x85a   :  { %v4571_v36 = vsel %vm1223_vm2, %v4565_v31, %v4476_v11  ;;  %v4584_v11 = vpop.permute.xlu1 %1061 }
 0x85b   :  { %3714 = vmatmul.mubr.msk.f32.vlgmr.msra.gmra.mxu1 %vm171_vm8, %v4571_v36  ;;  %vm1063_vm5 = vcmp.eq.s32.totalorder %v4584_v11, 1 }
 0x85c   :  { %3728 = vmatpush3.msra.mxu1 %v4280_v19  ;;  %3735 = vmatprep.mubr.msk.f32.mxu1 %vm4154_vm0, %v4152_v3 }
 0x85d   :  { %3729 = vmatprep.subr.mxu1 %v4152_v3 }
 0x85e   :  { %3730 = vmatpush3.msra.mxu1 %v4288_v20  ;;  %v1229_v57 = vpop.permute.xlu1 %1228 }
 0x85f   :  { %3731 = vmatprep.subr.mxu1 %v4152_v3  ;;  %v4635_v0 = vsel %vm1223_vm2, %v1229_v57, %v4520_v15 }
 0x860   :  { %3732 = vmatpush3.msra.mxu1 %v4297_v22  ;;  %v1564_v5 = vrot.slane %v4635_v0, 1 }
 0x861   :  { %3733 = vmatprep.subr.mxu1 %v4152_v3 }
 0x862   :  { %3734 = vmatpush3.msra.mxu1 %v4305_v23  ;;  %v4601_v23 = vld [vmem:[%s5195_s4 + $0x18] sm:$0xff] }
 0x863   :  { %3749 = vmatprep.subr.mxu1 %v4152_v3 }
 0x866   :  { %v1077_v19 = vpop.permute.xlu0 %1076 }
 0x867   :  { %v4591_v40 = vsel %vm1063_vm5, %v1077_v19, %v4496_v35  ;;  %v1080_v20 = vsel %vm1063_vm5, %v1077_v19, 0.0 }
 0x868   :  { %v1248_v22 = vrot.slane %v1080_v20, %v4380_v10  ;;  %3703 = vmatmul.mubr.msk.f32.vlgmr.msra.gmra.mxu0 %vm171_vm8, %v4591_v40 }
 0x869   :  { %3717 = vmatpush3.msra.mxu0 %v4601_v23  ;;  %3724 = vmatprep.mubr.msk.f32.mxu0 %vm4154_vm0, %v4152_v3 }
 0x86a   :  { %v1249_v35 = vcombine.high %v1248_v22, %v1248_v22  ;;  %3718 = vmatprep.subr.mxu0 %v4152_v3  ;;  %v1256_v43 = vrot.slane %v1248_v22, %v4380_v10 }
 0x86b   :  { %3719 = vmatpush3.msra.mxu0 %v4611_v45 }
 0x86c   :  { %3720 = vmatprep.subr.mxu0 %v4152_v3  ;;  %1266 = vst.msk [vmem:[#allocation3 + $0x2] sm:$0x1] %vm494_vm9, %v1256_v43  ;;  %v1263_v17 = vrot.slane %v1249_v35, %v4380_v10 }
 0x86d   :  { %3721 = vmatpush3.msra.mxu0 %v4620_v46 }
 0x86e   :  { %3722 = vmatprep.subr.mxu0 %v4152_v3  ;;  %1267 = vst.msk [vmem:[#allocation3 + $0xa] sm:$0x1] %vm494_vm9, %v1263_v17 }
 0x86f   :  { %3723 = vmatpush3.msra.mxu0 %v4628_v49 }
 0x870   :  { %3738 = vmatprep.subr.mxu0 %v4152_v3 }
 0x91b   :  { %v1539_v50 = vpop.f32.mrf.mxu1 }
 0x91c   :  { %v1544_v51 = vrot.slane %v1539_v50, 1  ;;  %v1547_v52 = vadd.f32 %v1539_v50, %v1467_v13 }
 0x91d   :  { %v3715_v55 = vpop.f32.mrf.mxu1 }
 0x91e   :  { %v1548_v56 = vadd.f32 %v1544_v51, %v1468_v53  ;;  %3941 = vtanh.f32 %v1547_v52  ;;  %v3508_v18 = vmul.f32 -1.442695, %v1547_v52 }
 0x920   :  { %3943 = vtanh.f32 %v1548_v56  ;;  %v3509_v14 = vmul.f32 -1.442695, %v1548_v56 }
 0x928   :  { %v1379_v47 = vpop.f32.mrf.mxu0 }
 0x929   :  { %v1384_v42 = vrot.slane %v1379_v47, 1  ;;  %v1387_v59 = vadd.f32 %v1379_v47, %v1307_v58 }
 0x92a   :  { %v3704_v61 = vpop.f32.mrf.mxu0 }
 0x92b   :  { %v3942_v63 = vpop.eup %3941  ;;  %v1388_v54 = vadd.f32 %v1384_v42, %v1308_v60  ;;  %3945 = vtanh.f32 %v1387_v59  ;;  %v3505_v27 = vmul.f32 -1.442695, %v1387_v59 }
 0x92c   :  { %1575 = vrot.lane.b32.xlu1 %v3942_v63, %s4155_s3 }
 0x92d   :  { %v3944_v2 = vpop.eup %3943  ;;  %3947 = vtanh.f32 %v1388_v54  ;;  %v3506_v32 = vmul.f32 -1.442695, %v1388_v54 }
 0x92e   :  { %1577 = vrot.lane.b32.xlu0 %v3944_v2, %s4155_s3  ;;  %3949 = vpow2.f32 %v3509_v14 }
 0x92f   :  { %3951 = vpow2.f32 %v3508_v18 }
 0x930   :  { %1567 = vrot.lane.b32.xlu1 %v1564_v5, %s4155_s3  ;;  %3953 = vpow2.f32 %v3505_v27 }
 0x931   :  { %3955 = vpow2.f32 %v3506_v32 }
 0x932   :  { %1068 = vrot.lane.b32.xlu0 %v4549_v62, %s4157_s30 }
 0x934   :  { %1565 = vrot.lane.b32.xlu1 %v4635_v0, %s4155_s3 }
 0x938   :  { %v3946_v15 = vpop.eup %3945 }
 0x939   :  { %1415 = vrot.lane.b32.xlu1 %v3946_v15, %s4155_s3 }
 0x93a   :  { %v3948_v6 = vpop.eup %3947 }
 0x93b   :  { %1417 = vrot.lane.b32.xlu0 %v3948_v6, %s4155_s3  ;;  %v3950_v33 = vpop.eup %3949 }
 0x93c   :  { %v1556_v34 = vadd.f32 1.0, %v3950_v33  ;;  %v3952_v62 = vpop.eup %3951 }
 0x93d   :  { %v1555_v37 = vadd.f32 1.0, %v3952_v62  ;;  %v3954_v12 = vpop.eup %3953 }
 0x93e   :  { %3957 = vrcp.f32 %v1556_v34  ;;  %v3956_v8 = vpop.eup %3955  ;;  %v1395_v41 = vadd.f32 1.0, %v3954_v12  ;;  %v1605_v34 = vsel %vm1469_vm6, 1, %v4153_v4 }
 0x93f   :  { %3959 = vrcp.f32 %v1555_v37  ;;  %v1396_v9 = vadd.f32 1.0, %v3956_v8 }
 0x940   :  { %3961 = vrcp.f32 %v1395_v41  ;;  %v1445_v41 = vsel %vm1309_vm11, 1, %v4153_v4 }
 0x941   :  { %3963 = vrcp.f32 %v1396_v9 }
 0x94b   :  { %v3958_v19 = vpop.eup %3957 }
 0x94c   :  { %v3960_v43 = vpop.eup %3959 }
 0x94d   :  { %v3962_v53 = vpop.eup %3961 }
 0x94e   :  { %v3964_v57 = vpop.eup %3963 }
 0x99e   :  { %v1576_v44 = vpop.permute.xlu1 %1575 }
 0x99f   :  { %v1581_v13 = vmul.f32 %v3960_v43, %v1576_v44 }
 0x9a0   :  { %v1578_v20 = vpop.permute.xlu0 %1577 }
 0x9a1   :  { %v1582_v22 = vmul.f32 %v3958_v19, %v1578_v20 }
 0x9a2   :  { %v1568_v35 = vpop.permute.xlu1 %1567 }
 0x9a3   :  { %1587 = vrot.lane.b32.xlu0 %v1582_v22, %s4155_s3 }
 0x9a4   :  { %v1069_v17 = vpop.permute.xlu0 %1068 }
 0x9a5   :  { %v4651_v50 = vsel %vm1063_vm5, %v1069_v17, %v4536_v39  ;;  %v1572_v39 = vmul.f32 %v3958_v19, %v1568_v35 }
 0x9a6   :  { %v1566_v51 = vpop.permute.xlu1 %1565  ;;  %v1404_v52 = vrot.slane %v4651_v50, 1 }
 0x9a7   :  { %1585 = vrot.lane.b32.xlu0 %v1581_v13, %s4155_s3  ;;  %v1571_v60 = vmul.f32 %v3960_v43, %v1566_v51 }
 0x9a8   :  { %1407 = vrot.lane.b32.xlu1 %v1404_v52, %s4155_s3 }
 0x9ab   :  { %v1416_v55 = vpop.permute.xlu1 %1415  ;;  %1405 = vrot.lane.b32.xlu0 %v4651_v50, %s4155_s3 }
 0x9ac   :  { %v1421_v56 = vmul.f32 %v3962_v53, %v1416_v55 }
 0x9ad   :  { %v1418_v58 = vpop.permute.xlu0 %1417 }
 0x9ae   :  { %v1422_v47 = vmul.f32 %v3964_v57, %v1418_v58 }
 0x9af   :  { %1425 = vrot.lane.b32.xlu0 %v1421_v56, %s4155_s3 }
 0x9b0   :  { %1427 = vrot.lane.b32.xlu1 %v1422_v47, %s4155_s3 }
 0xa15   :  { %v1588_v42 = vpop.permute.xlu0 %1587 }
 0xa16   :  { %v1592_v59 = vadd.f32 %v1588_v42, %v1572_v39  ;;  %v4716_v39 = vld [vmem:[%s5196_s5] sm:$0xff] }
 0xa18   :  { %3965 = vtanh.f32 %v1592_v59  ;;  %v1612_v9 = vrot.slane %v1592_v59, 7 }
 0xa19   :  { %v1586_v61 = vpop.permute.xlu0 %1585 }
 0xa1a   :  { %v1591_v63 = vadd.f32 %v1586_v61, %v1571_v60  ;;  %v1408_v2 = vpop.permute.xlu1 %1407 }
 0xa1b   :  { %v1412_v15 = vmul.f32 %v3964_v57, %v1408_v2 }
 0xa1c   :  { %3967 = vtanh.f32 %v1591_v63  ;;  %v1613_v44 = vsel %vm307_vm4, %v1612_v9, %v1591_v63 }
 0xa1d   :  { %v1406_v54 = vpop.permute.xlu0 %1405 }
 0xa1e   :  { %v1411_v5 = vmul.f32 %v3962_v53, %v1406_v54 }
 0xa21   :  { %v1426_v6 = vpop.permute.xlu0 %1425 }
 0xa22   :  { %v1431_v14 = vadd.f32 %v1426_v6, %v1411_v5  ;;  %v1428_v18 = vpop.permute.xlu1 %1427  ;;  %v1847_v5 = vld [vmem:[#allocation2 + $0xb] ss:$0 sm:$0xff] }
 0xa23   :  { %v1432_v27 = vadd.f32 %v1428_v18, %v1412_v15  ;;  %v1848_v18 = vld [vmem:[#allocation2 + $0x1b] ss:$0 sm:$0xff] }
 0xa24   :  { %3969 = vtanh.f32 %v1431_v14 }
 0xa25   :  { %v3966_v32 = vpop.eup %3965  ;;  %3971 = vtanh.f32 %v1432_v27  ;;  %v1452_v33 = vrot.slane %v1432_v27, 7 }
 0xa26   :  { %1599 = vrot.lane.b32.xlu1 %v3966_v32, %s4155_s3 }
 0xa27   :  { %v4664_v62 = vsel %vm307_vm4, %v1452_v33, %v1431_v14 }
 0xa29   :  { %v3968_v37 = vpop.eup %3967 }
 0xa2a   :  { %1607 = vperm.xlu1 %3832, %v1605_v34   ;;  %1597 = vrot.lane.b32.xlu0 %v3968_v37, %s4155_s3  ;;  %v1693_v34 = vld [vmem:[#allocation2 + $0x4] ss:$0 sm:$0xff] }
 0xa31   :  { %v3970_v12 = vpop.eup %3969 }
 0xa32   :  { %v3972_v8 = vpop.eup %3971  ;;  %1437 = vrot.lane.b32.xlu1 %v3970_v12, %s4155_s3 }
 0xa33   :  { %1439 = vrot.lane.b32.xlu0 %v3972_v8, %s4155_s3 }
 0xa36   :  { %1447 = vperm.xlu1 %3832, %v1445_v41   ;;  %v1694_v41 = vld [vmem:[#allocation2 + $0x14] ss:$0 sm:$0xff] }
 0xa3a   :  { %1614 = vrot.lane.b32.xlu1 %v1613_v44, %s4157_s30 }
 0xa98   :  { %v1600_v20 = vpop.permute.xlu1 %1599 }
 0xa99   :  { %v1604_v22 = vmul.f32 %v3958_v19, %v1600_v20 }
 0xa9b   :  { %v1620_v17 = vrot.slane %v1604_v22, 7 }
 0xa9c   :  { %v1598_v35 = vpop.permute.xlu0 %1597 }
 0xa9d   :  { %v1603_v13 = vmul.f32 %v3960_v43, %v1598_v35 }
 0xa9f   :  { %v1621_v48 = vsel %vm307_vm4, %v1620_v17, %v1603_v13 }
 0xaa0   :  { %1622 = vrot.lane.b32.xlu0 %v1621_v48, %s4156_s29 }
 0xaa5   :  { %v1440_v51 = vpop.permute.xlu0 %1439  ;;  %v4675_v52 = vpop.permute.xlu1 %1607 }
 0xaa6   :  { %v1444_v55 = vmul.f32 %v3964_v57, %v1440_v51  ;;  %vm1609_vm12 = vcmp.eq.s32.totalorder %v4675_v52, 1  ;;  %v4709_v57 = vld [vmem:[%s5196_s5 + $0x8] sm:$0xff] }
 0xaa8   :  { %v1460_v56 = vrot.slane %v1444_v55, 7 }
 0xaa9   :  { %v1438_v4 = vpop.permute.xlu1 %1437 }
 0xaaa   :  { %v1443_v58 = vmul.f32 %v3962_v53, %v1438_v4  ;;  %v4693_v53 = vld [vmem:[%s5196_s5 + $0x18] sm:$0xff] }
 0xaac   :  { %v1461_v47 = vsel %vm307_vm4, %v1460_v56, %v1443_v58 }
 0xaad   :  { %1462 = vrot.lane.b32.xlu0 %v1461_v47, %s4156_s29 }
 0xab1   :  { %v4719_v42 = vpop.permute.xlu1 %1447 }
 0xab2   :  { %vm1449_vm15 = vcmp.eq.s32.totalorder %v4719_v42, 1 }
 0xab5   :  { %v1615_v33 = vpop.permute.xlu1 %1614 }
 0xab6   :  { %v4750_v20 = vsel %vm1609_vm12, %v1615_v33, %v4635_v0 }
 0xab7   :  { %v1943_v17 = vrot.slane %v4750_v20, 1 }
 0xb12   :  { %v4680_v19 = vpop.permute.xlu0 %1622 }
 0xb13   :  { %v4686_v43 = vsel %vm1609_vm12, %v4680_v19, %v4571_v36  ;;  %v4702_v36 = vld [vmem:[%s5196_s5 + $0x10] sm:$0xff] }
 0xb14   :  { %3736 = vmatmul.mubr.msk.f32.vlgmr.msra.gmra.mxu1 %vm171_vm8, %v4686_v43 }
 0xb15   :  { %3750 = vmatpush3.msra.mxu1 %v4693_v53  ;;  %3757 = vmatprep.mubr.msk.f32.mxu1 %vm4154_vm0, %v4152_v3 }
 0xb16   :  { %3751 = vmatprep.subr.mxu1 %v4152_v3 }
 0xb17   :  { %3752 = vmatpush3.msra.mxu1 %v4702_v36 }
 0xb18   :  { %3753 = vmatprep.subr.mxu1 %v4152_v3 }
 0xb19   :  { %3754 = vmatpush3.msra.mxu1 %v4709_v57 }
 0xb1a   :  { %3755 = vmatprep.subr.mxu1 %v4152_v3 }
 0xb1b   :  { %3756 = vmatpush3.msra.mxu1 %v4716_v39 }
 0xb1c   :  { %3771 = vmatprep.subr.mxu1 %v4152_v3 }
 0xb1f   :  { %v1463_v59 = vpop.permute.xlu0 %1462 }
 0xb20   :  { %v4726_v60 = vsel %vm1449_vm15, %v1463_v59, %v4591_v40  ;;  %v1466_v61 = vsel %vm1449_vm15, %v1463_v59, 0.0 }
 0xb21   :  { %v1634_v63 = vrot.slane %v1466_v61, %v4380_v10  ;;  %3725 = vmatmul.mubr.msk.f32.vlgmr.msra.gmra.mxu0 %vm171_vm8, %v4726_v60 }
 0xb22   :  { %3739 = vmatpush3.msra.mxu0 %v4601_v23  ;;  %3746 = vmatprep.mubr.msk.f32.mxu0 %vm4154_vm0, %v4152_v3 }
 0xb23   :  { %v1635_v54 = vcombine.high %v1634_v63, %v1634_v63  ;;  %3740 = vmatprep.subr.mxu0 %v4152_v3  ;;  %v1642_v2 = vrot.slane %v1634_v63, %v4380_v10 }
 0xb24   :  { %3741 = vmatpush3.msra.mxu0 %v4611_v45 }
 0xb25   :  { %3742 = vmatprep.subr.mxu0 %v4152_v3  ;;  %1652 = vst.msk [vmem:[#allocation3 + $0x3] sm:$0x1] %vm494_vm9, %v1642_v2  ;;  %v1649_v40 = vrot.slane %v1635_v54, %v4380_v10 }
 0xb26   :  { %3743 = vmatpush3.msra.mxu0 %v4620_v46 }
 0xb27   :  { %3744 = vmatprep.subr.mxu0 %v4152_v3  ;;  %1653 = vst.msk [vmem:[#allocation3 + $0xb] sm:$0x1] %vm494_vm9, %v1649_v40 }
 0xb28   :  { %3745 = vmatpush3.msra.mxu0 %v4628_v49 }
 0xb29   :  { %3760 = vmatprep.subr.mxu0 %v4152_v3 }
 0xbd4   :  { %v1918_v15 = vpop.f32.mrf.mxu1 }
 0xbd5   :  { %v1923_v6 = vrot.slane %v1918_v15, 1  ;;  %v1926_v14 = vadd.f32 %v1918_v15, %v1847_v5 }
 0xbd6   :  { %v3737_v27 = vpop.f32.mrf.mxu1 }
 0xbd7   :  { %v1927_v32 = vadd.f32 %v1923_v6, %v1848_v18  ;;  %3973 = vtanh.f32 %v1926_v14  ;;  %v3514_v51 = vmul.f32 -1.442695, %v1926_v14 }
 0xbd9   :  { %3975 = vtanh.f32 %v1927_v32  ;;  %v3515_v48 = vmul.f32 -1.442695, %v1927_v32 }
 0xbe1   :  { %v1764_v37 = vpop.f32.mrf.mxu0 }
 0xbe2   :  { %v1769_v12 = vrot.slane %v1764_v37, 1  ;;  %v1772_v8 = vadd.f32 %v1764_v37, %v1693_v34 }
 0xbe3   :  { %v3726_v9 = vpop.f32.mrf.mxu0 }
 0xbe4   :  { %v3974_v44 = vpop.eup %3973  ;;  %v1773_v22 = vadd.f32 %v1769_v12, %v1694_v41  ;;  %3977 = vtanh.f32 %v1772_v8  ;;  %v3511_v55 = vmul.f32 -1.442695, %v1772_v8 }
 0xbe5   :  { %1954 = vrot.lane.b32.xlu1 %v3974_v44, %s4155_s3 }
 0xbe6   :  { %v3976_v35 = vpop.eup %3975  ;;  %3979 = vtanh.f32 %v1773_v22  ;;  %v3512_v4 = vmul.f32 -1.442695, %v1773_v22 }
 0xbe7   :  { %1956 = vrot.lane.b32.xlu0 %v3976_v35, %s4155_s3  ;;  %3981 = vpow2.f32 %v3515_v48 }
 0xbe8   :  { %3983 = vpow2.f32 %v3514_v51 }
 0xbe9   :  { %1946 = vrot.lane.b32.xlu1 %v1943_v17, %s4155_s3  ;;  %3985 = vpow2.f32 %v3511_v55 }
 0xbea   :  { %3987 = vpow2.f32 %v3512_v4 }
 0xbeb   :  { %1454 = vrot.lane.b32.xlu0 %v4664_v62, %s4157_s30 }
 0xbed   :  { %1944 = vrot.lane.b32.xlu1 %v4750_v20, %s4155_s3 }
 0xbf1   :  { %v3978_v0 = vpop.eup %3977 }
 0xbf2   :  { %1800 = vrot.lane.b32.xlu1 %v3978_v0, %s4155_s3 }
 0xbf3   :  { %v3980_v13 = vpop.eup %3979 }
 0xbf4   :  { %1802 = vrot.lane.b32.xlu0 %v3980_v13, %s4155_s3  ;;  %v3982_v56 = vpop.eup %3981 }
 0xbf5   :  { %v1935_v58 = vadd.f32 1.0, %v3982_v56  ;;  %v3984_v62 = vpop.eup %3983 }
 0xbf6   :  { %v1934_v47 = vadd.f32 1.0, %v3984_v62  ;;  %v3986_v59 = vpop.eup %3985 }
 0xbf7   :  { %3989 = vrcp.f32 %v1935_v58  ;;  %v3988_v61 = vpop.eup %3987  ;;  %v1780_v63 = vadd.f32 1.0, %v3986_v59 }
 0xbf8   :  { %3991 = vrcp.f32 %v1934_v47  ;;  %v1781_v54 = vadd.f32 1.0, %v3988_v61 }
 0xbf9   :  { %3993 = vrcp.f32 %v1780_v63 }
 0xbfa   :  { %3995 = vrcp.f32 %v1781_v54 }
 0xc04   :  { %v3990_v40 = vpop.eup %3989 }
 0xc05   :  { %v3992_v14 = vpop.eup %3991 }
 0xc06   :  { %v3994_v37 = vpop.eup %3993 }
 0xc07   :  { %v3996_v41 = vpop.eup %3995 }
 0xc57   :  { %v1955_v2 = vpop.permute.xlu1 %1954 }
 0xc58   :  { %v1960_v27 = vmul.f32 %v3992_v14, %v1955_v2 }
 0xc59   :  { %v1957_v5 = vpop.permute.xlu0 %1956 }
 0xc5a   :  { %v1961_v15 = vmul.f32 %v3990_v40, %v1957_v5 }
 0xc5b   :  { %v1947_v6 = vpop.permute.xlu1 %1946 }
 0xc5c   :  { %1966 = vrot.lane.b32.xlu0 %v1961_v15, %s4155_s3 }
 0xc5d   :  { %v1455_v18 = vpop.permute.xlu0 %1454 }
 0xc5e   :  { %v4766_v32 = vsel %vm1449_vm15, %v1455_v18, %v4651_v50  ;;  %v1951_v50 = vmul.f32 %v3990_v40, %v1947_v6 }
 0xc5f   :  { %v1945_v33 = vpop.permute.xlu1 %1944  ;;  %v1789_v34 = vrot.slane %v4766_v32, 1 }
 0xc60   :  { %1964 = vrot.lane.b32.xlu0 %v1960_v27, %s4155_s3  ;;  %v1950_v17 = vmul.f32 %v3992_v14, %v1945_v33 }
 0xc61   :  { %1792 = vrot.lane.b32.xlu1 %v1789_v34, %s4155_s3 }
 0xc64   :  { %v1801_v12 = vpop.permute.xlu1 %1800  ;;  %1790 = vrot.lane.b32.xlu0 %v4766_v32, %s4155_s3 }
 0xc65   :  { %v1806_v8 = vmul.f32 %v3994_v37, %v1801_v12 }
 0xc66   :  { %v1803_v9 = vpop.permute.xlu0 %1802 }
 0xc67   :  { %v1807_v44 = vmul.f32 %v3996_v41, %v1803_v9 }
 0xc68   :  { %1810 = vrot.lane.b32.xlu0 %v1806_v8, %s4155_s3 }
 0xc69   :  { %1812 = vrot.lane.b32.xlu1 %v1807_v44, %s4155_s3 }
 0xcce   :  { %v1967_v22 = vpop.permute.xlu0 %1966 }
 0xccf   :  { %v1971_v35 = vadd.f32 %v1967_v22, %v1951_v50 }
 0xcd1   :  { %3997 = vtanh.f32 %v1971_v35  ;;  %v1986_v13 = vrot.slane %v1971_v35, 7 }
 0xcd2   :  { %v1965_v0 = vpop.permute.xlu0 %1964 }
 0xcd3   :  { %v1970_v48 = vadd.f32 %v1965_v0, %v1950_v17  ;;  %v1793_v4 = vpop.permute.xlu1 %1792 }
 0xcd4   :  { %v1797_v58 = vmul.f32 %v3996_v41, %v1793_v4  ;;  %v2067_v4 = vld [vmem:[#allocation2 + $0x5] ss:$0 sm:$0xff] }
 0xcd5   :  { %3999 = vtanh.f32 %v1970_v48  ;;  %v1987_v51 = vsel %vm307_vm4, %v1986_v13, %v1970_v48  ;;  %v2222_v48 = vld [vmem:[#allocation2 + $0x1a] ss:$0 sm:$0xff] }
 0xcd6   :  { %v1791_v55 = vpop.permute.xlu0 %1790 }
 0xcd7   :  { %v1796_v56 = vmul.f32 %v3994_v37, %v1791_v55 }
 0xcda   :  { %v1811_v62 = vpop.permute.xlu0 %1810 }
 0xcdb   :  { %v1816_v47 = vadd.f32 %v1811_v62, %v1796_v56  ;;  %v1813_v59 = vpop.permute.xlu1 %1812 }
 0xcdc   :  { %v1817_v61 = vadd.f32 %v1813_v59, %v1797_v58  ;;  %v2068_v59 = vld [vmem:[#allocation2 + $0x15] ss:$0 sm:$0xff] }
 0xcdd   :  { %4001 = vtanh.f32 %v1816_v47 }
 0xcde   :  { %v3998_v63 = vpop.eup %3997  ;;  %4003 = vtanh.f32 %v1817_v61  ;;  %v1832_v54 = vrot.slane %v1817_v61, 7 }
 0xcdf   :  { %1978 = vrot.lane.b32.xlu1 %v3998_v63, %s4155_s3 }
 0xce0   :  { %v4778_v2 = vsel %vm307_vm4, %v1832_v54, %v1816_v47 }
 0xce2   :  { %v4000_v5 = vpop.eup %3999 }
 0xce3   :  { %1976 = vrot.lane.b32.xlu0 %v4000_v5, %s4155_s3 }
 0xcea   :  { %v4002_v15 = vpop.eup %4001 }
 0xceb   :  { %v4004_v6 = vpop.eup %4003  ;;  %1822 = vrot.lane.b32.xlu0 %v4002_v15, %s4155_s3 }
 0xcec   :  { %1824 = vrot.lane.b32.xlu1 %v4004_v6, %s4155_s3 }
 0xd51   :  { %v1979_v18 = vpop.permute.xlu1 %1978 }
 0xd52   :  { %v1983_v27 = vmul.f32 %v3990_v40, %v1979_v18 }
 0xd54   :  { %v1994_v34 = vrot.slane %v1983_v27, 7 }
 0xd55   :  { %v1977_v33 = vpop.permute.xlu0 %1976 }
 0xd56   :  { %v1982_v12 = vmul.f32 %v3992_v14, %v1977_v33 }
 0xd58   :  { %v1995_v8 = vsel %vm307_vm4, %v1994_v34, %v1982_v12 }
 0xd59   :  { %1996 = vrot.lane.b32.xlu1 %v1995_v8, %s4156_s29 }
 0xd5d   :  { %1988 = vrot.lane.b32.xlu1 %v1987_v51, %s4157_s30  ;;  %v1823_v9 = vpop.permute.xlu0 %1822 }
 0xd5e   :  { %v1825_v44 = vpop.permute.xlu1 %1824  ;;  %v1828_v22 = vmul.f32 %v3994_v37, %v1823_v9 }
 0xd5f   :  { %v1829_v50 = vmul.f32 %v3996_v41, %v1825_v44 }
 0xd61   :  { %v1840_v35 = vrot.slane %v1829_v50, 7 }
 0xd63   :  { %v1841_v17 = vsel %vm307_vm4, %v1840_v35, %v1828_v22 }
 0xd64   :  { %1842 = vrot.lane.b32.xlu0 %v1841_v17, %s4156_s29 }
 0xdcb   :  { %v4788_v0 = vpop.permute.xlu1 %1996 }
 0xdcc   :  { %v4794_v40 = vsel %vm1449_vm15, %v4788_v0, %v4686_v43 }
 0xdcd   :  { %3758 = vmatmul.mubr.msk.f32.vlgmr.msra.gmra.mxu1 %vm171_vm8, %v4794_v40 }
 0xdce   :  { %3772 = vmatpush3.msra.mxu1 %v4693_v53  ;;  %3779 = vmatprep.mubr.msk.f32.mxu1 %vm4154_vm0, %v4152_v3 }
 0xdcf   :  { %3773 = vmatprep.subr.mxu1 %v4152_v3  ;;  %v1989_v47 = vpop.permute.xlu1 %1988 }
 0xdd0   :  { %3774 = vmatpush3.msra.mxu1 %v4702_v36  ;;  %v4831_v5 = vsel %vm1449_vm15, %v1989_v47, %v4750_v20 }
 0xdd1   :  { %3775 = vmatprep.subr.mxu1 %v4152_v3  ;;  %v2317_v6 = vrot.slane %v4831_v5, 1 }
 0xdd2   :  { %3776 = vmatpush3.msra.mxu1 %v4709_v57 }
 0xdd3   :  { %3777 = vmatprep.subr.mxu1 %v4152_v3 }
 0xdd4   :  { %3778 = vmatpush3.msra.mxu1 %v4716_v39 }
 0xdd5   :  { %3793 = vmatprep.subr.mxu1 %v4152_v3 }
 0xdd6   :  { %v4808_v43 = vpop.permute.xlu0 %1842 }
 0xdd7   :  { %v4814_v14 = vsel %vm1609_vm12, %v4808_v43, %v4726_v60  ;;  %v2221_v60 = vld [vmem:[#allocation2 + $0xa] ss:$0 sm:$0xff] }
 0xdd8   :  { %3747 = vmatmul.mubr.msk.f32.vlgmr.msra.gmra.mxu0 %vm171_vm8, %v4814_v14 }
 0xdd9   :  { %3761 = vmatpush3.msra.mxu0 %v4601_v23  ;;  %3768 = vmatprep.mubr.msk.f32.mxu0 %vm4154_vm0, %v4152_v3 }
 0xdda   :  { %3762 = vmatprep.subr.mxu0 %v4152_v3 }
 0xddb   :  { %3763 = vmatpush3.msra.mxu0 %v4611_v45 }
 0xddc   :  { %3764 = vmatprep.subr.mxu0 %v4152_v3 }
 0xddd   :  { %3765 = vmatpush3.msra.mxu0 %v4620_v46 }
 0xdde   :  { %3766 = vmatprep.subr.mxu0 %v4152_v3 }
 0xddf   :  { %3767 = vmatpush3.msra.mxu0 %v4628_v49 }
 0xde0   :  { %3782 = vmatprep.subr.mxu0 %v4152_v3 }
 0xe8d   :  { %v2292_v37 = vpop.f32.mrf.mxu1 }
 0xe8e   :  { %v2297_v41 = vrot.slane %v2292_v37, 1  ;;  %v2300_v13 = vadd.f32 %v2292_v37, %v2221_v60 }
 0xe8f   :  { %v3759_v51 = vpop.f32.mrf.mxu1 }
 0xe90   :  { %v2301_v55 = vadd.f32 %v2297_v41, %v2222_v48  ;;  %4005 = vtanh.f32 %v2300_v13  ;;  %v3520_v33 = vmul.f32 -1.442695, %v2300_v13 }
 0xe92   :  { %4007 = vtanh.f32 %v2301_v55  ;;  %v3521_v27 = vmul.f32 -1.442695, %v2301_v55 }
 0xe98   :  { %v2138_v56 = vpop.f32.mrf.mxu0 }
 0xe99   :  { %v2143_v58 = vrot.slane %v2138_v56, 1  ;;  %v2146_v62 = vadd.f32 %v2138_v56, %v2067_v4 }
 0xe9a   :  { %v3748_v61 = vpop.f32.mrf.mxu0 }
 0xe9b   :  { %v2147_v63 = vadd.f32 %v2143_v58, %v2068_v59  ;;  %4009 = vtanh.f32 %v2146_v62  ;;  %v3517_v12 = vmul.f32 -1.442695, %v2146_v62 }
 0xe9d   :  { %v4006_v54 = vpop.eup %4005  ;;  %4011 = vtanh.f32 %v2147_v63  ;;  %v3518_v34 = vmul.f32 -1.442695, %v2147_v63 }
 0xe9e   :  { %2328 = vrot.lane.b32.xlu1 %v4006_v54, %s4155_s3  ;;  %4013 = vpow2.f32 %v3521_v27 }
 0xe9f   :  { %v4008_v15 = vpop.eup %4007  ;;  %4015 = vpow2.f32 %v3520_v33 }
 0xea0   :  { %2330 = vrot.lane.b32.xlu0 %v4008_v15, %s4155_s3  ;;  %4017 = vpow2.f32 %v3518_v34 }
 0xea1   :  { %4019 = vpow2.f32 %v3517_v12 }
 0xea2   :  { %2320 = vrot.lane.b32.xlu1 %v2317_v6, %s4155_s3 }
 0xea4   :  { %1834 = vrot.lane.b32.xlu0 %v4778_v2, %s4157_s30 }
 0xea6   :  { %2318 = vrot.lane.b32.xlu1 %v4831_v5, %s4155_s3 }
 0xea8   :  { %v4010_v18 = vpop.eup %4009 }
 0xeaa   :  { %2174 = vrot.lane.b32.xlu1 %v4010_v18, %s4155_s3  ;;  %v4012_v20 = vpop.eup %4011 }
 0xeab   :  { %2176 = vrot.lane.b32.xlu0 %v4012_v20, %s4155_s3  ;;  %v4014_v8 = vpop.eup %4013 }
 0xeac   :  { %v2309_v9 = vadd.f32 1.0, %v4014_v8  ;;  %v4016_v2 = vpop.eup %4015 }
 0xead   :  { %v2308_v44 = vadd.f32 1.0, %v4016_v2  ;;  %v4018_v50 = vpop.eup %4017 }
 0xeae   :  { %4021 = vrcp.f32 %v2309_v9  ;;  %v4020_v22 = vpop.eup %4019  ;;  %v2155_v35 = vadd.f32 1.0, %v4018_v50 }
 0xeaf   :  { %4023 = vrcp.f32 %v2308_v44  ;;  %v2154_v17 = vadd.f32 1.0, %v4020_v22 }
 0xeb0   :  { %4025 = vrcp.f32 %v2155_v35 }
 0xeb1   :  { %4027 = vrcp.f32 %v2154_v17 }
 0xebb   :  { %v4022_v37 = vpop.eup %4021 }
 0xebc   :  { %v4024_v51 = vpop.eup %4023 }
 0xebd   :  { %v4026_v59 = vpop.eup %4025 }
 0xebe   :  { %v4028_v63 = vpop.eup %4027 }
 0xf10   :  { %v2329_v60 = vpop.permute.xlu1 %2328 }
 0xf11   :  { %v2334_v4 = vmul.f32 %v4024_v51, %v2329_v60 }
 0xf12   :  { %v2331_v41 = vpop.permute.xlu0 %2330 }
 0xf13   :  { %v2335_v13 = vmul.f32 %v4022_v37, %v2331_v41 }
 0xf14   :  { %v2321_v48 = vpop.permute.xlu1 %2320 }
 0xf15   :  { %2340 = vrot.lane.b32.xlu0 %v2335_v13, %s4155_s3 }
 0xf16   :  { %v1835_v55 = vpop.permute.xlu0 %1834 }
 0xf17   :  { %v4847_v56 = vsel %vm1609_vm12, %v1835_v55, %v4766_v32  ;;  %v2325_v32 = vmul.f32 %v4022_v37, %v2321_v48 }
 0xf18   :  { %v2319_v58 = vpop.permute.xlu1 %2318  ;;  %v2163_v62 = vrot.slane %v4847_v56, 1 }
 0xf19   :  { %2338 = vrot.lane.b32.xlu0 %v2334_v4, %s4155_s3  ;;  %v2324_v20 = vmul.f32 %v4024_v51, %v2319_v58 }
 0xf1a   :  { %2166 = vrot.lane.b32.xlu1 %v2163_v62, %s4155_s3 }
 0xf1c   :  { %v2175_v47 = vpop.permute.xlu1 %2174 }
 0xf1d   :  { %v2177_v61 = vpop.permute.xlu0 %2176  ;;  %2164 = vrot.lane.b32.xlu0 %v4847_v56, %s4155_s3  ;;  %v2180_v15 = vmul.f32 %v4028_v63, %v2175_v47 }
 0xf1e   :  { %v2181_v54 = vmul.f32 %v4026_v59, %v2177_v61 }
 0xf20   :  { %2186 = vrot.lane.b32.xlu1 %v2181_v54, %s4155_s3 }
 0xf21   :  { %2184 = vrot.lane.b32.xlu0 %v2180_v15, %s4155_s3 }
 0xf87   :  { %v2341_v6 = vpop.permute.xlu0 %2340 }
 0xf88   :  { %v2345_v18 = vadd.f32 %v2341_v6, %v2325_v32 }
 0xf8a   :  { %4029 = vtanh.f32 %v2345_v18  ;;  %v2360_v33 = vrot.slane %v2345_v18, 7 }
 0xf8b   :  { %v2339_v27 = vpop.permute.xlu0 %2338 }
 0xf8c   :  { %v2344_v34 = vadd.f32 %v2339_v27, %v2324_v20  ;;  %v2167_v12 = vpop.permute.xlu1 %2166 }
 0xf8d   :  { %v2171_v2 = vmul.f32 %v4026_v59, %v2167_v12 }
 0xf8e   :  { %4031 = vtanh.f32 %v2344_v34  ;;  %v2361_v8 = vsel %vm307_vm4, %v2360_v33, %v2344_v34 }
 0xf8f   :  { %v2165_v9 = vpop.permute.xlu0 %2164 }
 0xf90   :  { %v2170_v44 = vmul.f32 %v4028_v63, %v2165_v9 }
 0xf92   :  { %v2187_v50 = vpop.permute.xlu1 %2186 }
 0xf93   :  { %v2191_v22 = vadd.f32 %v2187_v50, %v2171_v2  ;;  %v2185_v35 = vpop.permute.xlu0 %2184 }
 0xf94   :  { %v2190_v17 = vadd.f32 %v2185_v35, %v2170_v44 }
 0xf95   :  { %4033 = vtanh.f32 %v2191_v22  ;;  %v2206_v60 = vrot.slane %v2191_v22, 7 }
 0xf96   :  { %4035 = vtanh.f32 %v2190_v17 }
 0xf97   :  { %v4030_v41 = vpop.eup %4029  ;;  %v4858_v13 = vsel %vm307_vm4, %v2206_v60, %v2190_v17 }
 0xf98   :  { %2352 = vrot.lane.b32.xlu1 %v4030_v41, %s4155_s3 }
 0xf9b   :  { %v4032_v48 = vpop.eup %4031 }
 0xf9c   :  { %2350 = vrot.lane.b32.xlu0 %v4032_v48, %s4155_s3 }
 0xfa2   :  { %v4034_v55 = vpop.eup %4033 }
 0xfa3   :  { %v4036_v4 = vpop.eup %4035  ;;  %2198 = vrot.lane.b32.xlu1 %v4034_v55, %s4155_s3 }
 0xfa4   :  { %2196 = vrot.lane.b32.xlu0 %v4036_v4, %s4155_s3 }
0x100a   :  { %v2353_v58 = vpop.permute.xlu1 %2352 }
0x100b   :  { %v2357_v62 = vmul.f32 %v4022_v37, %v2353_v58 }
0x100d   :  { %v2368_v61 = vrot.slane %v2357_v62, 7 }
0x100e   :  { %v2351_v47 = vpop.permute.xlu0 %2350 }
0x100f   :  { %v2356_v54 = vmul.f32 %v4024_v51, %v2351_v47 }
0x1011   :  { %v2369_v15 = vsel %vm307_vm4, %v2368_v61, %v2356_v54 }
0x1012   :  { %2370 = vrot.lane.b32.xlu1 %v2369_v15, %s4156_s29 }
0x1015   :  { %v2199_v32 = vpop.permute.xlu1 %2198 }
0x1016   :  { %v2203_v6 = vmul.f32 %v4026_v59, %v2199_v32  ;;  %v2197_v18 = vpop.permute.xlu0 %2196  ;;  %2362 = vrot.lane.b32.xlu1 %v2361_v8, %s4157_s30 }
0x1017   :  { %v2202_v20 = vmul.f32 %v4028_v63, %v2197_v18 }
0x1018   :  { %v2214_v27 = vrot.slane %v2203_v6, 7 }
0x101a   :  { %v2215_v33 = vsel %vm307_vm4, %v2214_v27, %v2202_v20 }
0x101b   :  { %2216 = vrot.lane.b32.xlu0 %v2215_v33, %s4156_s29 }
0x1084   :  { %v4869_v34 = vpop.permute.xlu1 %2370 }
0x1085   :  { %v4875_v37 = vsel %vm1063_vm5, %v4869_v34, %v4794_v40  ;;  %v2374_v42 = vsel %vm1063_vm5, %v4869_v34, 0.0 }
0x1086   :  { %3780 = vmatmul.mubr.msk.f32.vlgmr.msra.gmra.mxu1 %vm171_vm8, %v4875_v37 }
0x1087   :  { %3794 = vmatpush3.msra.mxu1 %v4693_v53  ;;  %3801 = vmatprep.mubr.msk.f32.mxu1 %vm4154_vm0, %v4152_v3 }
0x1088   :  { %3795 = vmatprep.subr.mxu1 %v4152_v3  ;;  %v2363_v44 = vpop.permute.xlu1 %2362 }
0x1089   :  { %3796 = vmatpush3.msra.mxu1 %v4702_v36  ;;  %v2595_v36 = vld [vmem:[#allocation2 + $0x9] ss:$0 sm:$0xff]  ;;  %v4911_v50 = vsel %vm1063_vm5, %v2363_v44, %v4831_v5 }
0x108a   :  { %3797 = vmatprep.subr.mxu1 %v4152_v3  ;;  %v2691_v35 = vrot.slane %v4911_v50, 1 }
0x108b   :  { %3798 = vmatpush3.msra.mxu1 %v4709_v57 }
0x108c   :  { %3799 = vmatprep.subr.mxu1 %v4152_v3 }
0x108d   :  { %v4887_v40 = vpop.permute.xlu0 %2216  ;;  %3800 = vmatpush3.msra.mxu1 %v4716_v39 }
0x108e   :  { %v4894_v53 = vsel %vm1223_vm2, %v4887_v40, %v4814_v14  ;;  %v2596_v14 = vld [vmem:[#allocation2 + $0x19] ss:$0 sm:$0xff] }
0x108f   :  { %3769 = vmatmul.mubr.msk.f32.vlgmr.msra.gmra.mxu0 %vm171_vm8, %v4894_v53 }
0x1090   :  { %3783 = vmatpush3.msra.mxu0 %v4601_v23  ;;  %3790 = vmatprep.mubr.msk.f32.mxu0 %vm4154_vm0, %v4152_v3 }
0x1091   :  { %3784 = vmatprep.subr.mxu0 %v4152_v3 }
0x1092   :  { %3785 = vmatpush3.msra.mxu0 %v4611_v45  ;;  %v2441_v45 = vld [vmem:[#allocation2 + $0x6] ss:$0 sm:$0xff] }
0x1093   :  { %3786 = vmatprep.subr.mxu0 %v4152_v3 }
0x1094   :  { %3787 = vmatpush3.msra.mxu0 %v4620_v46  ;;  %v2442_v46 = vld [vmem:[#allocation2 + $0x16] ss:$0 sm:$0xff] }
0x1095   :  { %3788 = vmatprep.subr.mxu0 %v4152_v3 }
0x1096   :  { %3789 = vmatpush3.msra.mxu0 %v4628_v49 }
0x1097   :  { %3804 = vmatprep.subr.mxu0 %v4152_v3 }
0x1146   :  { %v2666_v57 = vpop.f32.mrf.mxu1 }
0x1147   :  { %v2671_v23 = vrot.slane %v2666_v57, 1  ;;  %v2674_v39 = vadd.f32 %v2666_v57, %v2595_v36 }
0x1148   :  { %v3781_v51 = vpop.f32.mrf.mxu1 }
0x1149   :  { %v2675_v59 = vadd.f32 %v2671_v23, %v2596_v14  ;;  %4037 = vtanh.f32 %v2674_v39  ;;  %v3526_v41 = vmul.f32 -1.442695, %v2674_v39 }
0x114b   :  { %4039 = vtanh.f32 %v2675_v59  ;;  %v3527_v5 = vmul.f32 -1.442695, %v2675_v59 }
0x114f   :  { %v2512_v63 = vpop.f32.mrf.mxu0 }
0x1150   :  { %v2517_v12 = vrot.slane %v2512_v63, 1  ;;  %v2520_v8 = vadd.f32 %v2512_v63, %v2441_v45 }
0x1151   :  { %v3770_v9 = vpop.f32.mrf.mxu0 }
0x1152   :  { %v2521_v2 = vadd.f32 %v2517_v12, %v2442_v46  ;;  %4041 = vtanh.f32 %v2520_v8  ;;  %v3523_v55 = vmul.f32 -1.442695, %v2520_v8 }
0x1154   :  { %4043 = vtanh.f32 %v2521_v2  ;;  %v3524_v48 = vmul.f32 -1.442695, %v2521_v2 }
0x1155   :  { %4045 = vpow2.f32 %v3527_v5 }
0x1156   :  { %v4038_v49 = vpop.eup %4037  ;;  %4047 = vpow2.f32 %v3526_v41 }
0x1157   :  { %2702 = vrot.lane.b32.xlu1 %v4038_v49, %s4155_s3  ;;  %4049 = vpow2.f32 %v3524_v48 }
0x1158   :  { %v4040_v22 = vpop.eup %4039  ;;  %4051 = vpow2.f32 %v3523_v55 }
0x1159   :  { %2704 = vrot.lane.b32.xlu0 %v4040_v22, %s4155_s3 }
0x115b   :  { %2694 = vrot.lane.b32.xlu1 %v2691_v35, %s4155_s3 }
0x115d   :  { %2208 = vrot.lane.b32.xlu0 %v4858_v13, %s4157_s30 }
0x115f   :  { %2692 = vrot.lane.b32.xlu1 %v4911_v50, %s4155_s3  ;;  %v4042_v17 = vpop.eup %4041 }
0x1161   :  { %v4044_v60 = vpop.eup %4043 }
0x1162   :  { %2550 = vrot.lane.b32.xlu0 %v4044_v60, %s4155_s3  ;;  %v4046_v4 = vpop.eup %4045 }
0x1163   :  { %2548 = vrot.lane.b32.xlu1 %v4042_v17, %s4155_s3  ;;  %v2683_v58 = vadd.f32 1.0, %v4046_v4  ;;  %v4048_v13 = vpop.eup %4047 }
0x1164   :  { %v2682_v62 = vadd.f32 1.0, %v4048_v13  ;;  %v4050_v47 = vpop.eup %4049 }
0x1165   :  { %4053 = vrcp.f32 %v2683_v58  ;;  %v4052_v61 = vpop.eup %4051  ;;  %v2529_v54 = vadd.f32 1.0, %v4050_v47 }
0x1166   :  { %4055 = vrcp.f32 %v2682_v62  ;;  %v2528_v15 = vadd.f32 1.0, %v4052_v61 }
0x1167   :  { %4057 = vrcp.f32 %v2529_v54 }
0x1168   :  { %4059 = vrcp.f32 %v2528_v15 }
0x1172   :  { %v4054_v6 = vpop.eup %4053 }
0x1173   :  { %v4056_v33 = vpop.eup %4055 }
0x1174   :  { %v4058_v51 = vpop.eup %4057 }
0x1175   :  { %v4060_v12 = vpop.eup %4059 }
0x11c9   :  { %v2703_v32 = vpop.permute.xlu1 %2702 }
0x11ca   :  { %v2708_v57 = vmul.f32 %v4056_v33, %v2703_v32 }
0x11cb   :  { %v2705_v18 = vpop.permute.xlu0 %2704 }
0x11cc   :  { %v2709_v20 = vmul.f32 %v4054_v6, %v2705_v18 }
0x11cd   :  { %v2695_v27 = vpop.permute.xlu1 %2694 }
0x11ce   :  { %2714 = vrot.lane.b32.xlu0 %v2709_v20, %s4155_s3 }
0x11cf   :  { %v2209_v36 = vpop.permute.xlu0 %2208 }
0x11d0   :  { %v4927_v23 = vsel %vm1223_vm2, %v2209_v36, %v4847_v56  ;;  %v2699_v56 = vmul.f32 %v4054_v6, %v2695_v27 }
0x11d1   :  { %v2693_v39 = vpop.permute.xlu1 %2692  ;;  %v2537_v14 = vrot.slane %v4927_v23, 1 }
0x11d2   :  { %2712 = vrot.lane.b32.xlu0 %v2708_v57, %s4155_s3  ;;  %v2698_v2 = vmul.f32 %v4056_v33, %v2693_v39 }
0x11d3   :  { %2540 = vrot.lane.b32.xlu1 %v2537_v14, %s4155_s3 }
0x11d4   :  { %v2551_v59 = vpop.permute.xlu0 %2550 }
0x11d5   :  { %v2555_v45 = vmul.f32 %v4058_v51, %v2551_v59  ;;  %v2549_v63 = vpop.permute.xlu1 %2548 }
0x11d6   :  { %2538 = vrot.lane.b32.xlu0 %v4927_v23, %s4155_s3  ;;  %v2554_v8 = vmul.f32 %v4060_v12, %v2549_v63 }
0x11d7   :  { %2560 = vrot.lane.b32.xlu1 %v2555_v45, %s4155_s3 }
0x11da   :  { %2558 = vrot.lane.b32.xlu0 %v2554_v8, %s4155_s3 }
0x1240   :  { %v2715_v46 = vpop.permute.xlu0 %2714 }
0x1241   :  { %v2719_v9 = vadd.f32 %v2715_v46, %v2699_v56 }
0x1243   :  { %4061 = vtanh.f32 %v2719_v9  ;;  %v2734_v49 = vrot.slane %v2719_v9, 7 }
0x1244   :  { %v2713_v44 = vpop.permute.xlu0 %2712 }
0x1245   :  { %v2718_v22 = vadd.f32 %v2713_v44, %v2698_v2  ;;  %v2541_v35 = vpop.permute.xlu1 %2540  ;;  %v2961_v44 = vld [vmem:[#allocation2 + $0x18] ss:$0 sm:$0xff] }
0x1246   :  { %v2545_v60 = vmul.f32 %v4058_v51, %v2541_v35 }
0x1247   :  { %4063 = vtanh.f32 %v2718_v22  ;;  %v2735_v17 = vsel %vm307_vm4, %v2734_v49, %v2718_v22 }
0x1248   :  { %v2539_v5 = vpop.permute.xlu0 %2538 }
0x1249   :  { %v2561_v41 = vpop.permute.xlu1 %2560  ;;  %v2544_v55 = vmul.f32 %v4060_v12, %v2539_v5 }
0x124a   :  { %v2565_v48 = vadd.f32 %v2561_v41, %v2545_v60  ;;  %v2816_v60 = vld [vmem:[#allocation2 + $0x17] ss:$0 sm:$0xff] }
0x124c   :  { %4065 = vtanh.f32 %v2565_v48  ;;  %v2580_v4 = vrot.slane %v2565_v48, 7  ;;  %v2559_v58 = vpop.permute.xlu0 %2558 }
0x124d   :  { %v2564_v13 = vadd.f32 %v2559_v58, %v2544_v55 }
0x124f   :  { %4067 = vtanh.f32 %v2564_v13  ;;  %v2581_v62 = vsel %vm307_vm4, %v2580_v4, %v2564_v13 }
0x1250   :  { %v4062_v47 = vpop.eup %4061 }
0x1251   :  { %2726 = vrot.lane.b32.xlu1 %v4062_v47, %s4155_s3 }
0x1254   :  { %v4064_v61 = vpop.eup %4063 }
0x1255   :  { %2724 = vrot.lane.b32.xlu0 %v4064_v61, %s4155_s3 }
0x1259   :  { %v4066_v54 = vpop.eup %4065 }
0x125a   :  { %2572 = vrot.lane.b32.xlu1 %v4066_v54, %s4155_s3 }
0x125c   :  { %v4068_v15 = vpop.eup %4067 }
0x125d   :  { %2570 = vrot.lane.b32.xlu0 %v4068_v15, %s4155_s3 }
0x12c3   :  { %v2727_v32 = vpop.permute.xlu1 %2726 }
0x12c4   :  { %v2731_v18 = vmul.f32 %v4054_v6, %v2727_v32 }
0x12c6   :  { %v2742_v27 = vrot.slane %v2731_v18, 7 }
0x12c7   :  { %v2725_v20 = vpop.permute.xlu0 %2724 }
0x12c8   :  { %v2730_v36 = vmul.f32 %v4056_v33, %v2725_v20 }
0x12ca   :  { %v2743_v57 = vsel %vm307_vm4, %v2742_v27, %v2730_v36 }
0x12cb   :  { %2744 = vrot.lane.b32.xlu1 %v2743_v57, %s4156_s29 }
0x12cc   :  { %v2573_v39 = vpop.permute.xlu1 %2572 }
0x12cd   :  { %v2577_v14 = vmul.f32 %v4058_v51, %v2573_v39 }
0x12cf   :  { %v2588_v59 = vrot.slane %v2577_v14, 7  ;;  %v2571_v45 = vpop.permute.xlu0 %2570  ;;  %2736 = vrot.lane.b32.xlu1 %v2735_v17, %s4157_s30  ;;  %v2815_v17 = vld [vmem:[#allocation2 + $0x7] ss:$0 sm:$0xff] }
0x12d0   :  { %v2576_v63 = vmul.f32 %v4060_v12, %v2571_v45  ;;  %v2960_v12 = vld [vmem:[#allocation2 + $0x8] ss:$0 sm:$0xff] }
0x12d2   :  { %v2589_v8 = vsel %vm307_vm4, %v2588_v59, %v2576_v63 }
0x12d3   :  { %2590 = vrot.lane.b32.xlu0 %v2589_v8, %s4156_s29 }
0x133d   :  { %v4947_v56 = vpop.permute.xlu1 %2744 }
0x133e   :  { %v2747_v6 = vsel %vm678_vm14, %v4947_v56, %v4875_v37  ;;  %v2748_v11 = vsel %vm678_vm14, %v4947_v56, 0.0 }
0x133f   :  { %3802 = vmatmul.mubr.msk.f32.vlgmr.msra.gmra.mxu1 %vm171_vm8, %v2747_v6 }
0x1341   :  { %v2737_v48 = vpop.permute.xlu1 %2736 }
0x1342   :  { %v2739_v4 = vsel %vm678_vm14, %v2737_v48, %v4911_v50 }
0x1343   :  { %v3056_v13 = vrot.slane %v2739_v4, 1 }
0x1345   :  { %v4954_v33 = vpop.permute.xlu0 %2590 }
0x1346   :  { %v2593_v51 = vsel %vm837_vm13, %v4954_v33, %v4894_v53 }
0x1347   :  { %3791 = vmatmul.mubr.msk.f32.vlgmr.msra.gmra.mxu0 %vm171_vm8, %v2593_v51 }
0x1348   :  { %3820 = vmatprep.mubr.msk.f32.mxu0 %vm4154_vm0, %v4152_v3  ;;  %vm534_vm0 = vcmask 516352  }
0x13ff   :  { %v3031_v46 = vpop.f32.mrf.mxu1 }
0x1400   :  { %v3036_v9 = vrot.slane %v3031_v46, 1  ;;  %v3039_v2 = vadd.f32 %v3031_v46, %v2960_v12 }
0x1401   :  { %v3803_v37 = vpop.f32.mrf.mxu1 }
0x1402   :  { %v3040_v49 = vadd.f32 %v3036_v9, %v2961_v44  ;;  %4069 = vtanh.f32 %v3039_v2  ;;  %v3532_v50 = vmul.f32 -1.442695, %v3039_v2 }
0x1404   :  { %4071 = vtanh.f32 %v3040_v49  ;;  %v3533_v54 = vmul.f32 -1.442695, %v3040_v49 }
0x1407   :  { %v2886_v22 = vpop.f32.mrf.mxu0 }
0x1408   :  { %v2891_v35 = vrot.slane %v2886_v22, 1  ;;  %v2894_v53 = vadd.f32 %v2886_v22, %v2815_v17 }
0x1409   :  { %v3792_v5 = vpop.f32.mrf.mxu0 }
0x140a   :  { %v2895_v41 = vadd.f32 %v2891_v35, %v2816_v60  ;;  %v3529_v32 = vmul.f32 -1.442695, %v2894_v53 }
0x140c   :  { %4073 = vtanh.f32 %v2895_v41  ;;  %v3530_v15 = vmul.f32 -1.442695, %v2895_v41 }
0x140d   :  { %4075 = vtanh.f32 %v2894_v53 }
0x140e   :  { %4077 = vpow2.f32 %v3533_v54 }
0x140f   :  { %v4070_v55 = vpop.eup %4069  ;;  %4079 = vpow2.f32 %v3532_v50 }
0x1410   :  { %3067 = vrot.lane.b32.xlu1 %v4070_v55, %s4155_s3  ;;  %4081 = vpow2.f32 %v3530_v15 }
0x1411   :  { %v4072_v58 = vpop.eup %4071  ;;  %4083 = vpow2.f32 %v3529_v32 }
0x1412   :  { %3069 = vrot.lane.b32.xlu0 %v4072_v58, %s4155_s3 }
0x1414   :  { %3059 = vrot.lane.b32.xlu1 %v3056_v13, %s4155_s3 }
0x1416   :  { %2582 = vrot.lane.b32.xlu0 %v2581_v62, %s4157_s30 }
0x1418   :  { %3057 = vrot.lane.b32.xlu1 %v2739_v4, %s4155_s3 }
0x1419   :  { %v4074_v47 = vpop.eup %4073 }
0x141a   :  { %v4076_v61 = vpop.eup %4075  ;;  %2924 = vrot.lane.b32.xlu0 %v4074_v47, %s4155_s3 }
0x141b   :  { %v4078_v18 = vpop.eup %4077 }
0x141c   :  { %2922 = vrot.lane.b32.xlu1 %v4076_v61, %s4155_s3  ;;  %v3048_v20 = vadd.f32 1.0, %v4078_v18  ;;  %v4080_v27 = vpop.eup %4079 }
0x141d   :  { %v3047_v62 = vadd.f32 1.0, %v4080_v27  ;;  %v4082_v36 = vpop.eup %4081 }
0x141e   :  { %4085 = vrcp.f32 %v3048_v20  ;;  %v2903_v57 = vadd.f32 1.0, %v4082_v36  ;;  %v4084_v39 = vpop.eup %4083 }
0x141f   :  { %4087 = vrcp.f32 %v3047_v62  ;;  %v2902_v14 = vadd.f32 1.0, %v4084_v39  ;;  %v854_v39 = vsel %vm837_vm13, %v4470_v1, 0.0 }
0x1420   :  { %4089 = vrcp.f32 %v2903_v57  ;;  %v504_v57 = vrot.slane %v4410_v29, %v4380_v10 }
0x1421   :  { %4091 = vrcp.f32 %v2902_v14 }
0x1422   :  { %v505_v29 = vcombine.high %v504_v57, %v504_v57 }
0x142b   :  { %v4086_v45 = vpop.eup %4085 }
0x142c   :  { %v4088_v51 = vpop.eup %4087 }
0x142d   :  { %v4090_v37 = vpop.eup %4089 }
0x142e   :  { %v4092_v17 = vpop.eup %4091 }
0x1482   :  { %v3068_v59 = vpop.permute.xlu1 %3067 }
0x1483   :  { %v3073_v46 = vmul.f32 %v4088_v51, %v3068_v59 }
0x1484   :  { %v3070_v63 = vpop.permute.xlu0 %3069 }
0x1485   :  { %v3074_v8 = vmul.f32 %v4086_v45, %v3070_v63 }
0x1486   :  { %v3060_v6 = vpop.permute.xlu1 %3059 }
0x1487   :  { %3079 = vrot.lane.b32.xlu0 %v3074_v8, %s4155_s3  ;;  %v3064_v5 = vmul.f32 %v4086_v45, %v3060_v6  ;;  %v512_v8 = vrot.slane %v504_v57, %v4380_v10  ;;  %v889_v6 = vrot.slane %v854_v39, %v4380_v10 }
0x1488   :  { %v2583_v12 = vpop.permute.xlu0 %2582 }
0x1489   :  { %v2585_v9 = vsel %vm837_vm13, %v2583_v12, %v4927_v23  ;;  %v1240_v12 = vsel %vm1223_vm2, %v4565_v31, 0.0 }
0x148a   :  { %v3058_v2 = vpop.permute.xlu1 %3057  ;;  %v2911_v44 = vrot.slane %v2585_v9, 1  ;;  %v1275_v1 = vrot.slane %v1240_v12, %v4380_v10 }
0x148b   :  { %3077 = vrot.lane.b32.xlu0 %v3073_v46, %s4155_s3  ;;  %v3063_v41 = vmul.f32 %v4088_v51, %v3058_v2 }
0x148c   :  { %v2925_v49 = vpop.permute.xlu0 %2924  ;;  %2914 = vrot.lane.b32.xlu1 %v2911_v44, %s4155_s3  ;;  %v1626_v44 = vsel %vm1609_vm12, %v4680_v19, 0.0 }
0x148d   :  { %v2929_v22 = vmul.f32 %v4090_v37, %v2925_v49 }
0x148e   :  { %v2923_v35 = vpop.permute.xlu1 %2922 }
0x148f   :  { %2912 = vrot.lane.b32.xlu0 %v2585_v9, %s4155_s3  ;;  %v2928_v60 = vmul.f32 %v4092_v17, %v2923_v35  ;;  %v897_v9 = vrot.slane %v889_v6, %v4380_v10  ;;  %v519_v35 = vrot.slane %v505_v29, %v4380_v10  ;;  %v2594_v29 = vsel %vm837_vm13, %v4954_v33, 0.0 }
0x1490   :  { %2934 = vrot.lane.b32.xlu1 %v2929_v22, %s4155_s3  ;;  %v1846_v33 = vsel %vm1609_vm12, %v4808_v43, 0.0 }
0x1491   :  { %v2008_v52 = vrot.slane %v1846_v33, %v4380_v10 }
0x1493   :  { %2932 = vrot.lane.b32.xlu0 %v2928_v60, %s4155_s3  ;;  %v890_v60 = vcombine.high %v889_v6, %v889_v6 }
0x14f9   :  { %v3080_v23 = vpop.permute.xlu0 %3079 }
0x14fa   :  { %v3084_v53 = vadd.f32 %v3080_v23, %v3064_v5  ;;  %v1283_v5 = vrot.slane %v1275_v1, %v4380_v10  ;;  %v1661_v23 = vrot.slane %v1626_v44, %v4380_v10 }
0x14fc   :  { %4093 = vtanh.f32 %v3084_v53  ;;  %v2000_v53 = vsel %vm1449_vm15, %v4788_v0, 0.0 }
0x14fd   :  { %v3078_v48 = vpop.permute.xlu0 %3077 }
0x14fe   :  { %v3083_v55 = vadd.f32 %v3078_v48, %v3063_v41  ;;  %v2915_v4 = vpop.permute.xlu1 %2914  ;;  %v527_v41 = vrot.slane %v519_v35, %v4337_v26  ;;  %v904_v48 = vrot.slane %v890_v60, %v4380_v10 }
0x14ff   :  { %v2919_v58 = vmul.f32 %v4090_v37, %v2915_v4  ;;  %v2035_v4 = vrot.slane %v2000_v53, %v4380_v10 }
0x1500   :  { %4095 = vtanh.f32 %v3083_v55  ;;  %v1669_v55 = vrot.slane %v1661_v23, %v4380_v10 }
0x1501   :  { %v2913_v13 = vpop.permute.xlu0 %2912 }
0x1502   :  { %v2935_v47 = vpop.permute.xlu1 %2934  ;;  %v2918_v54 = vmul.f32 %v4092_v17, %v2913_v13  ;;  %v1662_v13 = vcombine.high %v1661_v23, %v1661_v23 }
0x1503   :  { %v2939_v61 = vadd.f32 %v2935_v47, %v2919_v58  ;;  %v1294_v58 = vrot.slane %v1283_v5, %v4337_v26  ;;  %v2043_v47 = vrot.slane %v2035_v4, %v4380_v10 }
0x1504   :  { %v1676_v34 = vrot.slane %v1662_v13, %v4380_v10 }
0x1505   :  { %4097 = vtanh.f32 %v2939_v61  ;;  %v2933_v50 = vpop.permute.xlu0 %2932  ;;  %v2409_v61 = vrot.slane %v2374_v42, %v4380_v10  ;;  %v2009_v42 = vcombine.high %v2008_v52, %v2008_v52 }
0x1506   :  { %v2938_v15 = vadd.f32 %v2933_v50, %v2918_v54  ;;  %v1680_v54 = vrot.slane %v1669_v55, %v4337_v26  ;;  %v912_v50 = vrot.slane %v904_v48, %v4337_v26  ;;  %v1684_v30 = vrot.slane %v1676_v34, %v4337_v26 }
0x1508   :  { %4099 = vtanh.f32 %v2938_v15 }
0x1509   :  { %v4094_v32 = vpop.eup %4093 }
0x150a   :  { %3091 = vrot.lane.b32.xlu1 %v4094_v32, %s4155_s3  ;;  %v2036_v32 = vcombine.high %v2035_v4, %v2035_v4 }
0x150c   :  { %v2050_v56 = vrot.slane %v2036_v32, %v4380_v10 }
0x150d   :  { %v4096_v18 = vpop.eup %4095 }
0x150e   :  { %3089 = vrot.lane.b32.xlu0 %v4096_v18, %s4155_s3  ;;  %v2417_v18 = vrot.slane %v2409_v61, %v4380_v10 }
0x1512   :  { %v4098_v20 = vpop.eup %4097 }
0x1513   :  { %2946 = vrot.lane.b32.xlu1 %v4098_v20, %s4155_s3  ;;  %v2783_v20 = vrot.slane %v2748_v11, %v4380_v10 }
0x1515   :  { %v4100_v27 = vpop.eup %4099  ;;  %v2791_v57 = vrot.slane %v2783_v20, %v4380_v10 }
0x1516   :  { %2944 = vrot.lane.b32.xlu0 %v4100_v27, %s4155_s3  ;;  %v2054_v27 = vrot.slane %v2043_v47, %v4337_v26 }
0x157c   :  { %v3092_v62 = vpop.permute.xlu1 %3091 }
0x157d   :  { %v3096_v36 = vmul.f32 %v4086_v45, %v3092_v62  ;;  %v2410_v62 = vcombine.high %v2409_v61, %v2409_v61  ;;  %v2023_v61 = vrot.slane %v2009_v42, %v4380_v10 }
0x157f   :  { %v3099_v59 = vrot.slane %v3096_v36, 7  ;;  %v2428_v36 = vrot.slane %v2417_v18, %v4337_v26  ;;  %v2424_v39 = vrot.slane %v2410_v62, %v4380_v10 }
0x1580   :  { %v3090_v14 = vpop.permute.xlu0 %3089 }
0x1581   :  { %v3095_v63 = vmul.f32 %v4088_v51, %v3090_v14  ;;  %v523_v51 = vrot.slane %v512_v8, %v4337_v26  ;;  %v2784_v14 = vcombine.high %v2783_v20, %v2783_v20  ;;  %v2432_v6 = vrot.slane %v2424_v39, %v4337_v26  ;;  %v3535_v20 = vld [vmem:[%s5197_s6] ss:$0 sm:$0xff]  ;;  %v3536_v39 = vld [vmem:[#allocation5] ss:$0 sm:$0xff] }
0x1583   :  { %v3100_v45 = vsel %vm307_vm4, %v3099_v59, %v3095_v63  ;;  %v2802_v59 = vrot.slane %v2791_v57, %v4337_v26  ;;  %v2058_v63 = vrot.slane %v2050_v56, %v4337_v26  ;;  %v2798_v8 = vrot.slane %v2784_v14, %v4380_v10 }
0x1584   :  { %3101 = vrot.lane.b32.xlu1 %v3100_v45, %s4156_s29 }
0x1585   :  { %v2947_v46 = vpop.permute.xlu1 %2946  ;;  %v2806_v12 = vrot.slane %v2798_v8, %v4337_v26 }
0x1586   :  { %v2951_v2 = vmul.f32 %v4090_v37, %v2947_v46  ;;  %v908_v37 = vrot.slane %v897_v9, %v4337_v26 }
0x1588   :  { %v2954_v49 = vrot.slane %v2951_v2, 7  ;;  %v2945_v22 = vpop.permute.xlu0 %2944  ;;  %528 = vrot.lane.b32.xlu1 %v523_v51, %s4155_s3 }
0x1589   :  { %v2950_v31 = vmul.f32 %v4092_v17, %v2945_v22  ;;  %v1276_v17 = vcombine.high %v1275_v1, %v1275_v1  ;;  %v2756_v1 = vrot.slane %v2594_v29, %v4380_v10 }
0x158b   :  { %v2955_v19 = vsel %vm307_vm4, %v2954_v49, %v2950_v31  ;;  %v1290_v0 = vrot.slane %v1276_v17, %v4380_v10  ;;  %v2220_v49 = vsel %vm1223_vm2, %v4887_v40, 0.0  ;;  %v2764_v31 = vrot.slane %v2756_v1, %v4380_v10 }
0x158c   :  { %913 = vrot.lane.b32.xlu1 %v908_v37, %s4155_s3  ;;  %2956 = vrot.lane.b32.xlu0 %v2955_v19, %s4156_s29  ;;  %v2382_v22 = vrot.slane %v2220_v49, %v4380_v10  ;;  %v2757_v23 = vcombine.high %v2756_v1, %v2756_v1 }
0x158d   :  { %v1298_v15 = vrot.slane %v1290_v0, %v4337_v26 }
0x158e   :  { %v2390_v43 = vrot.slane %v2382_v22, %v4380_v10  ;;  %v2383_v48 = vcombine.high %v2382_v22, %v2382_v22  ;;  %v2771_v55 = vrot.slane %v2757_v23, %v4380_v10 }
0x1590   :  { %1299 = vrot.lane.b32.xlu1 %v1294_v58, %s4155_s3  ;;  %530 = vrot.lane.b32.xlu0 %v527_v41, %s4155_s3  ;;  %v2016_v41 = vrot.slane %v2008_v52, %v4380_v10  ;;  %v2397_v0 = vrot.slane %v2383_v48, %v4380_v10 }
0x1594   :  { %1685 = vrot.lane.b32.xlu1 %v1680_v54, %s4155_s3  ;;  %915 = vrot.lane.b32.xlu0 %v912_v50, %s4155_s3 }
0x1598   :  { %2059 = vrot.lane.b32.xlu1 %v2054_v27, %s4155_s3  ;;  %1301 = vrot.lane.b32.xlu0 %v1298_v15, %s4155_s3 }
0x159c   :  { %2433 = vrot.lane.b32.xlu1 %v2428_v36, %s4155_s3  ;;  %1687 = vrot.lane.b32.xlu0 %v1684_v30, %s4155_s3 }
0x15a0   :  { %2807 = vrot.lane.b32.xlu1 %v2802_v59, %s4155_s3  ;;  %2061 = vrot.lane.b32.xlu0 %v2058_v63, %s4155_s3 }
0x15a4   :  { %2435 = vrot.lane.b32.xlu0 %v2432_v6, %s4155_s3 }
0x15a8   :  { %2809 = vrot.lane.b32.xlu0 %v2806_v12, %s4155_s3  ;;  %v3174_v12 = vand.u32 127, %v59_v24 }
0x15f6   :  { %v3102_v45 = vpop.permute.xlu1 %3101 }
0x15f7   :  { %v3104_v46 = vsel %vm303_vm7, %v3102_v45, 0.0  ;;  %v3214_v45 = vsub.s32 %v3174_v12, %v4334_v25  ;;  %vm3222_vm7 = vcmask 58368  }
0x15f8   :  { %v3139_v9 = vrot.slane %v3104_v46, %v4380_v10 }
0x15fa   :  { %v3140_v2 = vcombine.high %v3139_v9, %v3139_v9  ;;  %v3147_v51 = vrot.slane %v3139_v9, %v4380_v10  ;;  %v529_v44 = vpop.permute.xlu1 %528 }
0x15fb   :  { %535 = vst.msk [vmem:[#allocation3 + $0x7] sm:$0x1] %vm534_vm0, %v529_v44 }
0x15fc   :  { %v3154_v16 = vrot.slane %v3140_v2, %v4380_v10  ;;  %v3158_v7 = vrot.slane %v3147_v51, %v4337_v26 }
0x15fe   :  { %v2957_v35 = vpop.permute.xlu0 %2956  ;;  %3163 = vrot.lane.b32.xlu1 %v3158_v7, %s4155_s3  ;;  %v914_v60 = vpop.permute.xlu1 %913  ;;  %v3162_v38 = vrot.slane %v3154_v16, %v4337_v26 }
0x15ff   :  { %v2959_v40 = vsel %vm452_vm10, %v2957_v35, 0.0  ;;  %919 = vst.msk [vmem:[#allocation3 + $0x6] sm:$0x1] %vm534_vm0, %v914_v60  ;;  %v4129_v35 = vld [vmem:[%s5192_s1] sm:$0x3] }
0x1600   :  { %v3112_v5 = vrot.slane %v2959_v40, %v4380_v10  ;;  %2774 = vst.msk [vmem:[#allocation3 + $0x6] sm:$0x1] %vm494_vm9, %v2764_v31  ;;  %3165 = vrot.lane.b32.xlu0 %v3162_v38, %s4155_s3 }
0x1602   :  { %v3113_v37 = vcombine.high %v3112_v5, %v3112_v5  ;;  %v3120_v53 = vrot.slane %v3112_v5, %v4380_v10  ;;  %v531_v19 = vpop.permute.xlu0 %530  ;;  %v1300_v17 = vpop.permute.xlu1 %1299 }
0x1603   :  { %536 = vst.msk [vmem:[#allocation3 + $0xf] sm:$0x1] %vm534_vm0, %v531_v19  ;;  %1305 = vst.msk [vmem:[#allocation3 + $0x5] sm:$0x1] %vm534_vm0, %v1300_v17 }
0x1604   :  { %v3127_v21 = vrot.slane %v3113_v37, %v4380_v10  ;;  %3130 = vst.msk [vmem:[#allocation3 + $0x7] sm:$0x1] %vm494_vm9, %v3120_v53  ;;  %2400 = vst.msk [vmem:[#allocation3 + $0x5] sm:$0x1] %vm494_vm9, %v2390_v43 }
0x1606   :  { %3131 = vst.msk [vmem:[#allocation3 + $0xf] sm:$0x1] %vm494_vm9, %v3127_v21  ;;  %v916_v4 = vpop.permute.xlu0 %915  ;;  %v1686_v58 = vpop.permute.xlu1 %1685 }
0x1607   :  { %920 = vst.msk [vmem:[#allocation3 + $0xe] sm:$0x1] %vm534_vm0, %v916_v4  ;;  %1691 = vst.msk [vmem:[#allocation3 + $0x4] sm:$0x1] %vm534_vm0, %v1686_v58 }
0x1608   :  { %2775 = vst.msk [vmem:[#allocation3 + $0xe] sm:$0x1] %vm494_vm9, %v2771_v55  ;;  %2026 = vst.msk [vmem:[#allocation3 + $0x4] sm:$0x1] %vm494_vm9, %v2016_v41 }
0x160a   :  { %v1302_v13 = vpop.permute.xlu0 %1301  ;;  %v2060_v47 = vpop.permute.xlu1 %2059 }
0x160b   :  { %1306 = vst.msk [vmem:[#allocation3 + $0xd] sm:$0x1] %vm534_vm0, %v1302_v13  ;;  %2065 = vst.msk [vmem:[#allocation3 + $0x3] sm:$0x1] %vm534_vm0, %v2060_v47 }
0x160c   :  { %2401 = vst.msk [vmem:[#allocation3 + $0xd] sm:$0x1] %vm494_vm9, %v2397_v0 }
0x160e   :  { %v1688_v54 = vpop.permute.xlu0 %1687  ;;  %v2434_v50 = vpop.permute.xlu1 %2433 }
0x160f   :  { %1692 = vst.msk [vmem:[#allocation3 + $0xc] sm:$0x1] %vm534_vm0, %v1688_v54  ;;  %2439 = vst.msk [vmem:[#allocation3 + $0x2] sm:$0x1] %vm534_vm0, %v2434_v50 }
0x1610   :  { %2027 = vst.msk [vmem:[#allocation3 + $0xc] sm:$0x1] %vm494_vm9, %v2023_v61  ;;  %vm3451_vm9 = vcmask 9216  }
0x1612   :  { %v2062_v11 = vpop.permute.xlu0 %2061  ;;  %v2808_v34 = vpop.permute.xlu1 %2807 }
0x1613   :  { %2066 = vst.msk [vmem:[#allocation3 + $0xb] sm:$0x1] %vm534_vm0, %v2062_v11  ;;  %2813 = vst.msk [vmem:[#allocation3 + $0x1] sm:$0x1] %vm534_vm0, %v2808_v34 }
0x1616   :  { %v2436_v15 = vpop.permute.xlu0 %2435 }
0x1617   :  { %2440 = vst.msk [vmem:[#allocation3 + $0xa] sm:$0x1] %vm534_vm0, %v2436_v15 }
0x161a   :  { %v2810_v32 = vpop.permute.xlu0 %2809 }
0x161b   :  { %2814 = vst.msk [vmem:[#allocation3 + $0x9] sm:$0x1] %vm534_vm0, %v2810_v32 }
0x1670   :  { %v3164_v10 = vpop.permute.xlu1 %3163 }
0x1671   :  { %3169 = vst.msk [vmem:[#allocation3] sm:$0x1] %vm534_vm0, %v3164_v10 }
0x1672   :  { %v3166_v18 = vpop.permute.xlu0 %3165 }
0x1673   :  { %3170 = vst.msk [vmem:[#allocation3 + $0x8] sm:$0x1] %vm534_vm0, %v3166_v18 }
0x1678   :  { %v5117_v27 = vld [vmem:[#allocation3] sm:$0xff] }
0x1679   :  { %v3189_v30 = vmul.f32 %v3535_v20, %v5117_v27 }
0x167a   :  { %v5120_v56 = vld [vmem:[#allocation3 + $0x8] sm:$0xff] }
0x167b   :  { %v3191_v62 = vsel %vm109_vm3, %v3189_v30, 0.0  ;;  %v3190_v36 = vmul.f32 %v3535_v20, %v5120_v56 }
0x167c   :  { %3192 = vadd.xlane.f32.xlu1 %v3191_v62  ;;  %v3368_v62 = vld [vmem:[%s5199_s8 + $0x38] sm:$0xff] }
0x167d   :  { %v3194_v57 = vsel %vm109_vm3, %v3190_v36, 0.0  ;;  %3805 = vmatpush3.msra.mxu0 %v3368_v62 }
0x167e   :  { %3195 = vadd.xlane.f32.xlu0 %v3194_v57  ;;  %3806 = vmatprep.subr.mxu0 %v4152_v3 }
0x1694   :  { %3203 = vperm.xlu0 %3831, %v3536_v39  }
0x1705   :  { %v3193_v59 = vpop.xlane.xlu1 %3192 }
0x1707   :  { %v3196_v14 = vpop.xlane.xlu0 %3195 }
0x170f   :  { %v3204_v63 = vpop.permute.xlu0 %3203 }
0x1710   :  { %v3206_v8 = vadd.f32 %v3204_v63, %v3193_v59  ;;  %v3207_v6 = vadd.f32 %v3204_v63, %v3196_v14  ;;  %v3367_v14 = vld [vmem:[%s5199_s8 + $0x30] sm:$0xff]  ;;  %v3364_v59 = vld [vmem:[%s5199_s8 + $0x18] sm:$0xff] }
0x1711   :  { %3807 = vmatpush3.msra.mxu0 %v3367_v14  ;;  %v3363_v63 = vld [vmem:[%s5199_s8 + $0x10] sm:$0xff] }
0x1712   :  { %4101 = vtanh.f32 %v3206_v8  ;;  %3808 = vmatprep.subr.mxu0 %v4152_v3  ;;  %v3362_v8 = vld [vmem:[%s5199_s8 + $0x8] sm:$0xff] }
0x1713   :  { %4103 = vtanh.f32 %v3207_v6  ;;  %v3361_v6 = vld [vmem:[%s5199_s8] sm:$0xff] }
0x171f   :  { %v4102_v29 = vpop.eup %4101 }
0x1720   :  { %v4104_v46 = vpop.eup %4103  ;;  %v3215_v9 = vrot.slane %v4102_v29, %v3214_v45 }
0x1721   :  { %v3219_v1 = vrot.slane %v4104_v46, %v3214_v45 }
0x1723   :  { %v3220_v2 = vsel %vm307_vm4, %v3219_v1, %v3215_v9 }
0x1724   :  { %v3223_v51 = vsel %vm3222_vm7, %v3220_v2, -inf }
0x1725   :  { %3224 = vmax.xlane.f32.xlu1 %v3223_v51 }
0x17ae   :  { %v3225_v44 = vpop.xlane.xlu1 %3224 }
0x17af   :  { %v3230_v49 = vrot.slane %v3225_v44, %v4337_v26  ;;  %v3234_v16 = vrot.slane %v3225_v44, %v4343_v28 }
0x17b1   :  { %v3237_v7 = vsub.f32 %v4102_v29, %v3230_v49  ;;  %v3238_v33 = vsub.f32 %v4104_v46, %v3234_v16 }
0x17b3   :  { %v3239_v24 = vmul.f32 1.442695, %v3237_v7  ;;  %v3241_v22 = vmul.f32 1.442695, %v3238_v33 }
0x17b5   :  { %4105 = vpow2.f32 %v3239_v24 }
0x17b6   :  { %4107 = vpow2.f32 %v3241_v22 }
0x17c2   :  { %v4106_v25 = vpop.eup %4105 }
0x17c3   :  { %v4108_v31 = vpop.eup %4107  ;;  %3246 = vperm.xlu1 %3832, %v4106_v25  }
0x17c4   :  { %3249 = vperm.xlu0 %3831, %v4108_v31  }
0x17c7   :  { %3176 = vperm.xlu1 %3832, %v4129_v35  }
0x183e   :  { %v3247_v60 = vpop.permute.xlu1 %3246 }
0x183f   :  { %v3250_v38 = vpop.permute.xlu0 %3249  ;;  %v3254_v40 = vrot.slane %v3247_v60, %v3214_v45 }
0x1840   :  { %v3258_v5 = vrot.slane %v3250_v38, %v3214_v45 }
0x1842   :  { %v3177_v52 = vpop.permute.xlu1 %3176  ;;  %v3259_v43 = vsel %vm307_vm4, %v3258_v5, %v3254_v40 }
0x1843   :  { %vm3178_vm8 = vcmp.lt.s32.totalorder %v3174_v12, %v3177_v52  ;;  %v3261_v23 = vsel %vm3222_vm7, %v3259_v43, 0.0 }
0x1844   :  { %v3534_v37 = vsel %vm3178_vm8, 1.0, %v4152_v3  ;;  %3262 = vadd.xlane.f32.xlu0 %v3261_v23 }
0x1845   :  { %v3283_v53 = vrot.slane %v3534_v37, %v4337_v26  ;;  %v3290_v19 = vrot.slane %v3534_v37, %v4343_v28 }
0x1847   :  { %3285 = vbcast.lane.b32.xlu1 %v3283_v53, 256 }
0x184b   :  { %3292 = vbcast.lane.b32.xlu1 %v3290_v19, 256 }
0x18b9   :  { %v3286_v55 = vpop.permute.xlu1 %3285 }
0x18bd   :  { %v3293_v13 = vpop.permute.xlu1 %3292 }
0x18cd   :  { %v3263_v17 = vpop.xlane.xlu0 %3262 }
0x18ce   :  { %v3268_v21 = vrot.slane %v3263_v17, %v4337_v26  ;;  %v3272_v41 = vrot.slane %v3263_v17, %v4343_v28 }
0x18d0   :  { %4109 = vrcp.f32 %v3268_v21 }
0x18d1   :  { %4111 = vrcp.f32 %v3272_v41 }
0x18dd   :  { %v4110_v48 = vpop.eup %4109 }
0x18de   :  { %v4112_v4 = vpop.eup %4111  ;;  %v3276_v58 = vmul.f32 %v4110_v48, %v4106_v25 }
0x18df   :  { %v3278_v0 = vmul.f32 %v4112_v4, %v4108_v31 }
0x18e0   :  { %v3296_v42 = vmul.f32 %v3286_v55, %v3276_v58 }
0x18e1   :  { %v3297_v47 = vmul.f32 %v3293_v13, %v3278_v0 }
0x18e2   :  { %3301 = vperm.xlu1 %3832, %v3296_v42  }
0x18e6   :  { %3304 = vperm.xlu1 %3832, %v3297_v47  }
0x195d   :  { %v3302_v61 = vpop.permute.xlu1 %3301 }
0x195e   :  { %v3309_v50 = vrot.slane %v3302_v61, %v3214_v45 }
0x1961   :  { %v3305_v54 = vpop.permute.xlu1 %3304 }
0x1962   :  { %v3313_v11 = vrot.slane %v3305_v54, %v3214_v45 }
0x1964   :  { %v3314_v34 = vsel %vm307_vm4, %v3313_v11, %v3309_v50 }
0x1965   :  { %v3316_v15 = vsel %vm3222_vm7, %v3314_v34, 0.0 }
0x1966   :  { %3317 = vadd.xlane.f32.xlu1 %v3316_v15 }
0x19ef   :  { %v3318_v32 = vpop.xlane.xlu1 %3317 }
0x19f0   :  { %v3319_v10 = vmax.f32 %v3318_v32, 1e-20 }
0x19f2   :  { %v3324_v18 = vrot.slane %v3319_v10, %v4337_v26  ;;  %v3328_v20 = vrot.slane %v3319_v10, %v4343_v28  ;;  %v3366_v26 = vld [vmem:[%s5199_s8 + $0x28] sm:$0xff]  ;;  %v3365_v28 = vld [vmem:[%s5199_s8 + $0x20] sm:$0xff] }
0x19f3   :  { %3809 = vmatpush3.msra.mxu0 %v3366_v26 }
0x19f4   :  { %4113 = vrcp.f32 %v3324_v18  ;;  %3810 = vmatprep.subr.mxu0 %v4152_v3 }
0x19f5   :  { %4115 = vrcp.f32 %v3328_v20  ;;  %3811 = vmatpush3.msra.mxu0 %v3365_v28 }
0x19f6   :  { %3812 = vmatprep.subr.mxu0 %v4152_v3 }
0x19f7   :  { %3813 = vmatpush3.msra.mxu0 %v3364_v59 }
0x19f8   :  { %3814 = vmatprep.subr.mxu0 %v4152_v3 }
0x19f9   :  { %3815 = vmatpush3.msra.mxu0 %v3363_v63 }
0x19fa   :  { %3816 = vmatprep.subr.mxu0 %v4152_v3 }
0x19fb   :  { %3817 = vmatpush3.msra.mxu0 %v3362_v8 }
0x19fc   :  { %3818 = vmatprep.subr.mxu0 %v4152_v3 }
0x19fd   :  { %3819 = vmatpush3.msra.mxu0 %v3361_v6 }
0x1a01   :  { %v4114_v30 = vpop.eup %4113 }
0x1a02   :  { %v4116_v36 = vpop.eup %4115  ;;  %v3332_v57 = vmul.f32 %v4114_v30, %v3296_v42 }
0x1a03   :  { %v3334_v39 = vmul.f32 %v4116_v36, %v3297_v47 }
0x1a04   :  { %3337 = vperm.xlu0 %3831, %v3332_v57  }
0x1a05   :  { %3342 = vperm.xlu1 %3832, %v3334_v39  }
0x1a7f   :  { %v3338_v12 = vpop.permute.xlu0 %3337 }
0x1a80   :  { %v3343_v45 = vpop.permute.xlu1 %3342  ;;  %v3345_v29 = vmul.f32 %v3338_v12, %v5117_v27 }
0x1a81   :  { %v3346_v46 = vmul.f32 %v3343_v45, %v5120_v56  ;;  %v3537_v56 = vld [vmem:[%s5200_s9] ss:$0 sm:$0xff]  ;;  %s3471_s9 = sshll.u32 %s4159_s18, 4  ;;  %s3472_s9 = int_to_ptr.vmem [resolvable:$true] %s3471_s9 }
0x1a82   :  { %v3347_v9 = vsel %vm109_vm3, %v3345_v29, 0.0  ;;  %s4130_s19 = scalar_lea.vmem %s3472_s9, 32  ;;  %p4135_p1 = scmp.lt.s32.totalorder %s3472_s9, %s3472_s9 }
0x1a83   :  { %v3354_v1 = vsel %vm109_vm3, %v3346_v46, 0.0  ;;  %v3348_v2 = vrot.slane %v3347_v9, 4  ;;  %p4131_p0 = scmp.ne.s32.totalorder %s3472_s9, %s4130_s19  ;;  %p4136_p2 = scmp.lt.s32.totalorder %s4130_s19, %s4130_s19 }
0x1a84   :  { %v3355_v51 = vrot.slane %v3354_v1, 4 }
0x1a85   :  { %v3349_v44 = vadd.f32 %v3348_v2, %v3347_v9  ;;  %p4137_p3 = por %p4136_p2, %p4135_p1 }
0x1a86   :  { %v3356_v49 = vadd.f32 %v3355_v51, %v3354_v1 }
0x1a87   :  { %v3350_v16 = vrot.slane %v3349_v44, 2  ;;  %p4138_p4 = pnand %p4137_p3, %p4131_p0 }
0x1a88   :  { %v3357_v7 = vrot.slane %v3356_v49, 2 }
0x1a89   :  { %v3351_v33 = vadd.f32 %v3350_v16, %v3349_v44 }
0x1a8a   :  { %v3358_v24 = vadd.f32 %v3357_v7, %v3356_v49 }
0x1a8b   :  { %v3352_v3 = vrot.slane %v3351_v33, 1 }
0x1a8c   :  { %v3359_v22 = vrot.slane %v3358_v24, 1 }
0x1a8d   :  { %v3353_v25 = vadd.f32 %v3352_v3, %v3351_v33 }
0x1a8e   :  { %v3360_v31 = vadd.f32 %v3359_v22, %v3358_v24 }
0x1a90   :  { %v3378_v27 = vsel %vm307_vm4, %v3360_v31, %v3353_v25 }
0x1a91   :  { %3821 = vmatmul.mubr.msk.f32.vlgmr.msra.gmra.mxu0 %vm109_vm3, %v3378_v27 }
0x1b51   :  { %v3447_v35 = vpop.f32.mrf.mxu0 }
0x1b52   :  { %v3448_v60 = vadd.f32 %v3537_v56, %v3447_v35 }
0x1b53   :  { %v3822_v38 = vpop.f32.mrf.mxu0 }
0x1b54   :  { %v3452_v40 = vsel %vm3451_vm9, %v3448_v60, -inf }
0x1b55   :  { %3453 = vmax.xlane.f32.xlu0 %v3452_v40 }
0x1bde   :  { %v3454_v5 = vpop.xlane.xlu0 %3453 }
0x1bdf   :  { %v3455_v52 = vsub.f32 %v3448_v60, %v3454_v5 }
0x1be1   :  { %v3456_v43 = vmul.f32 1.442695, %v3455_v52 }
0x1be3   :  { %4117 = vpow2.f32 %v3456_v43 }
0x1bf0   :  { %v4118_v23 = vpop.eup %4117 }
0x1bf1   :  { %v3458_v37 = vsel %vm3451_vm9, %v4118_v23, 0.0 }
0x1bf2   :  { %3459 = vadd.xlane.f32.xlu1 %v3458_v37 }
0x1c7b   :  { %v3460_v53 = vpop.xlane.xlu1 %3459 }
0x1c7c   :  { %4119 = vlog2.f32 %v3460_v53 }
0x1c89   :  { %v4120_v19 = vpop.eup %4119 }
0x1c8a   :  { %v3462_v17 = vmul.f32 0.6931472, %v4120_v19 }
0x1c8c   :  { %v3463_v21 = vsub.f32 %v3455_v52, %v3462_v17 }
0x1c8e   :  { %3464 = vst.msk [vmem:[#allocation6] sm:$0x3] %vm3451_vm9, %v3463_v21 }
0x1c8f   :  { %4141 = shalt.err (!%p4138_p4)
}
0x1c90   :  { %3474 = dma.vmem_to_hbm [thread:$0]  %s3472_s9, 32, %s5201_s10, [#allocation7]  }
0x1c91   :  { %4150 = dma.done.wait [#allocation7], 32  }
0x1c92   :  { %4151 = vsyncadd [#allocation7], 4294967264 }
0x1c93   :  { %3478 = vsyncpa [#allocation7], 1 }

// kernel: _lambda_.2
= control target key start
LH: loop header
LB: loop body
LE: loop exit
PB: predicated region body
PF: predicated region fallthrough
CT: control target
= control target key end

     0   :  { %s7731_s29 = smov 0   ;;  %s10167_s0 = inlined_call_operand.vmem [shape: f32[6,8,32], index: 0, kind: input, shape index: {}]   ;;  %s10168_s1 = inlined_call_operand.vmem [shape: s32[6,1,1], index: 1, kind: input, shape index: {}]   ;;  %s10169_s2 = inlined_call_operand.vmem [shape: bf16[32,256], index: 2, kind: input, shape index: {}]   ;;  %s10170_s3 = inlined_call_operand.vmem [shape: f32[1,256], index: 3, kind: input, shape index: {}]   ;;  %s10171_s4 = inlined_call_operand.vmem [shape: f32[32,128], index: 4, kind: input, shape index: {}]   ;;  %s10172_s5 = inlined_call_operand.vmem [shape: f32[32,128], index: 5, kind: input, shape index: {}]   ;;  %s10173_s6 = inlined_call_operand.vmem [shape: f32[64,2], index: 6, kind: input, shape index: {}]   ;;  %s10174_s7 = inlined_call_operand.vmem [shape: f32[1,2], index: 7, kind: input, shape index: {}]   ;;  %s10175_s8 = inlined_call_operand.vmem [shape: f32[1,2], index: 8, kind: input, shape index: {}]   ;;  %s10176_s9 = inlined_call_operand.<no memory space> [shape: f32[1,1], index: 9, kind: input, shape index: {}]   ;;  %s10177_s10 = inlined_call_operand.vmem [shape: f32[1,64], index: 10, kind: input, shape index: {}]   ;;  %s10178_s12 = inlined_call_operand.vmem [shape: f32[6,8,2], index: 12, kind: output, shape index: {0}]   ;;  %s10179_s13 = inlined_call_operand.vmem [shape: f32[6,1,64], index: 13, kind: output, shape index: {1}]   ;;  %s10180_s11 = inlined_call_operand.<no memory space> [shape: f32[1,1], index: 11, kind: input, shape index: {}]  }
   0x1   :  { %v19_v0 = vstv %s10176_s9  ;;  %v21_v1 = vstv %s10180_s11 }
   0x2   :  { %20 = vst [vmem:[#allocation5] sm:$0x1] %v19_v0  ;;  %22 = vst [vmem:[#allocation6] sm:$0x1] %v21_v1 }
   0x3 LB: > { %s6773_s30 = sadd.s32 4294967295, %s7646_s29   ;;  %p6777_p0 = scmp.ge.s32.totalorder %s7646_s29, 1  ;;  %s7646_s29 = sphi %s7731_s29, %s28_s29  }
   0x4   : > { %p405_p1 = scmp.lt.s32.totalorder %s7646_s29, 3 }
   0x6   : > { %p406_p2 = pnand %p6777_p0, %p405_p1 }
   0x8   : > { %409 = sbr.rel (%p406_p2) target bundleno = 8479 (0x211f), region = 68 }
   0xd   : > { %v7168_v2 = vld [vmem:[%s10169_s2 + $0x14] ss:$8 sps:$4 sm:$0xff]   ;;  %s457_s11 = smul.u32 3, %s6773_s30  ;;  %v7170_v3 = vld [vmem:[%s10169_s2 + $0x10] ss:$8 sps:$4 sm:$0xff]   ;;  %v10191_v4 = vmov 0   ;;  %v10181_v21 = vlaneseq }
   0xe   : > { %563 = vmatprep.mubr.bf16.mxu1 %v10191_v4  ;;  %7166 = vset.pattern.permute.xlu1 %v10191_v4  ;;  %v7171_v5 = vld [vmem:[%s10169_s2 + $0x4] ss:$8 sps:$4 sm:$0xff]   ;;  %v7173_v6 = vld [vmem:[%s10169_s2] ss:$8 sps:$4 sm:$0xff]   ;;  %v7757_v7 = vld [vmem:[%s10171_s4 + $0x18] sm:$0xff]  ;;  %v10185_v8 = vmov 0.0  }
   0xf   : > { %543 = vmatprep.subr.bf16.mxu1 %v7168_v2  ;;  %p458_p3 = scmp.lt.s32.totalorder %s457_s11, 5  ;;  %7167 = vset.pattern.permute.xlu0 %v10191_v4  ;;  %v7766_v9 = vld [vmem:[%s10171_s4 + $0x10] sm:$0xff]  ;;  %vm10183_vm0 = vmmov 0   ;;  %v7781_v10 = vld [vmem:[%s10171_s4 + $0x8] sm:$0xff]  ;;  %vm10197_vm1 = vcmask 261120   ;;  %v7789_v14 = vld [vmem:[%s10171_s4] sm:$0xff] }
  0x10   : > { %544 = vmatpush1.bf16.msra.mxu1 %v7170_v3  ;;  %6972 = vmatprep.subr.mxu0 %v10185_v8  ;;  %v7810_v17 = vld [vmem:[%s10172_s5 + $0x18] sm:$0xff]  ;;  %v7816_v18 = vld [vmem:[%s10172_s5 + $0x10] sm:$0xff]  ;;  %v7825_v19 = vld [vmem:[%s10172_s5 + $0x8] sm:$0xff]  ;;  %v7850_v22 = vshrl.u32 %v10181_v21, 7  ;;  %s7651_s27 = smov 32   ;;  %s7653_s14 = smov 64  }
  0x11   : > { %545 = vmatprep.subr.bf16.mxu1 %v7171_v5  ;;  %s10387_s11 = smov (!%p458_p3, %s457_s11), 5  ;;  %6973 = vmatpush3.msra.mxu0 %v7757_v7  ;;  %v7832_v20 = vld [vmem:[%s10172_s5] sm:$0xff]  ;;  %s7654_s15 = smov 96   ;;  %vm10182_vm12 = vcmask 253952  }
  0x12   : > { %6974 = vmatprep.subr.mxu0 %v10185_v8  ;;  %6980 = vmatprep.mubr.msk.f32.mxu0 %vm10183_vm0, %v10185_v8  ;;  %s6778_s25 = sshll.u32 %s10387_s11, 3  ;;  %10243 = vst [vmem:[#allocation7_spill] sm:$0xff] %v7850_v22  ;;  %v7853_v23 = vsub.s32 0, %v7850_v22  ;;  %v492_v24 = vld [vmem:[%s10170_s3] sm:$0x3]  ;;  %v7859_v25 = vsub.s32 1, %v7850_v22  ;;  %s7910_s9 = scalar_lea.vmem %s10168_s1, %s10387_s11 }
  0x13   : > { %6975 = vmatpush3.msra.mxu0 %v7766_v9  ;;  %s461_s28 = scalar_lea.vmem %s10167_s0, %s6778_s25  ;;  %s472_s16 = scalar_lea.vmem %s10178_s12, %s6778_s25 }
  0x14   : > { %546 = vmatpush1.bf16.msra.mxu1 %v7173_v6  ;;  %6976 = vmatprep.subr.mxu0 %v10185_v8  ;;  %v483_v11 = vld [vmem:[%s461_s28] sm:$0xff]  ;;  %v484_v12 = vld [vmem:[%s461_s28 + $0x8] sm:$0xff]  ;;  %v485_v15 = vld [vmem:[%s461_s28 + $0x10] sm:$0xff]  ;;  %10244 = vst [vmem:[#allocation8_spill] sm:$0xff] %v7859_v25  ;;  %v497_v26 = vrot.slane %v492_v24, %v7853_v23  ;;  %v501_v27 = vrot.slane %v492_v24, %v7859_v25  ;;  %s477_s21 = scalar_lea.vmem %s10179_s13, %s10387_s11 }
  0x15   : > { %6950 = vmatprep.subr.mxu1 %v10185_v8  ;;  %6977 = vmatpush3.msra.mxu0 %v7781_v10  ;;  %v486_v13 = vpack.c.bf16 %v484_v12, %v483_v11  ;;  %v487_v16 = vpack.c.bf16 %v485_v15, %v485_v15 }
  0x16   : > { %6978 = vmatprep.subr.mxu0 %v10185_v8 }
  0x17   : > { %6979 = vmatpush3.msra.mxu0 %v7789_v14  ;;  %6784 = vmatmul.mubr.msk.bf16.vlgmr.msra.gmra.mxu1 %vm10197_vm1, %v486_v13 }
  0x18   : > { %6994 = vmatprep.subr.mxu0 %v10185_v8  ;;  %6951 = vmatpush3.msra.mxu1 %v7757_v7 }
  0x19   : > { %573 = vmatprep.mubr.bf16.mxu1 %v10191_v4  ;;  %6952 = vmatprep.subr.mxu1 %v10185_v8 }
  0x1a   : > { %6953 = vmatpush3.msra.mxu1 %v7766_v9 }
  0x1b   : > { %6954 = vmatprep.subr.mxu1 %v10185_v8 }
  0x1c   : > { %6955 = vmatpush3.msra.mxu1 %v7781_v10 }
  0x1d   : > { %6956 = vmatprep.subr.mxu1 %v10185_v8 }
  0x1e   : > { %6957 = vmatpush3.msra.mxu1 %v7789_v14 }
  0x1f   : > { %6785 = vmatmul.mubr.msk.bf16.gmra.mxu1 %vm10197_vm1, %v487_v16  ;;  %6961 = vmatprep.subr.mxu1 %v10185_v8 }
  0x20   : > { %6958 = vmatprep.mubr.msk.f32.mxu1 %vm10183_vm0, %v10185_v8 }
  0x27   : > { %6959 = vmatmul.mubr.f32.vlgmr.msra.gmra.mxu1 %v10185_v8 }
  0x28   : > { %6962 = vmatpush3.msra.mxu1 %v7810_v17  ;;  %6969 = vmatprep.mubr.msk.f32.mxu1 %vm10183_vm0, %v10185_v8 }
  0x29   : > { %6963 = vmatprep.subr.mxu1 %v10185_v8 }
  0x2a   : > { %6964 = vmatpush3.msra.mxu1 %v7816_v18 }
  0x2b   : > { %6965 = vmatprep.subr.mxu1 %v10185_v8 }
  0x2c   : > { %6966 = vmatpush3.msra.mxu1 %v7825_v19 }
  0x2d   : > { %6967 = vmatprep.subr.mxu1 %v10185_v8 }
  0x2e   : > { %6968 = vmatpush3.msra.mxu1 %v7832_v20 }
  0x2f   : > { %6970 = vmatmul.mubr.f32.vlgmr.msra.gmra.mxu1 %v10185_v8  ;;  %6983 = vmatprep.subr.mxu1 %v10185_v8 }
  0x30   : > { %6984 = vmatpush3.msra.mxu1 %v7810_v17  ;;  %6991 = vmatprep.mubr.msk.f32.mxu1 %vm10183_vm0, %v10185_v8 }
  0x31   : > { %6985 = vmatprep.subr.mxu1 %v10185_v8 }
  0x32   : > { %6986 = vmatpush3.msra.mxu1 %v7816_v18 }
  0x33   : > { %6987 = vmatprep.subr.mxu1 %v10185_v8 }
  0x34   : > { %6988 = vmatpush3.msra.mxu1 %v7825_v19 }
  0x35   : > { %6989 = vmatprep.subr.mxu1 %v10185_v8 }
  0x36   : > { %6990 = vmatpush3.msra.mxu1 %v7832_v20 }
  0x37   : > { %7005 = vmatprep.subr.mxu1 %v10185_v8 }
  0xd7   : > { %v565_v28 = vpop.f32.mrf.mxu1 }
  0xd8   : > { %v566_v29 = vadd.f32 %v565_v28, %v497_v26 }
  0xd9   : > { %v567_v30 = vpop.f32.mrf.mxu1 }
  0xda   : > { %582 = vst [vmem:[#allocation2] sm:$0xff] %v566_v29  ;;  %v568_v31 = vadd.f32 %v567_v30, %v501_v27 }
  0xdb   : > { %v569_v32 = vpop.f32.mrf.mxu1 }
  0xdc   : > { %583 = vst [vmem:[#allocation2 + $0x8] sm:$0xff] %v568_v31  ;;  %v570_v33 = vadd.f32 %v569_v32, %v497_v26 }
  0xdd   : > { %v571_v34 = vpop.f32.mrf.mxu1 }
  0xde   : > { %584 = vst [vmem:[#allocation2 + $0x10] sm:$0xff] %v570_v33  ;;  %v572_v35 = vadd.f32 %v571_v34, %v501_v27 }
  0xdf   : > { %v575_v36 = vpop.f32.mrf.mxu1 }
  0xe0   : > { %585 = vst [vmem:[#allocation2 + $0x18] sm:$0xff] %v572_v35  ;;  %v576_v37 = vadd.f32 %v575_v36, %v497_v26 }
  0xe1   : > { %v577_v38 = vpop.f32.mrf.mxu1  ;;  %v596_v57 = vld [vmem:[#allocation2] ss:$0 sm:$0xff] }
  0xe2   : > { %586 = vst [vmem:[#allocation2 + $0x20] sm:$0xff] %v576_v37  ;;  %v578_v39 = vadd.f32 %v577_v38, %v501_v27 }
  0xe3   : > { %v579_v40 = vpop.f32.mrf.mxu1  ;;  %v897_v44 = vld [vmem:[#allocation2 + $0xf] ss:$0 sm:$0xff] }
  0xe4   : > { %587 = vst [vmem:[#allocation2 + $0x28] sm:$0xff] %v578_v39 }
  0xe5   : > { %v580_v41 = vpop.f32.mrf.mxu1  ;;  %v597_v55 = vld [vmem:[#allocation2 + $0x10] ss:$0 sm:$0xff] }
  0xe7   : > { %v671_v42 = vpop.f32.mrf.mxu1  ;;  %v898_v49 = vld [vmem:[#allocation2 + $0x1f] ss:$0 sm:$0xff] }
  0xe8   : > { %v676_v51 = vrot.slane %v671_v42, 1  ;;  %v681_v58 = vadd.f32 %v671_v42, %v596_v57  ;;  %v677_v13 = vrot.slane %v671_v42, 2 }
  0xe9   : > { %v6960_v43 = vpop.f32.mrf.mxu1  ;;  %v598_v15 = vld [vmem:[#allocation2 + $0x20] ss:$0 sm:$0xff] }
  0xea   : > { %v682_v56 = vadd.f32 %v676_v51, %v597_v55  ;;  %v6786_v3 = vmul.f32 -1.442695, %v681_v58  ;;  %v683_v26 = vadd.f32 %v677_v13, %v598_v15  ;;  %v7925_v13 = vld [vmem:[%s7910_s9 + $0x1] sm:$0x1]  ;;  %v7928_v15 = vld [vmem:[%s7910_s9 + $0x2] sm:$0x1] }
  0xeb   : > { %v899_v53 = vld [vmem:[#allocation2 + $0x2f] ss:$0 sm:$0xff]  ;;  %vm901_vm3 = vcmp.gt.s32.totalorder %v7925_v13, 7  ;;  %vm902_vm4 = vcmp.gt.s32.totalorder %v7928_v15, 7  ;;  %vm600_vm6 = vcmp.gt.s32.totalorder %v7925_v13, 0  ;;  %vm601_vm7 = vcmp.gt.s32.totalorder %v7928_v15, 0 }
  0xec   : > { %v6787_v5 = vmul.f32 -1.442695, %v682_v56 }
  0xef   : > { %v969_v45 = vpop.f32.mrf.mxu1 }
  0xf0   : > { %v974_v46 = vrot.slane %v969_v45, 1  ;;  %v975_v47 = vrot.slane %v969_v45, 2  ;;  %v979_v48 = vadd.f32 %v969_v45, %v897_v44 }
  0xf1   : > { %v6971_v50 = vpop.f32.mrf.mxu1 }
  0xf2   : > { %v980_v52 = vadd.f32 %v974_v46, %v898_v49  ;;  %7174 = vtanh.f32 %v979_v48  ;;  %v981_v54 = vadd.f32 %v975_v47, %v899_v53  ;;  %v6789_v0 = vmul.f32 -1.442695, %v979_v48 }
  0xf3   : > { %v6788_v48 = vmul.f32 -1.442695, %v683_v26 }
  0xf4   : > { %7176 = vtanh.f32 %v980_v52  ;;  %v6790_v1 = vmul.f32 -1.442695, %v980_v52  ;;  %v6791_v2 = vmul.f32 -1.442695, %v981_v54 }
  0xf5   : > { %7178 = vtanh.f32 %v981_v54 }
  0xf6   : > { %7180 = vtanh.f32 %v682_v56 }
  0xf7   : > { %7182 = vtanh.f32 %v681_v58 }
  0xf8   : > { %7184 = vpow2.f32 %v6789_v0 }
  0xf9   : > { %7186 = vpow2.f32 %v6790_v1 }
  0xfa   : > { %7188 = vpow2.f32 %v6791_v2 }
  0xfb   : > { %7190 = vpow2.f32 %v6786_v3 }
  0xfc   : > { %7192 = vpow2.f32 %v6787_v5 }
  0xff   : > { %v7175_v59 = vpop.eup %7174 }
 0x100   : > { %1009 = vrot.lane.b32.xlu0 %v7175_v59, %s7651_s27 }
 0x101   : > { %v7177_v60 = vpop.eup %7176 }
 0x102   : > { %v7179_v61 = vpop.eup %7178 }
 0x103   : > { %1013 = vrot.lane.b32.xlu1 %v7179_v61, %s7651_s27  ;;  %v7181_v62 = vpop.eup %7180 }
 0x104   : > { %1011 = vrot.lane.b32.xlu0 %v7177_v60, %s7651_s27  ;;  %v7183_v63 = vpop.eup %7182 }
 0x105   : > { %v7185_v6 = vpop.eup %7184 }
 0x106   : > { %v991_v11 = vadd.f32 1.0, %v7185_v6  ;;  %v7187_v12 = vpop.eup %7186 }
 0x107   : > { %711 = vrot.lane.b32.xlu1 %v7183_v63, %s7651_s27  ;;  %v992_v16 = vadd.f32 1.0, %v7187_v12  ;;  %v7189_v24 = vpop.eup %7188 }
 0x108   : > { %713 = vrot.lane.b32.xlu0 %v7181_v62, %s7651_s27  ;;  %7194 = vrcp.f32 %v991_v11  ;;  %v7191_v27 = vpop.eup %7190  ;;  %v993_v28 = vadd.f32 1.0, %v7189_v24  ;;  %v7918_v11 = vld [vmem:[%s7910_s9] sm:$0x1] }
 0x109   : > { %7196 = vrcp.f32 %v992_v16  ;;  %v7193_v29 = vpop.eup %7192  ;;  %v693_v30 = vadd.f32 1.0, %v7191_v27  ;;  %vm900_vm2 = vcmp.gt.s32.totalorder %v7918_v11, 7  ;;  %v1056_v27 = vsel %vm902_vm4, 1, %v10191_v4 }
 0x10a   : > { %7198 = vtanh.f32 %v683_v26  ;;  %v694_v31 = vadd.f32 1.0, %v7193_v29  ;;  %v1054_v16 = vsel %vm900_vm2, 1, %v10191_v4  ;;  %v1055_v26 = vsel %vm901_vm3, 1, %v10191_v4 }
 0x10b   : > { %7200 = vrcp.f32 %v993_v28  ;;  %vm599_vm5 = vcmp.gt.s32.totalorder %v7918_v11, 0  ;;  %vm1583_vm15 = vcmp.gt.s32.totalorder %v7918_v11, 6  ;;  %vm1584_vm2 = vcmp.gt.s32.totalorder %v7925_v13, 6 }
 0x10c   : > { %7202 = vrcp.f32 %v693_v30  ;;  %vm1585_vm3 = vcmp.gt.s32.totalorder %v7928_v15, 6  ;;  %vm1230_vm4 = vcmp.gt.s32.totalorder %v7918_v11, 1 }
 0x10d   : > { %7204 = vrcp.f32 %v694_v31 }
 0x10e   : > { %7206 = vpow2.f32 %v6788_v48 }
 0x115   : > { %v7868_v32 = vpop.eup %7194 }
 0x116   : > { %v7872_v35 = vpop.eup %7196  ;;  %v1003_v51 = vmul.f32 0.0, %v7868_v32 }
 0x117   : > { %v7199_v38 = vpop.eup %7198  ;;  %v1004_v54 = vmul.f32 0.0, %v7872_v35 }
 0x118   : > { %v7877_v40 = vpop.eup %7200 }
 0x119   : > { %v7880_v42 = vpop.eup %7202  ;;  %v1005_v60 = vmul.f32 0.0, %v7877_v40 }
 0x11a   : > { %v7884_v46 = vpop.eup %7204  ;;  %v705_v0 = vmul.f32 0.0, %v7880_v42 }
 0x11b   : > { %v7207_v49 = vpop.eup %7206  ;;  %v706_v2 = vmul.f32 0.0, %v7884_v46 }
 0x11c   : > { %v695_v50 = vadd.f32 1.0, %v7207_v49 }
 0x11e   : > { %7208 = vrcp.f32 %v695_v50 }
 0x12b   : > { %v7894_v55 = vpop.eup %7208 }
 0x12c   : > { %v707_v30 = vmul.f32 0.0, %v7894_v55 }
 0x172   : > { %v1010_v33 = vpop.permute.xlu0 %1009 }
 0x173   : > { %v1018_v34 = vmul.f32 %v7868_v32, %v1010_v33 }
 0x175   : > { %1024 = vrot.lane.b32.xlu1 %v1018_v34, %s7651_s27  ;;  %v1014_v39 = vpop.permute.xlu1 %1013  ;;  %v7652_v34 = vmov 1966171168  }
 0x176   : > { %v1012_v36 = vpop.permute.xlu0 %1011  ;;  %v1020_v41 = vmul.f32 %v7877_v40, %v1014_v39 }
 0x177   : > { %v1019_v37 = vmul.f32 %v7872_v35, %v1012_v36  ;;  %v787_v36 = vunpack.c.l.s4 %v7652_v34  ;;  %v10248_v34 = vmov 0 }
 0x179   : > { %1026 = vrot.lane.b32.xlu0 %v1019_v37, %s7651_s27  ;;  %715 = vrot.lane.b32.xlu1 %v7199_v38, %s7651_s27  ;;  %v712_v43 = vpop.permute.xlu1 %711  ;;  %v788_v37 = vunpack.c.0.s8 %v787_v36 }
 0x17a   : > { %v714_v44 = vpop.permute.xlu0 %713  ;;  %v720_v45 = vmul.f32 %v7880_v42, %v712_v43 }
 0x17b   : > { %v721_v47 = vmul.f32 %v7884_v46, %v714_v44  ;;  %v7944_v39 = vsub.s32 %v788_v37, %v7850_v22 }
 0x17d   : > { %1028 = vrot.lane.b32.xlu0 %v1020_v41, %s7651_s27  ;;  %726 = vrot.lane.b32.xlu1 %v720_v45, %s7651_s27 }
 0x181   : > { %728 = vrot.lane.b32.xlu0 %v721_v47, %s7651_s27 }
 0x1e7   : > { %v1025_v52 = vpop.permute.xlu1 %1024 }
 0x1e8   : > { %v7890_v53 = vadd.f32 %v1025_v52, %v1003_v51 }
 0x1ea   : > { %7210 = vtanh.f32 %v7890_v53 }
 0x1eb   : > { %v1027_v56 = vpop.permute.xlu0 %1026  ;;  %v716_v57 = vpop.permute.xlu1 %715 }
 0x1ec   : > { %v7896_v58 = vadd.f32 %v1027_v56, %v1004_v54  ;;  %v722_v59 = vmul.f32 %v7894_v55, %v716_v57  ;;  %v758_v56 = vsel %vm601_vm7, 1, %v10191_v4 }
 0x1ee   : > { %7212 = vtanh.f32 %v7896_v58  ;;  %730 = vrot.lane.b32.xlu1 %v722_v59, %s7651_s27 }
 0x1ef   : > { %v1029_v61 = vpop.permute.xlu0 %1028  ;;  %v727_v63 = vpop.permute.xlu1 %726 }
 0x1f0   : > { %v7902_v62 = vadd.f32 %v1029_v61, %v1005_v60  ;;  %v7913_v3 = vadd.f32 %v727_v63, %v705_v0 }
 0x1f2   : > { %7214 = vtanh.f32 %v7902_v62 }
 0x1f3   : > { %v729_v1 = vpop.permute.xlu0 %728  ;;  %7216 = vtanh.f32 %v7913_v3 }
 0x1f4   : > { %v7915_v5 = vadd.f32 %v729_v1, %v706_v2 }
 0x1f6   : > { %7218 = vtanh.f32 %v7915_v5 }
 0x1f7   : > { %v7211_v6 = vpop.eup %7210 }
 0x1f8   : > { %1042 = vrot.lane.b32.xlu0 %v7211_v6, %s7651_s27 }
 0x1fb   : > { %v7213_v12 = vpop.eup %7212 }
 0x1fc   : > { %1044 = vrot.lane.b32.xlu1 %v7213_v12, %s7651_s27  ;;  %v1090_v12 = vrot.slane %v7890_v53, %v7944_v39 }
 0x1ff   : > { %v7215_v24 = vpop.eup %7214 }
 0x200   : > { %1046 = vrot.lane.b32.xlu0 %v7215_v24, %s7651_s27  ;;  %1058 = vperm.xlu1 %7166, %v1054_v16   ;;  %v7217_v28 = vpop.eup %7216 }
 0x203   : > { %v7219_v29 = vpop.eup %7218 }
 0x204   : > { %1065 = vperm.xlu0 %7167, %v1055_v26   ;;  %1072 = vperm.xlu1 %7166, %v1056_v27  }
 0x208   : > { %746 = vrot.lane.b32.xlu0 %v7219_v29, %s7651_s27  ;;  %744 = vrot.lane.b32.xlu1 %v7217_v28, %s7651_s27 }
 0x260   : > { %v731_v31 = vpop.permute.xlu1 %730 }
 0x261   : > { %v7940_v33 = vadd.f32 %v731_v31, %v707_v30 }
 0x263   : > { %7220 = vtanh.f32 %v7940_v33 }
 0x26a   : > { %v1043_v38 = vpop.permute.xlu0 %1042 }
 0x26b   : > { %v1051_v41 = vmul.f32 %v7868_v32, %v1043_v38  ;;  %v1104_v38 = vrot.slane %v7896_v58, %v7944_v39 }
 0x26d   : > { %v1147_v43 = vrot.slane %v1051_v41, %v7944_v39 }
 0x26e   : > { %v1045_v44 = vpop.permute.xlu1 %1044 }
 0x26f   : > { %v1052_v45 = vmul.f32 %v7872_v35, %v1045_v44  ;;  %v1154_v47 = vrot.slane %v1147_v43, %v7944_v39  ;;  %v756_v35 = vsel %vm599_vm5, 1, %v10191_v4  ;;  %vm1231_vm5 = vcmp.gt.s32.totalorder %v7925_v13, 1 }
 0x270   : > { %v7221_v48 = vpop.eup %7220 }
 0x271   : > { %v1161_v49 = vrot.slane %v1052_v45, %v7944_v39  ;;  %1183 = vrot.lane.b32.xlu0 %v1154_v47, %s7653_s14  ;;  %748 = vrot.lane.b32.xlu1 %v7221_v48, %s7651_s27  ;;  %v10253_v45 = vmov 0  ;;  %v1111_v48 = vrot.slane %v1104_v38, %v7944_v39 }
 0x272   : > { %v1047_v50 = vpop.permute.xlu0 %1046 }
 0x273   : > { %v1053_v51 = vmul.f32 %v7877_v40, %v1047_v50  ;;  %v1168_v32 = vrot.slane %v1161_v49, %v7944_v39  ;;  %v757_v40 = vsel %vm600_vm6, 1, %v10191_v4  ;;  %vm1232_vm6 = vcmp.gt.s32.totalorder %v7928_v15, 1 }
 0x275   : > { %v1175_v52 = vrot.slane %v1053_v51, %v7944_v39  ;;  %1185 = vrot.lane.b32.xlu1 %v1168_v32, %s7653_s14 }
 0x277   : > { %v1182_v54 = vrot.slane %v1175_v52, %v7944_v39 }
 0x279   : > { %1187 = vrot.lane.b32.xlu0 %v1182_v54, %s7653_s14  ;;  %760 = vperm.xlu1 %7166, %v756_v35  }
 0x27b   : > { %v1059_v57 = vpop.permute.xlu1 %1058 }
 0x27c   : > { %v1063_v53 = vrot.slane %v1059_v57, %v7853_v23 }
 0x27d   : > { %767 = vperm.xlu0 %7167, %v757_v40   ;;  %774 = vperm.xlu1 %7166, %v758_v56  }
 0x27e   : > { %vm7985_vm8 = vcmp.eq.s32.totalorder %v1063_v53, 1  ;;  %v1581_v53 = vld [vmem:[#allocation2 + $0x1e] ss:$0 sm:$0xff] }
 0x27f   : > { %v1066_v59 = vpop.permute.xlu0 %1065  ;;  %v1073_v60 = vpop.permute.xlu1 %1072 }
 0x280   : > { %v1070_v27 = vrot.slane %v1066_v59, %v7853_v23  ;;  %v1077_v36 = vrot.slane %v1073_v60, %v7853_v23 }
 0x282   : > { %vm7989_vm9 = vcmp.eq.s32.totalorder %v1070_v27, 1  ;;  %vm8008_vm10 = vcmp.eq.s32.totalorder %v1077_v36, 1  ;;  %v806_v36 = vrot.slane %v7915_v5, %v7944_v39 }
 0x283   : > { %v747_v61 = vpop.permute.xlu0 %746  ;;  %v745_v63 = vpop.permute.xlu1 %744  ;;  %v10249_v34 = vsel %vm7989_vm9, 4294967295, %v10248_v34  ;;  %v10254_v45 = vsel %vm8008_vm10, 4294967295, %v10253_v45 }
 0x284   : > { %v754_v0 = vmul.f32 %v7884_v46, %v747_v61  ;;  %v753_v1 = vmul.f32 %v7880_v42, %v745_v63  ;;  %v1118_v46 = vrot.slane %v7902_v62, %v7944_v39  ;;  %v1097_v42 = vrot.slane %v1090_v12, %v7944_v39  ;;  %10250 = vst [vmem:[#allocation10_spill] sm:$0xff] %v10249_v34 }
 0x285   : > { %v10245_v62 = vmov 0  ;;  %10255 = vst [vmem:[#allocation13_spill] sm:$0xff] %v10254_v45  ;;  %v10263_v63 = vmov 0 }
 0x286   : > { %v863_v2 = vrot.slane %v754_v0, %v7944_v39  ;;  %v849_v6 = vrot.slane %v753_v1, %v7944_v39  ;;  %v1125_v26 = vrot.slane %v1118_v46, %v7944_v39  ;;  %v10246_v62 = vsel %vm7985_vm8, 4294967295, %v10245_v62 }
 0x287   : > { %10247 = vst [vmem:[#allocation9_spill] sm:$0xff] %v10246_v62 }
 0x288   : > { %v870_v16 = vrot.slane %v863_v2, %v7944_v39  ;;  %v856_v24 = vrot.slane %v849_v6, %v7944_v39 }
 0x28a   : > { %887 = vrot.lane.b32.xlu1 %v870_v16, %s7653_s14  ;;  %885 = vrot.lane.b32.xlu0 %v856_v24, %s7653_s14  ;;  %v1580_v24 = vld [vmem:[#allocation2 + $0xe] ss:$0 sm:$0xff] }
 0x28e   : > { %1126 = vrot.lane.b32.xlu1 %v1097_v42, %s7654_s15 }
 0x292   : > { %1130 = vrot.lane.b32.xlu1 %v1125_v26, %s7654_s15 }
 0x2e3   : > { %v749_v28 = vpop.permute.xlu1 %748  ;;  %v1184_v30 = vpop.permute.xlu0 %1183 }
 0x2e4   : > { %v755_v29 = vmul.f32 %v7894_v55, %v749_v28  ;;  %v7998_v55 = vsel %vm7985_vm8, %v1184_v30, 0.0 }
 0x2e5   : > { %10251 = vst [vmem:[#allocation11_spill] sm:$0xff] %v7998_v55 }
 0x2e6   : > { %v877_v31 = vrot.slane %v755_v29, %v7944_v39 }
 0x2e7   : > { %v1186_v37 = vpop.permute.xlu1 %1185 }
 0x2e8   : > { %v8002_v41 = vsel %vm7989_vm9, %v1186_v37, 0.0  ;;  %v884_v43 = vrot.slane %v877_v31, %v7944_v39 }
 0x2e9   : > { %10252 = vst [vmem:[#allocation12_spill] sm:$0xff] %v8002_v41  ;;  %v1586_v44 = vcombine.low %v7998_v55, %v8002_v41 }
 0x2ea   : > { %889 = vrot.lane.b32.xlu0 %v884_v43, %s7653_s14 }
 0x2eb   : > { %v1188_v58 = vpop.permute.xlu0 %1187  ;;  %v1593_v49 = vrot.slane %v1586_v44, %v7944_v39 }
 0x2ec   : > { %v8014_v47 = vsel %vm8008_vm10, %v1188_v58, 0.0  ;;  %v820_v58 = vrot.slane %v7940_v33, %v7944_v39 }
 0x2ed   : > { %10256 = vst [vmem:[#allocation14_spill] sm:$0xff] %v8014_v47  ;;  %v1600_v50 = vrot.slane %v8014_v47, %v7944_v39 }
 0x2ee   : > { %1128 = vrot.lane.b32.xlu0 %v1111_v48, %s7654_s15 }
 0x2ef   : > { %v1601_v51 = vcombine.low %v1593_v49, %v1600_v50  ;;  %v827_v50 = vrot.slane %v820_v58, %v7944_v39 }
 0x2f1   : > { %v1608_v32 = vrot.slane %v1601_v51, %v7944_v39 }
 0x2f3   : > { %6992 = vmatmul.mubr.msk.f32.vlgmr.msra.gmra.mxu1 %vm10197_vm1, %v1608_v32 }
 0x2f4   : > { %v761_v52 = vpop.permute.xlu1 %760  ;;  %7006 = vmatpush3.msra.mxu1 %v7810_v17  ;;  %7013 = vmatprep.mubr.msk.f32.mxu1 %vm10183_vm0, %v10185_v8  ;;  %v10257_v17 = vmov 0 }
 0x2f5   : > { %7007 = vmatprep.subr.mxu1 %v10185_v8  ;;  %v765_v35 = vrot.slane %v761_v52, %v7853_v23  ;;  %v1227_v52 = vld [vmem:[#allocation2 + $0x1] ss:$0 sm:$0xff] }
 0x2f6   : > { %7008 = vmatpush3.msra.mxu1 %v7816_v18  ;;  %v10260_v18 = vmov 0 }
 0x2f7   : > { %7009 = vmatprep.subr.mxu1 %v10185_v8  ;;  %vm8039_vm13 = vcmp.eq.s32.totalorder %v765_v35, 1 }
 0x2f8   : > { %v768_v54 = vpop.permute.xlu0 %767  ;;  %v775_v40 = vpop.permute.xlu1 %774  ;;  %7010 = vmatpush3.msra.mxu1 %v7825_v19  ;;  %v10261_v18 = vsel %vm8039_vm13, 4294967295, %v10260_v18 }
 0x2f9   : > { %v772_v56 = vrot.slane %v768_v54, %v7853_v23  ;;  %7011 = vmatprep.subr.mxu1 %v10185_v8  ;;  %10262 = vst [vmem:[#allocation16_spill] sm:$0xff] %v10261_v18  ;;  %v779_v60 = vrot.slane %v775_v40, %v7853_v23 }
 0x2fa   : > { %7012 = vmatpush3.msra.mxu1 %v7832_v20 }
 0x2fb   : > { %vm8034_vm11 = vcmp.eq.s32.totalorder %v772_v56, 1  ;;  %7027 = vmatprep.subr.mxu1 %v10185_v8  ;;  %vm8058_vm14 = vcmp.eq.s32.totalorder %v779_v60, 1 }
 0x2fc   : > { %v10258_v17 = vsel %vm8034_vm11, 4294967295, %v10257_v17  ;;  %v886_v57 = vpop.permute.xlu0 %885  ;;  %v888_v59 = vpop.permute.xlu1 %887  ;;  %v10264_v63 = vsel %vm8058_vm14, 4294967295, %v10263_v63 }
 0x2fd   : > { %10259 = vst [vmem:[#allocation15_spill] sm:$0xff] %v10258_v17  ;;  %v8045_v19 = vsel %vm8039_vm13, %v886_v57, 0.0  ;;  %v8049_v20 = vsel %vm8034_vm11, %v888_v59, 0.0  ;;  %10265 = vst [vmem:[#allocation17_spill] sm:$0xff] %v10264_v63  ;;  %v1228_v59 = vld [vmem:[#allocation2 + $0x11] ss:$0 sm:$0xff] }
 0x2fe   : > { %1196 = vst.msk [vmem:[#allocation3] sm:$0x1] %vm10182_vm12, %v8045_v19  ;;  %1197 = vst.msk [vmem:[#allocation3 + $0x8] sm:$0x1] %vm10182_vm12, %v8049_v20  ;;  %v1236_v61 = vcombine.low %v8045_v19, %v8049_v20 }
 0x300   : > { %v1243_v2 = vrot.slane %v1236_v61, %v7944_v39  ;;  %v1127_v31 = vpop.permute.xlu1 %1126 }
 0x301   : > { %v8092_v43 = vsel %vm7985_vm8, %v1127_v31, 0.0 }
 0x302   : > { %v1717_v5 = vrot.slane %v8092_v43, %v7853_v23 }
 0x35c   : > { %v890_v0 = vpop.permute.xlu0 %889 }
 0x35d   : > { %v8064_v1 = vsel %vm8058_vm14, %v890_v0, 0.0 }
 0x35e   : > { %v1250_v6 = vrot.slane %v8064_v1, %v7944_v39  ;;  %1198 = vst.msk [vmem:[#allocation3 + $0x10] sm:$0x1] %vm10182_vm12, %v8064_v1 }
 0x360   : > { %v1251_v12 = vcombine.low %v1243_v2, %v1250_v6  ;;  %v1129_v44 = vpop.permute.xlu0 %1128 }
 0x361   : > { %v8103_v48 = vsel %vm7989_vm9, %v1129_v44, 0.0  ;;  %vm10296_vm9 = vcmask 253952  }
 0x362   : > { %v1258_v16 = vrot.slane %v1251_v12, %v7944_v39  ;;  %v1721_v49 = vrot.slane %v8103_v48, %v7853_v23 }
 0x364   : > { %6981 = vmatmul.mubr.msk.f32.vlgmr.msra.gmra.mxu0 %vm10197_vm1, %v1258_v16 }
 0x365   : > { %6995 = vmatpush3.msra.mxu0 %v7757_v7  ;;  %7002 = vmatprep.mubr.msk.f32.mxu0 %vm10183_vm0, %v10185_v8 }
 0x366   : > { %6996 = vmatprep.subr.mxu0 %v10185_v8 }
 0x367   : > { %6997 = vmatpush3.msra.mxu0 %v7766_v9  ;;  %v1582_v9 = vld [vmem:[#allocation2 + $0x2e] ss:$0 sm:$0xff] }
 0x368   : > { %6998 = vmatprep.subr.mxu0 %v10185_v8 }
 0x369   : > { %6999 = vmatpush3.msra.mxu0 %v7781_v10 }
 0x36a   : > { %7000 = vmatprep.subr.mxu0 %v10185_v8 }
 0x36b   : > { %7001 = vmatpush3.msra.mxu0 %v7789_v14  ;;  %v792_v14 = vrot.slane %v7913_v3, %v7944_v39  ;;  %v813_v3 = vrot.slane %v806_v36, %v7944_v39 }
 0x36c   : > { %7016 = vmatprep.subr.mxu0 %v10185_v8 }
 0x36d   : > { %v799_v38 = vrot.slane %v792_v14, %v7944_v39 }
 0x3b3   : > { %v1677_v46 = vpop.f32.mrf.mxu1 }
 0x3b4   : > { %v1682_v7 = vrot.slane %v1677_v46, 1  ;;  %v1683_v42 = vrot.slane %v1677_v46, 2  ;;  %v1687_v26 = vadd.f32 %v1677_v46, %v1580_v24  ;;  %v1229_v24 = vld [vmem:[#allocation2 + $0x21] ss:$0 sm:$0xff] }
 0x3b5   : > { %v6993_v27 = vpop.f32.mrf.mxu1 }
 0x3b6   : > { %v1688_v28 = vadd.f32 %v1682_v7, %v1581_v53  ;;  %7222 = vtanh.f32 %v1687_v26  ;;  %v1689_v29 = vadd.f32 %v1683_v42, %v1582_v9  ;;  %v6797_v33 = vmul.f32 -1.442695, %v1687_v26  ;;  %v1131_v7 = vpop.permute.xlu1 %1130 }
 0x3b7   : > { %v8114_v26 = vsel %vm8008_vm10, %v1131_v7, 0.0  ;;  %vm10293_vm10 = vmmov 0  }
 0x3b8   : > { %7224 = vtanh.f32 %v1688_v28  ;;  %v6798_v51 = vmul.f32 -1.442695, %v1688_v28  ;;  %v6799_v32 = vmul.f32 -1.442695, %v1689_v29  ;;  %v1725_v28 = vrot.slane %v8114_v26, %v7853_v23 }
 0x3b9   : > { %7226 = vtanh.f32 %v1689_v29 }
 0x3ba   : > { %7228 = vpow2.f32 %v6797_v33 }
 0x3bb   : > { %7230 = vpow2.f32 %v6798_v51 }
 0x3bc   : > { %7232 = vpow2.f32 %v6799_v32 }
 0x3c3   : > { %v7223_v10 = vpop.eup %7222 }
 0x3c4   : > { %1741 = vrot.lane.b32.xlu0 %v7223_v10, %s7651_s27 }
 0x3c5   : > { %v7225_v30 = vpop.eup %7224 }
 0x3c6   : > { %1743 = vrot.lane.b32.xlu1 %v7225_v30, %s7651_s27  ;;  %v7227_v37 = vpop.eup %7226 }
 0x3c7   : > { %v7229_v54 = vpop.eup %7228 }
 0x3c8   : > { %1745 = vrot.lane.b32.xlu0 %v7227_v37, %s7651_s27  ;;  %v7231_v57 = vpop.eup %7230  ;;  %v1699_v0 = vadd.f32 1.0, %v7229_v54 }
 0x3c9   : > { %v1700_v2 = vadd.f32 1.0, %v7231_v57  ;;  %v7233_v6 = vpop.eup %7232 }
 0x3ca   : > { %828 = vrot.lane.b32.xlu1 %v799_v38, %s7654_s15  ;;  %v1701_v16 = vadd.f32 1.0, %v7233_v6 }
 0x3cc   : > { %830 = vrot.lane.b32.xlu0 %v813_v3, %s7654_s15 }
 0x3ce   : > { %1726 = vrot.lane.b32.xlu1 %v1717_v5, %s7651_s27 }
 0x3d0   : > { %1728 = vrot.lane.b32.xlu0 %v1721_v49, %s7651_s27 }
 0x3d2   : > { %832 = vrot.lane.b32.xlu1 %v827_v50, %s7654_s15 }
 0x424   : > { %v1327_v35 = vpop.f32.mrf.mxu0 }
 0x425   : > { %v1332_v40 = vrot.slane %v1327_v35, 1  ;;  %v1337_v56 = vadd.f32 %v1327_v35, %v1227_v52  ;;  %v1333_v12 = vrot.slane %v1327_v35, 2 }
 0x426   : > { %v6982_v60 = vpop.f32.mrf.mxu0 }
 0x427   : > { %v1338_v61 = vadd.f32 %v1332_v40, %v1228_v59  ;;  %7234 = vtanh.f32 %v1337_v56  ;;  %v1339_v46 = vadd.f32 %v1333_v12, %v1229_v24  ;;  %v6793_v35 = vmul.f32 -1.442695, %v1337_v56 }
 0x429   : > { %7236 = vtanh.f32 %v1338_v61  ;;  %v6794_v54 = vmul.f32 -1.442695, %v1338_v61  ;;  %v6795_v40 = vmul.f32 -1.442695, %v1339_v46 }
 0x42a   : > { %7238 = vrcp.f32 %v1699_v0 }
 0x42b   : > { %7240 = vrcp.f32 %v1700_v2 }
 0x42c   : > { %7242 = vrcp.f32 %v1701_v16 }
 0x42d   : > { %7244 = vtanh.f32 %v1339_v46 }
 0x42e   : > { %7246 = vpow2.f32 %v6793_v35  ;;  %v1787_v35 = vsel %vm1584_vm2, 1, %v10191_v4 }
 0x42f   : > { %7248 = vpow2.f32 %v6794_v54  ;;  %v1788_v54 = vsel %vm1585_vm3, 1, %v10191_v4 }
 0x430   : > { %7250 = vpow2.f32 %v6795_v40 }
 0x434   : > { %v7235_v42 = vpop.eup %7234 }
 0x435   : > { %1391 = vrot.lane.b32.xlu0 %v7235_v42, %s7651_s27 }
 0x436   : > { %v1742_v53 = vpop.permute.xlu0 %1741  ;;  %v7237_v27 = vpop.eup %7236 }
 0x437   : > { %1393 = vrot.lane.b32.xlu1 %v7237_v27, %s7651_s27  ;;  %v8120_v9 = vpop.eup %7238 }
 0x438   : > { %v1744_v29 = vpop.permute.xlu1 %1743  ;;  %v8123_v10 = vpop.eup %7240  ;;  %v1750_v14 = vmul.f32 %v8120_v9, %v1742_v53 }
 0x439   : > { %1730 = vrot.lane.b32.xlu0 %v1725_v28, %s7651_s27  ;;  %v1751_v30 = vmul.f32 %v8123_v10, %v1744_v29  ;;  %v8129_v37 = vpop.eup %7242 }
 0x43a   : > { %v1746_v31 = vpop.permute.xlu0 %1745  ;;  %v7245_v38 = vpop.eup %7244 }
 0x43b   : > { %1756 = vrot.lane.b32.xlu1 %v1750_v14, %s7651_s27  ;;  %v1752_v44 = vmul.f32 %v8129_v37, %v1746_v31  ;;  %v7247_v57 = vpop.eup %7246 }
 0x43c   : > { %v829_v36 = vpop.permute.xlu1 %828  ;;  %v7249_v59 = vpop.eup %7248  ;;  %v1349_v60 = vadd.f32 1.0, %v7247_v57 }
 0x43d   : > { %1758 = vrot.lane.b32.xlu0 %v1751_v30, %s7651_s27  ;;  %v8134_v3 = vsel %vm8039_vm13, %v829_v36, 0.0  ;;  %v1350_v0 = vadd.f32 1.0, %v7249_v59  ;;  %v7251_v2 = vpop.eup %7250  ;;  %vm10302_vm13 = vcmask 261120  }
 0x43e   : > { %v831_v58 = vpop.permute.xlu0 %830  ;;  %v1367_v50 = vrot.slane %v8134_v3, %v7853_v23  ;;  %7252 = vrcp.f32 %v1349_v60  ;;  %v1351_v6 = vadd.f32 1.0, %v7251_v2 }
 0x43f   : > { %1395 = vrot.lane.b32.xlu1 %v7245_v38, %s7651_s27  ;;  %v8139_v5 = vsel %vm8034_vm11, %v831_v58, 0.0  ;;  %7254 = vrcp.f32 %v1350_v0 }
 0x440   : > { %v1727_v49 = vpop.permute.xlu1 %1726  ;;  %v1371_v33 = vrot.slane %v8139_v5, %v7853_v23  ;;  %7256 = vrcp.f32 %v1351_v6 }
 0x441   : > { %1760 = vrot.lane.b32.xlu0 %v1752_v44, %s7651_s27  ;;  %v1735_v53 = vmul.f32 %v8120_v9, %v1727_v49 }
 0x442   : > { %v1729_v12 = vpop.permute.xlu0 %1728 }
 0x443   : > { %1376 = vrot.lane.b32.xlu1 %v1367_v50, %s7651_s27  ;;  %v1736_v27 = vmul.f32 %v8123_v10, %v1729_v12 }
 0x444   : > { %v833_v51 = vpop.permute.xlu1 %832 }
 0x445   : > { %1378 = vrot.lane.b32.xlu0 %v1371_v33, %s7651_s27  ;;  %v8150_v32 = vsel %vm8058_vm14, %v833_v51, 0.0  ;;  %v1786_v51 = vsel %vm1583_vm15, 1, %v10191_v4  ;;  %vm10299_vm14 = vmmov %vm10296_vm9 }
 0x446   : > { %v1375_v52 = vrot.slane %v8150_v32, %v7853_v23 }
 0x448   : > { %1380 = vrot.lane.b32.xlu1 %v1375_v52, %s7651_s27 }
 0x44b   : > { %v8155_v16 = vpop.eup %7252 }
 0x44c   : > { %v8158_v61 = vpop.eup %7254 }
 0x44d   : > { %v8170_v31 = vpop.eup %7256 }
 0x4a7   : > { %v1392_v24 = vpop.permute.xlu0 %1391 }
 0x4a8   : > { %v1400_v56 = vmul.f32 %v8155_v16, %v1392_v24 }
 0x4a9   : > { %v1394_v7 = vpop.permute.xlu1 %1393 }
 0x4aa   : > { %1406 = vrot.lane.b32.xlu0 %v1400_v56, %s7651_s27  ;;  %v1401_v46 = vmul.f32 %v8158_v61, %v1394_v7 }
 0x4ab   : > { %v1731_v42 = vpop.permute.xlu0 %1730 }
 0x4ac   : > { %1408 = vrot.lane.b32.xlu1 %v1401_v46, %s7651_s27  ;;  %v1737_v36 = vmul.f32 %v8129_v37, %v1731_v42 }
 0x4ad   : > { %v1757_v28 = vpop.permute.xlu1 %1756 }
 0x4ae   : > { %v8165_v29 = vadd.f32 %v1757_v28, %v1735_v53 }
 0x4af   : > { %v1759_v14 = vpop.permute.xlu0 %1758 }
 0x4b0   : > { %v8167_v30 = vadd.f32 %v1759_v14, %v1736_v27  ;;  %7258 = vtanh.f32 %v8165_v29 }
 0x4b1   : > { %v1396_v38 = vpop.permute.xlu1 %1395 }
 0x4b2   : > { %7260 = vtanh.f32 %v8167_v30  ;;  %v1402_v44 = vmul.f32 %v8170_v31, %v1396_v38 }
 0x4b3   : > { %v1761_v58 = vpop.permute.xlu0 %1760 }
 0x4b4   : > { %v8175_v49 = vadd.f32 %v1761_v58, %v1737_v36  ;;  %1410 = vrot.lane.b32.xlu0 %v1402_v44, %s7651_s27 }
 0x4b5   : > { %v1377_v40 = vpop.permute.xlu1 %1376 }
 0x4b6   : > { %7262 = vtanh.f32 %v8175_v49  ;;  %v1385_v59 = vmul.f32 %v8155_v16, %v1377_v40 }
 0x4b7   : > { %v1379_v57 = vpop.permute.xlu0 %1378 }
 0x4b8   : > { %v1386_v6 = vmul.f32 %v8158_v61, %v1379_v57 }
 0x4ba   : > { %v1381_v60 = vpop.permute.xlu1 %1380 }
 0x4bb   : > { %v1387_v56 = vmul.f32 %v8170_v31, %v1381_v60 }
 0x4bd   : > { %v7259_v50 = vpop.eup %7258 }
 0x4be   : > { %1774 = vrot.lane.b32.xlu1 %v7259_v50, %s7651_s27 }
 0x4bf   : > { %v7261_v33 = vpop.eup %7260 }
 0x4c0   : > { %1776 = vrot.lane.b32.xlu0 %v7261_v33, %s7651_s27 }
 0x4c3   : > { %v7263_v52 = vpop.eup %7262 }
 0x4c4   : > { %1778 = vrot.lane.b32.xlu1 %v7263_v52, %s7651_s27  ;;  %1790 = vperm.xlu0 %7167, %v1786_v51  }
 0x4c8   : > { %1797 = vperm.xlu1 %7166, %v1787_v35   ;;  %1804 = vperm.xlu0 %7167, %v1788_v54   ;;  %v1437_v35 = vsel %vm1231_vm5, 1, %v10191_v4  ;;  %v1438_v54 = vsel %vm1232_vm6, 1, %v10191_v4 }
 0x51c   : > { %v1407_v0 = vpop.permute.xlu0 %1406 }
 0x51d   : > { %v8189_v2 = vadd.f32 %v1407_v0, %v1385_v59 }
 0x51e   : > { %v1409_v12 = vpop.permute.xlu1 %1408 }
 0x51f   : > { %7264 = vtanh.f32 %v8189_v2  ;;  %v8193_v24 = vadd.f32 %v1409_v12, %v1386_v6 }
 0x521   : > { %7266 = vtanh.f32 %v8193_v24 }
 0x526   : > { %v1411_v7 = vpop.permute.xlu0 %1410 }
 0x527   : > { %v8197_v46 = vadd.f32 %v1411_v7, %v1387_v56  ;;  %v1822_v56 = vrot.slane %v8165_v29, %v7944_v39 }
 0x529   : > { %7268 = vtanh.f32 %v8197_v46  ;;  %v1829_v29 = vrot.slane %v1822_v56, %v7944_v39 }
 0x52c   : > { %v7265_v42 = vpop.eup %7264 }
 0x52d   : > { %1424 = vrot.lane.b32.xlu1 %v7265_v42, %s7651_s27 }
 0x52e   : > { %v7267_v53 = vpop.eup %7266 }
 0x52f   : > { %1426 = vrot.lane.b32.xlu0 %v7267_v53, %s7651_s27 }
 0x530   : > { %v1775_v27 = vpop.permute.xlu1 %1774 }
 0x531   : > { %v1783_v28 = vmul.f32 %v8120_v9, %v1775_v27 }
 0x532   : > { %v1777_v14 = vpop.permute.xlu0 %1776 }
 0x533   : > { %v1784_v36 = vmul.f32 %v8123_v10, %v1777_v14  ;;  %v1879_v38 = vrot.slane %v1783_v28, %v7944_v39 }
 0x535   : > { %v1893_v44 = vrot.slane %v1784_v36, %v7944_v39  ;;  %v1886_v50 = vrot.slane %v1879_v38, %v7944_v39  ;;  %v10267_v38 = vmov 0 }
 0x536   : > { %v1779_v58 = vpop.permute.xlu1 %1778  ;;  %v7269_v33 = vpop.eup %7268 }
 0x537   : > { %v1785_v51 = vmul.f32 %v8129_v37, %v1779_v58  ;;  %1428 = vrot.lane.b32.xlu1 %v7269_v33, %s7651_s27  ;;  %1915 = vrot.lane.b32.xlu0 %v1886_v50, %s7653_s14  ;;  %v1900_v9 = vrot.slane %v1893_v44, %v7944_v39  ;;  %v1436_v37 = vsel %vm1230_vm4, 1, %v10191_v4  ;;  %v10269_v44 = vmov 0 }
 0x538   : > { %v10272_v50 = vmov 0 }
 0x539   : > { %v1907_v52 = vrot.slane %v1785_v51, %v7944_v39 }
 0x53b   : > { %v1914_v10 = vrot.slane %v1907_v52, %v7944_v39  ;;  %1917 = vrot.lane.b32.xlu1 %v1900_v9, %s7653_s14 }
 0x53d   : > { %1919 = vrot.lane.b32.xlu0 %v1914_v10, %s7653_s14 }
 0x53f   : > { %1440 = vperm.xlu1 %7166, %v1436_v37   ;;  %v1791_v11 = vpop.permute.xlu0 %1790 }
 0x540   : > { %v1795_v42 = vrot.slane %v1791_v11, %v7853_v23 }
 0x541   : > { %1447 = vperm.xlu0 %7167, %v1437_v35  }
 0x542   : > { %vm8244_vm7 = vcmp.eq.s32.totalorder %v1795_v42, 1 }
 0x543   : > { %1454 = vperm.xlu1 %7166, %v1438_v54   ;;  %v1798_v40 = vpop.permute.xlu1 %1797  ;;  %v1805_v57 = vpop.permute.xlu0 %1804  ;;  %v10268_v38 = vsel %vm8244_vm7, 4294967295, %v10267_v38 }
 0x544   : > { %v1809_v27 = vrot.slane %v1805_v57, %v7853_v23  ;;  %v8294_v57 = vld [vmem:[%s10172_s5 + $0x18] sm:$0xff] }
 0x546   : > { %vm8255_vm2 = vcmp.eq.s32.totalorder %v1809_v27, 1 }
 0x547   : > { %v10273_v50 = vsel %vm8255_vm2, 4294967295, %v10272_v50 }
 0x548   : > { %10274 = vst [vmem:[#allocation20_spill] sm:$0xff] %v10273_v50 }
 0x59f   : > { %v1425_v59 = vpop.permute.xlu1 %1424 }
 0x5a0   : > { %v1433_v13 = vmul.f32 %v8155_v16, %v1425_v59  ;;  %v1850_v16 = vrot.slane %v8175_v49, %v7944_v39  ;;  %v1836_v49 = vrot.slane %v8167_v30, %v7944_v39  ;;  %v8303_v59 = vld [vmem:[%s10172_s5 + $0x10] sm:$0xff] }
 0x5a1   : > { %v1427_v0 = vpop.permute.xlu0 %1426 }
 0x5a2   : > { %v1529_v60 = vrot.slane %v1433_v13, %v7944_v39  ;;  %v1434_v6 = vmul.f32 %v8158_v61, %v1427_v0  ;;  %v1802_v61 = vrot.slane %v1798_v40, %v7853_v23  ;;  %v1843_v54 = vrot.slane %v1836_v49, %v7944_v39  ;;  %v8310_v13 = vld [vmem:[%s10172_s5 + $0x8] sm:$0xff] }
 0x5a4   : > { %v1536_v12 = vrot.slane %v1529_v60, %v7944_v39  ;;  %v1543_v15 = vrot.slane %v1434_v6, %v7944_v39  ;;  %vm8248_vm15 = vcmp.eq.s32.totalorder %v1802_v61, 1  ;;  %v8317_v60 = vld [vmem:[%s10172_s5] sm:$0xff]  ;;  %v10278_v61 = vmov 0 }
 0x5a5   : > { %v10270_v44 = vsel %vm8248_vm15, 4294967295, %v10269_v44 }
 0x5a6   : > { %1565 = vrot.lane.b32.xlu0 %v1536_v12, %s7653_s14  ;;  %v1550_v7 = vrot.slane %v1543_v15, %v7944_v39 }
 0x5a8   : > { %1567 = vrot.lane.b32.xlu1 %v1550_v7, %s7653_s14 }
 0x5a9   : > { %v1429_v53 = vpop.permute.xlu1 %1428  ;;  %v8236_v28 = vpop.permute.xlu0 %1915 }
 0x5aa   : > { %10266 = vst [vmem:[#allocation18_spill] sm:$0xff] %v8236_v28  ;;  %v1435_v14 = vmul.f32 %v8170_v31, %v1429_v53  ;;  %v1857_v31 = vrot.slane %v1850_v16, %v7944_v39  ;;  %v8263_v30 = vsel %vm8244_vm7, %v8236_v28, %v7998_v55 }
 0x5ac   : > { %v1557_v36 = vrot.slane %v1435_v14, %v7944_v39  ;;  %1858 = vrot.lane.b32.xlu1 %v1829_v29, %s7654_s15 }
 0x5ad   : > { %v8252_v58 = vpop.permute.xlu1 %1917 }
 0x5ae   : > { %10271 = vst [vmem:[#allocation19_spill] sm:$0xff] %v8252_v58  ;;  %v8269_v33 = vsel %vm8248_vm15, %v8252_v58, %v8002_v41  ;;  %v1564_v52 = vrot.slane %v1557_v36, %v7944_v39 }
 0x5af   : > { %v8271_v51 = vpop.permute.xlu0 %1919  ;;  %v2322_v9 = vcombine.low %v8263_v30, %v8269_v33 }
 0x5b0   : > { %10275 = vst [vmem:[#allocation21_spill] sm:$0xff] %v8271_v51  ;;  %v8280_v10 = vsel %vm8255_vm2, %v8271_v51, %v8014_v47  ;;  %1862 = vrot.lane.b32.xlu1 %v1857_v31, %s7654_s15  ;;  %1569 = vrot.lane.b32.xlu0 %v1564_v52, %s7653_s14  ;;  %v10280_v31 = vmov 0 }
 0x5b1   : > { %v2336_v37 = vrot.slane %v8280_v10, %v7944_v39  ;;  %v2329_v35 = vrot.slane %v2322_v9, %v7944_v39 }
 0x5b3   : > { %v2337_v11 = vcombine.low %v2329_v35, %v2336_v37 }
 0x5b4   : > { %1860 = vrot.lane.b32.xlu0 %v1843_v54, %s7654_s15 }
 0x5b5   : > { %v2344_v40 = vrot.slane %v2337_v11, %v7944_v39  ;;  %v8379_v11 = vld [vmem:[%s10171_s4 + $0x10] sm:$0xff] }
 0x5b7   : > { %7014 = vmatmul.mubr.msk.f32.vlgmr.msra.gmra.mxu1 %vm10197_vm1, %v2344_v40  ;;  %v8386_v40 = vld [vmem:[%s10171_s4 + $0x8] sm:$0xff] }
 0x5b8   : > { %7028 = vmatpush3.msra.mxu1 %v8294_v57  ;;  %7035 = vmatprep.mubr.msk.f32.mxu1 %vm10183_vm0, %v10185_v8 }
 0x5b9   : > { %7029 = vmatprep.subr.mxu1 %v10185_v8 }
 0x5ba   : > { %7030 = vmatpush3.msra.mxu1 %v8303_v59  ;;  %v1441_v0 = vpop.permute.xlu1 %1440 }
 0x5bb   : > { %7031 = vmatprep.subr.mxu1 %v10185_v8  ;;  %v1445_v6 = vrot.slane %v1441_v0, %v7853_v23  ;;  %v8393_v0 = vld [vmem:[%s10171_s4] sm:$0xff] }
 0x5bc   : > { %7032 = vmatpush3.msra.mxu1 %v8310_v13  ;;  %v1448_v12 = vpop.permute.xlu0 %1447 }
 0x5bd   : > { %7033 = vmatprep.subr.mxu1 %v10185_v8  ;;  %v1452_v15 = vrot.slane %v1448_v12, %v7853_v23  ;;  %vm8323_vm3 = vcmp.eq.s32.totalorder %v1445_v6, 1  ;;  %v2313_v6 = vld [vmem:[#allocation2 + $0xd] ss:$0 sm:$0xff] }
 0x5be   : > { %7034 = vmatpush3.msra.mxu1 %v8317_v60  ;;  %v1455_v56 = vpop.permute.xlu1 %1454 }
 0x5bf   : > { %7049 = vmatprep.subr.mxu1 %v10185_v8  ;;  %vm8330_vm4 = vcmp.eq.s32.totalorder %v1452_v15, 1  ;;  %v1459_v29 = vrot.slane %v1455_v56, %v7853_v23 }
 0x5c0   : > { %v10279_v61 = vsel %vm8330_vm4, 4294967295, %v10278_v61 }
 0x5c1   : > { %vm8350_vm5 = vcmp.eq.s32.totalorder %v1459_v29, 1  ;;  %v2315_v29 = vld [vmem:[#allocation2 + $0x2d] ss:$0 sm:$0xff] }
 0x5c2   : > { %v10281_v31 = vsel %vm8350_vm5, 4294967295, %v10280_v31 }
 0x618   : > { %v1566_v16 = vpop.permute.xlu0 %1565 }
 0x619   : > { %v1577_v42 = vsel %vm8323_vm3, %v1566_v16, 0.0  ;;  %v8346_v36 = vsel %vm8323_vm3, %v1566_v16, %v8045_v19 }
 0x61a   : > { %1930 = vst.msk [vmem:[#allocation3 + $0x1] sm:$0x1] %vm10182_vm12, %v1577_v42  ;;  %v1568_v53 = vpop.permute.xlu1 %1567  ;;  %v2314_v42 = vld [vmem:[#allocation2 + $0x1d] ss:$0 sm:$0xff] }
 0x61b   : > { %v1578_v27 = vsel %vm8330_vm4, %v1568_v53, 0.0  ;;  %v8340_v14 = vsel %vm8330_vm4, %v1568_v53, %v8049_v20 }
 0x61c   : > { %1931 = vst.msk [vmem:[#allocation3 + $0x9] sm:$0x1] %vm10182_vm12, %v1578_v27  ;;  %v1969_v49 = vcombine.low %v8346_v36, %v8340_v14 }
 0x61e   : > { %v1976_v37 = vrot.slane %v1969_v49, %v7944_v39 }
 0x622   : > { %v1570_v52 = vpop.permute.xlu0 %1569 }
 0x623   : > { %v8357_v20 = vsel %vm8350_vm5, %v1570_v52, %v8064_v1  ;;  %v1579_v9 = vsel %vm8350_vm5, %v1570_v52, 0.0  ;;  %v8370_v1 = vld [vmem:[%s10171_s4 + $0x18] sm:$0xff] }
 0x624   : > { %v1983_v19 = vrot.slane %v8357_v20, %v7944_v39  ;;  %1932 = vst.msk [vmem:[#allocation3 + $0x11] sm:$0x1] %vm10182_vm12, %v1579_v9  ;;  %v1472_v9 = vrot.slane %v8189_v2, %v7944_v39 }
 0x626   : > { %v1984_v35 = vcombine.low %v1976_v37, %v1983_v19  ;;  %v1859_v19 = vpop.permute.xlu1 %1858 }
 0x628   : > { %v1991_v54 = vrot.slane %v1984_v35, %v7944_v39  ;;  %v1486_v35 = vrot.slane %v8193_v24, %v7944_v39 }
 0x62a   : > { %7003 = vmatmul.mubr.msk.f32.vlgmr.msra.gmra.mxu0 %vm10197_vm1, %v1991_v54  ;;  %v1493_v2 = vrot.slane %v1486_v35, %v7944_v39 }
 0x62b   : > { %7017 = vmatpush3.msra.mxu0 %v8370_v1  ;;  %7024 = vmatprep.mubr.msk.f32.mxu0 %vm10183_vm0, %v10185_v8 }
 0x62c   : > { %7018 = vmatprep.subr.mxu0 %v10185_v8 }
 0x62d   : > { %7019 = vmatpush3.msra.mxu0 %v8379_v11 }
 0x62e   : > { %7020 = vmatprep.subr.mxu0 %v10185_v8 }
 0x62f   : > { %7021 = vmatpush3.msra.mxu0 %v8386_v40 }
 0x630   : > { %7022 = vmatprep.subr.mxu0 %v10185_v8 }
 0x631   : > { %7023 = vmatpush3.msra.mxu0 %v8393_v0 }
 0x632   : > { %7038 = vmatprep.subr.mxu0 %v10185_v8 }
 0x677   : > { %v2413_v12 = vpop.f32.mrf.mxu1 }
 0x678   : > { %v2418_v15 = vrot.slane %v2413_v12, 1  ;;  %v2419_v56 = vrot.slane %v2413_v12, 2  ;;  %v2423_v16 = vadd.f32 %v2413_v12, %v2313_v6  ;;  %v1479_v6 = vrot.slane %v1472_v9, %v7944_v39 }
 0x679   : > { %v7015_v53 = vpop.f32.mrf.mxu1  ;;  %v8407_v12 = vsel %vm8244_vm7, %v1859_v19, %v8092_v43  ;;  %vm10316_vm7 = vcmask 253952  }
 0x67a   : > { %v2424_v27 = vadd.f32 %v2418_v15, %v2314_v42  ;;  %7270 = vtanh.f32 %v2423_v16  ;;  %v2425_v49 = vadd.f32 %v2419_v56, %v2315_v29  ;;  %v1861_v15 = vpop.permute.xlu0 %1860  ;;  %v1500_v56 = vrot.slane %v8197_v46, %v7944_v39 }
 0x67b   : > { %v2453_v24 = vrot.slane %v8407_v12, %v7853_v23  ;;  %v8419_v42 = vsel %vm8248_vm15, %v1861_v15, %v8103_v48  ;;  %v6805_v46 = vmul.f32 -1.442695, %v2423_v16  ;;  %v1960_v48 = vld [vmem:[#allocation2 + $0x2] ss:$0 sm:$0xff] }
 0x67c   : > { %7272 = vtanh.f32 %v2424_v27  ;;  %v2457_v43 = vrot.slane %v8419_v42, %v7853_v23  ;;  %v1507_v53 = vrot.slane %v1500_v56, %v7944_v39  ;;  %v6806_v29 = vmul.f32 -1.442695, %v2424_v27  ;;  %v1962_v27 = vld [vmem:[#allocation2 + $0x22] ss:$0 sm:$0xff] }
 0x67d   : > { %7274 = vtanh.f32 %v2425_v49 }
 0x67e   : > { %7276 = vpow2.f32 %v6805_v46  ;;  %v1863_v46 = vpop.permute.xlu1 %1862 }
 0x67f   : > { %7278 = vpow2.f32 %v6806_v29 }
 0x687   : > { %v7271_v52 = vpop.eup %7270 }
 0x688   : > { %2477 = vrot.lane.b32.xlu0 %v7271_v52, %s7651_s27  ;;  %v6807_v52 = vmul.f32 -1.442695, %v2425_v49 }
 0x689   : > { %v7273_v37 = vpop.eup %7272 }
 0x68a   : > { %2479 = vrot.lane.b32.xlu1 %v7273_v37, %s7651_s27  ;;  %v7275_v54 = vpop.eup %7274  ;;  %7280 = vpow2.f32 %v6807_v52  ;;  %v8431_v52 = vsel %vm8255_vm2, %v1863_v46, %v8114_v26  ;;  %vm10313_vm2 = vcmask 261120  }
 0x68b   : > { %v7277_v37 = vpop.eup %7276 }
 0x68c   : > { %2481 = vrot.lane.b32.xlu0 %v7275_v54, %s7651_s27  ;;  %v7279_v54 = vpop.eup %7278  ;;  %v2435_v56 = vadd.f32 1.0, %v7277_v37 }
 0x68e   : > { %1508 = vrot.lane.b32.xlu1 %v1479_v6, %s7654_s15  ;;  %v1961_v6 = vld [vmem:[#allocation2 + $0x12] ss:$0 sm:$0xff] }
 0x690   : > { %1510 = vrot.lane.b32.xlu0 %v1493_v2, %s7654_s15 }
 0x692   : > { %2462 = vrot.lane.b32.xlu1 %v2453_v24, %s7651_s27  ;;  %v2436_v24 = vadd.f32 1.0, %v7279_v54 }
 0x694   : > { %2464 = vrot.lane.b32.xlu0 %v2457_v43, %s7651_s27 }
 0x696   : > { %1512 = vrot.lane.b32.xlu1 %v1507_v53, %s7654_s15 }
 0x697   : > { %v7281_v43 = vpop.eup %7280 }
 0x698   : > { %v2437_v16 = vadd.f32 1.0, %v7281_v43 }
 0x6ea   : > { %v2060_v9 = vpop.f32.mrf.mxu0 }
 0x6eb   : > { %v2065_v19 = vrot.slane %v2060_v9, 1  ;;  %v2070_v35 = vadd.f32 %v2060_v9, %v1960_v48  ;;  %v2066_v53 = vrot.slane %v2060_v9, 2  ;;  %v2461_v9 = vrot.slane %v8431_v52, %v7853_v23 }
 0x6ec   : > { %v7004_v15 = vpop.f32.mrf.mxu0 }
 0x6ed   : > { %v2071_v2 = vadd.f32 %v2065_v19, %v1961_v6  ;;  %7282 = vtanh.f32 %v2070_v35  ;;  %v2072_v49 = vadd.f32 %v2066_v53, %v1962_v27 }
 0x6ef   : > { %7284 = vtanh.f32 %v2071_v2 }
 0x6f0   : > { %7286 = vrcp.f32 %v2435_v56 }
 0x6f1   : > { %7288 = vrcp.f32 %v2436_v24 }
 0x6f2   : > { %7290 = vrcp.f32 %v2437_v16 }
 0x6f3   : > { %7292 = vtanh.f32 %v2072_v49 }
 0x6fa   : > { %v7283_v29 = vpop.eup %7282  ;;  %v2478_v48 = vpop.permute.xlu0 %2477 }
 0x6fb   : > { %2124 = vrot.lane.b32.xlu0 %v7283_v29, %s7651_s27 }
 0x6fc   : > { %v7285_v37 = vpop.eup %7284  ;;  %v2480_v19 = vpop.permute.xlu1 %2479 }
 0x6fd   : > { %2126 = vrot.lane.b32.xlu1 %v7285_v37, %s7651_s27  ;;  %v8437_v54 = vpop.eup %7286 }
 0x6fe   : > { %v8440_v6 = vpop.eup %7288  ;;  %v2486_v15 = vmul.f32 %v8437_v54, %v2478_v48  ;;  %v2482_v26 = vpop.permute.xlu0 %2481 }
 0x6ff   : > { %2466 = vrot.lane.b32.xlu0 %v2461_v9, %s7651_s27  ;;  %v2487_v56 = vmul.f32 %v8440_v6, %v2480_v19  ;;  %v8446_v43 = vpop.eup %7290 }
 0x700   : > { %v1509_v24 = vpop.permute.xlu1 %1508  ;;  %v7293_v16 = vpop.eup %7292  ;;  %v2488_v27 = vmul.f32 %v8446_v43, %v2482_v26  ;;  %v6802_v26 = vmul.f32 -1.442695, %v2071_v2 }
 0x701   : > { %2492 = vrot.lane.b32.xlu1 %v2486_v15, %s7651_s27  ;;  %v8452_v46 = vsel %vm8323_vm3, %v1509_v24, %v8134_v3  ;;  %v6801_v15 = vmul.f32 -1.442695, %v2070_v35 }
 0x702   : > { %v1511_v53 = vpop.permute.xlu0 %1510  ;;  %v2100_v37 = vrot.slane %v8452_v46, %v7853_v23 }
 0x703   : > { %2494 = vrot.lane.b32.xlu0 %v2487_v56, %s7651_s27  ;;  %v8457_v48 = vsel %vm8330_vm4, %v1511_v53, %v8139_v5  ;;  %7294 = vpow2.f32 %v6801_v15  ;;  %v6803_v56 = vmul.f32 -1.442695, %v2072_v49  ;;  %vm10323_vm4 = vcmask 261120  }
 0x704   : > { %v2463_v29 = vpop.permute.xlu1 %2462  ;;  %v2104_v9 = vrot.slane %v8457_v48, %v7853_v23  ;;  %7296 = vpow2.f32 %v6802_v26 }
 0x705   : > { %2128 = vrot.lane.b32.xlu1 %v7293_v16, %s7651_s27  ;;  %7298 = vpow2.f32 %v6803_v56  ;;  %v2471_v26 = vmul.f32 %v8437_v54, %v2463_v29 }
 0x707   : > { %2496 = vrot.lane.b32.xlu0 %v2488_v27, %s7651_s27 }
 0x708   : > { %v1513_v19 = vpop.permute.xlu1 %1512 }
 0x709   : > { %v8468_v3 = vsel %vm8350_vm5, %v1513_v19, %v8150_v32  ;;  %2109 = vrot.lane.b32.xlu1 %v2100_v37, %s7651_s27  ;;  %v2465_v19 = vpop.permute.xlu0 %2464  ;;  %vm10319_vm5 = vmmov %vm10316_vm7 }
 0x70a   : > { %v2108_v5 = vrot.slane %v8468_v3, %v7853_v23  ;;  %v2472_v56 = vmul.f32 %v8440_v6, %v2465_v19 }
 0x70b   : > { %2111 = vrot.lane.b32.xlu0 %v2104_v9, %s7651_s27 }
 0x70d   : > { %2113 = vrot.lane.b32.xlu1 %v2108_v5, %s7651_s27 }
 0x710   : > { %v7295_v24 = vpop.eup %7294 }
 0x711   : > { %v7297_v53 = vpop.eup %7296  ;;  %v2082_v16 = vadd.f32 1.0, %v7295_v24 }
 0x712   : > { %v2083_v32 = vadd.f32 1.0, %v7297_v53  ;;  %v7299_v27 = vpop.eup %7298 }
 0x713   : > { %7300 = vrcp.f32 %v2082_v16  ;;  %v2084_v37 = vadd.f32 1.0, %v7299_v27 }
 0x714   : > { %7302 = vrcp.f32 %v2083_v32 }
 0x715   : > { %7304 = vrcp.f32 %v2084_v37 }
 0x720   : > { %v8475_v21 = vpop.eup %7300 }
 0x721   : > { %v8478_v2 = vpop.eup %7302 }
 0x722   : > { %v8490_v27 = vpop.eup %7304 }
 0x76d   : > { %v2125_v9 = vpop.permute.xlu0 %2124 }
 0x76e   : > { %v2133_v35 = vmul.f32 %v8475_v21, %v2125_v9 }
 0x76f   : > { %v2127_v5 = vpop.permute.xlu1 %2126 }
 0x770   : > { %2139 = vrot.lane.b32.xlu0 %v2133_v35, %s7651_s27  ;;  %v2134_v49 = vmul.f32 %v8478_v2, %v2127_v5 }
 0x771   : > { %v2467_v15 = vpop.permute.xlu0 %2466 }
 0x772   : > { %2141 = vrot.lane.b32.xlu1 %v2134_v49, %s7651_s27  ;;  %v2473_v37 = vmul.f32 %v8446_v43, %v2467_v15  ;;  %v8500_v49 = vld [vmem:[%s7910_s9] sm:$0x1] }
 0x773   : > { %v2493_v24 = vpop.permute.xlu1 %2492  ;;  %vm2316_vm6 = vcmp.gt.s32.totalorder %v8500_v49, 5 }
 0x774   : > { %v8485_v53 = vadd.f32 %v2493_v24, %v2471_v26  ;;  %v2522_v15 = vsel %vm2316_vm6, 1, %v10191_v4  ;;  %v8511_v24 = vld [vmem:[%s7910_s9 + $0x2] sm:$0x1] }
 0x775   : > { %v2495_v16 = vpop.permute.xlu0 %2494  ;;  %vm2318_vm0 = vcmp.gt.s32.totalorder %v8511_v24, 5  ;;  %vm1965_vm6 = vcmp.gt.s32.totalorder %v8511_v24, 2  ;;  %vm3054_vm11 = vcmp.gt.s32.totalorder %v8511_v24, 4 }
 0x776   : > { %v8487_v32 = vadd.f32 %v2495_v16, %v2472_v56  ;;  %7306 = vtanh.f32 %v8485_v53  ;;  %v8507_v56 = vld [vmem:[%s7910_s9 + $0x1] sm:$0x1] }
 0x777   : > { %v2129_v29 = vpop.permute.xlu1 %2128  ;;  %vm2317_vm12 = vcmp.gt.s32.totalorder %v8507_v56, 5 }
 0x778   : > { %7308 = vtanh.f32 %v8487_v32  ;;  %v2135_v19 = vmul.f32 %v8490_v27, %v2129_v29  ;;  %v2524_v29 = vsel %vm2318_vm0, 1, %v10191_v4  ;;  %vm1963_vm0 = vcmp.gt.s32.totalorder %v8500_v49, 2 }
 0x779   : > { %v2497_v9 = vpop.permute.xlu0 %2496 }
 0x77a   : > { %v8495_v35 = vadd.f32 %v2497_v9, %v2473_v37  ;;  %2143 = vrot.lane.b32.xlu0 %v2135_v19, %s7651_s27  ;;  %v2523_v37 = vsel %vm2317_vm12, 1, %v10191_v4  ;;  %vm1964_vm12 = vcmp.gt.s32.totalorder %v8507_v56, 2 }
 0x77b   : > { %v2110_v19 = vpop.permute.xlu1 %2109 }
 0x77c   : > { %7310 = vtanh.f32 %v8495_v35 }
 0x77d   : > { %v2112_v9 = vpop.permute.xlu0 %2111 }
 0x77e   : > { %v2119_v22 = vmul.f32 %v8478_v2, %v2112_v9 }
 0x783   : > { %v7307_v5 = vpop.eup %7306 }
 0x784   : > { %2510 = vrot.lane.b32.xlu1 %v7307_v5, %s7651_s27  ;;  %v2118_v5 = vmul.f32 %v8475_v21, %v2110_v19 }
 0x785   : > { %v7309_v26 = vpop.eup %7308 }
 0x786   : > { %2512 = vrot.lane.b32.xlu0 %v7309_v26, %s7651_s27  ;;  %v2114_v26 = vpop.permute.xlu1 %2113 }
 0x789   : > { %v7311_v16 = vpop.eup %7310 }
 0x78a   : > { %2514 = vrot.lane.b32.xlu1 %v7311_v16, %s7651_s27  ;;  %2526 = vperm.xlu0 %7167, %v2522_v15  }
 0x78e   : > { %2533 = vperm.xlu1 %7166, %v2523_v37   ;;  %2540 = vperm.xlu0 %7167, %v2524_v29   ;;  %v2120_v37 = vmul.f32 %v8490_v27, %v2114_v26 }
 0x7e2   : > { %v2140_v8 = vpop.permute.xlu0 %2139 }
 0x7e3   : > { %v8518_v25 = vadd.f32 %v2140_v8, %v2118_v5 }
 0x7e4   : > { %v2142_v16 = vpop.permute.xlu1 %2141 }
 0x7e5   : > { %7312 = vtanh.f32 %v8518_v25  ;;  %v8522_v15 = vadd.f32 %v2142_v16, %v2119_v22 }
 0x7e7   : > { %7314 = vtanh.f32 %v8522_v15 }
 0x7ec   : > { %v2144_v29 = vpop.permute.xlu0 %2143 }
 0x7ed   : > { %v8526_v4 = vadd.f32 %v2144_v29, %v2120_v37 }
 0x7ef   : > { %7316 = vtanh.f32 %v8526_v4 }
 0x7f2   : > { %v7313_v19 = vpop.eup %7312 }
 0x7f3   : > { %2157 = vrot.lane.b32.xlu1 %v7313_v19, %s7651_s27 }
 0x7f4   : > { %v7315_v8 = vpop.eup %7314 }
 0x7f5   : > { %2159 = vrot.lane.b32.xlu0 %v7315_v8, %s7651_s27 }
 0x7f6   : > { %v2511_v9 = vpop.permute.xlu1 %2510 }
 0x7f7   : > { %v2519_v5 = vmul.f32 %v8437_v54, %v2511_v9 }
 0x7f8   : > { %v2513_v22 = vpop.permute.xlu0 %2512 }
 0x7f9   : > { %v2520_v16 = vmul.f32 %v8440_v6, %v2513_v22  ;;  %v2615_v45 = vrot.slane %v2519_v5, %v7944_v39 }
 0x7fb   : > { %v2622_v26 = vrot.slane %v2615_v45, %v7944_v39  ;;  %v2629_v37 = vrot.slane %v2520_v16, %v7944_v39  ;;  %v10282_v45 = vmov 0  }
 0x7fc   : > { %v2515_v29 = vpop.permute.xlu1 %2514  ;;  %v7317_v34 = vpop.eup %7316 }
 0x7fd   : > { %v2521_v62 = vmul.f32 %v8446_v43, %v2515_v29  ;;  %2161 = vrot.lane.b32.xlu1 %v7317_v34, %s7651_s27  ;;  %2651 = vrot.lane.b32.xlu0 %v2622_v26, %s7653_s14  ;;  %v2636_v54 = vrot.slane %v2629_v37, %v7944_v39  ;;  %v2169_v43 = vsel %vm1963_vm0, 1, %v10282_v45  ;;  %v2170_v34 = vsel %vm1964_vm12, 1, %v10282_v45 }
 0x7ff   : > { %v2643_v19 = vrot.slane %v2521_v62, %v7944_v39  ;;  %v2171_v62 = vsel %vm1965_vm6, 1, %v10282_v45 }
 0x801   : > { %v2650_v6 = vrot.slane %v2643_v19, %v7944_v39  ;;  %2653 = vrot.lane.b32.xlu1 %v2636_v54, %s7653_s14 }
 0x803   : > { %2655 = vrot.lane.b32.xlu0 %v2650_v6, %s7653_s14  ;;  %v2558_v6 = vrot.slane %v8485_v53, %v7944_v39 }
 0x805   : > { %2173 = vperm.xlu1 %7166, %v2169_v43   ;;  %v2527_v8 = vpop.permute.xlu0 %2526 }
 0x807   : > { %2180 = vperm.xlu0 %7167, %v2170_v34   ;;  %v2531_v34 = vrot.slane %v2527_v8, %v7853_v23 }
 0x809   : > { %2187 = vperm.xlu1 %7166, %v2171_v62   ;;  %v2534_v9 = vpop.permute.xlu1 %2533  ;;  %v2541_v5 = vpop.permute.xlu0 %2540  ;;  %vm8574_vm0 = vcmp.eq.s32.totalorder %v2531_v34, 1 }
 0x865   : > { %v2158_v22 = vpop.permute.xlu1 %2157 }
 0x866   : > { %v2166_v16 = vmul.f32 %v8475_v21, %v2158_v22  ;;  %v2586_v21 = vrot.slane %v8495_v35, %v7944_v39  ;;  %v2565_v22 = vrot.slane %v2558_v6, %v7944_v39  ;;  %v2572_v35 = vrot.slane %v8487_v32, %v7944_v39 }
 0x867   : > { %v2160_v37 = vpop.permute.xlu0 %2159 }
 0x868   : > { %v2262_v26 = vrot.slane %v2166_v16, %v7944_v39  ;;  %v2167_v29 = vmul.f32 %v8478_v2, %v2160_v37  ;;  %v2538_v2 = vrot.slane %v2534_v9, %v7853_v23  ;;  %v2545_v16 = vrot.slane %v2541_v5, %v7853_v23  ;;  %v6026_v9 = vld [vmem:[%s10173_s6 + $0x38] sm:$0xff] }
 0x869   : > { %v2593_v8 = vrot.slane %v2586_v21, %v7944_v39  ;;  %v2579_v34 = vrot.slane %v2572_v35, %v7944_v39 }
 0x86a   : > { %v2269_v19 = vrot.slane %v2262_v26, %v7944_v39  ;;  %v2276_v54 = vrot.slane %v2167_v29, %v7944_v39  ;;  %vm8578_vm12 = vcmp.eq.s32.totalorder %v2538_v2, 1  ;;  %vm8584_vm6 = vcmp.eq.s32.totalorder %v2545_v16, 1 }
 0x86c   : > { %2298 = vrot.lane.b32.xlu0 %v2269_v19, %s7653_s14  ;;  %v2283_v43 = vrot.slane %v2276_v54, %v7944_v39 }
 0x86e   : > { %2300 = vrot.lane.b32.xlu1 %v2283_v43, %s7653_s14 }
 0x86f   : > { %v2162_v62 = vpop.permute.xlu1 %2161  ;;  %v8566_v26 = vpop.permute.xlu0 %2651 }
 0x870   : > { %10283 = vst [vmem:[#allocation22_spill] sm:$0xff] %v8566_v26  ;;  %v2168_v53 = vmul.f32 %v8490_v27, %v2162_v62  ;;  %v10289_v27 = vmov 0  ;;  %v8592_v32 = vsel %vm8574_vm0, %v8566_v26, %v8263_v30 }
 0x871   : > { %v10290_v27 = vsel %vm8584_vm6, 4294967295, %v10289_v27 }
 0x872   : > { %v2290_v37 = vrot.slane %v2168_v53, %v7944_v39  ;;  %2594 = vrot.lane.b32.xlu1 %v2565_v22, %s7654_s15 }
 0x873   : > { %v8582_v5 = vpop.permute.xlu1 %2653 }
 0x874   : > { %10288 = vst [vmem:[#allocation23_spill] sm:$0xff] %v8582_v5  ;;  %v2297_v19 = vrot.slane %v2290_v37, %v7944_v39  ;;  %v8599_v54 = vsel %vm8578_vm12, %v8582_v5, %v8269_v33 }
 0x875   : > { %v8601_v6 = vpop.permute.xlu0 %2655  ;;  %v3058_v43 = vcombine.low %v8592_v32, %v8599_v54 }
 0x876   : > { %10291 = vst [vmem:[#allocation24_spill] sm:$0xff] %v8601_v6  ;;  %v8609_v21 = vsel %vm8584_vm6, %v8601_v6, %v8280_v10  ;;  %2598 = vrot.lane.b32.xlu1 %v2593_v8, %s7654_s15  ;;  %2302 = vrot.lane.b32.xlu0 %v2297_v19, %s7653_s14  ;;  %v10292_v10 = vmov 0.0   ;;  %v3757_v6 = vld [vmem:[#allocation2 + $0x2b] ss:$0 sm:$0xff] }
 0x877   : > { %v3072_v30 = vrot.slane %v8609_v21, %v7944_v39  ;;  %v3065_v33 = vrot.slane %v3058_v43, %v7944_v39 }
 0x879   : > { %v3073_v2 = vcombine.low %v3065_v33, %v3072_v30 }
 0x87a   : > { %2596 = vrot.lane.b32.xlu0 %v2579_v34, %s7654_s15 }
 0x87b   : > { %v3080_v62 = vrot.slane %v3073_v2, %v7944_v39  ;;  %v10300_v2 = vmov 0 }
 0x87d   : > { %7036 = vmatmul.mubr.msk.f32.vlgmr.msra.gmra.mxu1 %vm10197_vm1, %v3080_v62 }
 0x87e   : > { %7050 = vmatpush3.msra.mxu1 %v8294_v57  ;;  %7057 = vmatprep.mubr.msk.f32.mxu1 %vm10293_vm10, %v10292_v10 }
 0x87f   : > { %7051 = vmatprep.subr.mxu1 %v10292_v10 }
 0x880   : > { %7052 = vmatpush3.msra.mxu1 %v8303_v59  ;;  %v2174_v22 = vpop.permute.xlu1 %2173 }
 0x881   : > { %7053 = vmatprep.subr.mxu1 %v10292_v10  ;;  %v2178_v57 = vrot.slane %v2174_v22, %v7853_v23 }
 0x882   : > { %7054 = vmatpush3.msra.mxu1 %v8310_v13  ;;  %v2181_v16 = vpop.permute.xlu0 %2180 }
 0x883   : > { %7055 = vmatprep.subr.mxu1 %v10292_v10  ;;  %v2185_v53 = vrot.slane %v2181_v16, %v7853_v23  ;;  %vm8632_vm1 = vcmp.eq.s32.totalorder %v2178_v57, 1 }
 0x884   : > { %7056 = vmatpush3.msra.mxu1 %v8317_v60  ;;  %v2188_v37 = vpop.permute.xlu1 %2187 }
 0x885   : > { %7071 = vmatprep.subr.mxu1 %v10292_v10  ;;  %vm8639_vm8 = vcmp.eq.s32.totalorder %v2185_v53, 1  ;;  %v2192_v30 = vrot.slane %v2188_v37, %v7853_v23 }
 0x8de   : > { %v2299_v59 = vpop.permute.xlu0 %2298 }
 0x8df   : > { %v2310_v13 = vsel %vm8632_vm1, %v2299_v59, 0.0  ;;  %v8655_v33 = vsel %vm8632_vm1, %v2299_v59, %v8346_v36 }
 0x8e0   : > { %2666 = vst.msk [vmem:[#allocation3 + $0x2] sm:$0x1] %vm10296_vm9, %v2310_v13  ;;  %v2301_v8 = vpop.permute.xlu1 %2300  ;;  %vm8659_vm9 = vcmp.eq.s32.totalorder %v2192_v30, 1 }
 0x8e1   : > { %v2311_v19 = vsel %vm8639_vm8, %v2301_v8, 0.0  ;;  %v8649_v43 = vsel %vm8639_vm8, %v2301_v8, %v8340_v14  ;;  %v10301_v2 = vsel %vm8659_vm9, 4294967295, %v10300_v2  ;;  %v3050_v8 = vld [vmem:[#allocation2 + $0x1c] ss:$0 sm:$0xff] }
 0x8e2   : > { %2667 = vst.msk [vmem:[#allocation3 + $0xa] sm:$0x1] %vm10299_vm14, %v2311_v19  ;;  %v2705_v34 = vcombine.low %v8655_v33, %v8649_v43 }
 0x8e4   : > { %v2712_v57 = vrot.slane %v2705_v34, %v7944_v39 }
 0x8e8   : > { %v2303_v62 = vpop.permute.xlu0 %2302 }
 0x8e9   : > { %v8666_v14 = vsel %vm8659_vm9, %v2303_v62, %v8357_v20  ;;  %v2312_v22 = vsel %vm8659_vm9, %v2303_v62, 0.0  ;;  %v3049_v20 = vld [vmem:[#allocation2 + $0xc] ss:$0 sm:$0xff] }
 0x8ea   : > { %v2719_v36 = vrot.slane %v8666_v14, %v7944_v39  ;;  %2668 = vst.msk [vmem:[#allocation3 + $0x12] sm:$0x1] %vm10299_vm14, %v2312_v22  ;;  %v2595_v22 = vpop.permute.xlu1 %2594  ;;  %vm3053_vm14 = vcmp.gt.s32.totalorder %v8507_v56, 4 }
 0x8ec   : > { %v2720_v16 = vcombine.low %v2712_v57, %v2719_v36  ;;  %v2219_v57 = vrot.slane %v8522_v15, %v7944_v39 }
 0x8ee   : > { %v2727_v53 = vrot.slane %v2720_v16, %v7944_v39 }
 0x8f0   : > { %7025 = vmatmul.mubr.msk.f32.vlgmr.msra.gmra.mxu0 %vm10302_vm13, %v2727_v53  ;;  %v8696_v53 = vsel %vm8574_vm0, %v2595_v22, %v8407_v12  ;;  %vm3052_vm13 = vcmp.gt.s32.totalorder %v8500_v49, 4 }
 0x8f1   : > { %7039 = vmatpush3.msra.mxu0 %v8370_v1  ;;  %7046 = vmatprep.mubr.msk.f32.mxu0 %vm10293_vm10, %v10292_v10  ;;  %v3189_v15 = vrot.slane %v8696_v53, %v7853_v23 }
 0x8f2   : > { %7040 = vmatprep.subr.mxu0 %v10292_v10 }
 0x8f3   : > { %7041 = vmatpush3.msra.mxu0 %v8379_v11  ;;  %v3051_v11 = vld [vmem:[#allocation2 + $0x2c] ss:$0 sm:$0xff] }
 0x8f4   : > { %7042 = vmatprep.subr.mxu0 %v10292_v10 }
 0x8f5   : > { %7043 = vmatpush3.msra.mxu0 %v8386_v40 }
 0x8f6   : > { %7044 = vmatprep.subr.mxu0 %v10292_v10 }
 0x8f7   : > { %7045 = vmatpush3.msra.mxu0 %v8393_v0  ;;  %v2205_v0 = vrot.slane %v8518_v25, %v7944_v39  ;;  %v2226_v25 = vrot.slane %v2219_v57, %v7944_v39  ;;  %v2697_v57 = vld [vmem:[#allocation2 + $0x13] ss:$0 sm:$0xff] }
 0x8f8   : > { %7060 = vmatprep.subr.mxu0 %v10292_v10 }
 0x8f9   : > { %v2212_v16 = vrot.slane %v2205_v0, %v7944_v39 }
 0x93d   : > { %v3149_v37 = vpop.f32.mrf.mxu1 }
 0x93e   : > { %v3154_v1 = vrot.slane %v3149_v37, 1  ;;  %v3155_v59 = vrot.slane %v3149_v37, 2  ;;  %v3159_v13 = vadd.f32 %v3149_v37, %v3049_v20  ;;  %v2597_v20 = vpop.permute.xlu0 %2596  ;;  %v2233_v37 = vrot.slane %v8526_v4, %v7944_v39 }
 0x93f   : > { %v7037_v19 = vpop.f32.mrf.mxu1 }
 0x940   : > { %v3160_v30 = vadd.f32 %v3154_v1, %v3050_v8  ;;  %7318 = vtanh.f32 %v3159_v13  ;;  %v3161_v34 = vadd.f32 %v3155_v59, %v3051_v11  ;;  %v8708_v1 = vsel %vm8578_vm12, %v2597_v20, %v8419_v42  ;;  %v2696_v42 = vld [vmem:[#allocation2 + $0x3] ss:$0 sm:$0xff] }
 0x941   : > { %v3193_v12 = vrot.slane %v8708_v1, %v7853_v23  ;;  %v2240_v59 = vrot.slane %v2233_v37, %v7944_v39  ;;  %v6813_v4 = vmul.f32 -1.442695, %v3159_v13 }
 0x942   : > { %7320 = vtanh.f32 %v3160_v30  ;;  %v6814_v8 = vmul.f32 -1.442695, %v3160_v30  ;;  %v6815_v19 = vmul.f32 -1.442695, %v3161_v34  ;;  %v2698_v30 = vld [vmem:[#allocation2 + $0x23] ss:$0 sm:$0xff] }
 0x943   : > { %7322 = vtanh.f32 %v3161_v34 }
 0x944   : > { %7324 = vpow2.f32 %v6813_v4 }
 0x945   : > { %7326 = vpow2.f32 %v6814_v8 }
 0x946   : > { %7328 = vpow2.f32 %v6815_v19 }
 0x94d   : > { %v7319_v40 = vpop.eup %7318 }
 0x94e   : > { %3213 = vrot.lane.b32.xlu0 %v7319_v40, %s7651_s27 }
 0x94f   : > { %v7321_v62 = vpop.eup %7320 }
 0x950   : > { %3215 = vrot.lane.b32.xlu1 %v7321_v62, %s7651_s27  ;;  %v7323_v36 = vpop.eup %7322 }
 0x951   : > { %v7325_v40 = vpop.eup %7324 }
 0x952   : > { %3217 = vrot.lane.b32.xlu0 %v7323_v36, %s7651_s27  ;;  %v7327_v22 = vpop.eup %7326  ;;  %v3171_v20 = vadd.f32 1.0, %v7325_v40 }
 0x953   : > { %v7329_v37 = vpop.eup %7328 }
 0x954   : > { %2241 = vrot.lane.b32.xlu1 %v2212_v16, %s7654_s15  ;;  %v3173_v13 = vadd.f32 1.0, %v7329_v37 }
 0x956   : > { %2243 = vrot.lane.b32.xlu0 %v2226_v25, %s7654_s15  ;;  %v3172_v25 = vadd.f32 1.0, %v7327_v22 }
 0x958   : > { %3198 = vrot.lane.b32.xlu1 %v3189_v15, %s7651_s27 }
 0x95a   : > { %3200 = vrot.lane.b32.xlu0 %v3193_v12, %s7651_s27  ;;  %v2599_v12 = vpop.permute.xlu1 %2598 }
 0x95b   : > { %v8720_v4 = vsel %vm8584_vm6, %v2599_v12, %v8431_v52 }
 0x95c   : > { %2245 = vrot.lane.b32.xlu1 %v2240_v59, %s7654_s15 }
 0x9b0   : > { %v2796_v11 = vpop.f32.mrf.mxu0 }
 0x9b1   : > { %v2801_v0 = vrot.slane %v2796_v11, 1  ;;  %v2806_v62 = vadd.f32 %v2796_v11, %v2696_v42  ;;  %v2802_v15 = vrot.slane %v2796_v11, 2  ;;  %v3197_v42 = vrot.slane %v8720_v4, %v7853_v23 }
 0x9b2   : > { %v7026_v36 = vpop.f32.mrf.mxu0 }
 0x9b3   : > { %v2807_v16 = vadd.f32 %v2801_v0, %v2697_v57  ;;  %7330 = vtanh.f32 %v2806_v62  ;;  %v2808_v34 = vadd.f32 %v2802_v15, %v2698_v30 }
 0x9b5   : > { %7332 = vtanh.f32 %v2807_v16 }
 0x9b6   : > { %7334 = vrcp.f32 %v3171_v20 }
 0x9b7   : > { %7336 = vrcp.f32 %v3172_v25 }
 0x9b8   : > { %7338 = vrcp.f32 %v3173_v13 }
 0x9b9   : > { %7340 = vtanh.f32 %v2808_v34 }
 0x9c0   : > { %v7331_v59 = vpop.eup %7330  ;;  %v3214_v8 = vpop.permute.xlu0 %3213 }
 0x9c1   : > { %2860 = vrot.lane.b32.xlu0 %v7331_v59, %s7651_s27 }
 0x9c2   : > { %v7333_v19 = vpop.eup %7332  ;;  %v3216_v11 = vpop.permute.xlu1 %3215 }
 0x9c3   : > { %2862 = vrot.lane.b32.xlu1 %v7333_v19, %s7651_s27  ;;  %v8726_v40 = vpop.eup %7334 }
 0x9c4   : > { %v8729_v0 = vpop.eup %7336  ;;  %v3222_v22 = vmul.f32 %v8726_v40, %v3214_v8  ;;  %v3218_v52 = vpop.permute.xlu0 %3217 }
 0x9c5   : > { %3202 = vrot.lane.b32.xlu0 %v3197_v42, %s7651_s27  ;;  %v3223_v57 = vmul.f32 %v8729_v0, %v3216_v11  ;;  %v8735_v20 = vpop.eup %7338  ;;  %v6809_v42 = vmul.f32 -1.442695, %v2806_v62  ;;  %v6810_v11 = vmul.f32 -1.442695, %v2807_v16 }
 0x9c6   : > { %v2242_v36 = vpop.permute.xlu1 %2241  ;;  %v7341_v37 = vpop.eup %7340  ;;  %v3224_v15 = vmul.f32 %v8735_v20, %v3218_v52 }
 0x9c7   : > { %3228 = vrot.lane.b32.xlu1 %v3222_v22, %s7651_s27  ;;  %v8741_v13 = vsel %vm8632_vm1, %v2242_v36, %v8452_v46  ;;  %7342 = vpow2.f32 %v6809_v42  ;;  %v6811_v22 = vmul.f32 -1.442695, %v2808_v34 }
 0x9c8   : > { %v2244_v25 = vpop.permute.xlu0 %2243  ;;  %v2836_v59 = vrot.slane %v8741_v13, %v7853_v23  ;;  %7344 = vpow2.f32 %v6810_v11 }
 0x9c9   : > { %3230 = vrot.lane.b32.xlu0 %v3223_v57, %s7651_s27  ;;  %v8746_v12 = vsel %vm8639_vm8, %v2244_v25, %v8457_v48  ;;  %7346 = vpow2.f32 %v6811_v22 }
 0x9ca   : > { %v3199_v30 = vpop.permute.xlu1 %3198  ;;  %v2840_v8 = vrot.slane %v8746_v12, %v7853_v23 }
 0x9cb   : > { %2864 = vrot.lane.b32.xlu1 %v7341_v37, %s7651_s27  ;;  %v3207_v42 = vmul.f32 %v8726_v40, %v3199_v30 }
 0x9cd   : > { %3232 = vrot.lane.b32.xlu0 %v3224_v15, %s7651_s27  ;;  %v3201_v15 = vpop.permute.xlu0 %3200 }
 0x9ce   : > { %v2246_v19 = vpop.permute.xlu1 %2245  ;;  %v3208_v11 = vmul.f32 %v8729_v0, %v3201_v15 }
 0x9cf   : > { %v8757_v46 = vsel %vm8659_vm9, %v2246_v19, %v8468_v3  ;;  %2845 = vrot.lane.b32.xlu1 %v2836_v59, %s7651_s27 }
 0x9d0   : > { %v2844_v48 = vrot.slane %v8757_v46, %v7853_v23 }
 0x9d1   : > { %2847 = vrot.lane.b32.xlu0 %v2840_v8, %s7651_s27 }
 0x9d3   : > { %2849 = vrot.lane.b32.xlu1 %v2844_v48, %s7651_s27 }
 0x9d4   : > { %v7343_v52 = vpop.eup %7342 }
 0x9d5   : > { %v7345_v57 = vpop.eup %7344  ;;  %v2818_v36 = vadd.f32 1.0, %v7343_v52 }
 0x9d6   : > { %v2819_v3 = vadd.f32 1.0, %v7345_v57  ;;  %v7347_v25 = vpop.eup %7346 }
 0x9d7   : > { %7348 = vrcp.f32 %v2818_v36  ;;  %v2820_v37 = vadd.f32 1.0, %v7347_v25 }
 0x9d8   : > { %7350 = vrcp.f32 %v2819_v3 }
 0x9d9   : > { %7352 = vrcp.f32 %v2820_v37 }
 0x9e4   : > { %v8764_v59 = vpop.eup %7348 }
 0x9e5   : > { %v8767_v16 = vpop.eup %7350 }
 0x9e6   : > { %v8779_v3 = vpop.eup %7352 }
 0xa33   : > { %v2861_v8 = vpop.permute.xlu0 %2860 }
 0xa34   : > { %v2869_v62 = vmul.f32 %v8764_v59, %v2861_v8 }
 0xa35   : > { %v2863_v19 = vpop.permute.xlu1 %2862 }
 0xa36   : > { %2875 = vrot.lane.b32.xlu0 %v2869_v62, %s7651_s27  ;;  %v2870_v34 = vmul.f32 %v8767_v16, %v2863_v19 }
 0xa37   : > { %v3203_v48 = vpop.permute.xlu0 %3202 }
 0xa38   : > { %2877 = vrot.lane.b32.xlu1 %v2870_v34, %s7651_s27  ;;  %v3209_v25 = vmul.f32 %v8735_v20, %v3203_v48  ;;  %v3258_v34 = vsel %vm3052_vm13, 1, %v10282_v45  ;;  %vm2700_vm13 = vcmp.gt.s32.totalorder %v8507_v56, 3 }
 0xa39   : > { %v3229_v22 = vpop.permute.xlu1 %3228 }
 0xa3a   : > { %v8774_v52 = vadd.f32 %v3229_v22, %v3207_v42  ;;  %v3259_v42 = vsel %vm3053_vm14, 1, %v10282_v45  ;;  %vm2701_vm14 = vcmp.gt.s32.totalorder %v8511_v24, 3 }
 0xa3b   : > { %v3231_v57 = vpop.permute.xlu0 %3230 }
 0xa3c   : > { %v8776_v36 = vadd.f32 %v3231_v57, %v3208_v11  ;;  %7354 = vtanh.f32 %v8774_v52  ;;  %v3260_v11 = vsel %vm3054_vm11, 1, %v10282_v45  ;;  %vm2699_vm11 = vcmp.gt.s32.totalorder %v8500_v49, 3 }
 0xa3d   : > { %v2865_v37 = vpop.permute.xlu1 %2864 }
 0xa3e   : > { %7356 = vtanh.f32 %v8776_v36  ;;  %v2871_v30 = vmul.f32 %v8779_v3, %v2865_v37 }
 0xa3f   : > { %v3233_v8 = vpop.permute.xlu0 %3232 }
 0xa40   : > { %v8784_v62 = vadd.f32 %v3233_v8, %v3209_v25  ;;  %2879 = vrot.lane.b32.xlu0 %v2871_v30, %s7651_s27 }
 0xa41   : > { %v2846_v22 = vpop.permute.xlu1 %2845 }
 0xa42   : > { %7358 = vtanh.f32 %v8784_v62  ;;  %v2854_v25 = vmul.f32 %v8764_v59, %v2846_v22 }
 0xa43   : > { %v2848_v57 = vpop.permute.xlu0 %2847 }
 0xa45   : > { %v2850_v37 = vpop.permute.xlu1 %2849 }
 0xa49   : > { %v7355_v15 = vpop.eup %7354 }
 0xa4a   : > { %3246 = vrot.lane.b32.xlu1 %v7355_v15, %s7651_s27  ;;  %v2855_v15 = vmul.f32 %v8767_v16, %v2848_v57 }
 0xa4b   : > { %v7357_v19 = vpop.eup %7356 }
 0xa4c   : > { %3248 = vrot.lane.b32.xlu0 %v7357_v19, %s7651_s27 }
 0xa4f   : > { %v7359_v48 = vpop.eup %7358 }
 0xa50   : > { %3250 = vrot.lane.b32.xlu1 %v7359_v48, %s7651_s27  ;;  %3262 = vperm.xlu0 %7167, %v3258_v34   ;;  %v2856_v48 = vmul.f32 %v8779_v3, %v2850_v37 }
 0xa54   : > { %3269 = vperm.xlu1 %7166, %v3259_v42   ;;  %3276 = vperm.xlu0 %7167, %v3260_v11  }
 0xaa8   : > { %v2876_v30 = vpop.permute.xlu0 %2875 }
 0xaa9   : > { %v8798_v8 = vadd.f32 %v2876_v30, %v2854_v25 }
 0xaaa   : > { %v2878_v19 = vpop.permute.xlu1 %2877 }
 0xaab   : > { %7360 = vtanh.f32 %v8798_v8  ;;  %v8802_v34 = vadd.f32 %v2878_v19, %v2855_v15  ;;  %v2941_v51 = vrot.slane %v8798_v8, %v7944_v39 }
 0xaad   : > { %7362 = vtanh.f32 %v8802_v34 }
 0xab2   : > { %v2880_v42 = vpop.permute.xlu0 %2879 }
 0xab3   : > { %v8806_v11 = vadd.f32 %v2880_v42, %v2856_v48 }
 0xab5   : > { %7364 = vtanh.f32 %v8806_v11 }
 0xab8   : > { %v7361_v22 = vpop.eup %7360 }
 0xab9   : > { %2893 = vrot.lane.b32.xlu1 %v7361_v22, %s7651_s27 }
 0xaba   : > { %v7363_v25 = vpop.eup %7362 }
 0xabb   : > { %2895 = vrot.lane.b32.xlu0 %v7363_v25, %s7651_s27 }
 0xabc   : > { %v3247_v57 = vpop.permute.xlu1 %3246 }
 0xabd   : > { %v3255_v30 = vmul.f32 %v8726_v40, %v3247_v57 }
 0xabe   : > { %v3249_v15 = vpop.permute.xlu0 %3248 }
 0xabf   : > { %v3256_v19 = vmul.f32 %v8729_v0, %v3249_v15  ;;  %v3351_v63 = vrot.slane %v3255_v30, %v7944_v39 }
 0xac1   : > { %v3358_v37 = vrot.slane %v3351_v63, %v7944_v39  ;;  %v3365_v48 = vrot.slane %v3256_v19, %v7944_v39  ;;  %v2905_v63 = vsel %vm2699_vm11, 1, %v10282_v45 }
 0xac2   : > { %v3251_v42 = vpop.permute.xlu1 %3250  ;;  %v7365_v18 = vpop.eup %7364 }
 0xac3   : > { %v3257_v17 = vmul.f32 %v8735_v20, %v3251_v42  ;;  %2897 = vrot.lane.b32.xlu1 %v7365_v18, %s7651_s27  ;;  %3387 = vrot.lane.b32.xlu0 %v3358_v37, %s7653_s14  ;;  %v3372_v40 = vrot.slane %v3365_v48, %v7944_v39  ;;  %v2906_v18 = vsel %vm2700_vm13, 1, %v10282_v45 }
 0xac5   : > { %v3379_v22 = vrot.slane %v3257_v17, %v7944_v39  ;;  %v2907_v17 = vsel %vm2701_vm14, 1, %v10282_v45  ;;  %v3294_v45 = vrot.slane %v8774_v52, %v7944_v39 }
 0xac7   : > { %v3386_v0 = vrot.slane %v3379_v22, %v7944_v39  ;;  %3389 = vrot.lane.b32.xlu1 %v3372_v40, %s7653_s14  ;;  %v3301_v40 = vrot.slane %v3294_v45, %v7944_v39 }
 0xac9   : > { %3391 = vrot.lane.b32.xlu0 %v3386_v0, %s7653_s14 }
 0xacb   : > { %2909 = vperm.xlu1 %7166, %v2905_v63   ;;  %v3263_v49 = vpop.permute.xlu0 %3262 }
 0xacc   : > { %v3267_v42 = vrot.slane %v3263_v49, %v7853_v23  ;;  %v6022_v49 = vld [vmem:[%s10173_s6 + $0x18] sm:$0xff] }
 0xacd   : > { %2916 = vperm.xlu0 %7167, %v2906_v18  }
 0xace   : > { %vm8854_vm11 = vcmp.eq.s32.totalorder %v3267_v42, 1  ;;  %v8926_v42 = vld [vmem:[%s10172_s5] sm:$0xff] }
 0xacf   : > { %2923 = vperm.xlu1 %7166, %v2907_v17   ;;  %v3270_v20 = vpop.permute.xlu1 %3269  ;;  %v3277_v25 = vpop.permute.xlu0 %3276 }
 0xad0   : > { %v3281_v0 = vrot.slane %v3277_v25, %v7853_v23 }
 0xad2   : > { %vm8864_vm14 = vcmp.eq.s32.totalorder %v3281_v0, 1 }
 0xb2b   : > { %v2894_v57 = vpop.permute.xlu1 %2893 }
 0xb2c   : > { %v2902_v56 = vmul.f32 %v8764_v59, %v2894_v57  ;;  %v3322_v59 = vrot.slane %v8784_v62, %v7944_v39  ;;  %v3308_v62 = vrot.slane %v8776_v36, %v7944_v39 }
 0xb2d   : > { %v2896_v15 = vpop.permute.xlu0 %2895 }
 0xb2e   : > { %v2998_v30 = vrot.slane %v2902_v56, %v7944_v39  ;;  %v2903_v19 = vmul.f32 %v8767_v16, %v2896_v15  ;;  %v3274_v16 = vrot.slane %v3270_v20, %v7853_v23  ;;  %v3329_v17 = vrot.slane %v3322_v59, %v7944_v39  ;;  %v8919_v59 = vld [vmem:[%s10172_s5 + $0x8] sm:$0xff] }
 0xb30   : > { %v3005_v37 = vrot.slane %v2998_v30, %v7944_v39  ;;  %v3012_v24 = vrot.slane %v2903_v19, %v7944_v39  ;;  %vm8858_vm13 = vcmp.eq.s32.totalorder %v3274_v16, 1 }
 0xb32   : > { %3034 = vrot.lane.b32.xlu0 %v3005_v37, %s7653_s14  ;;  %v3019_v48 = vrot.slane %v3012_v24, %v7944_v39  ;;  %v3315_v37 = vrot.slane %v3308_v62, %v7944_v39 }
 0xb34   : > { %3036 = vrot.lane.b32.xlu1 %v3019_v48, %s7653_s14  ;;  %v8912_v48 = vld [vmem:[%s10172_s5 + $0x10] sm:$0xff] }
 0xb35   : > { %v2898_v22 = vpop.permute.xlu1 %2897  ;;  %v8846_v63 = vpop.permute.xlu0 %3387 }
 0xb36   : > { %10303 = vst [vmem:[#allocation25_spill] sm:$0xff] %v8846_v63  ;;  %v2904_v52 = vmul.f32 %v8779_v3, %v2898_v22  ;;  %v10309_v3 = vmov 0  ;;  %v8872_v36 = vsel %vm8854_vm11, %v8846_v63, %v8592_v32 }
 0xb37   : > { %v10310_v3 = vsel %vm8864_vm14, 4294967295, %v10309_v3 }
 0xb38   : > { %v3026_v18 = vrot.slane %v2904_v52, %v7944_v39  ;;  %3330 = vrot.lane.b32.xlu1 %v3301_v40, %s7654_s15  ;;  %10311 = vst [vmem:[#allocation27_spill] sm:$0xff] %v10310_v3 }
 0xb39   : > { %v8862_v25 = vpop.permute.xlu1 %3389 }
 0xb3a   : > { %10308 = vst [vmem:[#allocation26_spill] sm:$0xff] %v8862_v25  ;;  %v3033_v57 = vrot.slane %v3026_v18, %v7944_v39  ;;  %v8879_v56 = vsel %vm8858_vm13, %v8862_v25, %v8599_v54 }
 0xb3b   : > { %v8881_v30 = vpop.permute.xlu0 %3391  ;;  %v3761_v15 = vcombine.low %v8872_v36, %v8879_v56 }
 0xb3c   : > { %10312 = vst [vmem:[#allocation28_spill] sm:$0xff] %v8881_v30  ;;  %v8889_v19 = vsel %vm8864_vm14, %v8881_v30, %v8609_v21  ;;  %3334 = vrot.lane.b32.xlu1 %v3329_v17, %s7654_s15  ;;  %3038 = vrot.lane.b32.xlu0 %v3033_v57, %s7653_s14  ;;  %v8903_v21 = vld [vmem:[%s10172_s5 + $0x18] sm:$0xff] }
 0xb3d   : > { %v3775_v32 = vrot.slane %v8889_v19, %v7944_v39  ;;  %v3768_v54 = vrot.slane %v3761_v15, %v7944_v39 }
 0xb3f   : > { %v3776_v24 = vcombine.low %v3768_v54, %v3775_v32 }
 0xb40   : > { %3332 = vrot.lane.b32.xlu0 %v3315_v37, %s7654_s15 }
 0xb41   : > { %v3783_v45 = vrot.slane %v3776_v24, %v7944_v39 }
 0xb43   : > { %7058 = vmatmul.mubr.msk.f32.vlgmr.msra.gmra.mxu1 %vm10313_vm2, %v3783_v45  ;;  %v10348_v57 = vld [vmem:[#allocation28_spill] sm:$0xff] }
 0xb44   : > { %7072 = vmatpush3.msra.mxu1 %v8903_v21  ;;  %7079 = vmatprep.mubr.msk.f32.mxu1 %vm10293_vm10, %v10292_v10 }
 0xb45   : > { %7073 = vmatprep.subr.mxu1 %v10292_v10 }
 0xb46   : > { %7074 = vmatpush3.msra.mxu1 %v8912_v48  ;;  %v2910_v16 = vpop.permute.xlu1 %2909 }
 0xb47   : > { %7075 = vmatprep.subr.mxu1 %v10292_v10  ;;  %v2914_v22 = vrot.slane %v2910_v16, %v7853_v23  ;;  %v10320_v16 = vmov 0 }
 0xb48   : > { %7076 = vmatpush3.msra.mxu1 %v8919_v59  ;;  %v2917_v40 = vpop.permute.xlu0 %2916 }
 0xb49   : > { %7077 = vmatprep.subr.mxu1 %v10292_v10  ;;  %v2921_v0 = vrot.slane %v2917_v40, %v7853_v23  ;;  %vm8932_vm2 = vcmp.eq.s32.totalorder %v2914_v22, 1 }
 0xb4a   : > { %7078 = vmatpush3.msra.mxu1 %v8926_v42  ;;  %v2924_v52 = vpop.permute.xlu1 %2923 }
 0xb4b   : > { %7093 = vmatprep.subr.mxu1 %v10292_v10  ;;  %vm8939_vm15 = vcmp.eq.s32.totalorder %v2921_v0, 1  ;;  %v2928_v37 = vrot.slane %v2924_v52, %v7853_v23 }
 0xba4   : > { %v3035_v62 = vpop.permute.xlu0 %3034 }
 0xba5   : > { %v3046_v17 = vsel %vm8932_vm2, %v3035_v62, 0.0  ;;  %v8955_v24 = vsel %vm8932_vm2, %v3035_v62, %v8655_v33 }
 0xba6   : > { %3402 = vst.msk [vmem:[#allocation3 + $0x3] sm:$0x1] %vm10316_vm7, %v3046_v17  ;;  %v3037_v15 = vpop.permute.xlu1 %3036  ;;  %vm8959_vm7 = vcmp.eq.s32.totalorder %v2928_v37, 1  ;;  %v8988_v17 = vld [vmem:[%s10171_s4 + $0x10] sm:$0xff]  ;;  %v3755_v37 = vld [vmem:[#allocation2 + $0xb] ss:$0 sm:$0xff] }
 0xba7   : > { %v3047_v32 = vsel %vm8939_vm15, %v3037_v15, 0.0  ;;  %v8949_v54 = vsel %vm8939_vm15, %v3037_v15, %v8649_v43  ;;  %v10321_v16 = vsel %vm8959_vm7, 4294967295, %v10320_v16  ;;  %v8995_v15 = vld [vmem:[%s10171_s4 + $0x8] sm:$0xff] }
 0xba8   : > { %3403 = vst.msk [vmem:[#allocation3 + $0xb] sm:$0x1] %vm10319_vm5, %v3047_v32  ;;  %v3438_v45 = vcombine.low %v8955_v24, %v8949_v54  ;;  %10322 = vst [vmem:[#allocation29_spill] sm:$0xff] %v10321_v16  ;;  %v9002_v32 = vld [vmem:[%s10171_s4] sm:$0xff] }
 0xbaa   : > { %v3445_v0 = vrot.slane %v3438_v45, %v7944_v39  ;;  %v3331_v58 = vpop.permute.xlu1 %3330 }
 0xbae   : > { %v3039_v22 = vpop.permute.xlu0 %3038 }
 0xbaf   : > { %v8966_v43 = vsel %vm8959_vm7, %v3039_v22, %v8666_v14  ;;  %v3048_v40 = vsel %vm8959_vm7, %v3039_v22, 0.0  ;;  %v8979_v14 = vld [vmem:[%s10171_s4 + $0x18] sm:$0xff] }
 0xbb0   : > { %v3452_v33 = vrot.slane %v8966_v43, %v7944_v39  ;;  %3404 = vst.msk [vmem:[#allocation3 + $0x13] sm:$0x1] %vm10319_vm5, %v3048_v40  ;;  %vm10328_vm5 = vmmov %vm10323_vm4 }
 0xbb2   : > { %v3453_v52 = vcombine.low %v3445_v0, %v3452_v33  ;;  %v3756_v33 = vld [vmem:[#allocation2 + $0x1b] ss:$0 sm:$0xff] }
 0xbb4   : > { %v3460_v62 = vrot.slane %v3453_v52, %v7944_v39 }
 0xbb6   : > { %7047 = vmatmul.mubr.msk.f32.vlgmr.msra.gmra.mxu0 %vm10323_vm4, %v3460_v62 }
 0xbb7   : > { %7061 = vmatpush3.msra.mxu0 %v8979_v14  ;;  %7068 = vmatprep.mubr.msk.f32.mxu0 %vm10293_vm10, %v10292_v10 }
 0xbb8   : > { %7062 = vmatprep.subr.mxu0 %v10292_v10 }
 0xbb9   : > { %7063 = vmatpush3.msra.mxu0 %v8988_v17 }
 0xbba   : > { %7064 = vmatprep.subr.mxu0 %v10292_v10 }
 0xbbb   : > { %7065 = vmatpush3.msra.mxu0 %v8995_v15 }
 0xbbc   : > { %7066 = vmatprep.subr.mxu0 %v10292_v10 }
 0xbbd   : > { %7067 = vmatpush3.msra.mxu0 %v9002_v32 }
 0xbbe   : > { %7082 = vmatprep.subr.mxu0 %v10292_v10 }
 0xc03   : > { %v3852_v45 = vpop.f32.mrf.mxu1 }
 0xc04   : > { %v3857_v22 = vrot.slane %v3852_v45, 1  ;;  %v3858_v40 = vrot.slane %v3852_v45, 2  ;;  %v3862_v0 = vadd.f32 %v3852_v45, %v3755_v37  ;;  %v2955_v37 = vrot.slane %v8802_v34, %v7944_v39 }
 0xc05   : > { %v7059_v52 = vpop.f32.mrf.mxu1 }
 0xc06   : > { %v3863_v62 = vadd.f32 %v3857_v22, %v3756_v33  ;;  %7366 = vtanh.f32 %v3862_v0  ;;  %v3864_v47 = vadd.f32 %v3858_v40, %v3757_v6  ;;  %v2948_v22 = vrot.slane %v2941_v51, %v7944_v39  ;;  %v3333_v40 = vpop.permute.xlu0 %3332 }
 0xc07   : > { %v9016_v6 = vsel %vm8854_vm11, %v3331_v58, %v8696_v53  ;;  %v2962_v8 = vrot.slane %v2955_v37, %v7944_v39  ;;  %v9028_v51 = vsel %vm8858_vm13, %v3333_v40, %v8708_v1  ;;  %v3432_v1 = vld [vmem:[#allocation2 + $0x4] ss:$0 sm:$0xff] }
 0xc08   : > { %7368 = vtanh.f32 %v3863_v62  ;;  %v3892_v34 = vrot.slane %v9016_v6, %v7853_v23  ;;  %v3896_v58 = vrot.slane %v9028_v51, %v7853_v23  ;;  %v6823_v33 = vmul.f32 -1.442695, %v3864_v47 }
 0xc09   : > { %7370 = vtanh.f32 %v3864_v47  ;;  %v3434_v47 = vld [vmem:[#allocation2 + $0x24] ss:$0 sm:$0xff] }
 0xc13   : > { %v7367_v30 = vpop.eup %7366 }
 0xc14   : > { %3916 = vrot.lane.b32.xlu0 %v7367_v30, %s7651_s27  ;;  %v6822_v30 = vmul.f32 -1.442695, %v3863_v62 }
 0xc15   : > { %v7369_v25 = vpop.eup %7368 }
 0xc16   : > { %3918 = vrot.lane.b32.xlu1 %v7369_v25, %s7651_s27  ;;  %v7371_v45 = vpop.eup %7370  ;;  %v2969_v25 = vrot.slane %v8806_v11, %v7944_v39  ;;  %v6821_v11 = vmul.f32 -1.442695, %v3862_v0 }
 0xc18   : > { %3920 = vrot.lane.b32.xlu0 %v7371_v45, %s7651_s27  ;;  %v2976_v53 = vrot.slane %v2969_v25, %v7944_v39  ;;  %7372 = vpow2.f32 %v6821_v11  ;;  %v3335_v11 = vpop.permute.xlu1 %3334 }
 0xc19   : > { %7374 = vpow2.f32 %v6822_v30 }
 0xc1a   : > { %2977 = vrot.lane.b32.xlu1 %v2948_v22, %s7654_s15  ;;  %7376 = vpow2.f32 %v6823_v33  ;;  %v9040_v33 = vsel %vm8864_vm14, %v3335_v11, %v8720_v4 }
 0xc1c   : > { %2979 = vrot.lane.b32.xlu0 %v2962_v8, %s7654_s15  ;;  %v3433_v8 = vld [vmem:[#allocation2 + $0x14] ss:$0 sm:$0xff] }
 0xc1e   : > { %3901 = vrot.lane.b32.xlu1 %v3892_v34, %s7651_s27 }
 0xc20   : > { %3903 = vrot.lane.b32.xlu0 %v3896_v58, %s7651_s27 }
 0xc22   : > { %2981 = vrot.lane.b32.xlu1 %v2976_v53, %s7654_s15 }
 0xc25   : > { %v7373_v37 = vpop.eup %7372 }
 0xc26   : > { %v7375_v40 = vpop.eup %7374  ;;  %v3874_v25 = vadd.f32 1.0, %v7373_v37 }
 0xc27   : > { %v3875_v58 = vadd.f32 1.0, %v7375_v40  ;;  %v7377_v41 = vpop.eup %7376 }
 0xc28   : > { %v3876_v0 = vadd.f32 1.0, %v7377_v41 }
 0xc76   : > { %v3529_v52 = vpop.f32.mrf.mxu0 }
 0xc77   : > { %v3534_v45 = vrot.slane %v3529_v52, 1  ;;  %v3539_v22 = vadd.f32 %v3529_v52, %v3432_v1  ;;  %v3535_v53 = vrot.slane %v3529_v52, 2  ;;  %v3900_v52 = vrot.slane %v9040_v33, %v7853_v23 }
 0xc78   : > { %v7048_v34 = vpop.f32.mrf.mxu0 }
 0xc79   : > { %v3540_v5 = vadd.f32 %v3534_v45, %v3433_v8  ;;  %7378 = vtanh.f32 %v3539_v22  ;;  %v3541_v62 = vadd.f32 %v3535_v53, %v3434_v47 }
 0xc7b   : > { %7380 = vtanh.f32 %v3540_v5 }
 0xc7c   : > { %7382 = vrcp.f32 %v3874_v25 }
 0xc7d   : > { %7384 = vrcp.f32 %v3875_v58 }
 0xc7e   : > { %7386 = vrcp.f32 %v3876_v0 }
 0xc7f   : > { %7388 = vtanh.f32 %v3541_v62 }
 0xc86   : > { %v7379_v30 = vpop.eup %7378  ;;  %v3917_v1 = vpop.permute.xlu0 %3916 }
 0xc87   : > { %3593 = vrot.lane.b32.xlu0 %v7379_v30, %s7651_s27 }
 0xc88   : > { %v7381_v37 = vpop.eup %7380  ;;  %v3919_v41 = vpop.permute.xlu1 %3918 }
 0xc89   : > { %3595 = vrot.lane.b32.xlu1 %v7381_v37, %s7651_s27  ;;  %v9046_v45 = vpop.eup %7382 }
 0xc8a   : > { %v9049_v40 = vpop.eup %7384  ;;  %v3925_v8 = vmul.f32 %v9046_v45, %v3917_v1  ;;  %v3921_v4 = vpop.permute.xlu0 %3920 }
 0xc8b   : > { %3905 = vrot.lane.b32.xlu0 %v3900_v52, %s7651_s27  ;;  %v3926_v34 = vmul.f32 %v9049_v40, %v3919_v41  ;;  %v9055_v58 = vpop.eup %7386 }
 0xc8c   : > { %v2978_v25 = vpop.permute.xlu1 %2977  ;;  %v7389_v0 = vpop.eup %7388  ;;  %v3927_v47 = vmul.f32 %v9055_v58, %v3921_v4  ;;  %v6818_v4 = vmul.f32 -1.442695, %v3540_v5 }
 0xc8d   : > { %3931 = vrot.lane.b32.xlu1 %v3925_v8, %s7651_s27  ;;  %v9061_v11 = vsel %vm8932_vm2, %v2978_v25, %v8741_v13  ;;  %v6817_v8 = vmul.f32 -1.442695, %v3539_v22 }
 0xc8e   : > { %v2980_v53 = vpop.permute.xlu0 %2979  ;;  %v3569_v37 = vrot.slane %v9061_v11, %v7853_v23 }
 0xc8f   : > { %3933 = vrot.lane.b32.xlu0 %v3926_v34, %s7651_s27  ;;  %v9066_v1 = vsel %vm8939_vm15, %v2980_v53, %v8746_v12  ;;  %7390 = vpow2.f32 %v6817_v8  ;;  %v6819_v34 = vmul.f32 -1.442695, %v3541_v62 }
 0xc90   : > { %v3902_v30 = vpop.permute.xlu1 %3901  ;;  %v3573_v52 = vrot.slane %v9066_v1, %v7853_v23  ;;  %7392 = vpow2.f32 %v6818_v4 }
 0xc91   : > { %3597 = vrot.lane.b32.xlu1 %v7389_v0, %s7651_s27  ;;  %7394 = vpow2.f32 %v6819_v34  ;;  %v3910_v4 = vmul.f32 %v9046_v45, %v3902_v30 }
 0xc93   : > { %3935 = vrot.lane.b32.xlu0 %v3927_v47, %s7651_s27 }
 0xc94   : > { %v2982_v41 = vpop.permute.xlu1 %2981 }
 0xc95   : > { %v9077_v13 = vsel %vm8959_vm7, %v2982_v41, %v8757_v46  ;;  %3578 = vrot.lane.b32.xlu1 %v3569_v37, %s7651_s27  ;;  %v3904_v41 = vpop.permute.xlu0 %3903 }
 0xc96   : > { %v3577_v12 = vrot.slane %v9077_v13, %v7853_v23  ;;  %v3911_v34 = vmul.f32 %v9049_v40, %v3904_v41 }
 0xc97   : > { %3580 = vrot.lane.b32.xlu0 %v3573_v52, %s7651_s27 }
 0xc99   : > { %3582 = vrot.lane.b32.xlu1 %v3577_v12, %s7651_s27 }
 0xc9c   : > { %v7391_v25 = vpop.eup %7390 }
 0xc9d   : > { %v7393_v53 = vpop.eup %7392  ;;  %v3551_v0 = vadd.f32 1.0, %v7391_v25 }
 0xc9e   : > { %v3552_v46 = vadd.f32 1.0, %v7393_v53  ;;  %v7395_v47 = vpop.eup %7394 }
 0xc9f   : > { %7396 = vrcp.f32 %v3551_v0  ;;  %v3553_v37 = vadd.f32 1.0, %v7395_v47 }
 0xca0   : > { %7398 = vrcp.f32 %v3552_v46 }
 0xca1   : > { %7400 = vrcp.f32 %v3553_v37 }
 0xcac   : > { %v9084_v63 = vpop.eup %7396 }
 0xcad   : > { %v9087_v5 = vpop.eup %7398 }
 0xcae   : > { %v9099_v47 = vpop.eup %7400 }
 0xcf9   : > { %v3594_v52 = vpop.permute.xlu0 %3593 }
 0xcfa   : > { %v3602_v22 = vmul.f32 %v9084_v63, %v3594_v52 }
 0xcfb   : > { %v3596_v12 = vpop.permute.xlu1 %3595 }
 0xcfc   : > { %3608 = vrot.lane.b32.xlu0 %v3602_v22, %s7651_s27  ;;  %v3603_v62 = vmul.f32 %v9087_v5, %v3596_v12 }
 0xcfd   : > { %v3906_v8 = vpop.permute.xlu0 %3905 }
 0xcfe   : > { %3610 = vrot.lane.b32.xlu1 %v3603_v62, %s7651_s27  ;;  %v3912_v37 = vmul.f32 %v9055_v58, %v3906_v8 }
 0xcff   : > { %v3932_v25 = vpop.permute.xlu1 %3931 }
 0xd00   : > { %v9094_v53 = vadd.f32 %v3932_v25, %v3910_v4 }
 0xd01   : > { %v3934_v0 = vpop.permute.xlu0 %3933 }
 0xd02   : > { %v9096_v46 = vadd.f32 %v3934_v0, %v3911_v34  ;;  %7402 = vtanh.f32 %v9094_v53 }
 0xd03   : > { %v3598_v52 = vpop.permute.xlu1 %3597 }
 0xd04   : > { %7404 = vtanh.f32 %v9096_v46  ;;  %v3604_v30 = vmul.f32 %v9099_v47, %v3598_v52 }
 0xd05   : > { %v3936_v22 = vpop.permute.xlu0 %3935 }
 0xd06   : > { %v9104_v12 = vadd.f32 %v3936_v22, %v3912_v37  ;;  %3612 = vrot.lane.b32.xlu0 %v3604_v30, %s7651_s27 }
 0xd07   : > { %v3579_v8 = vpop.permute.xlu1 %3578 }
 0xd08   : > { %7406 = vtanh.f32 %v9104_v12  ;;  %v3587_v25 = vmul.f32 %v9084_v63, %v3579_v8 }
 0xd09   : > { %v3581_v34 = vpop.permute.xlu0 %3580 }
 0xd0a   : > { %v3588_v30 = vmul.f32 %v9087_v5, %v3581_v34 }
 0xd0b   : > { %v3583_v0 = vpop.permute.xlu1 %3582 }
 0xd0f   : > { %v7403_v41 = vpop.eup %7402 }
 0xd10   : > { %3949 = vrot.lane.b32.xlu1 %v7403_v41, %s7651_s27  ;;  %v3589_v41 = vmul.f32 %v9099_v47, %v3583_v0 }
 0xd11   : > { %v7405_v62 = vpop.eup %7404 }
 0xd12   : > { %3951 = vrot.lane.b32.xlu0 %v7405_v62, %s7651_s27 }
 0xd15   : > { %v7407_v4 = vpop.eup %7406 }
 0xd16   : > { %3953 = vrot.lane.b32.xlu1 %v7407_v4, %s7651_s27 }
 0xd6e   : > { %v3609_v37 = vpop.permute.xlu0 %3608 }
 0xd6f   : > { %v9112_v52 = vadd.f32 %v3609_v37, %v3587_v25 }
 0xd70   : > { %v3611_v22 = vpop.permute.xlu1 %3610 }
 0xd71   : > { %7408 = vtanh.f32 %v9112_v52  ;;  %v9116_v28 = vadd.f32 %v3611_v22, %v3588_v30 }
 0xd73   : > { %7410 = vtanh.f32 %v9116_v28 }
 0xd78   : > { %v3613_v62 = vpop.permute.xlu0 %3612 }
 0xd79   : > { %v9120_v4 = vadd.f32 %v3613_v62, %v3589_v41 }
 0xd7b   : > { %7412 = vtanh.f32 %v9120_v4 }
 0xd7e   : > { %v7409_v8 = vpop.eup %7408 }
 0xd7f   : > { %3626 = vrot.lane.b32.xlu0 %v7409_v8, %s7651_s27 }
 0xd80   : > { %v7411_v25 = vpop.eup %7410 }
 0xd81   : > { %3628 = vrot.lane.b32.xlu1 %v7411_v25, %s7651_s27 }
 0xd82   : > { %v3950_v34 = vpop.permute.xlu1 %3949 }
 0xd83   : > { %v3958_v37 = vmul.f32 %v9046_v45, %v3950_v34 }
 0xd84   : > { %v3952_v30 = vpop.permute.xlu0 %3951 }
 0xd85   : > { %v3959_v22 = vmul.f32 %v9049_v40, %v3952_v30  ;;  %v4027_v26 = vrot.slane %v3958_v37, %v7944_v39  ;;  %v3970_v30 = vrot.slane %v9094_v53, %v7944_v39  ;;  %v3984_v53 = vrot.slane %v9096_v46, %v7944_v39 }
 0xd87   : > { %v4034_v0 = vrot.slane %v4027_v26, %v7944_v39  ;;  %v4041_v41 = vrot.slane %v3959_v22, %v7944_v39 }
 0xd88   : > { %v3954_v62 = vpop.permute.xlu1 %3953  ;;  %v7413_v55 = vpop.eup %7412 }
 0xd89   : > { %v3960_v50 = vmul.f32 %v9055_v58, %v3954_v62  ;;  %3630 = vrot.lane.b32.xlu0 %v7413_v55, %s7651_s27  ;;  %4063 = vrot.lane.b32.xlu1 %v4034_v0, %s7653_s14  ;;  %v4048_v45 = vrot.slane %v4041_v41, %v7944_v39  ;;  %v3998_v41 = vrot.slane %v9104_v12, %v7944_v39 }
 0xd8b   : > { %v4055_v8 = vrot.slane %v3960_v50, %v7944_v39 }
 0xd8d   : > { %v4062_v40 = vrot.slane %v4055_v8, %v7944_v39  ;;  %4065 = vrot.lane.b32.xlu0 %v4048_v45, %s7653_s14 }
 0xd8f   : > { %4067 = vrot.lane.b32.xlu1 %v4062_v40, %s7653_s14  ;;  %v4005_v40 = vrot.slane %v3998_v41, %v7944_v39 }
 0xdf1   : > { %v3627_v26 = vpop.permute.xlu0 %3626 }
 0xdf2   : > { %v3635_v25 = vmul.f32 %v9084_v63, %v3627_v26  ;;  %v3977_v63 = vrot.slane %v3970_v30, %v7944_v39 }
 0xdf3   : > { %v3629_v58 = vpop.permute.xlu1 %3628 }
 0xdf4   : > { %v3704_v34 = vrot.slane %v3635_v25, %v7944_v39  ;;  %v3636_v55 = vmul.f32 %v9087_v5, %v3629_v58  ;;  %v3991_v58 = vrot.slane %v3984_v53, %v7944_v39 }
 0xdf6   : > { %v3711_v37 = vrot.slane %v3704_v34, %v7944_v39  ;;  %v3718_v50 = vrot.slane %v3636_v55, %v7944_v39 }
 0xdf8   : > { %3740 = vrot.lane.b32.xlu0 %v3711_v37, %s7653_s14  ;;  %v3725_v22 = vrot.slane %v3718_v50, %v7944_v39 }
 0xdfa   : > { %3742 = vrot.lane.b32.xlu1 %v3725_v22, %s7653_s14 }
 0xdfb   : > { %v3631_v0 = vpop.permute.xlu0 %3630  ;;  %v9152_v62 = vpop.permute.xlu1 %4063 }
 0xdfc   : > { %v3637_v5 = vmul.f32 %v9099_v47, %v3631_v0  ;;  %v9166_v47 = vsel %vm8932_vm2, %v9152_v62, %v8872_v36 }
 0xdfe   : > { %v3732_v8 = vrot.slane %v3637_v5, %v7944_v39  ;;  %4006 = vrot.lane.b32.xlu1 %v3977_v63, %s7654_s15 }
 0xdff   : > { %v9158_v45 = vpop.permute.xlu0 %4065 }
 0xe00   : > { %v3739_v26 = vrot.slane %v3732_v8, %v7944_v39  ;;  %v9172_v12 = vsel %vm8939_vm15, %v9158_v45, %v8879_v56  ;;  %v4076_v60 = vsel %vm8939_vm15, %v9158_v45, 0.0  ;;  %v10349_v45 = vld [vmem:[#allocation27_spill] sm:$0xff] }
 0xe01   : > { %v9174_v25 = vpop.permute.xlu1 %4067  ;;  %v4437_v46 = vcombine.low %v9166_v47, %v9172_v12 }
 0xe02   : > { %10324 = vst [vmem:[#allocation30_spill] sm:$0xff] %v9174_v25  ;;  %v9182_v34 = vsel %vm8959_vm7, %v9174_v25, %v8889_v19  ;;  %3744 = vrot.lane.b32.xlu0 %v3739_v26, %s7653_s14  ;;  %4010 = vrot.lane.b32.xlu1 %v4005_v40, %s7654_s15 }
 0xe03   : > { %v4451_v36 = vrot.slane %v9182_v34, %v7944_v39  ;;  %v4444_v56 = vrot.slane %v4437_v46, %v7944_v39 }
 0xe05   : > { %v4452_v55 = vcombine.low %v4444_v56, %v4451_v36  ;;  %v4432_v36 = vld [vmem:[#allocation2 + $0x1a] ss:$0 sm:$0xff] }
 0xe06   : > { %4008 = vrot.lane.b32.xlu0 %v3991_v58, %s7654_s15 }
 0xe07   : > { %v4459_v37 = vrot.slane %v4452_v55, %v7944_v39  ;;  %v4433_v55 = vld [vmem:[#allocation2 + $0x2a] ss:$0 sm:$0xff] }
 0xe09   : > { %7080 = vmatmul.mubr.msk.f32.vlgmr.msra.gmra.mxu1 %vm10323_vm4, %v4459_v37 }
 0xe0a   : > { %7094 = vmatpush3.msra.mxu1 %v8903_v21  ;;  %7101 = vmatprep.mubr.msk.f32.mxu1 %vm10293_vm10, %v10292_v10 }
 0xe0b   : > { %7095 = vmatprep.subr.mxu1 %v10292_v10 }
 0xe0c   : > { %7096 = vmatpush3.msra.mxu1 %v8912_v48 }
 0xe0d   : > { %7097 = vmatprep.subr.mxu1 %v10292_v10 }
 0xe0e   : > { %7098 = vmatpush3.msra.mxu1 %v8919_v59 }
 0xe0f   : > { %7099 = vmatprep.subr.mxu1 %v10292_v10 }
 0xe10   : > { %7100 = vmatpush3.msra.mxu1 %v8926_v42 }
 0xe11   : > { %7115 = vmatprep.subr.mxu1 %v10292_v10 }
 0xe6a   : > { %v9205_v50 = vpop.permute.xlu0 %3740 }
 0xe6b   : > { %10326 = vst [vmem:[#allocation32_spill] sm:$0xff] %v9205_v50  ;;  %v9217_v22 = vsel %vm8854_vm11, %v9205_v50, %v8955_v24 }
 0xe6c   : > { %v9203_v19 = vpop.permute.xlu1 %3742 }
 0xe6d   : > { %10325 = vst [vmem:[#allocation31_spill] sm:$0xff] %v9203_v19  ;;  %v9211_v30 = vsel %vm8858_vm13, %v9203_v19, %v8949_v54 }
 0xe6e   : > { %v4114_v0 = vcombine.low %v9217_v22, %v9211_v30 }
 0xe70   : > { %v4121_v54 = vrot.slane %v4114_v0, %v7944_v39 }
 0xe74   : > { %v9221_v63 = vpop.permute.xlu0 %3744 }
 0xe75   : > { %10327 = vst [vmem:[#allocation33_spill] sm:$0xff] %v9221_v63  ;;  %v9227_v41 = vsel %vm8864_vm14, %v9221_v63, %v8966_v43  ;;  %v4431_v43 = vld [vmem:[#allocation2 + $0xa] ss:$0 sm:$0xff] }
 0xe76   : > { %v4128_v5 = vrot.slane %v9227_v41, %v7944_v39 }
 0xe78   : > { %v4129_v8 = vcombine.low %v4121_v54, %v4128_v5  ;;  %v3647_v54 = vrot.slane %v9112_v52, %v7944_v39 }
 0xe7a   : > { %v4136_v24 = vrot.slane %v4129_v8, %v7944_v39  ;;  %v4007_v8 = vpop.permute.xlu1 %4006 }
 0xe7c   : > { %7069 = vmatmul.mubr.msk.f32.vlgmr.msra.gmra.mxu0 %vm10328_vm5, %v4136_v24  ;;  %v3661_v24 = vrot.slane %v9116_v28, %v7944_v39  ;;  %vm10329_vm5 = vmmov %vm10323_vm4 }
 0xe7d   : > { %7083 = vmatpush3.msra.mxu0 %v8979_v14  ;;  %7090 = vmatprep.mubr.msk.f32.mxu0 %vm10293_vm10, %v10292_v10 }
 0xe7e   : > { %7084 = vmatprep.subr.mxu0 %v10292_v10  ;;  %v3668_v52 = vrot.slane %v3661_v24, %v7944_v39 }
 0xe7f   : > { %7085 = vmatpush3.msra.mxu0 %v8988_v17 }
 0xe80   : > { %7086 = vmatprep.subr.mxu0 %v10292_v10 }
 0xe81   : > { %7087 = vmatpush3.msra.mxu0 %v8995_v15 }
 0xe82   : > { %7088 = vmatprep.subr.mxu0 %v10292_v10 }
 0xe83   : > { %7089 = vmatpush3.msra.mxu0 %v9002_v32 }
 0xe84   : > { %7104 = vmatprep.subr.mxu0 %v10292_v10 }
 0xec9   : > { %v4528_v53 = vpop.f32.mrf.mxu1 }
 0xeca   : > { %v4533_v40 = vrot.slane %v4528_v53, 1  ;;  %v4534_v26 = vrot.slane %v4528_v53, 2  ;;  %v4538_v46 = vadd.f32 %v4528_v53, %v4431_v43  ;;  %v3654_v53 = vrot.slane %v3647_v54, %v7944_v39 }
 0xecb   : > { %v7081_v56 = vpop.f32.mrf.mxu1 }
 0xecc   : > { %v4539_v58 = vadd.f32 %v4533_v40, %v4432_v36  ;;  %7414 = vtanh.f32 %v4538_v46  ;;  %v4540_v37 = vadd.f32 %v4534_v26, %v4433_v55  ;;  %v9254_v40 = vsel %vm8932_vm2, %v4007_v8, %v9016_v6  ;;  %v4009_v26 = vpop.permute.xlu0 %4008 }
 0xecd   : > { %v3675_v36 = vrot.slane %v9120_v4, %v7944_v39  ;;  %v4568_v28 = vrot.slane %v9254_v40, %v7853_v23  ;;  %v9266_v56 = vsel %vm8939_vm15, %v4009_v26, %v9028_v51  ;;  %v6829_v4 = vmul.f32 -1.442695, %v4538_v46  ;;  %v4108_v51 = vld [vmem:[#allocation2 + $0x5] ss:$0 sm:$0xff]  ;;  %v4109_v26 = vld [vmem:[#allocation2 + $0x15] ss:$0 sm:$0xff] }
 0xece   : > { %7416 = vtanh.f32 %v4539_v58  ;;  %v4572_v6 = vrot.slane %v9266_v56, %v7853_v23  ;;  %v6831_v54 = vmul.f32 -1.442695, %v4540_v37  ;;  %vm10350_vm15 = vnez %v10349_v45 }
 0xecf   : > { %7418 = vtanh.f32 %v4540_v37  ;;  %v3682_v55 = vrot.slane %v3675_v36, %v7944_v39 }
 0xed0   : > { %7420 = vpow2.f32 %v6829_v4  ;;  %v4011_v4 = vpop.permute.xlu1 %4010 }
 0xed9   : > { %v7415_v0 = vpop.eup %7414 }
 0xeda   : > { %4592 = vrot.lane.b32.xlu0 %v7415_v0, %s7651_s27  ;;  %v6830_v0 = vmul.f32 -1.442695, %v4539_v58  ;;  %v4110_v58 = vld [vmem:[#allocation2 + $0x25] ss:$0 sm:$0xff] }
 0xedb   : > { %v7417_v5 = vpop.eup %7416 }
 0xedc   : > { %4594 = vrot.lane.b32.xlu1 %v7417_v5, %s7651_s27  ;;  %v7419_v43 = vpop.eup %7418  ;;  %7422 = vpow2.f32 %v6830_v0 }
 0xedd   : > { %7424 = vpow2.f32 %v6831_v54  ;;  %v7421_v8 = vpop.eup %7420  ;;  %v9278_v54 = vsel %vm8959_vm7, %v4011_v4, %v9040_v33  ;;  %vm10334_vm7 = vnez %v10268_v38  ;;  %v6024_v38 = vld [vmem:[%s10173_s6 + $0x28] sm:$0xff] }
 0xede   : > { %4596 = vrot.lane.b32.xlu0 %v7419_v43, %s7651_s27  ;;  %v4550_v36 = vadd.f32 1.0, %v7421_v8 }
 0xee0   : > { %3683 = vrot.lane.b32.xlu1 %v3654_v53, %s7654_s15 }
 0xee2   : > { %3685 = vrot.lane.b32.xlu0 %v3668_v52, %s7654_s15 }
 0xee4   : > { %4577 = vrot.lane.b32.xlu1 %v4568_v28, %s7651_s27 }
 0xee6   : > { %4579 = vrot.lane.b32.xlu0 %v4572_v6, %s7651_s27 }
 0xee8   : > { %3687 = vrot.lane.b32.xlu1 %v3682_v55, %s7654_s15 }
 0xee9   : > { %v7423_v53 = vpop.eup %7422 }
 0xeea   : > { %v4551_v6 = vadd.f32 1.0, %v7423_v53  ;;  %v7425_v63 = vpop.eup %7424 }
 0xeeb   : > { %v4552_v46 = vadd.f32 1.0, %v7425_v63 }
 0xf3c   : > { %v4205_v5 = vpop.f32.mrf.mxu0 }
 0xf3d   : > { %v4210_v24 = vrot.slane %v4205_v5, 1  ;;  %v4215_v43 = vadd.f32 %v4205_v5, %v4108_v51  ;;  %v4211_v55 = vrot.slane %v4205_v5, 2  ;;  %v4576_v5 = vrot.slane %v9278_v54, %v7853_v23 }
 0xf3e   : > { %v7070_v52 = vpop.f32.mrf.mxu0 }
 0xf3f   : > { %v4216_v28 = vadd.f32 %v4210_v24, %v4109_v26  ;;  %7426 = vtanh.f32 %v4215_v43  ;;  %v4217_v37 = vadd.f32 %v4211_v55, %v4110_v58 }
 0xf41   : > { %7428 = vtanh.f32 %v4216_v28 }
 0xf42   : > { %7430 = vrcp.f32 %v4550_v36 }
 0xf43   : > { %7432 = vrcp.f32 %v4551_v6 }
 0xf44   : > { %7434 = vrcp.f32 %v4552_v46 }
 0xf45   : > { %7436 = vtanh.f32 %v4217_v37 }
 0xf4c   : > { %v7427_v0 = vpop.eup %7426  ;;  %v4593_v51 = vpop.permute.xlu0 %4592 }
 0xf4d   : > { %4269 = vrot.lane.b32.xlu0 %v7427_v0, %s7651_s27 }
 0xf4e   : > { %v7429_v8 = vpop.eup %7428  ;;  %v4595_v63 = vpop.permute.xlu1 %4594 }
 0xf4f   : > { %4271 = vrot.lane.b32.xlu1 %v7429_v8, %s7651_s27  ;;  %v9284_v24 = vpop.eup %7430 }
 0xf50   : > { %v9287_v53 = vpop.eup %7432  ;;  %v4601_v26 = vmul.f32 %v9284_v24, %v4593_v51  ;;  %v4597_v33 = vpop.permute.xlu0 %4596 }
 0xf51   : > { %4581 = vrot.lane.b32.xlu0 %v4576_v5, %s7651_s27  ;;  %v4602_v52 = vmul.f32 %v9287_v53, %v4595_v63  ;;  %v9293_v6 = vpop.eup %7434 }
 0xf52   : > { %v3684_v36 = vpop.permute.xlu1 %3683  ;;  %v7437_v46 = vpop.eup %7436  ;;  %v4603_v58 = vmul.f32 %v9293_v6, %v4597_v33  ;;  %v6826_v33 = vmul.f32 -1.442695, %v4216_v28 }
 0xf53   : > { %4607 = vrot.lane.b32.xlu1 %v4601_v26, %s7651_s27  ;;  %v9299_v4 = vsel %vm8854_vm11, %v3684_v36, %v9061_v11  ;;  %v6825_v26 = vmul.f32 -1.442695, %v4215_v43 }
 0xf54   : > { %v3686_v55 = vpop.permute.xlu0 %3685  ;;  %v4245_v8 = vrot.slane %v9299_v4, %v7853_v23 }
 0xf55   : > { %4609 = vrot.lane.b32.xlu0 %v4602_v52, %s7651_s27  ;;  %v9304_v51 = vsel %vm8858_vm13, %v3686_v55, %v9066_v1  ;;  %7438 = vpow2.f32 %v6825_v26  ;;  %v6827_v52 = vmul.f32 -1.442695, %v4217_v37 }
 0xf56   : > { %v4578_v0 = vpop.permute.xlu1 %4577  ;;  %v4249_v5 = vrot.slane %v9304_v51, %v7853_v23  ;;  %7440 = vpow2.f32 %v6826_v33 }
 0xf57   : > { %4273 = vrot.lane.b32.xlu1 %v7437_v46, %s7651_s27  ;;  %7442 = vpow2.f32 %v6827_v52  ;;  %v4586_v33 = vmul.f32 %v9284_v24, %v4578_v0 }
 0xf59   : > { %4611 = vrot.lane.b32.xlu0 %v4603_v58, %s7651_s27 }
 0xf5a   : > { %v3688_v63 = vpop.permute.xlu1 %3687 }
 0xf5b   : > { %v9315_v11 = vsel %vm8864_vm14, %v3688_v63, %v9077_v13  ;;  %4254 = vrot.lane.b32.xlu1 %v4245_v8, %s7651_s27  ;;  %v4580_v63 = vpop.permute.xlu0 %4579  ;;  %vm10337_vm14 = vcmask 261120  }
 0xf5c   : > { %v4253_v1 = vrot.slane %v9315_v11, %v7853_v23  ;;  %v4587_v52 = vmul.f32 %v9287_v53, %v4580_v63 }
 0xf5d   : > { %4256 = vrot.lane.b32.xlu0 %v4249_v5, %s7651_s27 }
 0xf5f   : > { %4258 = vrot.lane.b32.xlu1 %v4253_v1, %s7651_s27 }
 0xf62   : > { %v7439_v36 = vpop.eup %7438 }
 0xf63   : > { %v7441_v55 = vpop.eup %7440  ;;  %v4227_v46 = vadd.f32 1.0, %v7439_v36 }
 0xf64   : > { %v4228_v13 = vadd.f32 1.0, %v7441_v55  ;;  %v7443_v58 = vpop.eup %7442 }
 0xf65   : > { %7444 = vrcp.f32 %v4227_v46  ;;  %v4229_v8 = vadd.f32 1.0, %v7443_v58 }
 0xf66   : > { %7446 = vrcp.f32 %v4228_v13 }
 0xf67   : > { %7448 = vrcp.f32 %v4229_v8 }
 0xf72   : > { %v9322_v19 = vpop.eup %7444 }
 0xf73   : > { %v9325_v28 = vpop.eup %7446 }
 0xf74   : > { %v9337_v58 = vpop.eup %7448 }
 0xfbf   : > { %v4270_v5 = vpop.permute.xlu0 %4269 }
 0xfc0   : > { %v4278_v43 = vmul.f32 %v9322_v19, %v4270_v5 }
 0xfc1   : > { %v4272_v1 = vpop.permute.xlu1 %4271 }
 0xfc2   : > { %4284 = vrot.lane.b32.xlu0 %v4278_v43, %s7651_s27  ;;  %v4279_v37 = vmul.f32 %v9325_v28, %v4272_v1 }
 0xfc3   : > { %v4582_v26 = vpop.permute.xlu0 %4581 }
 0xfc4   : > { %4286 = vrot.lane.b32.xlu1 %v4279_v37, %s7651_s27  ;;  %v4588_v8 = vmul.f32 %v9293_v6, %v4582_v26 }
 0xfc5   : > { %v4608_v36 = vpop.permute.xlu1 %4607 }
 0xfc6   : > { %v9332_v55 = vadd.f32 %v4608_v36, %v4586_v33 }
 0xfc7   : > { %v4610_v46 = vpop.permute.xlu0 %4609 }
 0xfc8   : > { %v9334_v13 = vadd.f32 %v4610_v46, %v4587_v52  ;;  %7450 = vtanh.f32 %v9332_v55 }
 0xfc9   : > { %v4274_v5 = vpop.permute.xlu1 %4273 }
 0xfca   : > { %7452 = vtanh.f32 %v9334_v13  ;;  %v4280_v0 = vmul.f32 %v9337_v58, %v4274_v5 }
 0xfcb   : > { %v4612_v43 = vpop.permute.xlu0 %4611 }
 0xfcc   : > { %v9342_v1 = vadd.f32 %v4612_v43, %v4588_v8  ;;  %4288 = vrot.lane.b32.xlu0 %v4280_v0, %s7651_s27 }
 0xfcd   : > { %v4255_v26 = vpop.permute.xlu1 %4254 }
 0xfce   : > { %7454 = vtanh.f32 %v9342_v1  ;;  %v4263_v36 = vmul.f32 %v9322_v19, %v4255_v26 }
 0xfcf   : > { %v4257_v52 = vpop.permute.xlu0 %4256 }
 0xfd0   : > { %v4264_v0 = vmul.f32 %v9325_v28, %v4257_v52 }
 0xfd1   : > { %v4259_v46 = vpop.permute.xlu1 %4258 }
 0xfd5   : > { %v7451_v63 = vpop.eup %7450 }
 0xfd6   : > { %4625 = vrot.lane.b32.xlu1 %v7451_v63, %s7651_s27  ;;  %v4265_v63 = vmul.f32 %v9337_v58, %v4259_v46 }
 0xfd7   : > { %v7453_v37 = vpop.eup %7452 }
 0xfd8   : > { %4627 = vrot.lane.b32.xlu0 %v7453_v37, %s7651_s27 }
 0xfdb   : > { %v7455_v33 = vpop.eup %7454 }
 0xfdc   : > { %4629 = vrot.lane.b32.xlu1 %v7455_v33, %s7651_s27 }
0x1034   : > { %v4285_v8 = vpop.permute.xlu0 %4284 }
0x1035   : > { %v9350_v5 = vadd.f32 %v4285_v8, %v4263_v36 }
0x1036   : > { %v4287_v43 = vpop.permute.xlu1 %4286 }
0x1037   : > { %7456 = vtanh.f32 %v9350_v5  ;;  %v9354_v50 = vadd.f32 %v4287_v43, %v4264_v0 }
0x1039   : > { %7458 = vtanh.f32 %v9354_v50 }
0x103e   : > { %v4289_v37 = vpop.permute.xlu0 %4288 }
0x103f   : > { %v9358_v33 = vadd.f32 %v4289_v37, %v4265_v63 }
0x1041   : > { %7460 = vtanh.f32 %v9358_v33 }
0x1044   : > { %v7457_v26 = vpop.eup %7456 }
0x1045   : > { %4302 = vrot.lane.b32.xlu0 %v7457_v26, %s7651_s27 }
0x1046   : > { %v7459_v36 = vpop.eup %7458 }
0x1047   : > { %4304 = vrot.lane.b32.xlu1 %v7459_v36, %s7651_s27 }
0x1048   : > { %v4626_v52 = vpop.permute.xlu1 %4625 }
0x1049   : > { %v4634_v8 = vmul.f32 %v9284_v24, %v4626_v52 }
0x104a   : > { %v4628_v0 = vpop.permute.xlu0 %4627 }
0x104b   : > { %v4635_v43 = vmul.f32 %v9287_v53, %v4628_v0  ;;  %v4703_v16 = vrot.slane %v4634_v8, %v7944_v39  ;;  %v4646_v0 = vrot.slane %v9332_v55, %v7944_v39  ;;  %v4660_v55 = vrot.slane %v9334_v13, %v7944_v39 }
0x104d   : > { %v4710_v46 = vrot.slane %v4703_v16, %v7944_v39  ;;  %v4717_v63 = vrot.slane %v4635_v43, %v7944_v39 }
0x104e   : > { %v4630_v37 = vpop.permute.xlu1 %4629  ;;  %v7461_v25 = vpop.eup %7460 }
0x104f   : > { %v4636_v3 = vmul.f32 %v9293_v6, %v4630_v37  ;;  %4306 = vrot.lane.b32.xlu0 %v7461_v25, %s7651_s27  ;;  %4739 = vrot.lane.b32.xlu1 %v4710_v46, %s7653_s14  ;;  %v4724_v24 = vrot.slane %v4717_v63, %v7944_v39  ;;  %v4674_v63 = vrot.slane %v9342_v1, %v7944_v39 }
0x1051   : > { %v4731_v26 = vrot.slane %v4636_v3, %v7944_v39 }
0x1053   : > { %v4738_v53 = vrot.slane %v4731_v26, %v7944_v39  ;;  %4741 = vrot.lane.b32.xlu0 %v4724_v24, %s7653_s14 }
0x1055   : > { %4743 = vrot.lane.b32.xlu1 %v4738_v53, %s7653_s14  ;;  %v4681_v53 = vrot.slane %v4674_v63, %v7944_v39 }
0x10b7   : > { %v4303_v16 = vpop.permute.xlu0 %4302 }
0x10b8   : > { %v4311_v36 = vmul.f32 %v9322_v19, %v4303_v16  ;;  %v4653_v19 = vrot.slane %v4646_v0, %v7944_v39 }
0x10b9   : > { %v4305_v6 = vpop.permute.xlu1 %4304 }
0x10ba   : > { %v4380_v52 = vrot.slane %v4311_v36, %v7944_v39  ;;  %v4312_v25 = vmul.f32 %v9325_v28, %v4305_v6  ;;  %v4667_v6 = vrot.slane %v4660_v55, %v7944_v39 }
0x10bc   : > { %v4387_v8 = vrot.slane %v4380_v52, %v7944_v39  ;;  %v4394_v3 = vrot.slane %v4312_v25, %v7944_v39 }
0x10be   : > { %4416 = vrot.lane.b32.xlu0 %v4387_v8, %s7653_s14  ;;  %v4401_v43 = vrot.slane %v4394_v3, %v7944_v39 }
0x10c0   : > { %4418 = vrot.lane.b32.xlu1 %v4401_v43, %s7653_s14 }
0x10c1   : > { %v4307_v46 = vpop.permute.xlu0 %4306  ;;  %v9390_v37 = vpop.permute.xlu1 %4739 }
0x10c2   : > { %v4313_v28 = vmul.f32 %v9337_v58, %v4307_v46  ;;  %v9404_v58 = vsel %vm8632_vm1, %v9390_v37, %v9166_v47 }
0x10c4   : > { %v4408_v26 = vrot.slane %v4313_v28, %v7944_v39  ;;  %4682 = vrot.lane.b32.xlu1 %v4653_v19, %s7654_s15 }
0x10c5   : > { %v9396_v24 = vpop.permute.xlu0 %4741 }
0x10c6   : > { %v4415_v16 = vrot.slane %v4408_v26, %v7944_v39  ;;  %v9410_v1 = vsel %vm8639_vm8, %v9396_v24, %v9172_v12  ;;  %v5108_v26 = vld [vmem:[#allocation2 + $0x19] ss:$0 sm:$0xff] }
0x10c7   : > { %v9412_v36 = vpop.permute.xlu1 %4743  ;;  %v5113_v13 = vcombine.low %v9404_v58, %v9410_v1 }
0x10c8   : > { %v9420_v52 = vsel %vm8659_vm9, %v9412_v36, %v9182_v34  ;;  %4420 = vrot.lane.b32.xlu0 %v4415_v16, %s7653_s14  ;;  %4686 = vrot.lane.b32.xlu1 %v4681_v53, %s7654_s15 }
0x10c9   : > { %v5127_v47 = vrot.slane %v9420_v52, %v7944_v39  ;;  %v5120_v12 = vrot.slane %v5113_v13, %v7944_v39 }
0x10cb   : > { %v5128_v25 = vcombine.low %v5120_v12, %v5127_v47  ;;  %v4337_v12 = vrot.slane %v9354_v50, %v7944_v39 }
0x10cc   : > { %4684 = vrot.lane.b32.xlu0 %v4667_v6, %s7654_s15 }
0x10cd   : > { %v5135_v8 = vrot.slane %v5128_v25, %v7944_v39 }
0x10cf   : > { %7102 = vmatmul.mubr.msk.f32.vlgmr.msra.gmra.mxu1 %vm10323_vm4, %v5135_v8  ;;  %vm10330_vm4 = vnez %v10279_v61 }
0x10d0   : > { %7116 = vmatpush3.msra.mxu1 %v8903_v21  ;;  %7123 = vmatprep.mubr.msk.f32.mxu1 %vm10293_vm10, %v10292_v10 }
0x10d1   : > { %7117 = vmatprep.subr.mxu1 %v10292_v10 }
0x10d2   : > { %7118 = vmatpush3.msra.mxu1 %v8912_v48 }
0x10d3   : > { %7119 = vmatprep.subr.mxu1 %v10292_v10 }
0x10d4   : > { %7120 = vmatpush3.msra.mxu1 %v8919_v59 }
0x10d5   : > { %7121 = vmatprep.subr.mxu1 %v10292_v10 }
0x10d6   : > { %7122 = vmatpush3.msra.mxu1 %v8926_v42 }
0x1130   : > { %v9442_v3 = vpop.permute.xlu0 %4416 }
0x1131   : > { %v9454_v48 = vsel %vm8574_vm0, %v9442_v3, %v9217_v22 }
0x1132   : > { %v9440_v34 = vpop.permute.xlu1 %4418 }
0x1133   : > { %v9448_v21 = vsel %vm8578_vm12, %v9440_v34, %v9211_v30 }
0x1134   : > { %v4790_v59 = vcombine.low %v9454_v48, %v9448_v21 }
0x1136   : > { %v4797_v30 = vrot.slane %v4790_v59, %v7944_v39  ;;  %v4683_v47 = vpop.permute.xlu1 %4682 }
0x1137   : > { %v9491_v8 = vsel %vm8632_vm1, %v4683_v47, %v9254_v40 }
0x1138   : > { %v5244_v50 = vrot.slane %v9491_v8, %v7853_v23 }
0x113a   : > { %v9458_v42 = vpop.permute.xlu0 %4420 }
0x113b   : > { %v9464_v0 = vsel %vm8584_vm6, %v9458_v42, %v9227_v41  ;;  %v5107_v41 = vld [vmem:[#allocation2 + $0x9] ss:$0 sm:$0xff] }
0x113c   : > { %v4804_v43 = vrot.slane %v9464_v0, %v7944_v39 }
0x113e   : > { %v4805_v46 = vcombine.low %v4797_v30, %v4804_v43  ;;  %v4685_v59 = vpop.permute.xlu0 %4684  ;;  %v4351_v30 = vrot.slane %v9358_v33, %v7944_v39 }
0x113f   : > { %v9503_v43 = vsel %vm8639_vm8, %v4685_v59, %v9266_v56  ;;  %v4784_v56 = vld [vmem:[#allocation2 + $0x6] ss:$0 sm:$0xff] }
0x1140   : > { %v4812_v22 = vrot.slane %v4805_v46, %v7944_v39  ;;  %v5248_v40 = vrot.slane %v9503_v43, %v7853_v23  ;;  %v4358_v46 = vrot.slane %v4351_v30, %v7944_v39 }
0x1142   : > { %7091 = vmatmul.mubr.msk.f32.vlgmr.msra.gmra.mxu0 %vm10329_vm5, %v4812_v22  ;;  %vm10331_vm5 = vnez %v10281_v31  ;;  %v6020_v31 = vld [vmem:[%s10173_s6 + $0x8] sm:$0xff] }
0x1143   : > { %7105 = vmatpush3.msra.mxu0 %v8979_v14  ;;  %7112 = vmatprep.mubr.msk.f32.mxu0 %vm10293_vm10, %v10292_v10 }
0x1144   : > { %7106 = vmatprep.subr.mxu0 %v10292_v10 }
0x1145   : > { %7107 = vmatpush3.msra.mxu0 %v8988_v17  ;;  %v5109_v17 = vld [vmem:[#allocation2 + $0x29] ss:$0 sm:$0xff] }
0x1146   : > { %7108 = vmatprep.subr.mxu0 %v10292_v10 }
0x1147   : > { %7109 = vmatpush3.msra.mxu0 %v8995_v15 }
0x1148   : > { %7110 = vmatprep.subr.mxu0 %v10292_v10 }
0x1149   : > { %7111 = vmatpush3.msra.mxu0 %v9002_v32  ;;  %v4323_v32 = vrot.slane %v9350_v5, %v7944_v39  ;;  %v4344_v5 = vrot.slane %v4337_v12, %v7944_v39 }
0x114a   : > { %7126 = vmatprep.subr.mxu0 %v10292_v10 }
0x114b   : > { %v4330_v25 = vrot.slane %v4323_v32, %v7944_v39 }
0x118f   : > { %v5204_v19 = vpop.f32.mrf.mxu1 }
0x1190   : > { %v5209_v14 = vrot.slane %v5204_v19, 1  ;;  %v5210_v63 = vrot.slane %v5204_v19, 2  ;;  %v5214_v28 = vadd.f32 %v5204_v19, %v5107_v41 }
0x1191   : > { %v7103_v55 = vpop.f32.mrf.mxu1 }
0x1192   : > { %v5215_v53 = vadd.f32 %v5209_v14, %v5108_v26  ;;  %7462 = vtanh.f32 %v5214_v28  ;;  %v5216_v16 = vadd.f32 %v5210_v63, %v5109_v17  ;;  %v6837_v33 = vmul.f32 -1.442695, %v5214_v28  ;;  %v4785_v17 = vld [vmem:[#allocation2 + $0x16] ss:$0 sm:$0xff] }
0x1194   : > { %7464 = vtanh.f32 %v5215_v53  ;;  %v6838_v22 = vmul.f32 -1.442695, %v5215_v53  ;;  %v6839_v41 = vmul.f32 -1.442695, %v5216_v16  ;;  %v4786_v53 = vld [vmem:[#allocation2 + $0x26] ss:$0 sm:$0xff] }
0x1195   : > { %7466 = vtanh.f32 %v5216_v16 }
0x1196   : > { %7468 = vpow2.f32 %v6837_v33 }
0x1197   : > { %7470 = vpow2.f32 %v6838_v22 }
0x1198   : > { %7472 = vpow2.f32 %v6839_v41 }
0x119f   : > { %v7463_v15 = vpop.eup %7462 }
0x11a0   : > { %5268 = vrot.lane.b32.xlu0 %v7463_v15, %s7651_s27 }
0x11a1   : > { %v7465_v13 = vpop.eup %7464 }
0x11a2   : > { %5270 = vrot.lane.b32.xlu1 %v7465_v13, %s7651_s27  ;;  %v7467_v6 = vpop.eup %7466 }
0x11a3   : > { %v7469_v14 = vpop.eup %7468 }
0x11a4   : > { %5272 = vrot.lane.b32.xlu0 %v7467_v6, %s7651_s27  ;;  %v7471_v55 = vpop.eup %7470  ;;  %v5226_v13 = vadd.f32 1.0, %v7469_v14 }
0x11a5   : > { %v5227_v47 = vadd.f32 1.0, %v7471_v55  ;;  %v7473_v12 = vpop.eup %7472 }
0x11a6   : > { %4359 = vrot.lane.b32.xlu1 %v4330_v25, %s7654_s15  ;;  %v5228_v28 = vadd.f32 1.0, %v7473_v12  ;;  %v4687_v25 = vpop.permute.xlu1 %4686 }
0x11a8   : > { %4361 = vrot.lane.b32.xlu0 %v4344_v5, %s7654_s15  ;;  %v9515_v5 = vsel %vm8659_vm9, %v4687_v25, %v9278_v54  ;;  %vm10332_vm9 = vcmask 261120  }
0x11aa   : > { %5253 = vrot.lane.b32.xlu1 %v5244_v50, %s7651_s27 }
0x11ac   : > { %5255 = vrot.lane.b32.xlu0 %v5248_v40, %s7651_s27  ;;  %v5252_v40 = vrot.slane %v9515_v5, %v7853_v23 }
0x11ae   : > { %4363 = vrot.lane.b32.xlu1 %v4358_v46, %s7654_s15 }
0x1202   : > { %v4881_v19 = vpop.f32.mrf.mxu0 }
0x1203   : > { %v4886_v63 = vrot.slane %v4881_v19, 1  ;;  %v4891_v26 = vadd.f32 %v4881_v19, %v4784_v56  ;;  %v4887_v6 = vrot.slane %v4881_v19, 2 }
0x1204   : > { %v7092_v15 = vpop.f32.mrf.mxu0 }
0x1205   : > { %v4892_v32 = vadd.f32 %v4886_v63, %v4785_v17  ;;  %7474 = vtanh.f32 %v4891_v26  ;;  %v4893_v16 = vadd.f32 %v4887_v6, %v4786_v53  ;;  %v6833_v53 = vmul.f32 -1.442695, %v4891_v26 }
0x1207   : > { %7476 = vtanh.f32 %v4892_v32  ;;  %v6834_v25 = vmul.f32 -1.442695, %v4892_v32 }
0x1208   : > { %7478 = vrcp.f32 %v5226_v13 }
0x1209   : > { %7480 = vrcp.f32 %v5227_v47 }
0x120a   : > { %7482 = vrcp.f32 %v5228_v28 }
0x120b   : > { %7484 = vtanh.f32 %v4893_v16 }
0x120c   : > { %7486 = vpow2.f32 %v6833_v53 }
0x120d   : > { %7488 = vpow2.f32 %v6834_v25 }
0x1212   : > { %v7475_v59 = vpop.eup %7474  ;;  %v5269_v30 = vpop.permute.xlu0 %5268 }
0x1213   : > { %4945 = vrot.lane.b32.xlu0 %v7475_v59, %s7651_s27  ;;  %v6835_v59 = vmul.f32 -1.442695, %v4893_v16 }
0x1214   : > { %v7477_v50 = vpop.eup %7476  ;;  %v5271_v46 = vpop.permute.xlu1 %5270 }
0x1215   : > { %4947 = vrot.lane.b32.xlu1 %v7477_v50, %s7651_s27  ;;  %v9521_v33 = vpop.eup %7478  ;;  %7490 = vpow2.f32 %v6835_v59 }
0x1216   : > { %v9524_v22 = vpop.eup %7480  ;;  %v5277_v41 = vmul.f32 %v9521_v33, %v5269_v30  ;;  %v5273_v54 = vpop.permute.xlu0 %5272 }
0x1217   : > { %5257 = vrot.lane.b32.xlu0 %v5252_v40, %s7651_s27  ;;  %v5278_v56 = vmul.f32 %v9524_v22, %v5271_v46  ;;  %v9530_v14 = vpop.eup %7482 }
0x1218   : > { %v4360_v19 = vpop.permute.xlu1 %4359  ;;  %v7485_v55 = vpop.eup %7484  ;;  %v5279_v17 = vmul.f32 %v9530_v14, %v5273_v54 }
0x1219   : > { %5283 = vrot.lane.b32.xlu1 %v5277_v41, %s7651_s27  ;;  %v9536_v15 = vsel %vm8574_vm0, %v4360_v19, %v9299_v4  ;;  %v7487_v30 = vpop.eup %7486 }
0x121a   : > { %v4362_v63 = vpop.permute.xlu0 %4361  ;;  %v4921_v12 = vrot.slane %v9536_v15, %v7853_v23  ;;  %v7489_v50 = vpop.eup %7488  ;;  %v4903_v40 = vadd.f32 1.0, %v7487_v30 }
0x121b   : > { %5285 = vrot.lane.b32.xlu0 %v5278_v56, %s7651_s27  ;;  %v9541_v47 = vsel %vm8578_vm12, %v4362_v63, %v9304_v51 }
0x121c   : > { %v5254_v13 = vpop.permute.xlu1 %5253  ;;  %v4925_v6 = vrot.slane %v9541_v47, %v7853_v23  ;;  %7492 = vrcp.f32 %v4903_v40 }
0x121d   : > { %4949 = vrot.lane.b32.xlu1 %v7485_v55, %s7651_s27 }
0x121e   : > { %v5256_v54 = vpop.permute.xlu0 %5255 }
0x121f   : > { %5287 = vrot.lane.b32.xlu0 %v5279_v17, %s7651_s27  ;;  %v5262_v17 = vmul.f32 %v9521_v33, %v5254_v13 }
0x1220   : > { %v4364_v28 = vpop.permute.xlu1 %4363 }
0x1221   : > { %v9552_v4 = vsel %vm8584_vm6, %v4364_v28, %v9315_v11  ;;  %4930 = vrot.lane.b32.xlu1 %v4921_v12, %s7651_s27  ;;  %v4904_v11 = vadd.f32 1.0, %v7489_v50  ;;  %v5263_v12 = vmul.f32 %v9524_v22, %v5256_v54  ;;  %vm10333_vm6 = vnez %v10270_v44 }
0x1222   : > { %v4929_v51 = vrot.slane %v9552_v4, %v7853_v23  ;;  %v7491_v46 = vpop.eup %7490 }
0x1223   : > { %4932 = vrot.lane.b32.xlu0 %v4925_v6, %s7651_s27  ;;  %7494 = vrcp.f32 %v4904_v11  ;;  %v4905_v41 = vadd.f32 1.0, %v7491_v46 }
0x1225   : > { %4934 = vrot.lane.b32.xlu1 %v4929_v51, %s7651_s27  ;;  %7496 = vrcp.f32 %v4905_v41 }
0x1229   : > { %v9559_v56 = vpop.eup %7492 }
0x1230   : > { %v9562_v32 = vpop.eup %7494 }
0x1232   : > { %v9574_v25 = vpop.eup %7496 }
0x1285   : > { %v4946_v19 = vpop.permute.xlu0 %4945 }
0x1286   : > { %v4954_v26 = vmul.f32 %v9559_v56, %v4946_v19 }
0x1287   : > { %v4948_v63 = vpop.permute.xlu1 %4947 }
0x1288   : > { %4960 = vrot.lane.b32.xlu0 %v4954_v26, %s7651_s27  ;;  %v4955_v16 = vmul.f32 %v9562_v32, %v4948_v63 }
0x1289   : > { %v5258_v55 = vpop.permute.xlu0 %5257 }
0x128a   : > { %4962 = vrot.lane.b32.xlu1 %v4955_v16, %s7651_s27  ;;  %v5264_v59 = vmul.f32 %v9530_v14, %v5258_v55 }
0x128b   : > { %v5284_v6 = vpop.permute.xlu1 %5283 }
0x128c   : > { %v9569_v28 = vadd.f32 %v5284_v6, %v5262_v17 }
0x128d   : > { %v5286_v51 = vpop.permute.xlu0 %5285 }
0x128e   : > { %v9571_v53 = vadd.f32 %v5286_v51, %v5263_v12  ;;  %7498 = vtanh.f32 %v9569_v28 }
0x128f   : > { %v4950_v30 = vpop.permute.xlu1 %4949 }
0x1290   : > { %7500 = vtanh.f32 %v9571_v53  ;;  %v4956_v13 = vmul.f32 %v9574_v25, %v4950_v30 }
0x1291   : > { %v5288_v50 = vpop.permute.xlu0 %5287 }
0x1292   : > { %v9579_v40 = vadd.f32 %v5288_v50, %v5264_v59  ;;  %4964 = vrot.lane.b32.xlu0 %v4956_v13, %s7651_s27 }
0x1293   : > { %v4931_v54 = vpop.permute.xlu1 %4930 }
0x1294   : > { %7502 = vtanh.f32 %v9579_v40  ;;  %v4939_v26 = vmul.f32 %v9559_v56, %v4931_v54 }
0x1295   : > { %v4933_v19 = vpop.permute.xlu0 %4932 }
0x1296   : > { %v4940_v17 = vmul.f32 %v9562_v32, %v4933_v19 }
0x1297   : > { %v4935_v63 = vpop.permute.xlu1 %4934 }
0x1298   : > { %v4941_v51 = vmul.f32 %v9574_v25, %v4935_v63 }
0x129b   : > { %v7499_v11 = vpop.eup %7498 }
0x129c   : > { %5301 = vrot.lane.b32.xlu1 %v7499_v11, %s7651_s27 }
0x129d   : > { %v7501_v46 = vpop.eup %7500 }
0x129e   : > { %5303 = vrot.lane.b32.xlu0 %v7501_v46, %s7651_s27 }
0x12a1   : > { %v7503_v41 = vpop.eup %7502 }
0x12a2   : > { %5305 = vrot.lane.b32.xlu1 %v7503_v41, %s7651_s27 }
0x12fa   : > { %v4961_v16 = vpop.permute.xlu0 %4960 }
0x12fb   : > { %v9587_v55 = vadd.f32 %v4961_v16, %v4939_v26 }
0x12fc   : > { %v4963_v12 = vpop.permute.xlu1 %4962 }
0x12fd   : > { %7504 = vtanh.f32 %v9587_v55  ;;  %v9591_v6 = vadd.f32 %v4963_v12, %v4940_v17 }
0x12ff   : > { %7506 = vtanh.f32 %v9591_v6 }
0x1304   : > { %v4965_v59 = vpop.permute.xlu0 %4964 }
0x1305   : > { %v9595_v30 = vadd.f32 %v4965_v59, %v4941_v51 }
0x1307   : > { %7508 = vtanh.f32 %v9595_v30 }
0x130a   : > { %v7505_v13 = vpop.eup %7504 }
0x130b   : > { %4978 = vrot.lane.b32.xlu0 %v7505_v13, %s7651_s27 }
0x130c   : > { %v7507_v50 = vpop.eup %7506 }
0x130d   : > { %4980 = vrot.lane.b32.xlu1 %v7507_v50, %s7651_s27 }
0x130e   : > { %v5302_v11 = vpop.permute.xlu1 %5301 }
0x130f   : > { %v5310_v46 = vmul.f32 %v9521_v33, %v5302_v11 }
0x1310   : > { %v5304_v41 = vpop.permute.xlu0 %5303 }
0x1311   : > { %v5311_v54 = vmul.f32 %v9524_v22, %v5304_v41  ;;  %v5379_v19 = vrot.slane %v5310_v46, %v7944_v39 }
0x1313   : > { %v5386_v26 = vrot.slane %v5379_v19, %v7944_v39  ;;  %v5393_v63 = vrot.slane %v5311_v54, %v7944_v39  ;;  %v5322_v54 = vrot.slane %v9569_v28, %v7944_v39 }
0x1314   : > { %v5306_v16 = vpop.permute.xlu1 %5305  ;;  %v7509_v17 = vpop.eup %7508 }
0x1315   : > { %v5312_v12 = vmul.f32 %v9530_v14, %v5306_v16  ;;  %4982 = vrot.lane.b32.xlu0 %v7509_v17, %s7651_s27  ;;  %5415 = vrot.lane.b32.xlu1 %v5386_v26, %s7653_s14  ;;  %v5400_v33 = vrot.slane %v5393_v63, %v7944_v39  ;;  %v5329_v63 = vrot.slane %v5322_v54, %v7944_v39 }
0x1317   : > { %v5407_v51 = vrot.slane %v5312_v12, %v7944_v39 }
0x1319   : > { %v5414_v22 = vrot.slane %v5407_v51, %v7944_v39  ;;  %5417 = vrot.lane.b32.xlu0 %v5400_v33, %s7653_s14  ;;  %v5350_v51 = vrot.slane %v9579_v40, %v7944_v39 }
0x131b   : > { %5419 = vrot.lane.b32.xlu1 %v5414_v22, %s7653_s14 }
0x137d   : > { %v4979_v59 = vpop.permute.xlu0 %4978 }
0x137e   : > { %v4987_v13 = vmul.f32 %v9559_v56, %v4979_v59  ;;  %v5336_v56 = vrot.slane %v9571_v53, %v7944_v39 }
0x137f   : > { %v4981_v14 = vpop.permute.xlu1 %4980 }
0x1380   : > { %v5056_v50 = vrot.slane %v4987_v13, %v7944_v39  ;;  %v4988_v11 = vmul.f32 %v9562_v32, %v4981_v14  ;;  %v5343_v28 = vrot.slane %v5336_v56, %v7944_v39 }
0x1382   : > { %v5063_v46 = vrot.slane %v5056_v50, %v7944_v39  ;;  %v5070_v41 = vrot.slane %v4988_v11, %v7944_v39  ;;  %v5357_v50 = vrot.slane %v5350_v51, %v7944_v39 }
0x1384   : > { %5092 = vrot.lane.b32.xlu0 %v5063_v46, %s7653_s14  ;;  %v5077_v19 = vrot.slane %v5070_v41, %v7944_v39 }
0x1386   : > { %5094 = vrot.lane.b32.xlu1 %v5077_v19, %s7653_s14 }
0x1387   : > { %v4983_v26 = vpop.permute.xlu0 %4982  ;;  %v9627_v16 = vpop.permute.xlu1 %5415 }
0x1388   : > { %v4989_v32 = vmul.f32 %v9574_v25, %v4983_v26  ;;  %v5424_v25 = vsel %vm8323_vm3, %v9627_v16, %v9404_v58  ;;  %v10335_v26 = vld [vmem:[#allocation20_spill] sm:$0xff] }
0x138a   : > { %v5084_v17 = vrot.slane %v4989_v32, %v7944_v39  ;;  %5358 = vrot.lane.b32.xlu1 %v5329_v63, %s7654_s15 }
0x138b   : > { %v9632_v12 = vpop.permute.xlu0 %5417 }
0x138c   : > { %v5091_v53 = vrot.slane %v5084_v17, %v7944_v39  ;;  %v5425_v33 = vsel %vm10330_vm4, %v9632_v12, %v9410_v1  ;;  %v4999_v1 = vrot.slane %v9587_v55, %v7944_v39 }
0x138d   : > { %v9645_v22 = vpop.permute.xlu1 %5419  ;;  %v5729_v59 = vcombine.low %v5424_v25, %v5425_v33  ;;  %v5724_v33 = vld [vmem:[#allocation2 + $0x18] ss:$0 sm:$0xff] }
0x138e   : > { %v5426_v40 = vsel %vm10331_vm5, %v9645_v22, %v9420_v52  ;;  %5096 = vrot.lane.b32.xlu0 %v5091_v53, %s7653_s14  ;;  %5360 = vrot.lane.b32.xlu1 %v5343_v28, %s7654_s15  ;;  %v5006_v52 = vrot.slane %v4999_v1, %v7944_v39 }
0x138f   : > { %v5743_v13 = vrot.slane %v5426_v40, %v7944_v39  ;;  %v5736_v58 = vrot.slane %v5729_v59, %v7944_v39 }
0x1391   : > { %v5744_v14 = vcombine.low %v5736_v58, %v5743_v13  ;;  %v5725_v13 = vld [vmem:[#allocation2 + $0x28] ss:$0 sm:$0xff] }
0x1392   : > { %5362 = vrot.lane.b32.xlu1 %v5357_v50, %s7654_s15 }
0x1393   : > { %v5751_v11 = vrot.slane %v5744_v14, %v7944_v39 }
0x1395   : > { %7124 = vmatmul.mubr.msk.f32.vlgmr.msra.gmra.mxu1 %vm10332_vm9, %v5751_v11  ;;  %vm10336_vm9 = vnez %v10335_v26 }
0x1396   : > { %5035 = vrot.lane.b32.xlu1 %v5006_v52, %s7654_s15 }
0x13f6   : > { %v9665_v41 = vpop.permute.xlu0 %5092 }
0x13f7   : > { %v5101_v54 = vsel %vm10334_vm7, %v9665_v41, %v9454_v48  ;;  %v5723_v48 = vld [vmem:[#allocation2 + $0x8] ss:$0 sm:$0xff]  ;;  %v5104_v61 = vsel %vm10334_vm7, %v9665_v41, 0.0 }
0x13f8   : > { %v9663_v46 = vpop.permute.xlu1 %5094 }
0x13f9   : > { %v5102_v55 = vsel %vm10333_vm6, %v9663_v46, %v9448_v21 }
0x13fa   : > { %v5466_v19 = vcombine.low %v5101_v54, %v5102_v55 }
0x13fc   : > { %v5473_v32 = vrot.slane %v5466_v19, %v7944_v39  ;;  %v5359_v1 = vpop.permute.xlu1 %5358 }
0x13fd   : > { %v5367_v55 = vsel %vm8323_vm3, %v5359_v1, %v9491_v8 }
0x13fe   : > { %v5860_v54 = vrot.slane %v5367_v55, %v7853_v23  ;;  %v5013_v55 = vrot.slane %v9591_v6, %v7944_v39 }
0x1400   : > { %v9675_v56 = vpop.permute.xlu0 %5096  ;;  %v5361_v11 = vpop.permute.xlu1 %5360 }
0x1401   : > { %v5103_v63 = vsel %vm10336_vm9, %v9675_v56, %v9464_v0  ;;  %v5368_v19 = vsel %vm10330_vm4, %v5361_v11, %v9503_v43  ;;  %v5461_v11 = vld [vmem:[#allocation2 + $0x17] ss:$0 sm:$0xff] }
0x1402   : > { %v5480_v17 = vrot.slane %v5103_v63, %v7944_v39 }
0x1404   : > { %v5481_v28 = vcombine.low %v5473_v32, %v5480_v17  ;;  %v5363_v63 = vpop.permute.xlu1 %5362  ;;  %v5864_v32 = vrot.slane %v5368_v19, %v7853_v23 }
0x1405   : > { %v5369_v17 = vsel %vm10331_vm5, %v5363_v63, %v9515_v5 }
0x1406   : > { %v5488_v21 = vrot.slane %v5481_v28, %v7944_v39  ;;  %v5868_v8 = vrot.slane %v5369_v17, %v7853_v23  ;;  %v5020_v17 = vrot.slane %v5013_v55, %v7944_v39 }
0x1408   : > { %7113 = vmatmul.mubr.msk.f32.vlgmr.msra.gmra.mxu0 %vm10337_vm14, %v5488_v21  ;;  %vm10358_vm14 = vnez %v10290_v27 }
0x1409   : > { %7142 = vmatprep.mubr.msk.f32.mxu0 %vm10293_vm10, %v10292_v10  ;;  %7127 = vmatpush3.msra.mxu0 %v6026_v9 }
0x140a   : > { %7128 = vmatprep.subr.mxu0 %v10292_v10 }
0x1455   : > { %v5820_v51 = vpop.f32.mrf.mxu1 }
0x1456   : > { %v5825_v53 = vrot.slane %v5820_v51, 1  ;;  %v5830_v25 = vadd.f32 %v5820_v51, %v5723_v48  ;;  %v5826_v40 = vrot.slane %v5820_v51, 2 }
0x1457   : > { %v7125_v59 = vpop.f32.mrf.mxu1 }
0x1458   : > { %v5831_v0 = vadd.f32 %v5825_v53, %v5724_v33  ;;  %7510 = vtanh.f32 %v5830_v25  ;;  %v5832_v58 = vadd.f32 %v5826_v40, %v5725_v13  ;;  %v6845_v28 = vmul.f32 -1.442695, %v5830_v25  ;;  %v5460_v33 = vld [vmem:[#allocation2 + $0x7] ss:$0 sm:$0xff] }
0x145a   : > { %7512 = vtanh.f32 %v5831_v0  ;;  %v6846_v21 = vmul.f32 -1.442695, %v5831_v0  ;;  %v6847_v48 = vmul.f32 -1.442695, %v5832_v58 }
0x145b   : > { %7514 = vtanh.f32 %v5832_v58  ;;  %v5462_v58 = vld [vmem:[#allocation2 + $0x27] ss:$0 sm:$0xff] }
0x145c   : > { %7516 = vpow2.f32 %v6845_v28 }
0x145d   : > { %7518 = vpow2.f32 %v6846_v21 }
0x145e   : > { %7520 = vpow2.f32 %v6847_v48  ;;  %v5027_v48 = vrot.slane %v9595_v30, %v7944_v39 }
0x1465   : > { %v7511_v50 = vpop.eup %7510 }
0x1466   : > { %5884 = vrot.lane.b32.xlu0 %v7511_v50, %s7651_s27 }
0x1467   : > { %v7513_v14 = vpop.eup %7512 }
0x1468   : > { %v7515_v52 = vpop.eup %7514 }
0x1469   : > { %v7517_v43 = vpop.eup %7516 }
0x146a   : > { %5886 = vrot.lane.b32.xlu0 %v7513_v14, %s7651_s27  ;;  %v5842_v51 = vadd.f32 1.0, %v7517_v43  ;;  %v7519_v53 = vpop.eup %7518 }
0x146b   : > { %v7521_v13 = vpop.eup %7520  ;;  %v5843_v50 = vadd.f32 1.0, %v7519_v53 }
0x146c   : > { %7522 = vrcp.f32 %v5842_v51  ;;  %v5844_v14 = vadd.f32 1.0, %v7521_v13 }
0x146e   : > { %5888 = vrot.lane.b32.xlu0 %v7515_v52, %s7651_s27 }
0x1472   : > { %5869 = vrot.lane.b32.xlu0 %v5860_v54, %s7651_s27 }
0x1476   : > { %5871 = vrot.lane.b32.xlu0 %v5864_v32, %s7651_s27 }
0x1479   : > { %v9705_v52 = vpop.eup %7522 }
0x147a   : > { %5873 = vrot.lane.b32.xlu0 %v5868_v8, %s7651_s27 }
0x14c8   : > { %v5557_v59 = vpop.f32.mrf.mxu0 }
0x14c9   : > { %v5567_v40 = vadd.f32 %v5557_v59, %v5460_v33  ;;  %v5562_v1 = vrot.slane %v5557_v59, 1  ;;  %v5563_v0 = vrot.slane %v5557_v59, 2  ;;  %v5034_v33 = vrot.slane %v5027_v48, %v7944_v39  ;;  %v5036_v59 = vpop.permute.xlu1 %5035 }
0x14ca   : > { %v7114_v5 = vpop.f32.mrf.mxu0  ;;  %v5044_v30 = vsel %vm10334_vm7, %v5036_v59, %v9536_v15 }
0x14cb   : > { %7524 = vtanh.f32 %v5567_v40  ;;  %v5568_v25 = vadd.f32 %v5562_v1, %v5461_v11  ;;  %v5569_v54 = vadd.f32 %v5563_v0, %v5462_v58  ;;  %v5597_v13 = vrot.slane %v5044_v30, %v7853_v23 }
0x14cc   : > { %7526 = vrcp.f32 %v5843_v50  ;;  %v6841_v50 = vmul.f32 -1.442695, %v5567_v40 }
0x14cd   : > { %7528 = vrcp.f32 %v5844_v14  ;;  %v6842_v1 = vmul.f32 -1.442695, %v5568_v25  ;;  %v6843_v14 = vmul.f32 -1.442695, %v5569_v54 }
0x14ce   : > { %7530 = vtanh.f32 %v5568_v25 }
0x14cf   : > { %7532 = vtanh.f32 %v5569_v54 }
0x14d0   : > { %7534 = vpow2.f32 %v6841_v50 }
0x14d1   : > { %7536 = vpow2.f32 %v6842_v1 }
0x14d2   : > { %7538 = vpow2.f32 %v6843_v14 }
0x14d8   : > { %v7525_v19 = vpop.eup %7524  ;;  %v5885_v63 = vpop.permute.xlu0 %5884 }
0x14d9   : > { %v5893_v32 = vmul.f32 %v9705_v52, %v5885_v63  ;;  %5621 = vrot.lane.b32.xlu1 %v7525_v19, %s7651_s27  ;;  %v9713_v8 = vpop.eup %7526 }
0x14da   : > { %v9717_v6 = vpop.eup %7528 }
0x14db   : > { %5899 = vrot.lane.b32.xlu0 %v5893_v32, %s7651_s27  ;;  %v7531_v43 = vpop.eup %7530 }
0x14dc   : > { %v5887_v28 = vpop.permute.xlu0 %5886  ;;  %v7533_v5 = vpop.eup %7532 }
0x14dd   : > { %v5894_v21 = vmul.f32 %v9713_v8, %v5887_v28  ;;  %5037 = vrot.lane.b32.xlu1 %v5020_v17, %s7654_s15  ;;  %v7535_v11 = vpop.eup %7534 }
0x14de   : > { %v5579_v0 = vadd.f32 1.0, %v7535_v11  ;;  %v7537_v55 = vpop.eup %7536 }
0x14df   : > { %5901 = vrot.lane.b32.xlu0 %v5894_v21, %s7651_s27  ;;  %v5580_v19 = vadd.f32 1.0, %v7537_v55  ;;  %v7539_v15 = vpop.eup %7538 }
0x14e0   : > { %v5889_v51 = vpop.permute.xlu0 %5888  ;;  %7540 = vrcp.f32 %v5579_v0  ;;  %v5581_v17 = vadd.f32 1.0, %v7539_v15 }
0x14e1   : > { %v5895_v53 = vmul.f32 %v9717_v6, %v5889_v51  ;;  %5623 = vrot.lane.b32.xlu1 %v7531_v43, %s7651_s27  ;;  %7542 = vrcp.f32 %v5580_v19 }
0x14e2   : > { %7544 = vrcp.f32 %v5581_v17 }
0x14e3   : > { %5903 = vrot.lane.b32.xlu0 %v5895_v53, %s7651_s27 }
0x14e4   : > { %v5870_v58 = vpop.permute.xlu0 %5869 }
0x14e5   : > { %5039 = vrot.lane.b32.xlu1 %v5034_v33, %s7654_s15  ;;  %v5878_v40 = vmul.f32 %v9705_v52, %v5870_v58 }
0x14e8   : > { %v5872_v63 = vpop.permute.xlu0 %5871 }
0x14e9   : > { %5625 = vrot.lane.b32.xlu1 %v7533_v5, %s7651_s27  ;;  %v5879_v51 = vmul.f32 %v9713_v8, %v5872_v63 }
0x14ec   : > { %v5874_v32 = vpop.permute.xlu0 %5873 }
0x14ed   : > { %5606 = vrot.lane.b32.xlu1 %v5597_v13, %s7651_s27  ;;  %v9733_v28 = vpop.eup %7540  ;;  %v5880_v50 = vmul.f32 %v9717_v6, %v5874_v32 }
0x14ee   : > { %v9743_v30 = vpop.eup %7542 }
0x14ef   : > { %v9753_v55 = vpop.eup %7544 }
0x154b   : > { %v5622_v21 = vpop.permute.xlu1 %5621 }
0x154c   : > { %v5630_v25 = vmul.f32 %v9733_v28, %v5622_v21 }
0x154d   : > { %v5900_v54 = vpop.permute.xlu0 %5899 }
0x154e   : > { %v5908_v48 = vadd.f32 %v5900_v54, %v5878_v40  ;;  %5636 = vrot.lane.b32.xlu0 %v5630_v25, %s7651_s27 }
0x154f   : > { %v5038_v43 = vpop.permute.xlu1 %5037 }
0x1550   : > { %7546 = vtanh.f32 %v5908_v48  ;;  %v5045_v53 = vsel %vm10333_vm6, %v5038_v43, %v9541_v47 }
0x1551   : > { %v5601_v33 = vrot.slane %v5045_v53, %v7853_v23  ;;  %v5902_v59 = vpop.permute.xlu0 %5901 }
0x1552   : > { %v5909_v5 = vadd.f32 %v5902_v59, %v5879_v51 }
0x1553   : > { %5608 = vrot.lane.b32.xlu1 %v5601_v33, %s7651_s27  ;;  %v5624_v13 = vpop.permute.xlu1 %5623 }
0x1554   : > { %7548 = vtanh.f32 %v5909_v5  ;;  %v5631_v1 = vmul.f32 %v9743_v30, %v5624_v13 }
0x1555   : > { %v5904_v14 = vpop.permute.xlu0 %5903 }
0x1556   : > { %v5910_v11 = vadd.f32 %v5904_v14, %v5880_v50  ;;  %5638 = vrot.lane.b32.xlu0 %v5631_v1, %s7651_s27 }
0x1557   : > { %v5040_v0 = vpop.permute.xlu1 %5039 }
0x1558   : > { %7550 = vtanh.f32 %v5910_v11  ;;  %v5046_v47 = vsel %vm10336_vm9, %v5040_v0, %v9552_v4 }
0x1559   : > { %v5605_v58 = vrot.slane %v5046_v47, %v7853_v23 }
0x155b   : > { %5610 = vrot.lane.b32.xlu1 %v5605_v58, %s7651_s27  ;;  %v5626_v19 = vpop.permute.xlu1 %5625 }
0x155c   : > { %v5632_v63 = vmul.f32 %v9753_v55, %v5626_v19 }
0x155d   : > { %v7547_v15 = vpop.eup %7546 }
0x155e   : > { %5640 = vrot.lane.b32.xlu0 %v5632_v63, %s7651_s27 }
0x155f   : > { %5917 = vrot.lane.b32.xlu1 %v7547_v15, %s7651_s27  ;;  %v5607_v4 = vpop.permute.xlu1 %5606 }
0x1560   : > { %v5615_v21 = vmul.f32 %v9733_v28, %v5607_v4 }
0x1561   : > { %v7549_v32 = vpop.eup %7548 }
0x1562   : > { %5919 = vrot.lane.b32.xlu0 %v7549_v32, %s7651_s27  ;;  %v10338_v32 = vld [vmem:[#allocation11_spill] sm:$0xff] }
0x1565   : > { %v7551_v17 = vpop.eup %7550 }
0x1566   : > { %5921 = vrot.lane.b32.xlu1 %v7551_v17, %s7651_s27  ;;  %v1205_v17 = vrot.slane %v10338_v32, %v7853_v23  ;;  %v10344_v32 = vld [vmem:[#allocation19_spill] sm:$0xff] }
0x15c0   : > { %v5637_v40 = vpop.permute.xlu0 %5636 }
0x15c1   : > { %v5645_v25 = vadd.f32 %v5637_v40, %v5615_v21 }
0x15c3   : > { %7552 = vtanh.f32 %v5645_v25 }
0x15c5   : > { %v5609_v54 = vpop.permute.xlu1 %5608 }
0x15c6   : > { %v5616_v48 = vmul.f32 %v9743_v30, %v5609_v54  ;;  %v10340_v54 = vld [vmem:[#allocation18_spill] sm:$0xff] }
0x15c8   : > { %v5639_v43 = vpop.permute.xlu0 %5638 }
0x15c9   : > { %v5646_v51 = vadd.f32 %v5639_v43, %v5616_v48  ;;  %v1927_v48 = vsel %vm10334_vm7, %v10340_v54, 0.0 }
0x15ca   : > { %v1939_v43 = vrot.slane %v1927_v48, %v7853_v23  ;;  %v10346_v48 = vld [vmem:[#allocation21_spill] sm:$0xff] }
0x15cb   : > { %7554 = vtanh.f32 %v5646_v51  ;;  %v10341_v51 = vld [vmem:[#allocation25_spill] sm:$0xff] }
0x15cd   : > { %v5611_v53 = vpop.permute.xlu1 %5610 }
0x15ce   : > { %v5617_v33 = vmul.f32 %v9753_v55, %v5611_v53  ;;  %v3399_v53 = vsel %vm8854_vm11, %v10341_v51, 0.0  ;;  %v4428_v51 = vsel %vm8574_vm0, %v9442_v3, 0.0  ;;  %v6025_v3 = vld [vmem:[%s10173_s6 + $0x30] sm:$0xff] }
0x15cf   : > { %7129 = vmatpush3.msra.mxu0 %v6025_v3 }
0x15d0   : > { %v7553_v59 = vpop.eup %7552  ;;  %v5641_v5 = vpop.permute.xlu0 %5640  ;;  %7130 = vmatprep.subr.mxu0 %v10292_v10 }
0x15d1   : > { %v5647_v13 = vadd.f32 %v5641_v5, %v5617_v33  ;;  %5654 = vrot.lane.b32.xlu0 %v7553_v59, %s7651_s27  ;;  %v5918_v50 = vpop.permute.xlu1 %5917  ;;  %v3411_v33 = vrot.slane %v3399_v53, %v7853_v23  ;;  %v4075_v59 = vsel %vm8932_vm2, %v9152_v62, 0.0  ;;  %7131 = vmatpush3.msra.mxu0 %v6024_v38 }
0x15d2   : > { %v5926_v1 = vmul.f32 %v9705_v52, %v5918_v50  ;;  %v4087_v5 = vrot.slane %v4075_v59, %v7853_v23  ;;  %v4091_v59 = vrot.slane %v4076_v60, %v7853_v23  ;;  %7132 = vmatprep.subr.mxu0 %v10292_v10 }
0x15d3   : > { %7556 = vtanh.f32 %v5647_v13  ;;  %v5427_v13 = vsel %vm8323_vm3, %v9627_v16, 0.0 }
0x15d4   : > { %v5938_v14 = vrot.slane %v5926_v1, %v7944_v39  ;;  %v5920_v11 = vpop.permute.xlu0 %5919  ;;  %v5439_v50 = vrot.slane %v5427_v13, %v7853_v23  ;;  %v10342_v1 = vld [vmem:[#allocation12_spill] sm:$0xff]  ;;  %v5428_v13 = vsel %vm10330_vm4, %v9632_v12, 0.0  ;;  %v10351_v12 = vld [vmem:[#allocation30_spill] sm:$0xff]  ;;  %vm10364_vm4 = vnez %v10301_v2 }
0x15d5   : > { %v5927_v0 = vmul.f32 %v9713_v8, %v5920_v11  ;;  %v10339_v8 = vld [vmem:[#allocation22_spill] sm:$0xff]  ;;  %v10343_v11 = vld [vmem:[#allocation23_spill] sm:$0xff] }
0x15d6   : > { %v5945_v47 = vrot.slane %v5938_v14, %v7944_v39  ;;  %v2663_v4 = vsel %vm8574_vm0, %v10339_v8, 0.0  ;;  %v1209_v14 = vrot.slane %v10342_v1, %v7853_v23  ;;  %v2664_v18 = vsel %vm8578_vm12, %v10343_v11, 0.0  ;;  %v10352_v11 = vld [vmem:[#allocation29_spill] sm:$0xff] }
0x15d7   : > { %v5952_v58 = vrot.slane %v5927_v0, %v7944_v39  ;;  %v2675_v25 = vrot.slane %v2663_v4, %v7853_v23  ;;  %v2679_v62 = vrot.slane %v2664_v18, %v7853_v23  ;;  %v10345_v4 = vld [vmem:[#allocation26_spill] sm:$0xff]  ;;  %vm10353_vm3 = vnez %v10352_v11  ;;  %v10377_v11 = vld [vmem:[#allocation33_spill] sm:$0xff] }
0x15d8   : > { %v7555_v19 = vpop.eup %7554  ;;  %5974 = vrot.lane.b32.xlu0 %v5945_v47, %s7653_s14  ;;  %v5922_v63 = vpop.permute.xlu1 %5921  ;;  %v4077_v18 = vsel %vm10353_vm3, %v10351_v12, 0.0 }
0x15d9   : > { %v5959_v15 = vrot.slane %v5952_v58, %v7944_v39  ;;  %5656 = vrot.lane.b32.xlu1 %v7555_v19, %s7651_s27  ;;  %v5928_v52 = vmul.f32 %v9717_v6, %v5922_v63  ;;  %v4751_v58 = vsel %vm8632_vm1, %v9390_v37, 0.0  ;;  %vm1223_vm1 = vcmask 516352  }
0x15db   : > { %v5966_v21 = vrot.slane %v5928_v52, %v7944_v39 }
0x15dc   : > { %5976 = vrot.lane.b32.xlu0 %v5959_v15, %s7653_s14  ;;  %v4763_v15 = vrot.slane %v4751_v58, %v7853_v23 }
0x15dd   : > { %v5973_v6 = vrot.slane %v5966_v21, %v7944_v39  ;;  %v3400_v21 = vsel %vm8858_vm13, %v10345_v4, 0.0  ;;  %v6021_v4 = vld [vmem:[%s10173_s6 + $0x10] sm:$0xff] }
0x15e0   : > { %v7557_v40 = vpop.eup %7556  ;;  %1214 = vrot.lane.b32.xlu0 %v1205_v17, %s7651_s27 }
0x15e1   : > { %5658 = vrot.lane.b32.xlu1 %v7557_v40, %s7651_s27 }
0x15e4   : > { %2684 = vrot.lane.b32.xlu0 %v2675_v25, %s7651_s27 }
0x15e5   : > { %5978 = vrot.lane.b32.xlu1 %v5973_v6, %s7653_s14  ;;  %v3415_v6 = vrot.slane %v3400_v21, %v7853_v23 }
0x15e9   : > { %1948 = vrot.lane.b32.xlu1 %v1939_v43, %s7651_s27  ;;  %v1929_v43 = vsel %vm10336_vm9, %v10346_v48, 0.0 }
0x15ed   : > { %3420 = vrot.lane.b32.xlu1 %v3411_v33, %s7651_s27  ;;  %v1947_v33 = vrot.slane %v1929_v43, %v7853_v23 }
0x15f1   : > { %4096 = vrot.lane.b32.xlu1 %v4087_v5, %s7651_s27  ;;  %v3401_v5 = vsel %vm10350_vm15, %v10348_v57, 0.0 }
0x15f2   : > { %v3419_v1 = vrot.slane %v3401_v5, %v7853_v23 }
0x15f5   : > { %5448 = vrot.lane.b32.xlu1 %v5439_v50, %s7651_s27 }
0x15f9   : > { %1216 = vrot.lane.b32.xlu1 %v1209_v14, %s7651_s27  ;;  %v5443_v14 = vrot.slane %v5428_v13, %v7853_v23  ;;  %v10370_v13 = vld [vmem:[#allocation10_spill] sm:$0xff] }
0x15fd   : > { %2686 = vrot.lane.b32.xlu1 %v2679_v62, %s7651_s27  ;;  %v10355_v62 = vld [vmem:[#allocation14_spill] sm:$0xff] }
0x1643   : > { %v5655_v7 = vpop.permute.xlu0 %5654 }
0x1644   : > { %v5663_v16 = vmul.f32 %v9733_v28, %v5655_v7  ;;  %v1928_v28 = vsel %vm10333_vm6, %v10344_v32, 0.0  ;;  %v1213_v7 = vrot.slane %v10355_v62, %v7853_v23  ;;  %v10359_v32 = vld [vmem:[#allocation15_spill] sm:$0xff]  ;;  %v4430_v62 = vsel %vm10358_vm14, %v9458_v42, 0.0 }
0x1645   : > { %v1943_v35 = vrot.slane %v1928_v28, %v7853_v23  ;;  %vm10360_vm2 = vnez %v10359_v32 }
0x1646   : > { %v5675_v0 = vrot.slane %v5663_v16, %v7944_v39  ;;  %v4095_v16 = vrot.slane %v4077_v18, %v7853_v23  ;;  %v3754_v18 = vsel %vm10350_vm15, %v10377_v11, 0.0 }
0x1648   : > { %v5682_v47 = vrot.slane %v5675_v0, %v7944_v39  ;;  %v10356_v0 = vld [vmem:[#allocation32_spill] sm:$0xff] }
0x164a   : > { %5711 = vrot.lane.b32.xlu0 %v5682_v47, %s7653_s14  ;;  %v9822_v19 = vpop.permute.xlu0 %5974  ;;  %v3752_v47 = vsel %vm8854_vm11, %v10356_v0, 0.0 }
0x164b   : > { %v5657_v63 = vpop.permute.xlu1 %5656 }
0x164c   : > { %v5664_v52 = vmul.f32 %v9743_v30, %v5657_v63  ;;  %v4752_v30 = vsel %vm8639_vm8, %v9396_v24, 0.0  ;;  %vm10347_vm8 = vcmask 253952   ;;  %v6023_v63 = vld [vmem:[%s10173_s6 + $0x20] sm:$0xff] }
0x164d   : > { %v4767_v54 = vrot.slane %v4752_v30, %v7853_v23  ;;  %vm10354_vm0 = vmmov %vm10347_vm8  ;;  %7133 = vmatpush3.msra.mxu0 %v6023_v63 }
0x164e   : > { %v5689_v17 = vrot.slane %v5664_v52, %v7944_v39  ;;  %4772 = vrot.lane.b32.xlu0 %v4763_v15, %s7651_s27  ;;  %v9831_v8 = vpop.permute.xlu0 %5976  ;;  %v10357_v15 = vld [vmem:[#allocation24_spill] sm:$0xff]  ;;  %vm10361_vm7 = vmmov %vm10354_vm0  ;;  %7134 = vmatprep.subr.mxu0 %v10292_v10 }
0x164f   : > { %v2665_v52 = vsel %vm10358_vm14, %v10357_v15, 0.0  ;;  %v5984_v28 = vsel %vm10360_vm2, %v9831_v8, 0.0  ;;  %7135 = vmatpush3.msra.mxu0 %v6022_v49  ;;  %vm10372_vm2 = vmmov %vm10354_vm0  ;;  %vm6034_vm14 = vcmask 523264  }
0x1650   : > { %v5696_v37 = vrot.slane %v5689_v17, %v7944_v39  ;;  %v2683_v17 = vrot.slane %v2665_v52, %v7853_v23  ;;  %7136 = vmatprep.subr.mxu0 %v10292_v10  ;;  %v6848_v52 = vld [vmem:[%s10174_s7] ss:$0 sm:$0xff] }
0x1651   : > { %7137 = vmatpush3.msra.mxu0 %v6021_v4 }
0x1652   : > { %1950 = vrot.lane.b32.xlu0 %v1943_v35, %s7651_s27  ;;  %v1215_v40 = vpop.permute.xlu0 %1214  ;;  %5713 = vrot.lane.b32.xlu1 %v5696_v37, %s7653_s14  ;;  %v5999_v35 = vrot.slane %v5984_v28, %v7853_v23  ;;  %v5429_v37 = vsel %vm10331_vm5, %v9645_v22, 0.0  ;;  %v10362_v22 = vld [vmem:[#allocation16_spill] sm:$0xff] }
0x1653   : > { %1224 = vst.msk [vmem:[#allocation3 + $0x7] sm:$0x1] %vm1223_vm1, %v1215_v40  ;;  %v5659_v25 = vpop.permute.xlu1 %5658  ;;  %v5447_v30 = vrot.slane %v5429_v37, %v7853_v23  ;;  %vm10363_vm11 = vnez %v10362_v22  ;;  %7138 = vmatprep.subr.mxu0 %v10292_v10 }
0x1654   : > { %v5665_v58 = vmul.f32 %v9753_v55, %v5659_v25  ;;  %v5983_v25 = vsel %vm10363_vm11, %v9822_v19, 0.0  ;;  %7139 = vmatpush3.msra.mxu0 %v6020_v31  ;;  %v4753_v19 = vsel %vm10364_vm4, %v9412_v36, 0.0  ;;  %vm10376_vm11 = vmmov %vm10354_vm0 }
0x1655   : > { %v5995_v48 = vrot.slane %v5983_v25, %v7853_v23  ;;  %7140 = vmatprep.subr.mxu0 %v10292_v10  ;;  %v4771_v60 = vrot.slane %v4753_v19, %v7853_v23  ;;  %vm10382_vm4 = vmmov %vm10354_vm0 }
0x1656   : > { %3422 = vrot.lane.b32.xlu0 %v3415_v6, %s7651_s27  ;;  %v2685_v24 = vpop.permute.xlu0 %2684  ;;  %4774 = vrot.lane.b32.xlu1 %v4767_v54, %s7651_s27  ;;  %v5703_v8 = vrot.slane %v5665_v58, %v7944_v39  ;;  %v6019_v6 = vld [vmem:[%s10173_s6] sm:$0xff] }
0x1657   : > { %2693 = vst.msk [vmem:[#allocation3 + $0x5] sm:$0x1] %vm1223_vm1, %v2685_v24  ;;  %v9858_v53 = vpop.permute.xlu1 %5978  ;;  %7141 = vmatpush3.msra.mxu0 %v6019_v6  ;;  %v4429_v24 = vsel %vm8578_vm12, %v9440_v34, 0.0  ;;  %vm10371_vm12 = vnez %v10370_v13  ;;  %v6853_v13 = vld [vmem:[%s10175_s8] ss:$0 sm:$0xff] }
0x1658   : > { %4754 = vst.msk [vmem:[#allocation3 + $0x5] sm:$0x1] %vm10347_vm8, %v4428_v51  ;;  %v5710_v40 = vrot.slane %v5703_v8, %v7944_v39  ;;  %v10365_v51 = vld [vmem:[#allocation17_spill] sm:$0xff]  ;;  %vm10367_vm8 = vmmov %vm10354_vm0 }
0x1659   : > { %vm10366_vm5 = vnez %v10365_v51 }
0x165a   : > { %4098 = vrot.lane.b32.xlu0 %v4091_v59, %s7651_s27  ;;  %1952 = vrot.lane.b32.xlu1 %v1947_v33, %s7651_s27  ;;  %v5985_v33 = vsel %vm10366_vm5, %v9858_v53, 0.0  ;;  %v10368_v59 = vld [vmem:[#allocation9_spill] sm:$0xff]  ;;  %v5105_v53 = vsel %vm10333_vm6, %v9663_v46, 0.0  ;;  %vm10375_vm6 = vmmov %vm10354_vm0  ;;  %vm6265_vm5 = vcmask 1042434  }
0x165b   : > { %v1949_v50 = vpop.permute.xlu1 %1948  ;;  %v6003_v2 = vrot.slane %v5985_v33, %v7853_v23  ;;  %vm10369_vm3 = vnez %v10368_v59 }
0x165c   : > { %1957 = vst.msk [vmem:[#allocation3 + $0x6] sm:$0x1] %vm1223_vm1, %v1949_v50 }
0x165d   : > { %5430 = vst.msk [vmem:[#allocation3 + $0x6] sm:$0x1] %vm10354_vm0, %v5104_v61  ;;  %v5106_v61 = vsel %vm10336_vm9, %v9675_v56, 0.0  ;;  %vm10379_vm9 = vmmov %vm10354_vm0 }
0x165e   : > { %5450 = vrot.lane.b32.xlu0 %v5443_v14, %s7651_s27  ;;  %3424 = vrot.lane.b32.xlu1 %v3419_v1, %s7651_s27  ;;  %v10374_v1 = vld [vmem:[#allocation31_spill] sm:$0xff] }
0x165f   : > { %v3421_v41 = vpop.permute.xlu1 %3420  ;;  %v3753_v14 = vsel %vm8858_vm13, %v10374_v1, 0.0  ;;  %vm10378_vm13 = vmmov %vm10354_vm0 }
0x1660   : > { %3429 = vst.msk [vmem:[#allocation3 + $0x4] sm:$0x1] %vm1223_vm1, %v3421_v41 }
0x1661   : > { %4078 = vst.msk [vmem:[#allocation3 + $0x4] sm:$0x1] %vm10361_vm7, %v3752_v47  ;;  %vm10373_vm7 = vmmov %vm10354_vm0 }
0x1662   : > { %1218 = vrot.lane.b32.xlu0 %v1213_v7, %s7651_s27  ;;  %4100 = vrot.lane.b32.xlu1 %v4095_v16, %s7651_s27  ;;  %v10380_v16 = vld [vmem:[#allocation13_spill] sm:$0xff] }
0x1663   : > { %v4097_v55 = vpop.permute.xlu1 %4096  ;;  %vm10381_vm15 = vnez %v10380_v16 }
0x1664   : > { %4105 = vst.msk [vmem:[#allocation3 + $0x3] sm:$0x1] %vm1223_vm1, %v4097_v55 }
0x1666   : > { %2688 = vrot.lane.b32.xlu0 %v2683_v17, %s7651_s27  ;;  %6006 = vrot.lane.b32.xlu1 %v5999_v35, %s7651_s27 }
0x1667   : > { %v5449_v21 = vpop.permute.xlu1 %5448 }
0x1668   : > { %5457 = vst.msk [vmem:[#allocation3 + $0x1] sm:$0x1] %vm1223_vm1, %v5449_v21 }
0x166a   : > { %5452 = vrot.lane.b32.xlu1 %v5447_v30, %s7651_s27  ;;  %5715 = vrot.lane.b32.xlu0 %v5710_v40, %s7653_s14 }
0x166b   : > { %v1217_v54 = vpop.permute.xlu1 %1216 }
0x166c   : > { %1225 = vst.msk [vmem:[#allocation3 + $0xf] sm:$0x1] %vm1223_vm1, %v1217_v54 }
0x166e   : > { %6004 = vrot.lane.b32.xlu0 %v5995_v48, %s7651_s27 }
0x166f   : > { %v2687_v43 = vpop.permute.xlu1 %2686 }
0x1670   : > { %2694 = vst.msk [vmem:[#allocation3 + $0xd] sm:$0x1] %vm1223_vm1, %v2687_v43 }
0x1671   : > { %4755 = vst.msk [vmem:[#allocation3 + $0xd] sm:$0x1] %vm10367_vm8, %v4429_v24  ;;  %vm6268_vm8 = vcmask 59392  }
0x1672   : > { %4776 = vrot.lane.b32.xlu0 %v4771_v60, %s7651_s27 }
0x1676   : > { %6008 = vrot.lane.b32.xlu0 %v6003_v2, %s7651_s27 }
0x16bc   : > { %v5712_v36 = vpop.permute.xlu0 %5711 }
0x16bd   : > { %v5720_v57 = vsel %vm10369_vm3, %v5712_v36, 0.0 }
0x16be   : > { %5986 = vst.msk [vmem:[#allocation3 + $0x7] sm:$0x1] %vm10354_vm0, %v5720_v57  ;;  %vm6676_vm0 = vcmask 516096  }
0x16c0   : > { %v4773_v29 = vpop.permute.xlu0 %4772 }
0x16c1   : > { %4781 = vst.msk [vmem:[#allocation3 + $0x2] sm:$0x1] %vm1223_vm1, %v4773_v29 }
0x16c4   : > { %v1951_v34 = vpop.permute.xlu0 %1950  ;;  %v5714_v5 = vpop.permute.xlu1 %5713 }
0x16c5   : > { %1958 = vst.msk [vmem:[#allocation3 + $0xe] sm:$0x1] %vm1223_vm1, %v1951_v34  ;;  %v5721_v9 = vsel %vm10371_vm12, %v5714_v5, 0.0 }
0x16c6   : > { %5431 = vst.msk [vmem:[#allocation3 + $0xe] sm:$0x1] %vm10372_vm2, %v5105_v53 }
0x16c7   : > { %5987 = vst.msk [vmem:[#allocation3 + $0xf] sm:$0x1] %vm10373_vm7, %v5721_v9 }
0x16c8   : > { %v3423_v3 = vpop.permute.xlu0 %3422  ;;  %v4775_v50 = vpop.permute.xlu1 %4774 }
0x16c9   : > { %3430 = vst.msk [vmem:[#allocation3 + $0xc] sm:$0x1] %vm1223_vm1, %v3423_v3  ;;  %4782 = vst.msk [vmem:[#allocation3 + $0xa] sm:$0x1] %vm1223_vm1, %v4775_v50 }
0x16ca   : > { %4079 = vst.msk [vmem:[#allocation3 + $0xc] sm:$0x1] %vm10375_vm6, %v3753_v14 }
0x16cc   : > { %v4099_v44 = vpop.permute.xlu0 %4098  ;;  %v1953_v46 = vpop.permute.xlu1 %1952 }
0x16cd   : > { %4106 = vst.msk [vmem:[#allocation3 + $0xb] sm:$0x1] %vm1223_vm1, %v4099_v44  ;;  %1959 = vst.msk [vmem:[#allocation3 + $0x16] sm:$0x1] %vm1223_vm1, %v1953_v46 }
0x16ce   : > { %5432 = vst.msk [vmem:[#allocation3 + $0x16] sm:$0x1] %vm10376_vm11, %v5106_v61 }
0x16d0   : > { %v5451_v20 = vpop.permute.xlu0 %5450  ;;  %v3425_v12 = vpop.permute.xlu1 %3424 }
0x16d1   : > { %5458 = vst.msk [vmem:[#allocation3 + $0x9] sm:$0x1] %vm1223_vm1, %v5451_v20  ;;  %3431 = vst.msk [vmem:[#allocation3 + $0x14] sm:$0x1] %vm1223_vm1, %v3425_v12 }
0x16d2   : > { %4080 = vst.msk [vmem:[#allocation3 + $0x14] sm:$0x1] %vm10378_vm13, %v3754_v18 }
0x16d4   : > { %v1219_v26 = vpop.permute.xlu0 %1218  ;;  %v4101_v56 = vpop.permute.xlu1 %4100 }
0x16d5   : > { %1226 = vst.msk [vmem:[#allocation3 + $0x17] sm:$0x1] %vm1223_vm1, %v1219_v26  ;;  %4107 = vst.msk [vmem:[#allocation3 + $0x13] sm:$0x1] %vm1223_vm1, %v4101_v56  ;;  %v6854_v56 = vld [vmem:[#allocation5] ss:$0 sm:$0xff] }
0x16d8   : > { %v2689_v38 = vpop.permute.xlu0 %2688  ;;  %v6007_v41 = vpop.permute.xlu1 %6006 }
0x16d9   : > { %2695 = vst.msk [vmem:[#allocation3 + $0x15] sm:$0x1] %vm1223_vm1, %v2689_v38  ;;  %6014 = vst.msk [vmem:[#allocation3 + $0x8] sm:$0x1] %vm1223_vm1, %v6007_v41 }
0x16da   : > { %4756 = vst.msk [vmem:[#allocation3 + $0x15] sm:$0x1] %vm10379_vm9, %v4430_v62 }
0x16dc   : > { %v5716_v45 = vpop.permute.xlu0 %5715  ;;  %v5453_v7 = vpop.permute.xlu1 %5452 }
0x16dd   : > { %v5722_v0 = vsel %vm10381_vm15, %v5716_v45, 0.0  ;;  %5459 = vst.msk [vmem:[#allocation3 + $0x11] sm:$0x1] %vm1223_vm1, %v5453_v7 }
0x16de   : > { %5988 = vst.msk [vmem:[#allocation3 + $0x17] sm:$0x1] %vm10382_vm4, %v5722_v0 }
0x16e0   : > { %v6005_v47 = vpop.permute.xlu0 %6004  ;;  %v10017_v63 = vld [vmem:[#allocation3 + $0x8] sm:$0xff] }
0x16e1   : > { %6013 = vst.msk [vmem:[#allocation3] sm:$0x1] %vm1223_vm1, %v6005_v47  ;;  %v10383_v47 = vlaneseq }
0x16e4   : > { %v4777_v27 = vpop.permute.xlu0 %4776 }
0x16e5   : > { %4783 = vst.msk [vmem:[#allocation3 + $0x12] sm:$0x1] %vm1223_vm1, %v4777_v27  ;;  %v6165_v27 = vand.u32 127, %v10383_v47 }
0x16e8   : > { %v6009_v42 = vpop.permute.xlu0 %6008  ;;  %v10010_v58 = vld [vmem:[#allocation3] sm:$0xff] }
0x16e9   : > { %6015 = vst.msk [vmem:[#allocation3 + $0x10] sm:$0x1] %vm1223_vm1, %v6009_v42  ;;  %7143 = vmatmul.mubr.msk.f32.vlgmr.msra.gmra.mxu0 %vm6034_vm14, %v10010_v58  ;;  %vm6124_vm1 = vcmask 15360   ;;  %v10384_v42 = vld [vmem:[#allocation7_spill] sm:$0xff] }
0x16ea   : > { %7145 = vmatprep.mubr.msk.f32.mxu0 %vm10293_vm10, %v10292_v10 }
0x16ed   : > { %7146 = vmatmul.mubr.msk.f32.gmra.mxu0 %vm6034_vm14, %v10017_v63 }
0x16ee   : > { %7148 = vmatprep.mubr.msk.f32.mxu0 %vm10293_vm10, %v10292_v10  ;;  %vm6263_vm10 = vcmask 1041409  }
0x16f0   : > { %v10023_v15 = vld [vmem:[#allocation3 + $0x10] sm:$0xff] }
0x16f1   : > { %7149 = vmatmul.mubr.msk.f32.gmra.mxu0 %vm6034_vm14, %v10023_v15 }
0x17a9   : > { %v6110_v32 = vpop.f32.mrf.mxu0 }
0x17aa   : > { %v6111_v28 = vadd.f32 %v6848_v52, %v6110_v32 }
0x17ab   : > { %v7144_v49 = vpop.f32.mrf.mxu0 }
0x17ac   : > { %v6125_v55 = vsel %vm6124_vm1, %v6111_v28, -inf }
0x17ad   : > { %6126 = vmax.xlane.f32.xlu1 %v6125_v55  ;;  %v6115_v17 = vpop.f32.mrf.mxu0 }
0x17ae   : > { %v6116_v35 = vadd.f32 %v6848_v52, %v6115_v17 }
0x17af   : > { %v7147_v8 = vpop.f32.mrf.mxu0 }
0x17b0   : > { %v6128_v37 = vsel %vm6124_vm1, %v6116_v35, -inf }
0x17b1   : > { %6129 = vmax.xlane.f32.xlu0 %v6128_v37  ;;  %v6120_v4 = vpop.f32.mrf.mxu0 }
0x17b2   : > { %v6121_v21 = vadd.f32 %v6848_v52, %v6120_v4  ;;  %v10052_v52 = vsub.s32 %v6165_v27, %v10384_v42 }
0x17b3   : > { %v7150_v30 = vpop.f32.mrf.mxu0 }
0x17b4   : > { %v6131_v40 = vsel %vm6124_vm1, %v6121_v21, -inf }
0x17b5   : > { %6132 = vmax.xlane.f32.xlu0 %v6131_v40 }
0x1836   : > { %v6127_v31 = vpop.xlane.xlu1 %6126 }
0x1837   : > { %v6134_v22 = vsub.f32 %v6111_v28, %v6127_v31  ;;  %v10385_v31 = vld [vmem:[#allocation8_spill] sm:$0xff] }
0x1839   : > { %v6137_v25 = vmul.f32 1.442695, %v6134_v22 }
0x183a   : > { %v6130_v6 = vpop.xlane.xlu0 %6129 }
0x183b   : > { %7558 = vpow2.f32 %v6137_v25  ;;  %v6135_v54 = vsub.f32 %v6116_v35, %v6130_v6 }
0x183d   : > { %v6139_v48 = vmul.f32 1.442695, %v6135_v54 }
0x183e   : > { %v6133_v19 = vpop.xlane.xlu0 %6132 }
0x183f   : > { %7560 = vpow2.f32 %v6139_v48  ;;  %v6136_v43 = vsub.f32 %v6121_v21, %v6133_v19  ;;  %v10061_v21 = vsub.s32 2, %v10384_v42 }
0x1841   : > { %v6141_v60 = vmul.f32 1.442695, %v6136_v43 }
0x1843   : > { %7562 = vpow2.f32 %v6141_v60 }
0x1848   : > { %v7559_v24 = vpop.eup %7558 }
0x1849   : > { %v6143_v51 = vsel %vm6124_vm1, %v7559_v24, 0.0 }
0x184a   : > { %6144 = vadd.xlane.f32.xlu1 %v6143_v51 }
0x184c   : > { %v7561_v33 = vpop.eup %7560 }
0x184d   : > { %v6146_v2 = vsel %vm6124_vm1, %v7561_v33, 0.0 }
0x184e   : > { %6147 = vadd.xlane.f32.xlu0 %v6146_v2  ;;  %v7637_v2 = vld [vmem:[%s7910_s9 + $0x1] sm:$0x1] }
0x1850   : > { %v7563_v36 = vpop.eup %7562 }
0x1851   : > { %v6149_v59 = vsel %vm6124_vm1, %v7563_v36, 0.0  ;;  %v7638_v36 = vld [vmem:[%s7910_s9] sm:$0x1] }
0x1852   : > { %6150 = vadd.xlane.f32.xlu1 %v6149_v59  ;;  %v7639_v59 = vld [vmem:[%s7910_s9 + $0x2] sm:$0x1] }
0x18d3   : > { %v6145_v57 = vpop.xlane.xlu1 %6144 }
0x18d4   : > { %7564 = vlog2.f32 %v6145_v57 }
0x18d7   : > { %v6148_v29 = vpop.xlane.xlu0 %6147 }
0x18d8   : > { %7566 = vlog2.f32 %v6148_v29 }
0x18db   : > { %v6151_v34 = vpop.xlane.xlu1 %6150 }
0x18dc   : > { %7568 = vlog2.f32 %v6151_v34 }
0x18e1   : > { %v7565_v5 = vpop.eup %7564 }
0x18e2   : > { %v6153_v53 = vmul.f32 0.6931472, %v7565_v5 }
0x18e4   : > { %v6158_v9 = vsub.f32 %v6134_v22, %v6153_v53 }
0x18e5   : > { %v7567_v3 = vpop.eup %7566 }
0x18e6   : > { %v6155_v50 = vmul.f32 0.6931472, %v7567_v3  ;;  %v6221_v1 = vmul.f32 %v6853_v13, %v6158_v9  ;;  %6161 = vst.msk [vmem:[%s472_s16] sm:$0xff] %vm6124_vm1, %v6158_v9 }
0x18e8   : > { %v6224_v14 = vsel %vm6124_vm1, %v6221_v1, 0.0  ;;  %v6159_v44 = vsub.f32 %v6135_v54, %v6155_v50 }
0x18e9   : > { %v7569_v46 = vpop.eup %7568  ;;  %6225 = vadd.xlane.f32.xlu0 %v6224_v14 }
0x18ea   : > { %v6157_v61 = vmul.f32 0.6931472, %v7569_v46  ;;  %6162 = vst.msk [vmem:[%s472_s16 + $0x8] sm:$0xff] %vm6124_vm1, %v6159_v44  ;;  %v6222_v20 = vmul.f32 %v6853_v13, %v6159_v44 }
0x18ec   : > { %v6227_v12 = vsel %vm6124_vm1, %v6222_v20, 0.0  ;;  %v6160_v11 = vsub.f32 %v6136_v43, %v6157_v61 }
0x18ed   : > { %6228 = vadd.xlane.f32.xlu1 %v6227_v12 }
0x18ee   : > { %v6223_v18 = vmul.f32 %v6853_v13, %v6160_v11  ;;  %6163 = vst.msk [vmem:[%s472_s16 + $0x10] sm:$0xff] %vm6124_vm1, %v6160_v11 }
0x18f0   : > { %v6230_v26 = vsel %vm6124_vm1, %v6223_v18, 0.0 }
0x18f1   : > { %6231 = vadd.xlane.f32.xlu0 %v6230_v26 }
0x18fe   : > { %6239 = vperm.xlu1 %7166, %v6854_v56  }
0x1972   : > { %v6226_v38 = vpop.xlane.xlu0 %6225 }
0x1976   : > { %v6229_v41 = vpop.xlane.xlu1 %6228 }
0x197a   : > { %v6232_v62 = vpop.xlane.xlu0 %6231  ;;  %v6240_v45 = vpop.permute.xlu1 %6239 }
0x197b   : > { %v6242_v7 = vadd.f32 %v6240_v45, %v6226_v38  ;;  %v6243_v16 = vadd.f32 %v6240_v45, %v6229_v41  ;;  %v6244_v0 = vadd.f32 %v6240_v45, %v6232_v62 }
0x197d   : > { %7570 = vtanh.f32 %v6242_v7 }
0x197e   : > { %7572 = vtanh.f32 %v6243_v16 }
0x197f   : > { %7574 = vtanh.f32 %v6244_v0 }
0x198a   : > { %v7571_v32 = vpop.eup %7570 }
0x198b   : > { %v7573_v28 = vpop.eup %7572  ;;  %v6254_v49 = vrot.slane %v7571_v32, %v10052_v52 }
0x198c   : > { %v7575_v55 = vpop.eup %7574  ;;  %v6258_v17 = vrot.slane %v7573_v28, %v10052_v52 }
0x198d   : > { %v6262_v35 = vrot.slane %v7575_v55, %v10052_v52 }
0x198e   : > { %v6264_v8 = vsel %vm6263_vm10, %v6258_v17, %v6254_v49 }
0x198f   : > { %v6266_v37 = vsel %vm6265_vm5, %v6262_v35, %v6264_v8 }
0x1990   : > { %v6269_v4 = vsel %vm6268_vm8, %v6266_v37, -inf }
0x1991   : > { %6270 = vmax.xlane.f32.xlu0 %v6269_v4 }
0x1a1a   : > { %v6271_v30 = vpop.xlane.xlu0 %6270 }
0x1a1b   : > { %v6276_v40 = vrot.slane %v6271_v30, %v7853_v23  ;;  %v6280_v22 = vrot.slane %v6271_v30, %v10385_v31  ;;  %v6284_v25 = vrot.slane %v6271_v30, %v10061_v21 }
0x1a1d   : > { %v6288_v6 = vsub.f32 %v7571_v32, %v6276_v40  ;;  %v6289_v54 = vsub.f32 %v7573_v28, %v6280_v22  ;;  %v6290_v48 = vsub.f32 %v7575_v55, %v6284_v25 }
0x1a1f   : > { %v6291_v19 = vmul.f32 1.442695, %v6288_v6  ;;  %v6293_v43 = vmul.f32 1.442695, %v6289_v54  ;;  %v6295_v60 = vmul.f32 1.442695, %v6290_v48 }
0x1a21   : > { %7576 = vpow2.f32 %v6291_v19 }
0x1a22   : > { %7578 = vpow2.f32 %v6293_v43 }
0x1a23   : > { %7580 = vpow2.f32 %v6295_v60 }
0x1a2e   : > { %v7577_v24 = vpop.eup %7576 }
0x1a2f   : > { %v7579_v51 = vpop.eup %7578  ;;  %6301 = vperm.xlu0 %7167, %v7577_v24  }
0x1a30   : > { %6304 = vperm.xlu1 %7166, %v7579_v51   ;;  %v7581_v33 = vpop.eup %7580 }
0x1a33   : > { %6174 = vperm.xlu0 %7167, %v7637_v2  }
0x1a34   : > { %6307 = vperm.xlu1 %7166, %v7581_v33  }
0x1a38   : > { %6167 = vperm.xlu1 %7166, %v7638_v36  }
0x1a3c   : > { %6181 = vperm.xlu1 %7166, %v7639_v59  }
0x1aaa   : > { %v6302_v57 = vpop.permute.xlu0 %6301 }
0x1aab   : > { %v6305_v29 = vpop.permute.xlu1 %6304  ;;  %v6312_v5 = vrot.slane %v6302_v57, %v10052_v52 }
0x1aac   : > { %v6316_v34 = vrot.slane %v6305_v29, %v10052_v52 }
0x1aae   : > { %v6175_v9 = vpop.permute.xlu0 %6174  ;;  %v6321_v3 = vsel %vm6263_vm10, %v6316_v34, %v6312_v5  ;;  %v6855_v5 = vld [vmem:[%s10177_s10] ss:$0 sm:$0xff] }
0x1aaf   : > { %v6308_v53 = vpop.permute.xlu1 %6307  ;;  %v6179_v44 = vrot.slane %v6175_v9, %v7853_v23 }
0x1ab0   : > { %v6320_v13 = vrot.slane %v6308_v53, %v10052_v52 }
0x1ab2   : > { %v6322_v50 = vsel %vm6265_vm5, %v6320_v13, %v6321_v3 }
0x1ab3   : > { %v6168_v1 = vpop.permute.xlu1 %6167  ;;  %v6324_v14 = vsel %vm6268_vm8, %v6322_v50, 0.0 }
0x1ab4   : > { %v6172_v46 = vrot.slane %v6168_v1, %v7853_v23  ;;  %6325 = vadd.xlane.f32.xlu0 %v6324_v14 }
0x1ab6   : > { %v6187_v61 = vcombine.low %v6172_v46, %v6179_v44 }
0x1ab7   : > { %v6182_v20 = vpop.permute.xlu1 %6181 }
0x1ab8   : > { %v6186_v12 = vrot.slane %v6182_v20, %v7853_v23  ;;  %v6194_v11 = vrot.slane %v6187_v61, %v7944_v39 }
0x1aba   : > { %v6201_v18 = vrot.slane %v6186_v12, %v7944_v39  ;;  %v6856_v12 = vld [vmem:[#allocation6] ss:$0 sm:$0xff] }
0x1abc   : > { %v6202_v26 = vcombine.low %v6194_v11, %v6201_v18 }
0x1abe   : > { %v6209_v56 = vrot.slane %v6202_v26, %v7944_v39 }
0x1ac0   : > { %vm6210_vm3 = vcmp.lt.s32.totalorder %v6165_v27, %v6209_v56 }
0x1ac1   : > { %v6852_v38 = vsel %vm6210_vm3, 1.0, %v10292_v10 }
0x1ac2   : > { %v6353_v41 = vrot.slane %v6852_v38, %v7853_v23  ;;  %v6360_v62 = vrot.slane %v6852_v38, %v10385_v31  ;;  %v6367_v45 = vrot.slane %v6852_v38, %v10061_v21 }
0x1ac4   : > { %6355 = vbcast.lane.b32.xlu1 %v6353_v41, 256 }
0x1ac8   : > { %6362 = vbcast.lane.b32.xlu1 %v6360_v62, 256 }
0x1acc   : > { %6369 = vbcast.lane.b32.xlu1 %v6367_v45, 256 }
0x1b36   : > { %v10088_v39 = vpop.permute.xlu1 %6355 }
0x1b3a   : > { %v10091_v55 = vpop.permute.xlu1 %6362 }
0x1b3d   : > { %v6326_v7 = vpop.xlane.xlu0 %6325 }
0x1b3e   : > { %v6331_v16 = vrot.slane %v6326_v7, %v7853_v23  ;;  %v6335_v0 = vrot.slane %v6326_v7, %v10385_v31  ;;  %v6339_v47 = vrot.slane %v6326_v7, %v10061_v21  ;;  %v10094_v8 = vpop.permute.xlu1 %6369 }
0x1b40   : > { %7582 = vrcp.f32 %v6331_v16 }
0x1b41   : > { %7584 = vrcp.f32 %v6335_v0 }
0x1b42   : > { %7586 = vrcp.f32 %v6339_v47 }
0x1b4d   : > { %v7583_v10 = vpop.eup %7582 }
0x1b4e   : > { %v7585_v27 = vpop.eup %7584  ;;  %v6344_v42 = vmul.f32 %v7583_v10, %v7577_v24 }
0x1b4f   : > { %v6346_v28 = vmul.f32 %v7585_v27, %v7579_v51  ;;  %v7587_v49 = vpop.eup %7586 }
0x1b50   : > { %v6374_v32 = vmul.f32 %v10088_v39, %v6344_v42  ;;  %v6348_v17 = vmul.f32 %v7587_v49, %v7581_v33 }
0x1b51   : > { %v6375_v35 = vmul.f32 %v10091_v55, %v6346_v28 }
0x1b52   : > { %6381 = vperm.xlu1 %7166, %v6374_v32   ;;  %v6376_v37 = vmul.f32 %v10094_v8, %v6348_v17 }
0x1b56   : > { %6384 = vperm.xlu1 %7166, %v6375_v35  }
0x1b5a   : > { %6387 = vperm.xlu1 %7166, %v6376_v37  }
0x1bcd   : > { %v6382_v4 = vpop.permute.xlu1 %6381 }
0x1bce   : > { %v6392_v22 = vrot.slane %v6382_v4, %v10052_v52 }
0x1bd1   : > { %v6385_v30 = vpop.permute.xlu1 %6384 }
0x1bd2   : > { %v6396_v40 = vrot.slane %v6385_v30, %v10052_v52 }
0x1bd4   : > { %v6401_v54 = vsel %vm6263_vm10, %v6396_v40, %v6392_v22 }
0x1bd5   : > { %v6388_v25 = vpop.permute.xlu1 %6387 }
0x1bd6   : > { %v6400_v6 = vrot.slane %v6388_v25, %v10052_v52 }
0x1bd8   : > { %v6402_v48 = vsel %vm6265_vm5, %v6400_v6, %v6401_v54 }
0x1bd9   : > { %v6404_v19 = vsel %vm6268_vm8, %v6402_v48, 0.0 }
0x1bda   : > { %6405 = vadd.xlane.f32.xlu1 %v6404_v19 }
0x1c63   : > { %v6406_v43 = vpop.xlane.xlu1 %6405 }
0x1c64   : > { %v6407_v60 = vmax.f32 %v6406_v43, 1e-20 }
0x1c66   : > { %v6412_v24 = vrot.slane %v6407_v60, %v7853_v23  ;;  %v6416_v51 = vrot.slane %v6407_v60, %v10385_v31  ;;  %v6420_v33 = vrot.slane %v6407_v60, %v10061_v21 }
0x1c68   : > { %7588 = vrcp.f32 %v6412_v24 }
0x1c69   : > { %7590 = vrcp.f32 %v6416_v51 }
0x1c6a   : > { %7592 = vrcp.f32 %v6420_v33 }
0x1c75   : > { %v7589_v2 = vpop.eup %7588 }
0x1c76   : > { %v6425_v36 = vmul.f32 %v7589_v2, %v6374_v32  ;;  %v7591_v59 = vpop.eup %7590 }
0x1c77   : > { %v6427_v57 = vmul.f32 %v7591_v59, %v6375_v35  ;;  %v7593_v29 = vpop.eup %7592 }
0x1c78   : > { %6432 = vperm.xlu0 %7167, %v6425_v36   ;;  %v6429_v34 = vmul.f32 %v7593_v29, %v6376_v37 }
0x1c7c   : > { %6437 = vperm.xlu0 %7167, %v6427_v57  }
0x1c80   : > { %6442 = vperm.xlu0 %7167, %v6429_v34  }
0x1cf3   : > { %v6433_v53 = vpop.permute.xlu0 %6432 }
0x1cf4   : > { %v10110_v13 = vmul.f32 %v6433_v53, %v10010_v58 }
0x1cf6   : > { %v6456_v9 = vmul.f32 %v6855_v5, %v10110_v13 }
0x1cf7   : > { %v6438_v3 = vpop.permute.xlu0 %6437 }
0x1cf8   : > { %v10114_v50 = vmul.f32 %v6438_v3, %v10017_v63  ;;  %v6459_v1 = vsel %vm6034_vm14, %v6456_v9, 0.0 }
0x1cf9   : > { %6460 = vadd.xlane.f32.xlu1 %v6459_v1 }
0x1cfa   : > { %v6457_v14 = vmul.f32 %v6855_v5, %v10114_v50 }
0x1cfb   : > { %v6443_v44 = vpop.permute.xlu0 %6442 }
0x1cfc   : > { %v10119_v46 = vmul.f32 %v6443_v44, %v10023_v15  ;;  %v6462_v61 = vsel %vm6034_vm14, %v6457_v14, 0.0 }
0x1cfd   : > { %6463 = vadd.xlane.f32.xlu0 %v6462_v61 }
0x1cfe   : > { %v6458_v58 = vmul.f32 %v6855_v5, %v10119_v46 }
0x1d00   : > { %v6465_v20 = vsel %vm6034_vm14, %v6458_v58, 0.0 }
0x1d01   : > { %6466 = vadd.xlane.f32.xlu1 %v6465_v20 }
0x1d12   : > { %6474 = vperm.xlu1 %7166, %v6856_v12  }
0x1d82   : > { %v6461_v63 = vpop.xlane.xlu1 %6460 }
0x1d86   : > { %v6464_v18 = vpop.xlane.xlu0 %6463 }
0x1d8a   : > { %v6467_v11 = vpop.xlane.xlu1 %6466 }
0x1d8e   : > { %v6475_v26 = vpop.permute.xlu1 %6474 }
0x1d8f   : > { %v6477_v56 = vadd.f32 %v6475_v26, %v6461_v63  ;;  %v6478_v38 = vadd.f32 %v6475_v26, %v6464_v18  ;;  %v6479_v41 = vadd.f32 %v6475_v26, %v6467_v11 }
0x1d91   : > { %7594 = vtanh.f32 %v6477_v56 }
0x1d92   : > { %7596 = vtanh.f32 %v6478_v38 }
0x1d93   : > { %7598 = vtanh.f32 %v6479_v41 }
0x1d9e   : > { %v7595_v15 = vpop.eup %7594 }
0x1d9f   : > { %v7597_v62 = vpop.eup %7596  ;;  %v6489_v45 = vrot.slane %v7595_v15, %v10052_v52 }
0x1da0   : > { %v7599_v7 = vpop.eup %7598  ;;  %v6493_v16 = vrot.slane %v7597_v62, %v10052_v52 }
0x1da1   : > { %v6497_v0 = vrot.slane %v7599_v7, %v10052_v52 }
0x1da2   : > { %v6498_v47 = vsel %vm6263_vm10, %v6493_v16, %v6489_v45 }
0x1da3   : > { %v6499_v10 = vsel %vm6265_vm5, %v6497_v0, %v6498_v47 }
0x1da4   : > { %v6501_v27 = vsel %vm6268_vm8, %v6499_v10, -inf }
0x1da5   : > { %6502 = vmax.xlane.f32.xlu1 %v6501_v27 }
0x1e2e   : > { %v6503_v42 = vpop.xlane.xlu1 %6502 }
0x1e2f   : > { %v6508_v32 = vrot.slane %v6503_v42, %v7853_v23  ;;  %v6512_v28 = vrot.slane %v6503_v42, %v10385_v31  ;;  %v6516_v49 = vrot.slane %v6503_v42, %v10061_v21 }
0x1e31   : > { %v6520_v17 = vsub.f32 %v7595_v15, %v6508_v32  ;;  %v6521_v35 = vsub.f32 %v7597_v62, %v6512_v28  ;;  %v6522_v4 = vsub.f32 %v7599_v7, %v6516_v49 }
0x1e33   : > { %v6523_v37 = vmul.f32 1.442695, %v6520_v17  ;;  %v6525_v30 = vmul.f32 1.442695, %v6521_v35  ;;  %v6527_v40 = vmul.f32 1.442695, %v6522_v4 }
0x1e35   : > { %7600 = vpow2.f32 %v6523_v37 }
0x1e36   : > { %7602 = vpow2.f32 %v6525_v30 }
0x1e37   : > { %7604 = vpow2.f32 %v6527_v40 }
0x1e42   : > { %v7601_v22 = vpop.eup %7600 }
0x1e43   : > { %6533 = vperm.xlu0 %7167, %v7601_v22   ;;  %v7603_v25 = vpop.eup %7602 }
0x1e44   : > { %v7605_v6 = vpop.eup %7604 }
0x1e47   : > { %6536 = vperm.xlu0 %7167, %v7603_v25  }
0x1e4b   : > { %6539 = vperm.xlu0 %7167, %v7605_v6  }
0x1ebe   : > { %v6534_v54 = vpop.permute.xlu0 %6533 }
0x1ebf   : > { %v6544_v43 = vrot.slane %v6534_v54, %v10052_v52 }
0x1ec2   : > { %v6537_v48 = vpop.permute.xlu0 %6536 }
0x1ec3   : > { %v6548_v19 = vrot.slane %v6537_v48, %v10052_v52 }
0x1ec5   : > { %v6553_v51 = vsel %vm6263_vm10, %v6548_v19, %v6544_v43 }
0x1ec6   : > { %v6540_v60 = vpop.permute.xlu0 %6539 }
0x1ec7   : > { %v6552_v24 = vrot.slane %v6540_v60, %v10052_v52 }
0x1ec9   : > { %v6554_v33 = vsel %vm6265_vm5, %v6552_v24, %v6553_v51 }
0x1eca   : > { %v6556_v2 = vsel %vm6268_vm8, %v6554_v33, 0.0 }
0x1ecb   : > { %6557 = vadd.xlane.f32.xlu1 %v6556_v2 }
0x1f54   : > { %v6558_v36 = vpop.xlane.xlu1 %6557 }
0x1f55   : > { %v6563_v59 = vrot.slane %v6558_v36, %v7853_v23  ;;  %v6567_v57 = vrot.slane %v6558_v36, %v10385_v31  ;;  %v6571_v29 = vrot.slane %v6558_v36, %v10061_v21 }
0x1f57   : > { %7606 = vrcp.f32 %v6563_v59 }
0x1f58   : > { %7608 = vrcp.f32 %v6567_v57 }
0x1f59   : > { %7610 = vrcp.f32 %v6571_v29 }
0x1f64   : > { %v7607_v34 = vpop.eup %7606 }
0x1f65   : > { %v7609_v5 = vpop.eup %7608  ;;  %v6576_v53 = vmul.f32 %v7607_v34, %v7601_v22 }
0x1f66   : > { %v7611_v9 = vpop.eup %7610  ;;  %v6578_v3 = vmul.f32 %v7609_v5, %v7603_v25 }
0x1f67   : > { %v6581_v1 = vmul.f32 %v6576_v53, %v10088_v39  ;;  %v6580_v14 = vmul.f32 %v7611_v9, %v7605_v6 }
0x1f68   : > { %v6582_v44 = vmul.f32 %v6578_v3, %v10091_v55 }
0x1f69   : > { %6588 = vperm.xlu0 %7167, %v6581_v1   ;;  %v6583_v61 = vmul.f32 %v6580_v14, %v10094_v8 }
0x1f6a   : > { %6591 = vperm.xlu1 %7166, %v6582_v44  }
0x1f6d   : > { %6594 = vperm.xlu0 %7167, %v6583_v61  }
0x1fe4   : > { %v6589_v58 = vpop.permute.xlu0 %6588 }
0x1fe5   : > { %v6592_v20 = vpop.permute.xlu1 %6591  ;;  %v6599_v63 = vrot.slane %v6589_v58, %v10052_v52 }
0x1fe6   : > { %v6603_v12 = vrot.slane %v6592_v20, %v10052_v52 }
0x1fe8   : > { %v6595_v11 = vpop.permute.xlu0 %6594  ;;  %v6608_v26 = vsel %vm6263_vm10, %v6603_v12, %v6599_v63 }
0x1fe9   : > { %v6607_v18 = vrot.slane %v6595_v11, %v10052_v52 }
0x1feb   : > { %v6609_v39 = vsel %vm6265_vm5, %v6607_v18, %v6608_v26 }
0x1fec   : > { %v6611_v55 = vsel %vm6268_vm8, %v6609_v39, 0.0 }
0x1fed   : > { %6612 = vadd.xlane.f32.xlu0 %v6611_v55 }
0x2076   : > { %v6613_v56 = vpop.xlane.xlu0 %6612 }
0x2077   : > { %v6614_v38 = vmax.f32 %v6613_v56, 1e-20 }
0x2079   : > { %v6619_v8 = vrot.slane %v6614_v38, %v7853_v23  ;;  %v6623_v41 = vrot.slane %v6614_v38, %v10385_v31  ;;  %v6627_v15 = vrot.slane %v6614_v38, %v10061_v21 }
0x207b   : > { %7612 = vrcp.f32 %v6619_v8 }
0x207c   : > { %7614 = vrcp.f32 %v6623_v41 }
0x207d   : > { %7616 = vrcp.f32 %v6627_v15 }
0x2088   : > { %v7613_v62 = vpop.eup %7612 }
0x2089   : > { %v6632_v52 = vmul.f32 %v7613_v62, %v6581_v1  ;;  %v7615_v45 = vpop.eup %7614 }
0x208a   : > { %v6634_v7 = vmul.f32 %v7615_v45, %v6582_v44  ;;  %v7617_v16 = vpop.eup %7616 }
0x208b   : > { %6639 = vperm.xlu1 %7166, %v6632_v52   ;;  %v6636_v0 = vmul.f32 %v7617_v16, %v6583_v61 }
0x208f   : > { %6644 = vperm.xlu1 %7166, %v6634_v7  }
0x2093   : > { %6649 = vperm.xlu1 %7166, %v6636_v0  }
0x2106   : > { %v6640_v47 = vpop.permute.xlu1 %6639 }
0x2107   : > { %v6652_v10 = vmul.f32 %v6640_v47, %v10110_v13 }
0x2109   : > { %v6655_v23 = vsel %vm6034_vm14, %v6652_v10, 0.0 }
0x210a   : > { %v6656_v31 = vrot.slane %v6655_v23, 4  ;;  %v6645_v27 = vpop.permute.xlu1 %6644 }
0x210b   : > { %v6653_v21 = vmul.f32 %v6645_v27, %v10114_v50 }
0x210c   : > { %v6657_v42 = vadd.f32 %v6656_v31, %v6655_v23 }
0x210d   : > { %v6662_v32 = vsel %vm6034_vm14, %v6653_v21, 0.0 }
0x210e   : > { %v6658_v28 = vrot.slane %v6657_v42, 2  ;;  %v6663_v49 = vrot.slane %v6662_v32, 4  ;;  %v6650_v17 = vpop.permute.xlu1 %6649 }
0x210f   : > { %v6654_v35 = vmul.f32 %v6650_v17, %v10119_v46 }
0x2110   : > { %v6659_v37 = vadd.f32 %v6658_v28, %v6657_v42  ;;  %v6664_v4 = vadd.f32 %v6663_v49, %v6662_v32 }
0x2111   : > { %v6669_v30 = vsel %vm6034_vm14, %v6654_v35, 0.0 }
0x2112   : > { %v6660_v13 = vrot.slane %v6659_v37, 1  ;;  %v6665_v40 = vrot.slane %v6664_v4, 2  ;;  %v6670_v22 = vrot.slane %v6669_v30, 4 }
0x2114   : > { %v6661_v50 = vadd.f32 %v6660_v13, %v6659_v37  ;;  %v6666_v25 = vadd.f32 %v6665_v40, %v6664_v4  ;;  %v6671_v6 = vadd.f32 %v6670_v22, %v6669_v30 }
0x2116   : > { %6677 = vst.msk [vmem:[%s477_s21] sm:$0x1] %vm6676_vm0, %v6661_v50  ;;  %v6667_v54 = vrot.slane %v6666_v25, 1  ;;  %v6672_v48 = vrot.slane %v6671_v6, 2 }
0x2118   : > { %v6668_v19 = vadd.f32 %v6667_v54, %v6666_v25  ;;  %v6673_v46 = vadd.f32 %v6672_v48, %v6671_v6 }
0x211a   : > { %6678 = vst.msk [vmem:[%s477_s21 + $0x1] sm:$0x1] %vm6676_vm0, %v6668_v19  ;;  %v6674_v43 = vrot.slane %v6673_v46, 1 }
0x211c   : > { %v6675_v60 = vadd.f32 %v6674_v43, %v6673_v46 }
0x211e   : > { %6679 = vst.msk [vmem:[%s477_s21 + $0x2] sm:$0x1] %vm6676_vm0, %v6675_v60 }
0x211f PF: > { %s28_s29 = sadd.s32 1, %s7646_s29  }
0x2120   : > { %p25_p4 = scmp.ge.s32.totalorder %s28_s29, 4  }
0x2122   :  { %27 = sbr.rel (!%p25_p4) target bundleno = 3 (0x3), region = 113 }

</bundles_post_ra>
